<compile_context>
chip_gen: v7x
topology: tpu7x:2x2x1
jax: 0.10.0
libtpu: 0.0.40
codegen_flags: <defaults>
</compile_context>

<pallas_src>
import functools
import math

import jax
import jax.numpy as jnp
from jax import lax
from jax.experimental import pallas as pl
from jax.experimental.pallas import tpu as pltpu


def _leaky_relu(x, alpha):
    return jnp.where(x > 0, x, alpha * x)


def _elu(x):
    return jnp.where(x > 0, x, jnp.exp(x) - 1.0)


def _masked_softmax_rows(e, nz):
    """softmax over dim=1 with -9e15 fill on non-edges (matches the torch code)."""
    att = jnp.where(nz, e, -9.0e15)
    att = att - jnp.max(att, axis=1, keepdims=True)
    p = jnp.exp(att)
    # reciprocal goes to the EUP slot; turns the (tile, N) divide into a multiply.
    inv = pl.reciprocal(jnp.sum(p, axis=1, keepdims=True), approx=True)
    return p * inv


# -----------------------------------------------------------------------------
# 1) projection kernel: x @ W and the attention scalars, hoisted out of the
#    attention kernels.
# -----------------------------------------------------------------------------
def proj_kernel(x_ref, wT_ref, wa1_ref, wa2T_ref, hT_ref, f1_ref, f2T_ref):
    x = x_ref[...]                                                 # (tile, Fin) f32
    # (x @ W)^T via the A @ B^T MXU form: output lanes = tile (>=128), K = Fin.
    hT = lax.dot_general(wT_ref[...], x, (((1,), (1,)), ((), ())),
                         preferred_element_type=jnp.float32)       # (H*Fh, tile)
    hT_ref[...] = hT.astype(jnp.bfloat16)    # stored bf16 once (aggregation operand)
    # f1[q, h] = h_q . a1_h  ==  x_q . (W_h @ a1_h)   (f32)
    f1_ref[...] = jnp.dot(x, wa1_ref[...],
                          preferred_element_type=jnp.float32)      # (tile, H)
    # f2^T[h, q] = h_q . a2_h   (f32)
    f2T_ref[...] = lax.dot_general(wa2T_ref[...], x, (((1,), (1,)), ((), ())),
                                   preferred_element_type=jnp.float32)  # (H, tile)


# -----------------------------------------------------------------------------
# 2) all attention heads + fused output-layer projection, one query-row block
#    per grid step; the adjacency strip is read once and shared by all heads.
# -----------------------------------------------------------------------------
def gat_heads_kernel(adj_ref, hT_ref, f1_ref, f2T_ref, outwT_ref, outa_ref,
                     accT_ref, g_ref, *, alpha, nheads, fh):
    nz = adj_ref[...] != 0                      # int8 compare; no i8->f32 unpack
    f1 = f1_ref[...]                            # (tile, H) f32
    f2T = f2T_ref[...]                          # (H, N)    f32

    head_outs = []
    for h in range(nheads):                     # static unroll, H is small
        # e[q, j] = leakyrelu(h_q.a1 + h_j.a2)
        e = _leaky_relu(f1[:, h:h + 1] + f2T[h:h + 1, :], alpha)    # (tile, N)
        att = _masked_softmax_rows(e, nz)                           # (tile, N)
        # (att @ h_head)^T as A @ B^T: output lanes = tile, K = N.
        hpT = lax.dot_general(hT_ref[h * fh:(h + 1) * fh, :],
                              att.astype(jnp.bfloat16),
                              (((1,), (1,)), ((), ())),
                              preferred_element_type=jnp.float32)   # (Fh, tile)
        head_outs.append(_elu(hpT))             # concat=True -> per-head ELU

    hp_all = jnp.concatenate(head_outs, axis=0)         # (H*Fh, tile) = cat(heads)^T
    # Fused output-layer projection: ONE K=H*Fh matmul (not H K=Fh matmuls).
    accT = lax.dot_general(outwT_ref[...], hp_all, (((1,), (0,)), ((), ())),
                           preferred_element_type=jnp.float32)      # (C, tile)
    # Output-layer attention scalars [g1, g2], from f32 acc before the bf16 cast.
    g_ref[...] = lax.dot_general(accT, outa_ref[...], (((0,), (0,)), ((), ())),
                                 preferred_element_type=jnp.float32)  # (tile, 2)
    accT_ref[...] = accT.astype(jnp.bfloat16)


# -----------------------------------------------------------------------------
# 3) output GATConv aggregation + F.elu + log_softmax (transposed layout).
# -----------------------------------------------------------------------------
def gat_out_kernel(adj_ref, accT_ref, g1_ref, g2T_ref, out_ref, *, alpha):
    nz = adj_ref[...] != 0
    e = _leaky_relu(g1_ref[...] + g2T_ref[...], alpha)              # (tile, N)
    att = _masked_softmax_rows(e, nz)
    hpT = lax.dot_general(accT_ref[...], att.astype(jnp.bfloat16),
                          (((1,), (1,)), ((), ())),
                          preferred_element_type=jnp.float32)       # (C, tile)
    y = _elu(hpT)                                                   # F.elu in GatModel
    # log_softmax over classes (axis 0 in this layout == torch dim=1), exact math.
    z = y - jnp.max(y, axis=0, keepdims=True)
    out_ref[...] = z - jnp.log(jnp.sum(jnp.exp(z), axis=0, keepdims=True))


def _pick_vmem_limit(tile_i, n, hfh):
    """Explicit scoped-VMEM ceiling; None when the default limit already fits."""
    # Per-step live set of the heads kernel: adj tile (x2 buffers) + ~3 (tile,N)
    # softmax temporaries + the double-buffered bf16 h / f2 / acc residents.
    est = tile_i * n * (1 * 2 + 4 * 3) + (hfh * 2 + 4 + 8) * n * 2
    if est < 12 * 1024 * 1024:
        return None
    # v5e/v6e (128 MiB physical VMEM): up to ~96 MiB is fine with tile_i=512;
    # on v7x (64 MiB physical) keep tile_i<=256 and this limit <= ~48 MiB.
    return min(2 * est, 96 * 1024 * 1024)


def gat_model_forward(x, adj, params, *, alpha, tile_i=None, vmem_limit_bytes=None):
    head_W = params["head_W"]     # (H, Fin, Fh)
    head_a = params["head_a"]     # (H, 2*Fh, 1)
    out_W = params["out_W"]       # (H*Fh, C)
    out_a = params["out_a"]       # (2*C, 1)

    H, Fin, Fh = head_W.shape
    N = x.shape[0]
    C = out_W.shape[1]
    HFh = H * Fh
    assert out_W.shape[0] == HFh

    if tile_i is None:
        # v5e/v6e (128 MiB VMEM) can afford 512-row tiles; keep <=256 for v7x.
        tile_i = N if N <= 256 else 256
    assert N % tile_i == 0, "N must be divisible by the query-row tile"
    assert tile_i == N or tile_i % 128 == 0, "row tile must be lane-aligned (x128)"
    nb = N // tile_i
    if vmem_limit_bytes is None:
        vmem_limit_bytes = _pick_vmem_limit(tile_i, N, HFh)

    # ---- one-time parameter re-layouts (tiny, plain XLA) -----------------------
    a1 = head_a[:, :Fh, 0]                                         # (H, Fh)
    a2 = head_a[:, Fh:, 0]                                         # (H, Fh)
    wT = jnp.transpose(head_W, (0, 2, 1)).reshape(HFh, Fin)        # (H*Fh, Fin)
    wa1 = jnp.einsum("hif,hf->ih", head_W, a1)                     # (Fin, H)
    wa2T = jnp.einsum("hif,hf->hi", head_W, a2)                    # (H, Fin)
    out_WT = jnp.transpose(out_W)                                  # (C, H*Fh)
    out_a12 = jnp.concatenate([out_a[:C, :], out_a[C:, :]], axis=1)   # (C, 2)

    adj_i8 = (adj > 0).astype(jnp.int8)      # compact adjacency: 4x less HBM traffic

    def cparams(*sem):
        return pltpu.CompilerParams(dimension_semantics=sem,
                                    vmem_limit_bytes=vmem_limit_bytes)

    # ---- 1) projection: bf16 h^T + attention scalars ---------------------------
    hT, f1, f2T = pl.pallas_call(
        proj_kernel,
        out_shape=(jax.ShapeDtypeStruct((HFh, N), jnp.bfloat16),
                   jax.ShapeDtypeStruct((N, H), jnp.float32),
                   jax.ShapeDtypeStruct((H, N), jnp.float32)),
        grid=(nb,),
        in_specs=[
            pl.BlockSpec((tile_i, Fin), lambda i: (i, 0)),
            pl.BlockSpec((HFh, Fin), lambda i: (0, 0)),
            pl.BlockSpec((Fin, H), lambda i: (0, 0)),
            pl.BlockSpec((H, Fin), lambda i: (0, 0)),
        ],
        out_specs=(
            pl.BlockSpec((HFh, tile_i), lambda i: (0, i)),   # lane-dense store
            pl.BlockSpec((tile_i, H), lambda i: (i, 0)),
            pl.BlockSpec((H, tile_i), lambda i: (0, i)),
        ),
        compiler_params=cparams("parallel"),
    )(x, wT, wa1, wa2T)

    # ---- 2) all heads + fused output-layer projection --------------------------
    # TODO(synk): for very large N add a key-block grid axis with online-softmax
    #             accumulation and pl.Buffered(1) on the grid-invariant residents
    #             (v7x VMEM); unnecessary at these sizes.
    accT, g = pl.pallas_call(
        functools.partial(gat_heads_kernel, alpha=alpha, nheads=H, fh=Fh),
        out_shape=(jax.ShapeDtypeStruct((C, N), jnp.bfloat16),
                   jax.ShapeDtypeStruct((N, 2), jnp.float32)),
        grid=(nb,),
        in_specs=[
            pl.BlockSpec((tile_i, N), lambda i: (i, 0)),   # adj strip: 1 DMA / block
            pl.BlockSpec((HFh, N), lambda i: (0, 0)),      # h^T (bf16), resident
            pl.BlockSpec((tile_i, H), lambda i: (i, 0)),   # f1 rows of this block
            pl.BlockSpec((H, N), lambda i: (0, 0)),        # f2^T, resident
            pl.BlockSpec((C, HFh), lambda i: (0, 0)),      # out_W^T, resident
            pl.BlockSpec((C, 2), lambda i: (0, 0)),        # out-layer [a1|a2]
        ],
        out_specs=(
            pl.BlockSpec((C, tile_i), lambda i: (0, i)),   # acc^T, lane-dense store
            pl.BlockSpec((tile_i, 2), lambda i: (i, 0)),   # [g1, g2]
        ),
        compiler_params=cparams("parallel"),
    )(adj_i8, hT, f1, f2T, out_WT, out_a12)

    g1 = g[:, 0:1]                      # (N, 1)
    g2T = jnp.transpose(g[:, 1:2])      # (1, N)  tiny XLA transpose

    # ---- 3) output attention + elu + log_softmax -------------------------------
    outT = pl.pallas_call(
        functools.partial(gat_out_kernel, alpha=alpha),
        out_shape=jax.ShapeDtypeStruct((C, N), jnp.float32),
        grid=(nb,),
        in_specs=[
            pl.BlockSpec((tile_i, N), lambda i: (i, 0)),
            pl.BlockSpec((C, N), lambda i: (0, 0)),
            pl.BlockSpec((tile_i, 1), lambda i: (i, 0)),
            pl.BlockSpec((1, N), lambda i: (0, 0)),
        ],
        out_specs=pl.BlockSpec((C, tile_i), lambda i: (0, i)),
        compiler_params=cparams("parallel"),
    )(adj_i8, accT, g1, g2T)

    return jnp.transpose(outT)          # (N, C) log-probabilities


def xavier_uniform(key, shape, gain):
    fan_in, fan_out = shape[0], shape[1]
    bound = gain * math.sqrt(6.0 / (fan_in + fan_out))
    return jax.random.uniform(key, shape, jnp.float32, -bound, bound)


if __name__ == "__main__":
    # Small shapes consistent with GatModel(nfeat, nhid, nclass, dropout, alpha, nheads)
    N, nfeat, nhid, nclass, nheads = 256, 32, 16, 8, 4
    alpha = 0.2
    gain = 1.414
    tile_i = 128   # two query-row blocks -> exercises the tiled path

    key = jax.random.PRNGKey(0)
    keys = jax.random.split(key, 1 + 2 * nheads + 2)

    x = jax.random.normal(keys[0], (N, nfeat), jnp.float32)

    # Deterministic adjacency: self-loops + ring + skip-3 edges (0/1 float mask).
    idx = jnp.arange(N)
    adj = jnp.zeros((N, N), jnp.float32)
    adj = adj.at[idx, idx].set(1.0)
    adj = adj.at[idx, (idx + 1) % N].set(1.0)
    adj = adj.at[idx, (idx - 1) % N].set(1.0)
    adj = adj.at[idx, (idx + 3) % N].set(1.0)

    head_W = jnp.stack(
        [xavier_uniform(keys[1 + i], (nfeat, nhid), gain) for i in range(nheads)]
    )
    head_a = jnp.stack(
        [xavier_uniform(keys[1 + nheads + i], (2 * nhid, 1), gain) for i in range(nheads)]
    )
    out_W = xavier_uniform(keys[-2], (nhid * nheads, nclass), gain)
    out_a = xavier_uniform(keys[-1], (2 * nclass, 1), gain)

    params = dict(head_W=head_W, head_a=head_a, out_W=out_W, out_a=out_a)

    fwd = jax.jit(functools.partial(gat_model_forward, alpha=alpha, tile_i=tile_i))
    log_probs = fwd(x, adj, params)
    jax.block_until_ready(log_probs)

    assert log_probs.shape == (N, nclass)
    assert bool(jnp.all(jnp.isfinite(log_probs)))
    row_sums = jnp.exp(log_probs).sum(axis=1)
    assert bool(jnp.all(jnp.abs(row_sums - 1.0) < 1e-3))
    print("KERNEL_OK")
</pallas_src>

<mosaic_0001>
module attributes {stable_mosaic.version = 11 : i64} {
  func.func @proj_kernel(%arg0: i32, %arg1: memref<128x32xf32, #tpu.memory_space<vmem>>, %arg2: memref<64x32xf32, #tpu.memory_space<vmem>>, %arg3: memref<32x4xf32, #tpu.memory_space<vmem>>, %arg4: memref<4x32xf32, #tpu.memory_space<vmem>>, %arg5: memref<64x128xbf16, #tpu.memory_space<vmem>>, %arg6: memref<128x4xf32, #tpu.memory_space<vmem>>, %arg7: memref<4x128xf32, #tpu.memory_space<vmem>>) attributes {dimension_semantics = [#tpu.dimension_semantics<parallel>], iteration_bounds = array<i64: 2>, scalar_prefetch = 0 : i64, scratch_operands = 0 : i64, tpu.core_type = #tpu.core_type<tc>, window_params = [{transform_indices = @transform_0, window_bounds = array<i64: 128, 32>}, {pipeline_mode = #tpu.pipeline_mode<synchronous>, transform_indices = @transform_1, window_bounds = array<i64: 64, 32>}, {pipeline_mode = #tpu.pipeline_mode<synchronous>, transform_indices = @transform_2, window_bounds = array<i64: 32, 4>}, {pipeline_mode = #tpu.pipeline_mode<synchronous>, transform_indices = @transform_3, window_bounds = array<i64: 4, 32>}, {transform_indices = @transform_4, window_bounds = array<i64: 64, 128>}, {transform_indices = @transform_5, window_bounds = array<i64: 128, 4>}, {transform_indices = @transform_6, window_bounds = array<i64: 4, 128>}]} {
    %c0 = arith.constant 0 : index
    %c0_0 = arith.constant 0 : index
    %0 = vector.load %arg1[%c0, %c0_0] : memref<128x32xf32, #tpu.memory_space<vmem>>, vector<128x32xf32>
    %c0_1 = arith.constant 0 : index
    %c0_2 = arith.constant 0 : index
    %1 = vector.load %arg2[%c0_1, %c0_2] : memref<64x32xf32, #tpu.memory_space<vmem>>, vector<64x32xf32>
    %cst = arith.constant dense<0.000000e+00> : vector<64x128xf32>
    %2 = tpu.matmul %1, %0, %cst {dimension_numbers = #tpu.dot_dimension_numbers<[1], [1], [0], [0], [0, 0, 1, 0], [], []>} : vector<64x32xf32>, vector<128x32xf32>, vector<64x128xf32> -> vector<64x128xf32>
    %3 = arith.truncf %2 : vector<64x128xf32> to vector<64x128xbf16>
    %c0_3 = arith.constant 0 : index
    %c0_4 = arith.constant 0 : index
    %4 = vector.load %arg5[%c0_3, %c0_4] : memref<64x128xbf16, #tpu.memory_space<vmem>>, vector<64x128xbf16>
    tpu.vector_store %arg5[%c0_3, %c0_4], %3 {strides = array<i32>} : memref<64x128xbf16, #tpu.memory_space<vmem>>, vector<64x128xbf16>,
    %c0_5 = arith.constant 0 : index
    %c0_6 = arith.constant 0 : index
    %5 = vector.load %arg3[%c0_5, %c0_6] : memref<32x4xf32, #tpu.memory_space<vmem>>, vector<32x4xf32>
    %cst_7 = arith.constant dense<0.000000e+00> : vector<128x4xf32>
    %6 = tpu.matmul %0, %5, %cst_7 {dimension_numbers = #tpu.dot_dimension_numbers<[1], [0], [0], [1], [0, 0, 1, 1], [], []>} : vector<128x32xf32>, vector<32x4xf32>, vector<128x4xf32> -> vector<128x4xf32>
    %c0_8 = arith.constant 0 : index
    %c0_9 = arith.constant 0 : index
    %7 = vector.load %arg6[%c0_8, %c0_9] : memref<128x4xf32, #tpu.memory_space<vmem>>, vector<128x4xf32>
    tpu.vector_store %arg6[%c0_8, %c0_9], %6 {strides = array<i32>} : memref<128x4xf32, #tpu.memory_space<vmem>>, vector<128x4xf32>,
    %c0_10 = arith.constant 0 : index
    %c0_11 = arith.constant 0 : index
    %8 = vector.load %arg4[%c0_10, %c0_11] : memref<4x32xf32, #tpu.memory_space<vmem>>, vector<4x32xf32>
    %cst_12 = arith.constant dense<0.000000e+00> : vector<4x128xf32>
    %9 = tpu.matmul %8, %0, %cst_12 {dimension_numbers = #tpu.dot_dimension_numbers<[1], [1], [0], [0], [0, 0, 1, 0], [], []>} : vector<4x32xf32>, vector<128x32xf32>, vector<4x128xf32> -> vector<4x128xf32>
    %c0_13 = arith.constant 0 : index
    %c0_14 = arith.constant 0 : index
    %10 = vector.load %arg7[%c0_13, %c0_14] : memref<4x128xf32, #tpu.memory_space<vmem>>, vector<4x128xf32>
    tpu.vector_store %arg7[%c0_13, %c0_14], %9 {strides = array<i32>} : memref<4x128xf32, #tpu.memory_space<vmem>>, vector<4x128xf32>,
    return
  }
  func.func @transform_0(%arg0: i32) -> (i32, i32) {
    %c0_i32 = arith.constant 0 : i32
    %c0_i32_0 = arith.constant 0 : i32
    return %arg0, %c0_i32 : i32, i32
  }
  func.func @transform_1(%arg0: i32) -> (i32, i32) {
    %c0_i32 = arith.constant 0 : i32
    %c0_i32_0 = arith.constant 0 : i32
    %c0_i32_1 = arith.constant 0 : i32
    return %c0_i32, %c0_i32_0 : i32, i32
  }
  func.func @transform_2(%arg0: i32) -> (i32, i32) {
    %c0_i32 = arith.constant 0 : i32
    %c0_i32_0 = arith.constant 0 : i32
    %c0_i32_1 = arith.constant 0 : i32
    return %c0_i32, %c0_i32_0 : i32, i32
  }
  func.func @transform_3(%arg0: i32) -> (i32, i32) {
    %c0_i32 = arith.constant 0 : i32
    %c0_i32_0 = arith.constant 0 : i32
    %c0_i32_1 = arith.constant 0 : i32
    return %c0_i32, %c0_i32_0 : i32, i32
  }
  func.func @transform_4(%arg0: i32) -> (i32, i32) {
    %c0_i32 = arith.constant 0 : i32
    %c0_i32_0 = arith.constant 0 : i32
    return %c0_i32, %arg0 : i32, i32
  }
  func.func @transform_5(%arg0: i32) -> (i32, i32) {
    %c0_i32 = arith.constant 0 : i32
    %c0_i32_0 = arith.constant 0 : i32
    return %arg0, %c0_i32 : i32, i32
  }
  func.func @transform_6(%arg0: i32) -> (i32, i32) {
    %c0_i32 = arith.constant 0 : i32
    %c0_i32_0 = arith.constant 0 : i32
    return %c0_i32, %arg0 : i32, i32
  }
}

module attributes {stable_mosaic.version = 11 : i64} {
  func.func @gat_heads_kernel(%arg0: i32, %arg1: memref<128x256xi8, #tpu.memory_space<vmem>>, %arg2: memref<64x256xbf16, #tpu.memory_space<vmem>>, %arg3: memref<128x4xf32, #tpu.memory_space<vmem>>, %arg4: memref<4x256xf32, #tpu.memory_space<vmem>>, %arg5: memref<8x64xf32, #tpu.memory_space<vmem>>, %arg6: memref<8x2xf32, #tpu.memory_space<vmem>>, %arg7: memref<8x128xbf16, #tpu.memory_space<vmem>>, %arg8: memref<128x2xf32, #tpu.memory_space<vmem>>) attributes {dimension_semantics = [#tpu.dimension_semantics<parallel>], iteration_bounds = array<i64: 2>, scalar_prefetch = 0 : i64, scratch_operands = 0 : i64, tpu.core_type = #tpu.core_type<tc>, window_params = [{transform_indices = @transform_0, window_bounds = array<i64: 128, 256>}, {pipeline_mode = #tpu.pipeline_mode<synchronous>, transform_indices = @transform_1, window_bounds = array<i64: 64, 256>}, {transform_indices = @transform_2, window_bounds = array<i64: 128, 4>}, {pipeline_mode = #tpu.pipeline_mode<synchronous>, transform_indices = @transform_3, window_bounds = array<i64: 4, 256>}, {pipeline_mode = #tpu.pipeline_mode<synchronous>, transform_indices = @transform_4, window_bounds = array<i64: 8, 64>}, {pipeline_mode = #tpu.pipeline_mode<synchronous>, transform_indices = @transform_5, window_bounds = array<i64: 8, 2>}, {transform_indices = @transform_6, window_bounds = array<i64: 8, 128>}, {transform_indices = @transform_7, window_bounds = array<i64: 128, 2>}]} {
    %c0 = arith.constant 0 : index
    %c0_0 = arith.constant 0 : index
    %0 = vector.load %arg1[%c0, %c0_0] : memref<128x256xi8, #tpu.memory_space<vmem>>, vector<128x256xi8>
    %c0_i8 = arith.constant 0 : i8
    %1 = vector.broadcast %c0_i8 : i8 to vector<128x256xi8>
    %2 = arith.cmpi ne, %0, %1 : vector<128x256xi8>
    %c0_1 = arith.constant 0 : index
    %c0_2 = arith.constant 0 : index
    %3 = vector.load %arg3[%c0_1, %c0_2] : memref<128x4xf32, #tpu.memory_space<vmem>>, vector<128x4xf32>
    %c0_3 = arith.constant 0 : index
    %c0_4 = arith.constant 0 : index
    %4 = vector.load %arg4[%c0_3, %c0_4] : memref<4x256xf32, #tpu.memory_space<vmem>>, vector<4x256xf32>
    %5 = vector.extract_strided_slice %3 {offsets = [0, 0], sizes = [128, 1], strides = [1, 1]} : vector<128x4xf32> to vector<128x1xf32>
    %6 = vector.extract_strided_slice %4 {offsets = [0, 0], sizes = [1, 256], strides = [1, 1]} : vector<4x256xf32> to vector<1x256xf32>
    %7 = vector.broadcast %5 : vector<128x1xf32> to vector<128x256xf32>
    %8 = vector.broadcast %6 : vector<1x256xf32> to vector<128x256xf32>
    %9 = arith.addf %7, %8 : vector<128x256xf32>
    %cst = arith.constant 0.000000e+00 : f32
    %10 = vector.broadcast %cst : f32 to vector<128x256xf32>
    %11 = arith.cmpf ogt, %9, %10 : vector<128x256xf32>
    %cst_5 = arith.constant 2.000000e-01 : f32
    %12 = vector.broadcast %cst_5 : f32 to vector<128x256xf32>
    %13 = arith.mulf %12, %9 : vector<128x256xf32>
    %14 = arith.select %11, %9, %13 : vector<128x256xi1>, vector<128x256xf32>
    %cst_6 = arith.constant -9.000000e+15 : f32
    %15 = vector.broadcast %cst_6 : f32 to vector<128x256xf32>
    %16 = arith.select %2, %14, %15 : vector<128x256xi1>, vector<128x256xf32>
    %cst_7 = arith.constant dense<0xFF800000> : vector<128xf32>
    %17 = vector.multi_reduction <maximumf>, %16, %cst_7 [1] : vector<128x256xf32> to vector<128xf32>
    %18 = vector.shape_cast %17 : vector<128xf32> to vector<128x1xf32>
    %19 = vector.broadcast %18 : vector<128x1xf32> to vector<128x256xf32>
    %20 = arith.subf %16, %19 : vector<128x256xf32>
    %21 = math.exp %20 : vector<128x256xf32>
    %cst_8 = arith.constant dense<0.000000e+00> : vector<128xf32>
    %22 = vector.multi_reduction <add>, %21, %cst_8 [1] : vector<128x256xf32> to vector<128xf32>
    %23 = vector.shape_cast %22 : vector<128xf32> to vector<128x1xf32>
    %24 = tpu.reciprocal %23 {approx = true} : vector<128x1xf32> -> vector<128x1xf32>
    %25 = vector.broadcast %24 : vector<128x1xf32> to vector<128x256xf32>
    %26 = arith.mulf %21, %25 : vector<128x256xf32>
    %c0_9 = arith.constant 0 : index
    %c0_10 = arith.constant 0 : index
    %27 = vector.load %arg2[%c0_9, %c0_10] : memref<64x256xbf16, #tpu.memory_space<vmem>>, vector<16x256xbf16>
    %28 = arith.truncf %26 : vector<128x256xf32> to vector<128x256xbf16>
    %cst_11 = arith.constant dense<0.000000e+00> : vector<16x128xf32>
    %29 = tpu.matmul %27, %28, %cst_11 {dimension_numbers = #tpu.dot_dimension_numbers<[1], [1], [0], [0], [0, 0, 1, 0], [], []>} : vector<16x256xbf16>, vector<128x256xbf16>, vector<16x128xf32> -> vector<16x128xf32>
    %cst_12 = arith.constant 0.000000e+00 : f32
    %30 = vector.broadcast %cst_12 : f32 to vector<16x128xf32>
    %31 = arith.cmpf ogt, %29, %30 : vector<16x128xf32>
    %32 = math.exp %29 : vector<16x128xf32>
    %cst_13 = arith.constant 1.000000e+00 : f32
    %33 = vector.broadcast %cst_13 : f32 to vector<16x128xf32>
    %34 = arith.subf %32, %33 : vector<16x128xf32>
    %35 = arith.select %31, %29, %34 : vector<16x128xi1>, vector<16x128xf32>
    %36 = vector.extract_strided_slice %3 {offsets = [0, 1], sizes = [128, 1], strides = [1, 1]} : vector<128x4xf32> to vector<128x1xf32>
    %37 = vector.extract_strided_slice %4 {offsets = [1, 0], sizes = [1, 256], strides = [1, 1]} : vector<4x256xf32> to vector<1x256xf32>
    %38 = vector.broadcast %36 : vector<128x1xf32> to vector<128x256xf32>
    %39 = vector.broadcast %37 : vector<1x256xf32> to vector<128x256xf32>
    %40 = arith.addf %38, %39 : vector<128x256xf32>
    %cst_14 = arith.constant 0.000000e+00 : f32
    %41 = vector.broadcast %cst_14 : f32 to vector<128x256xf32>
    %42 = arith.cmpf ogt, %40, %41 : vector<128x256xf32>
    %cst_15 = arith.constant 2.000000e-01 : f32
    %43 = vector.broadcast %cst_15 : f32 to vector<128x256xf32>
    %44 = arith.mulf %43, %40 : vector<128x256xf32>
    %45 = arith.select %42, %40, %44 : vector<128x256xi1>, vector<128x256xf32>
    %cst_16 = arith.constant -9.000000e+15 : f32
    %46 = vector.broadcast %cst_16 : f32 to vector<128x256xf32>
    %47 = arith.select %2, %45, %46 : vector<128x256xi1>, vector<128x256xf32>
    %cst_17 = arith.constant dense<0xFF800000> : vector<128xf32>
    %48 = vector.multi_reduction <maximumf>, %47, %cst_17 [1] : vector<128x256xf32> to vector<128xf32>
    %49 = vector.shape_cast %48 : vector<128xf32> to vector<128x1xf32>
    %50 = vector.broadcast %49 : vector<128x1xf32> to vector<128x256xf32>
    %51 = arith.subf %47, %50 : vector<128x256xf32>
    %52 = math.exp %51 : vector<128x256xf32>
    %cst_18 = arith.constant dense<0.000000e+00> : vector<128xf32>
    %53 = vector.multi_reduction <add>, %52, %cst_18 [1] : vector<128x256xf32> to vector<128xf32>
    %54 = vector.shape_cast %53 : vector<128xf32> to vector<128x1xf32>
    %55 = tpu.reciprocal %54 {approx = true} : vector<128x1xf32> -> vector<128x1xf32>
    %56 = vector.broadcast %55 : vector<128x1xf32> to vector<128x256xf32>
    %57 = arith.mulf %52, %56 : vector<128x256xf32>
    %c16 = arith.constant 16 : index
    %c0_19 = arith.constant 0 : index
    %58 = vector.load %arg2[%c16, %c0_19] : memref<64x256xbf16, #tpu.memory_space<vmem>>, vector<16x256xbf16>
    %59 = arith.truncf %57 : vector<128x256xf32> to vector<128x256xbf16>
    %cst_20 = arith.constant dense<0.000000e+00> : vector<16x128xf32>
    %60 = tpu.matmul %58, %59, %cst_20 {dimension_numbers = #tpu.dot_dimension_numbers<[1], [1], [0], [0], [0, 0, 1, 0], [], []>} : vector<16x256xbf16>, vector<128x256xbf16>, vector<16x128xf32> -> vector<16x128xf32>
    %cst_21 = arith.constant 0.000000e+00 : f32
    %61 = vector.broadcast %cst_21 : f32 to vector<16x128xf32>
    %62 = arith.cmpf ogt, %60, %61 : vector<16x128xf32>
    %63 = math.exp %60 : vector<16x128xf32>
    %cst_22 = arith.constant 1.000000e+00 : f32
    %64 = vector.broadcast %cst_22 : f32 to vector<16x128xf32>
    %65 = arith.subf %63, %64 : vector<16x128xf32>
    %66 = arith.select %62, %60, %65 : vector<16x128xi1>, vector<16x128xf32>
    %67 = vector.extract_strided_slice %3 {offsets = [0, 2], sizes = [128, 1], strides = [1, 1]} : vector<128x4xf32> to vector<128x1xf32>
    %68 = vector.extract_strided_slice %4 {offsets = [2, 0], sizes = [1, 256], strides = [1, 1]} : vector<4x256xf32> to vector<1x256xf32>
    %69 = vector.broadcast %67 : vector<128x1xf32> to vector<128x256xf32>
    %70 = vector.broadcast %68 : vector<1x256xf32> to vector<128x256xf32>
    %71 = arith.addf %69, %70 : vector<128x256xf32>
    %cst_23 = arith.constant 0.000000e+00 : f32
    %72 = vector.broadcast %cst_23 : f32 to vector<128x256xf32>
    %73 = arith.cmpf ogt, %71, %72 : vector<128x256xf32>
    %cst_24 = arith.constant 2.000000e-01 : f32
    %74 = vector.broadcast %cst_24 : f32 to vector<128x256xf32>
    %75 = arith.mulf %74, %71 : vector<128x256xf32>
    %76 = arith.select %73, %71, %75 : vector<128x256xi1>, vector<128x256xf32>
    %cst_25 = arith.constant -9.000000e+15 : f32
    %77 = vector.broadcast %cst_25 : f32 to vector<128x256xf32>
    %78 = arith.select %2, %76, %77 : vector<128x256xi1>, vector<128x256xf32>
    %cst_26 = arith.constant dense<0xFF800000> : vector<128xf32>
    %79 = vector.multi_reduction <maximumf>, %78, %cst_26 [1] : vector<128x256xf32> to vector<128xf32>
    %80 = vector.shape_cast %79 : vector<128xf32> to vector<128x1xf32>
    %81 = vector.broadcast %80 : vector<128x1xf32> to vector<128x256xf32>
    %82 = arith.subf %78, %81 : vector<128x256xf32>
    %83 = math.exp %82 : vector<128x256xf32>
    %cst_27 = arith.constant dense<0.000000e+00> : vector<128xf32>
    %84 = vector.multi_reduction <add>, %83, %cst_27 [1] : vector<128x256xf32> to vector<128xf32>
    %85 = vector.shape_cast %84 : vector<128xf32> to vector<128x1xf32>
    %86 = tpu.reciprocal %85 {approx = true} : vector<128x1xf32> -> vector<128x1xf32>
    %87 = vector.broadcast %86 : vector<128x1xf32> to vector<128x256xf32>
    %88 = arith.mulf %83, %87 : vector<128x256xf32>
    %c32 = arith.constant 32 : index
    %c0_28 = arith.constant 0 : index
    %89 = vector.load %arg2[%c32, %c0_28] : memref<64x256xbf16, #tpu.memory_space<vmem>>, vector<16x256xbf16>
    %90 = arith.truncf %88 : vector<128x256xf32> to vector<128x256xbf16>
    %cst_29 = arith.constant dense<0.000000e+00> : vector<16x128xf32>
    %91 = tpu.matmul %89, %90, %cst_29 {dimension_numbers = #tpu.dot_dimension_numbers<[1], [1], [0], [0], [0, 0, 1, 0], [], []>} : vector<16x256xbf16>, vector<128x256xbf16>, vector<16x128xf32> -> vector<16x128xf32>
    %cst_30 = arith.constant 0.000000e+00 : f32
    %92 = vector.broadcast %cst_30 : f32 to vector<16x128xf32>
    %93 = arith.cmpf ogt, %91, %92 : vector<16x128xf32>
    %94 = math.exp %91 : vector<16x128xf32>
    %cst_31 = arith.constant 1.000000e+00 : f32
    %95 = vector.broadcast %cst_31 : f32 to vector<16x128xf32>
    %96 = arith.subf %94, %95 : vector<16x128xf32>
    %97 = arith.select %93, %91, %96 : vector<16x128xi1>, vector<16x128xf32>
    %98 = vector.extract_strided_slice %3 {offsets = [0, 3], sizes = [128, 1], strides = [1, 1]} : vector<128x4xf32> to vector<128x1xf32>
    %99 = vector.extract_strided_slice %4 {offsets = [3, 0], sizes = [1, 256], strides = [1, 1]} : vector<4x256xf32> to vector<1x256xf32>
    %100 = vector.broadcast %98 : vector<128x1xf32> to vector<128x256xf32>
    %101 = vector.broadcast %99 : vector<1x256xf32> to vector<128x256xf32>
    %102 = arith.addf %100, %101 : vector<128x256xf32>
    %cst_32 = arith.constant 0.000000e+00 : f32
    %103 = vector.broadcast %cst_32 : f32 to vector<128x256xf32>
    %104 = arith.cmpf ogt, %102, %103 : vector<128x256xf32>
    %cst_33 = arith.constant 2.000000e-01 : f32
    %105 = vector.broadcast %cst_33 : f32 to vector<128x256xf32>
    %106 = arith.mulf %105, %102 : vector<128x256xf32>
    %107 = arith.select %104, %102, %106 : vector<128x256xi1>, vector<128x256xf32>
    %cst_34 = arith.constant -9.000000e+15 : f32
    %108 = vector.broadcast %cst_34 : f32 to vector<128x256xf32>
    %109 = arith.select %2, %107, %108 : vector<128x256xi1>, vector<128x256xf32>
    %cst_35 = arith.constant dense<0xFF800000> : vector<128xf32>
    %110 = vector.multi_reduction <maximumf>, %109, %cst_35 [1] : vector<128x256xf32> to vector<128xf32>
    %111 = vector.shape_cast %110 : vector<128xf32> to vector<128x1xf32>
    %112 = vector.broadcast %111 : vector<128x1xf32> to vector<128x256xf32>
    %113 = arith.subf %109, %112 : vector<128x256xf32>
    %114 = math.exp %113 : vector<128x256xf32>
    %cst_36 = arith.constant dense<0.000000e+00> : vector<128xf32>
    %115 = vector.multi_reduction <add>, %114, %cst_36 [1] : vector<128x256xf32> to vector<128xf32>
    %116 = vector.shape_cast %115 : vector<128xf32> to vector<128x1xf32>
    %117 = tpu.reciprocal %116 {approx = true} : vector<128x1xf32> -> vector<128x1xf32>
    %118 = vector.broadcast %117 : vector<128x1xf32> to vector<128x256xf32>
    %119 = arith.mulf %114, %118 : vector<128x256xf32>
    %c48 = arith.constant 48 : index
    %c0_37 = arith.constant 0 : index
    %120 = vector.load %arg2[%c48, %c0_37] : memref<64x256xbf16, #tpu.memory_space<vmem>>, vector<16x256xbf16>
    %121 = arith.truncf %119 : vector<128x256xf32> to vector<128x256xbf16>
    %cst_38 = arith.constant dense<0.000000e+00> : vector<16x128xf32>
    %122 = tpu.matmul %120, %121, %cst_38 {dimension_numbers = #tpu.dot_dimension_numbers<[1], [1], [0], [0], [0, 0, 1, 0], [], []>} : vector<16x256xbf16>, vector<128x256xbf16>, vector<16x128xf32> -> vector<16x128xf32>
    %cst_39 = arith.constant 0.000000e+00 : f32
    %123 = vector.broadcast %cst_39 : f32 to vector<16x128xf32>
    %124 = arith.cmpf ogt, %122, %123 : vector<16x128xf32>
    %125 = math.exp %122 : vector<16x128xf32>
    %cst_40 = arith.constant 1.000000e+00 : f32
    %126 = vector.broadcast %cst_40 : f32 to vector<16x128xf32>
    %127 = arith.subf %125, %126 : vector<16x128xf32>
    %128 = arith.select %124, %122, %127 : vector<16x128xi1>, vector<16x128xf32>
    %129 = tpu.concatenate %35, %66, %97, %128 in 0 : vector<16x128xf32>, vector<16x128xf32>, vector<16x128xf32>, vector<16x128xf32> -> vector<64x128xf32>
    %c0_41 = arith.constant 0 : index
    %c0_42 = arith.constant 0 : index
    %130 = vector.load %arg5[%c0_41, %c0_42] : memref<8x64xf32, #tpu.memory_space<vmem>>, vector<8x64xf32>
    %cst_43 = arith.constant dense<0.000000e+00> : vector<8x128xf32>
    %131 = tpu.matmul %130, %129, %cst_43 {dimension_numbers = #tpu.dot_dimension_numbers<[1], [0], [0], [1], [0, 0, 1, 1], [], []>} : vector<8x64xf32>, vector<64x128xf32>, vector<8x128xf32> -> vector<8x128xf32>
    %c0_44 = arith.constant 0 : index
    %c0_45 = arith.constant 0 : index
    %132 = vector.load %arg6[%c0_44, %c0_45] : memref<8x2xf32, #tpu.memory_space<vmem>>, vector<8x2xf32>
    %cst_46 = arith.constant dense<0.000000e+00> : vector<128x2xf32>
    %133 = tpu.matmul %131, %132, %cst_46 {dimension_numbers = #tpu.dot_dimension_numbers<[0], [0], [1], [1], [0, 1, 1, 1], [], []>} : vector<8x128xf32>, vector<8x2xf32>, vector<128x2xf32> -> vector<128x2xf32>
    %c0_47 = arith.constant 0 : index
    %c0_48 = arith.constant 0 : index
    %134 = vector.load %arg8[%c0_47, %c0_48] : memref<128x2xf32, #tpu.memory_space<vmem>>, vector<128x2xf32>
    tpu.vector_store %arg8[%c0_47, %c0_48], %133 {strides = array<i32>} : memref<128x2xf32, #tpu.memory_space<vmem>>, vector<128x2xf32>,
    %135 = arith.truncf %131 : vector<8x128xf32> to vector<8x128xbf16>
    %c0_49 = arith.constant 0 : index
    %c0_50 = arith.constant 0 : index
    %136 = vector.load %arg7[%c0_49, %c0_50] : memref<8x128xbf16, #tpu.memory_space<vmem>>, vector<8x128xbf16>
    tpu.vector_store %arg7[%c0_49, %c0_50], %135 {strides = array<i32>} : memref<8x128xbf16, #tpu.memory_space<vmem>>, vector<8x128xbf16>,
    return
  }
  func.func @transform_0(%arg0: i32) -> (i32, i32) {
    %c0_i32 = arith.constant 0 : i32
    %c0_i32_0 = arith.constant 0 : i32
    return %arg0, %c0_i32 : i32, i32
  }
  func.func @transform_1(%arg0: i32) -> (i32, i32) {
    %c0_i32 = arith.constant 0 : i32
    %c0_i32_0 = arith.constant 0 : i32
    %c0_i32_1 = arith.constant 0 : i32
    return %c0_i32, %c0_i32_0 : i32, i32
  }
  func.func @transform_2(%arg0: i32) -> (i32, i32) {
    %c0_i32 = arith.constant 0 : i32
    %c0_i32_0 = arith.constant 0 : i32
    return %arg0, %c0_i32 : i32, i32
  }
  func.func @transform_3(%arg0: i32) -> (i32, i32) {
    %c0_i32 = arith.constant 0 : i32
    %c0_i32_0 = arith.constant 0 : i32
    %c0_i32_1 = arith.constant 0 : i32
    return %c0_i32, %c0_i32_0 : i32, i32
  }
  func.func @transform_4(%arg0: i32) -> (i32, i32) {
    %c0_i32 = arith.constant 0 : i32
    %c0_i32_0 = arith.constant 0 : i32
    %c0_i32_1 = arith.constant 0 : i32
    return %c0_i32, %c0_i32_0 : i32, i32
  }
  func.func @transform_5(%arg0: i32) -> (i32, i32) {
    %c0_i32 = arith.constant 0 : i32
    %c0_i32_0 = arith.constant 0 : i32
    %c0_i32_1 = arith.constant 0 : i32
    return %c0_i32, %c0_i32_0 : i32, i32
  }
  func.func @transform_6(%arg0: i32) -> (i32, i32) {
    %c0_i32 = arith.constant 0 : i32
    %c0_i32_0 = arith.constant 0 : i32
    return %c0_i32, %arg0 : i32, i32
  }
  func.func @transform_7(%arg0: i32) -> (i32, i32) {
    %c0_i32 = arith.constant 0 : i32
    %c0_i32_0 = arith.constant 0 : i32
    return %arg0, %c0_i32 : i32, i32
  }
}

module attributes {stable_mosaic.version = 11 : i64} {
  func.func @gat_out_kernel(%arg0: i32, %arg1: memref<128x256xi8, #tpu.memory_space<vmem>>, %arg2: memref<8x256xbf16, #tpu.memory_space<vmem>>, %arg3: memref<128x1xf32, #tpu.memory_space<vmem>>, %arg4: memref<1x256xf32, #tpu.memory_space<vmem>>, %arg5: memref<8x128xf32, #tpu.memory_space<vmem>>) attributes {dimension_semantics = [#tpu.dimension_semantics<parallel>], iteration_bounds = array<i64: 2>, scalar_prefetch = 0 : i64, scratch_operands = 0 : i64, tpu.core_type = #tpu.core_type<tc>, window_params = [{transform_indices = @transform_0, window_bounds = array<i64: 128, 256>}, {pipeline_mode = #tpu.pipeline_mode<synchronous>, transform_indices = @transform_1, window_bounds = array<i64: 8, 256>}, {transform_indices = @transform_2, window_bounds = array<i64: 128, 1>}, {pipeline_mode = #tpu.pipeline_mode<synchronous>, transform_indices = @transform_3, window_bounds = array<i64: 1, 256>}, {transform_indices = @transform_4, window_bounds = array<i64: 8, 128>}]} {
    %c0 = arith.constant 0 : index
    %c0_0 = arith.constant 0 : index
    %0 = vector.load %arg1[%c0, %c0_0] : memref<128x256xi8, #tpu.memory_space<vmem>>, vector<128x256xi8>
    %c0_i8 = arith.constant 0 : i8
    %1 = vector.broadcast %c0_i8 : i8 to vector<128x256xi8>
    %2 = arith.cmpi ne, %0, %1 : vector<128x256xi8>
    %c0_1 = arith.constant 0 : index
    %c0_2 = arith.constant 0 : index
    %3 = vector.load %arg3[%c0_1, %c0_2] : memref<128x1xf32, #tpu.memory_space<vmem>>, vector<128x1xf32>
    %c0_3 = arith.constant 0 : index
    %c0_4 = arith.constant 0 : index
    %4 = vector.load %arg4[%c0_3, %c0_4] : memref<1x256xf32, #tpu.memory_space<vmem>>, vector<1x256xf32>
    %5 = vector.broadcast %3 : vector<128x1xf32> to vector<128x256xf32>
    %6 = vector.broadcast %4 : vector<1x256xf32> to vector<128x256xf32>
    %7 = arith.addf %5, %6 : vector<128x256xf32>
    %cst = arith.constant 0.000000e+00 : f32
    %8 = vector.broadcast %cst : f32 to vector<128x256xf32>
    %9 = arith.cmpf ogt, %7, %8 : vector<128x256xf32>
    %cst_5 = arith.constant 2.000000e-01 : f32
    %10 = vector.broadcast %cst_5 : f32 to vector<128x256xf32>
    %11 = arith.mulf %10, %7 : vector<128x256xf32>
    %12 = arith.select %9, %7, %11 : vector<128x256xi1>, vector<128x256xf32>
    %cst_6 = arith.constant -9.000000e+15 : f32
    %13 = vector.broadcast %cst_6 : f32 to vector<128x256xf32>
    %14 = arith.select %2, %12, %13 : vector<128x256xi1>, vector<128x256xf32>
    %cst_7 = arith.constant dense<0xFF800000> : vector<128xf32>
    %15 = vector.multi_reduction <maximumf>, %14, %cst_7 [1] : vector<128x256xf32> to vector<128xf32>
    %16 = vector.shape_cast %15 : vector<128xf32> to vector<128x1xf32>
    %17 = vector.broadcast %16 : vector<128x1xf32> to vector<128x256xf32>
    %18 = arith.subf %14, %17 : vector<128x256xf32>
    %19 = math.exp %18 : vector<128x256xf32>
    %cst_8 = arith.constant dense<0.000000e+00> : vector<128xf32>
    %20 = vector.multi_reduction <add>, %19, %cst_8 [1] : vector<128x256xf32> to vector<128xf32>
    %21 = vector.shape_cast %20 : vector<128xf32> to vector<128x1xf32>
    %22 = tpu.reciprocal %21 {approx = true} : vector<128x1xf32> -> vector<128x1xf32>
    %23 = vector.broadcast %22 : vector<128x1xf32> to vector<128x256xf32>
    %24 = arith.mulf %19, %23 : vector<128x256xf32>
    %c0_9 = arith.constant 0 : index
    %c0_10 = arith.constant 0 : index
    %25 = vector.load %arg2[%c0_9, %c0_10] : memref<8x256xbf16, #tpu.memory_space<vmem>>, vector<8x256xbf16>
    %26 = arith.truncf %24 : vector<128x256xf32> to vector<128x256xbf16>
    %cst_11 = arith.constant dense<0.000000e+00> : vector<8x128xf32>
    %27 = tpu.matmul %25, %26, %cst_11 {dimension_numbers = #tpu.dot_dimension_numbers<[1], [1], [0], [0], [0, 0, 1, 0], [], []>} : vector<8x256xbf16>, vector<128x256xbf16>, vector<8x128xf32> -> vector<8x128xf32>
    %cst_12 = arith.constant 0.000000e+00 : f32
    %28 = vector.broadcast %cst_12 : f32 to vector<8x128xf32>
    %29 = arith.cmpf ogt, %27, %28 : vector<8x128xf32>
    %30 = math.exp %27 : vector<8x128xf32>
    %cst_13 = arith.constant 1.000000e+00 : f32
    %31 = vector.broadcast %cst_13 : f32 to vector<8x128xf32>
    %32 = arith.subf %30, %31 : vector<8x128xf32>
    %33 = arith.select %29, %27, %32 : vector<8x128xi1>, vector<8x128xf32>
    %cst_14 = arith.constant dense<0xFF800000> : vector<128xf32>
    %34 = vector.multi_reduction <maximumf>, %33, %cst_14 [0] : vector<8x128xf32> to vector<128xf32>
    %35 = vector.shape_cast %34 : vector<128xf32> to vector<1x128xf32>
    %36 = vector.broadcast %35 : vector<1x128xf32> to vector<8x128xf32>
    %37 = arith.subf %33, %36 : vector<8x128xf32>
    %38 = math.exp %37 : vector<8x128xf32>
    %cst_15 = arith.constant dense<0.000000e+00> : vector<128xf32>
    %39 = vector.multi_reduction <add>, %38, %cst_15 [0] : vector<8x128xf32> to vector<128xf32>
    %40 = vector.shape_cast %39 : vector<128xf32> to vector<1x128xf32>
    %41 = math.log %40 : vector<1x128xf32>
    %42 = vector.broadcast %41 : vector<1x128xf32> to vector<8x128xf32>
    %43 = arith.subf %37, %42 : vector<8x128xf32>
    %c0_16 = arith.constant 0 : index
    %c0_17 = arith.constant 0 : index
    %44 = vector.load %arg5[%c0_16, %c0_17] : memref<8x128xf32, #tpu.memory_space<vmem>>, vector<8x128xf32>
    tpu.vector_store %arg5[%c0_16, %c0_17], %43 {strides = array<i32>} : memref<8x128xf32, #tpu.memory_space<vmem>>, vector<8x128xf32>,
    return
  }
  func.func @transform_0(%arg0: i32) -> (i32, i32) {
    %c0_i32 = arith.constant 0 : i32
    %c0_i32_0 = arith.constant 0 : i32
    return %arg0, %c0_i32 : i32, i32
  }
  func.func @transform_1(%arg0: i32) -> (i32, i32) {
    %c0_i32 = arith.constant 0 : i32
    %c0_i32_0 = arith.constant 0 : i32
    %c0_i32_1 = arith.constant 0 : i32
    return %c0_i32, %c0_i32_0 : i32, i32
  }
  func.func @transform_2(%arg0: i32) -> (i32, i32) {
    %c0_i32 = arith.constant 0 : i32
    %c0_i32_0 = arith.constant 0 : i32
    return %arg0, %c0_i32 : i32, i32
  }
  func.func @transform_3(%arg0: i32) -> (i32, i32) {
    %c0_i32 = arith.constant 0 : i32
    %c0_i32_0 = arith.constant 0 : i32
    %c0_i32_1 = arith.constant 0 : i32
    return %c0_i32, %c0_i32_0 : i32, i32
  }
  func.func @transform_4(%arg0: i32) -> (i32, i32) {
    %c0_i32 = arith.constant 0 : i32
    %c0_i32_0 = arith.constant 0 : i32
    return %c0_i32, %arg0 : i32, i32
  }
}

</mosaic_0001>

<bundles_post_ra>
// kernel: gat_model_forward.3
= control target key start
LH: loop header
LB: loop body
LE: loop exit
PB: predicated region body
PF: predicated region fallthrough
CT: control target
= control target key end

     0   :  { %s1406_s21 = smov 0   ;;  %s1408_s22 = smov 0   ;;  %s1663_s0 = inlined_call_operand.vmem [shape: f32[256,32], index: 0, kind: input, shape index: {}]   ;;  %s1664_s1 = inlined_call_operand.vmem [shape: f32[64,32], index: 1, kind: input, shape index: {}]   ;;  %s1665_s2 = inlined_call_operand.vmem [shape: f32[32,4], index: 2, kind: input, shape index: {}]   ;;  %s1666_s3 = inlined_call_operand.vmem [shape: f32[4,32], index: 3, kind: input, shape index: {}]   ;;  %s1667_s4 = inlined_call_operand.vmem [shape: bf16[64,256], index: 4, kind: output, shape index: {0}]   ;;  %s1668_s5 = inlined_call_operand.vmem [shape: f32[256,4], index: 5, kind: output, shape index: {1}]   ;;  %s1669_s6 = inlined_call_operand.vmem [shape: f32[4,256], index: 6, kind: output, shape index: {2}]  }
   0x1   :  { %s1410_s23 = smov 0  }
   0x2 LB: > { %s1419_s24 = sadd.s32 4294967295, %s1366_s23   ;;  %s1421_s25 = sadd.s32 1, %s1366_s23   ;;  %s1366_s23 = sphi %s1410_s23, %s1675_s23   ;;  %s1362_s22 = sphi %s1408_s22, %s1674_s22   ;;  %s1358_s21 = sphi %s1406_s21, %s1673_s21  }
   0x3   : > { %s110_s26 = ssub.s32 %s1366_s23, %s1421_s25  ;;  %s113_s27 = sadd.s32 1, %s1362_s22 }
   0x4   : > { %p111_p0 = scmp.eq.s32.totalorder %s110_s26, 0  ;;  %p123_p1 = scmp.ne.s32.totalorder %s1362_s22, %s1358_s21 }
   0x5   : > { %p124_p2 = scmp.eq.s32.totalorder %s1419_s24, 1  ;;  %p950_p3 = scmp.ge.s32.totalorder %s1366_s23, 1 }
   0x6   : > { %s1429_s28 = scalar_select %p111_p0, %s1362_s22, %s113_s27  }
   0x7   : > { %p1431_p4 = por %p124_p2, %p123_p1  ;;  %p218_p5 = scmp.lt.s32.totalorder %s1366_s23, 3 }
   0x9   : > { %p219_p6 = pnand %p950_p3, %p218_p5 }
   0xa   : > { %s952_s30 = sshll.u32 (!%p219_p6), %s1419_s24, 4  ;;  %v514_v0 = vld [vmem:[%s1665_s2] sm:$0xff] (!%p219_p6)  ;;  %v515_v1 = vld [vmem:[%s1665_s2 + $0x8] sm:$0xff] (!%p219_p6)  ;;  %v516_v2 = vld [vmem:[%s1665_s2 + $0x10] sm:$0xff] (!%p219_p6)  ;;  %vm296_vm0 = vcmask (!%p219_p6), 261120   ;;  %v1368_v14 = vmov (!%p219_p6), 0.0|0.0  }
   0xb   : > { %222 = sbr.rel (%p219_p6) target bundleno = 324 (0x144), region = 36  ;;  %p257_p7 = scmp.lt.s32.totalorder (!%p219_p6), %s952_s30, 31  ;;  %v1277_v3 = vpack.c.bf16 (!%p219_p6), %v515_v1, %v514_v0  ;;  %v517_v4 = vld [vmem:[%s1665_s2 + $0x18] sm:$0xff] (!%p219_p6)  ;;  %v288_v5 = vld [vmem:[%s1664_s1] sm:$0xff] (!%p219_p6)  ;;  %vm1464_vm1 = vmpackc.low (!%p219_p6), %vm296_vm0, %vm296_vm0  ;;  %vm1369_vm2 = vmmov (!%p219_p6), 0   ;;  %v1370_v31 = vmov (!%p219_p6), 0.0  }
   0xc   : > { %v1281_v6 = vpack.c.bf16 (!%p219_p6), %v517_v4, %v516_v2  ;;  %1150 = vmatprep.mubr.msk.f32.mxu0 (!%p219_p6), %vm296_vm0, %v288_v5  ;;  %v289_v34 = vld [vmem:[%s1664_s1 + $0x8] sm:$0xff] (!%p219_p6)  ;;  %v290_v35 = vld [vmem:[%s1664_s1 + $0x10] sm:$0xff] (!%p219_p6)  ;;  %v291_v36 = vld [vmem:[%s1664_s1 + $0x18] sm:$0xff] (!%p219_p6)  ;;  %vm663_vm3 = vcmask (!%p219_p6), 31744   ;;  %p268_p8 = scmp.lt.s32.totalorder (!%p219_p6), %s1419_s24, 1 }
   0xd   : > { %1278 = vmatprep.subr.bf16.mxu1 (!%p219_p6), %v1277_v3  ;;  %v292_v37 = vld [vmem:[%s1664_s1 + $0x20] sm:$0xff] (!%p219_p6)  ;;  %v293_v39 = vld [vmem:[%s1664_s1 + $0x28] sm:$0xff] (!%p219_p6)  ;;  %v294_v40 = vld [vmem:[%s1664_s1 + $0x30] sm:$0xff] (!%p219_p6) }
   0xe   : > { %1280 = vmatpush3.bf16.msra.mxu1 (!%p219_p6), %v1277_v3  ;;  %v680_v38 = vld [vmem:[%s1666_s3] sm:$0xf] (!%p219_p6)  ;;  %v295_v41 = vld [vmem:[%s1664_s1 + $0x38] sm:$0xff] (!%p219_p6) }
   0xf   : > { %1282 = vmatprep.subr.bf16.mxu1 (!%p219_p6), %v1281_v6 }
  0x12   : > { %s1677_s30 = smov (!%p257_p7, %s952_s30), 31  ;;  %1284 = vmatpush3.bf16.msra.mxu1 %v1281_v6 }
  0x13   : > { %s953_s17 = sshll.u32 %s1677_s30, 3  ;;  %1285 = vmatprep.subr.bf16.mxu1 %v1368_v14  ;;  %s240_s30 = sand.u32 1, %s1358_s21  }
  0x14   : > { %s1460_s20 = scalar_lea.vmem %s1663_s0, %s953_s17  ;;  %s1593_s27 = scalar_lea.vmem %s1668_s5, %s953_s17 }
  0x15   : > { %v272_v8 = vld [vmem:[%s1460_s20] sm:$0xff]  ;;  %v273_v9 = vld [vmem:[%s1460_s20 + $0x8] sm:$0xff]  ;;  %v274_v10 = vld [vmem:[%s1460_s20 + $0x10] sm:$0xff]  ;;  %s269_s17 = scalar_select %p268_p8, %s1419_s24, 1 }
  0x16   : > { %v1229_v11 = vpack.c.bf16 %v273_v9, %v272_v8  ;;  %v275_v12 = vld [vmem:[%s1460_s20 + $0x18] sm:$0xff]  ;;  %1170 = vmatprep.mubr.msk.f32.mxu1 %vm296_vm0, %v272_v8  ;;  %v276_v15 = vld [vmem:[%s1460_s20 + $0x20] sm:$0xff]  ;;  %v277_v16 = vld [vmem:[%s1460_s20 + $0x28] sm:$0xff]  ;;  %s951_s7 = sshll.u32 %s240_s30, 5  ;;  %s1023_s21 = sshll.u32 (%p1431_p4), %s1419_s24, 2 }
  0x17   : > { %v1235_v13 = vpack.c.bf16 %v275_v12, %v274_v10  ;;  %1171 = vmatmul.mubr.msk.f32.vlgmr.msra.gmra.mrb[0].mxu1 %vm296_vm0, %v273_v9  ;;  %v1241_v17 = vpack.c.bf16 %v277_v16, %v276_v15  ;;  %v278_v18 = vld [vmem:[%s1460_s20 + $0x30] sm:$0xff]  ;;  %v279_v19 = vld [vmem:[%s1460_s20 + $0x38] sm:$0xff]  ;;  %v280_v20 = vld [vmem:[%s1460_s20 + $0x40] sm:$0xff]  ;;  %s956_s8 = sshll.u32 %s269_s17, 2  ;;  %s1630_s9 = scalar_lea.vmem [#allocation2], %s951_s7 }
  0x18   : > { %1231 = vmatprep.subr.msk.bf16.mxu0 %vm1464_vm1, %v1229_v11  ;;  %1173 = vmatprep.mubr.msk.f32.mxu1 %vm296_vm0, %v274_v10  ;;  %v1247_v21 = vpack.c.bf16 %v279_v19, %v278_v18  ;;  %v281_v22 = vld [vmem:[%s1460_s20 + $0x48] sm:$0xff]  ;;  %v282_v23 = vld [vmem:[%s1460_s20 + $0x50] sm:$0xff]  ;;  %v283_v24 = vld [vmem:[%s1460_s20 + $0x58] sm:$0xff]  ;;  %s271_s12 = scalar_lea.vmem %s1669_s6, %s956_s8  ;;  %s772_s15 = scalar_lea.vmem (%p1431_p4), %s1667_s4, %s1023_s21 }
  0x19   : > { %1234 = vmatpush3.bf16.xpose.msk.msra.mxu0 %vm1464_vm1, %v1229_v11  ;;  %v284_v25 = vld [vmem:[%s1460_s20 + $0x60] sm:$0xff]  ;;  %v1253_v26 = vpack.c.bf16 %v281_v22, %v280_v20  ;;  %v285_v27 = vld [vmem:[%s1460_s20 + $0x68] sm:$0xff]  ;;  %v286_v28 = vld [vmem:[%s1460_s20 + $0x70] sm:$0xff]  ;;  %v1259_v30 = vpack.c.bf16 %v283_v24, %v282_v23 }
  0x1a   : > { %1237 = vmatprep.subr.msk.bf16.mxu0 %vm1464_vm1, %v1235_v13  ;;  %v287_v29 = vld [vmem:[%s1460_s20 + $0x78] sm:$0xff]  ;;  %v1265_v32 = vpack.c.bf16 %v285_v27, %v284_v25 }
  0x1b   : > { %1174 = vmatmul.mubr.msk.f32.gmra.mrb[2].mxu1 %vm296_vm0, %v275_v12  ;;  %v1271_v33 = vpack.c.bf16 %v287_v29, %v286_v28 }
  0x1c   : > { %1176 = vmatprep.mubr.msk.f32.mxu1 %vm296_vm0, %v276_v15  ;;  %1288 = vmatpush3.bf16.xpose.msk.msra.mxu1 %vm1464_vm1, %v1229_v11 }
  0x1d   : > { %1289 = vmatprep.subr.bf16.mxu1 %v1368_v14 }
  0x1f   : > { %1177 = vmatmul.mubr.msk.f32.gmra.mrb[4].mxu1 %vm296_vm0, %v277_v16 }
  0x20   : > { %1179 = vmatprep.mubr.msk.f32.mxu1 %vm296_vm0, %v278_v18 }
  0x21   : > { %1240 = vmatpush3.bf16.xpose.msk.msra.mxu0 %vm1464_vm1, %v1235_v13 }
  0x22   : > { %1243 = vmatprep.subr.msk.bf16.mxu0 %vm1464_vm1, %v1241_v17 }
  0x23   : > { %1180 = vmatmul.mubr.msk.f32.gmra.mrb[6].mxu1 %vm296_vm0, %v279_v19 }
  0x24   : > { %1182 = vmatprep.mubr.msk.f32.mxu1 %vm296_vm0, %v280_v20  ;;  %1292 = vmatpush3.bf16.xpose.msk.msra.mxu1 %vm1464_vm1, %v1235_v13 }
  0x25   : > { %1293 = vmatprep.subr.bf16.mxu1 %v1368_v14 }
  0x27   : > { %1183 = vmatmul.mubr.msk.f32.gmra.mrb[8].mxu1 %vm296_vm0, %v281_v22 }
  0x28   : > { %1185 = vmatprep.mubr.msk.f32.mxu1 %vm296_vm0, %v282_v23 }
  0x29   : > { %1246 = vmatpush3.bf16.xpose.msk.msra.mxu0 %vm1464_vm1, %v1241_v17 }
  0x2a   : > { %1249 = vmatprep.subr.msk.bf16.mxu0 %vm1464_vm1, %v1247_v21 }
  0x2b   : > { %1186 = vmatmul.mubr.msk.f32.gmra.mrb[10].mxu1 %vm296_vm0, %v283_v24 }
  0x2c   : > { %1188 = vmatprep.mubr.msk.f32.mxu1 %vm296_vm0, %v284_v25  ;;  %1296 = vmatpush3.bf16.xpose.msk.msra.mxu1 %vm1464_vm1, %v1241_v17 }
  0x2d   : > { %1297 = vmatprep.subr.bf16.mxu1 %v1368_v14 }
  0x2f   : > { %1189 = vmatmul.mubr.msk.f32.gmra.mrb[12].mxu1 %vm296_vm0, %v285_v27 }
  0x30   : > { %1191 = vmatprep.mubr.msk.f32.mxu1 %vm296_vm0, %v286_v28 }
  0x31   : > { %1252 = vmatpush3.bf16.xpose.msk.msra.mxu0 %vm1464_vm1, %v1247_v21 }
  0x32   : > { %1255 = vmatprep.subr.msk.bf16.mxu0 %vm1464_vm1, %v1253_v26 }
  0x33   : > { %1192 = vmatmul.mubr.msk.f32.gmra.mrb[14].mxu1 %vm296_vm0, %v287_v29 }
  0x34   : > { %1226 = vmatprep.mubr.msk.f32.mxu1 %vm1369_vm2, %v1370_v31  ;;  %1300 = vmatpush3.bf16.xpose.msk.msra.mxu1 %vm1464_vm1, %v1247_v21 }
  0x35   : > { %1301 = vmatprep.subr.bf16.mxu1 %v1368_v14 }
  0x39   : > { %1258 = vmatpush3.bf16.xpose.msk.msra.mxu0 %vm1464_vm1, %v1253_v26 }
  0x3a   : > { %1261 = vmatprep.subr.msk.bf16.mxu0 %vm1464_vm1, %v1259_v30 }
  0x3c   : > { %1304 = vmatpush3.bf16.xpose.msk.msra.mxu1 %vm1464_vm1, %v1253_v26 }
  0x3d   : > { %1305 = vmatprep.subr.bf16.mxu1 %v1368_v14 }
  0x41   : > { %1264 = vmatpush3.bf16.xpose.msk.msra.mxu0 %vm1464_vm1, %v1259_v30 }
  0x42   : > { %1267 = vmatprep.subr.msk.bf16.mxu0 %vm1464_vm1, %v1265_v32 }
  0x44   : > { %1308 = vmatpush3.bf16.xpose.msk.msra.mxu1 %vm1464_vm1, %v1259_v30 }
  0x45   : > { %1309 = vmatprep.subr.bf16.mxu1 %v1368_v14 }
  0x49   : > { %1270 = vmatpush3.bf16.xpose.msk.msra.mxu0 %vm1464_vm1, %v1265_v32 }
  0x4a   : > { %1273 = vmatprep.subr.msk.bf16.mxu0 %vm1464_vm1, %v1271_v33 }
  0x4c   : > { %1312 = vmatpush3.bf16.xpose.msk.msra.mxu1 %vm1464_vm1, %v1265_v32 }
  0x4d   : > { %1313 = vmatprep.subr.bf16.mxu1 %v1368_v14 }
  0x51   : > { %1276 = vmatpush3.bf16.xpose.msk.msra.mxu0 %vm1464_vm1, %v1271_v33 }
  0x54   : > { %1316 = vmatpush3.bf16.xpose.msk.msra.mxu1 %vm1464_vm1, %v1271_v33 }
  0x58   : > { %1151 = vmatmul.mubr.msk.f32.vlgmr.msra.gmra.mrb[0].mxu0 %vm296_vm0, %v289_v34 }
  0x59   : > { %1153 = vmatprep.mubr.msk.f32.mxu0 %vm296_vm0, %v290_v35 }
  0x5b   : > { %1227 = vmatmul.mubr.msk.f32.vlgmr.msra.gmra.mrb[16].mxu1 %vm296_vm0, %v680_v38 }
  0x5c   : > { %1154 = vmatmul.mubr.msk.f32.gmra.mrb[2].mxu0 %vm296_vm0, %v291_v36 }
  0x5d   : > { %1156 = vmatprep.mubr.msk.f32.mxu0 %vm296_vm0, %v292_v37 }
  0x60   : > { %1157 = vmatmul.mubr.msk.f32.gmra.mrb[4].mxu0 %vm296_vm0, %v293_v39 }
  0x61   : > { %1159 = vmatprep.mubr.msk.f32.mxu0 %vm296_vm0, %v294_v40 }
  0x64   : > { %1160 = vmatmul.mubr.msk.f32.gmra.mrb[6].mxu0 %vm296_vm0, %v295_v41 }
  0xea   : > { %v1172_v42 = vpop.f32.mrb[0].mxu1 }
  0xeb   : > { %665 = vst.msk [vmem:[%s1593_s27 + $0x8] sm:$0xff] %vm663_vm3, %v1172_v42  ;;  %v584_v43 = vpop.f32.mrb[1].mxu1 }
  0xec   : > { %664 = vst.msk [vmem:[%s1593_s27] sm:$0xff] %vm663_vm3, %v584_v43 }
  0xee   : > { %v1175_v44 = vpop.f32.mrb[2].mxu1 }
  0xef   : > { %667 = vst.msk [vmem:[%s1593_s27 + $0x18] sm:$0xff] %vm663_vm3, %v1175_v44  ;;  %v594_v45 = vpop.f32.mrb[3].mxu1 }
  0xf0   : > { %666 = vst.msk [vmem:[%s1593_s27 + $0x10] sm:$0xff] %vm663_vm3, %v594_v45 }
  0xf2   : > { %v1178_v46 = vpop.f32.mrb[4].mxu1 }
  0xf3   : > { %669 = vst.msk [vmem:[%s1593_s27 + $0x28] sm:$0xff] %vm663_vm3, %v1178_v46  ;;  %v604_v47 = vpop.f32.mrb[5].mxu1 }
  0xf4   : > { %668 = vst.msk [vmem:[%s1593_s27 + $0x20] sm:$0xff] %vm663_vm3, %v604_v47 }
  0xf6   : > { %v1181_v48 = vpop.f32.mrb[6].mxu1 }
  0xf7   : > { %671 = vst.msk [vmem:[%s1593_s27 + $0x38] sm:$0xff] %vm663_vm3, %v1181_v48  ;;  %v614_v49 = vpop.f32.mrb[7].mxu1 }
  0xf8   : > { %670 = vst.msk [vmem:[%s1593_s27 + $0x30] sm:$0xff] %vm663_vm3, %v614_v49 }
  0xfa   : > { %v1184_v50 = vpop.f32.mrb[8].mxu1 }
  0xfb   : > { %673 = vst.msk [vmem:[%s1593_s27 + $0x48] sm:$0xff] %vm663_vm3, %v1184_v50  ;;  %v624_v51 = vpop.f32.mrb[9].mxu1 }
  0xfc   : > { %672 = vst.msk [vmem:[%s1593_s27 + $0x40] sm:$0xff] %vm663_vm3, %v624_v51 }
  0xfe   : > { %v1187_v52 = vpop.f32.mrb[10].mxu1 }
  0xff   : > { %675 = vst.msk [vmem:[%s1593_s27 + $0x58] sm:$0xff] %vm663_vm3, %v1187_v52  ;;  %v634_v53 = vpop.f32.mrb[11].mxu1 }
 0x100   : > { %674 = vst.msk [vmem:[%s1593_s27 + $0x50] sm:$0xff] %vm663_vm3, %v634_v53 }
 0x102   : > { %v1190_v54 = vpop.f32.mrb[12].mxu1 }
 0x103   : > { %677 = vst.msk [vmem:[%s1593_s27 + $0x68] sm:$0xff] %vm663_vm3, %v1190_v54  ;;  %v644_v55 = vpop.f32.mrb[13].mxu1 }
 0x104   : > { %676 = vst.msk [vmem:[%s1593_s27 + $0x60] sm:$0xff] %vm663_vm3, %v644_v55 }
 0x106   : > { %v1193_v56 = vpop.f32.mrb[14].mxu1 }
 0x107   : > { %679 = vst.msk [vmem:[%s1593_s27 + $0x78] sm:$0xff] %vm663_vm3, %v1193_v56  ;;  %v654_v57 = vpop.f32.mrb[15].mxu1 }
 0x108   : > { %678 = vst.msk [vmem:[%s1593_s27 + $0x70] sm:$0xff] %vm663_vm3, %v654_v57 }
 0x12b   : > { %v1152_v58 = vpop.f32.mrb[0].mxu0 }
 0x12c   : > { %v435_v59 = vpop.f32.mrb[1].mxu0 }
 0x12d   : > { %v1037_v60 = vpack.c.bf16 %v1152_v58, %v435_v59 }
 0x12e   : > { %v750_v0 = vpop.f32.mrb[16].mxu1 }
 0x12f   : > { %1038 = vst [vmem:[%s1630_s9] sm:$0xff] %v1037_v60   ;;  %v1155_v61 = vpop.f32.mrb[2].mxu0  ;;  %754 = vst [vmem:[%s271_s12] sm:$0xf] %v750_v0  ;;  %v1228_v1 = vpop.f32.mrb[17].mxu1 }
 0x130   : > { %v445_v62 = vpop.f32.mrb[3].mxu0 }
 0x131   : > { %v1042_v63 = vpack.c.bf16 %v1155_v61, %v445_v62 }
 0x133   : > { %1054 = vst [vmem:[%s1630_s9 + $0x8] sm:$0xff] %v1042_v63   ;;  %v1158_v2 = vpop.f32.mrb[4].mxu0 }
 0x134   : > { %v455_v3 = vpop.f32.mrb[5].mxu0 }
 0x135   : > { %v1047_v4 = vpack.c.bf16 %v1158_v2, %v455_v3  ;;  %770 = sbr.rel (!%p1431_p4) target bundleno = 324 (0x144), region = 40 }
 0x136   : > { %v788_v8 = vld [vmem:[%s1630_s9] sm:$0xf] (%p1431_p4)  ;;  %v790_v9 = vld [vmem:[%s1630_s9 + $0x4] sm:$0xf] (%p1431_p4) }
 0x137   : > { %1055 = vst [vmem:[%s1630_s9 + $0x10] sm:$0xff] %v1047_v4   ;;  %v1161_v5 = vpop.f32.mrb[6].mxu0  ;;  %789 = vst [vmem:[%s772_s15] sm:$0xf] (%p1431_p4), %v788_v8 }
 0x138   : > { %v465_v6 = vpop.f32.mrb[7].mxu0  ;;  %791 = vst [vmem:[%s772_s15 + $0x8] sm:$0xf] (%p1431_p4), %v790_v9 }
 0x139   : > { %v1052_v7 = vpack.c.bf16 %v1161_v5, %v465_v6 }
 0x13a   : > { %v792_v10 = vld [vmem:[%s1630_s9 + $0x8] sm:$0xf] (%p1431_p4)  ;;  %v794_v11 = vld [vmem:[%s1630_s9 + $0xc] sm:$0xf] (%p1431_p4) }
 0x13b   : > { %1056 = vst [vmem:[%s1630_s9 + $0x18] sm:$0xff] %v1052_v7   ;;  %793 = vst [vmem:[%s772_s15 + $0x10] sm:$0xf] (%p1431_p4), %v792_v10 }
 0x13c   : > { %795 = vst [vmem:[%s772_s15 + $0x18] sm:$0xf] %v794_v11 }
 0x13e   : > { %v796_v12 = vld [vmem:[%s1630_s9 + $0x10] sm:$0xf]  ;;  %v798_v13 = vld [vmem:[%s1630_s9 + $0x14] sm:$0xf] }
 0x13f   : > { %797 = vst [vmem:[%s772_s15 + $0x20] sm:$0xf] %v796_v12  ;;  %799 = vst [vmem:[%s772_s15 + $0x28] sm:$0xf] %v798_v13 }
 0x142   : > { %v800_v14 = vld [vmem:[%s1630_s9 + $0x18] sm:$0xf]  ;;  %v802_v15 = vld [vmem:[%s1630_s9 + $0x1c] sm:$0xf] }
 0x143   : > { %801 = vst [vmem:[%s772_s15 + $0x30] sm:$0xf] %v800_v14  ;;  %803 = vst [vmem:[%s772_s15 + $0x38] sm:$0xf] %v802_v15 }
 0x144 PF: > { %p14_p9 = scmp.ge.s32.totalorder %s1421_s25, 4   ;;  %s1673_s21 = smov %s1362_s22 }
 0x145   : > { %s1674_s22 = smov %s1429_s28  ;;  %s1675_s23 = smov %s1421_s25 }
 0x146   :  { %16 = sbr.rel (!%p14_p9) target bundleno = 2 (0x2), region = 131 }

// kernel: gat_model_forward.5
= control target key start
LH: loop header
LB: loop body
LE: loop exit
PB: predicated region body
PF: predicated region fallthrough
CT: control target
= control target key end

     0   :  { %9 = vsyncpa [#allocation3], 0  ;;  %s2284_s0 = inlined_call_operand.vmem [shape: s8[256,256], index: 0, kind: input, shape index: {}]   ;;  %s2285_s1 = inlined_call_operand.vmem [shape: bf16[8,256], index: 1, kind: input, shape index: {}]   ;;  %s2286_s2 = inlined_call_operand.vmem [shape: f32[256,1], index: 2, kind: input, shape index: {}]   ;;  %s2287_s3 = inlined_call_operand.vmem [shape: f32[1,256], index: 3, kind: input, shape index: {}]   ;;  %s2288_s4 = inlined_call_operand.hbm [shape: f32[8,256], index: 4, kind: output, shape index: {}]  }
   0x1   :  { %11 = vsyncpa [#allocation3 + $0x1], 0  ;;  %s1346_s15 = smov 0   ;;  %s1348_s16 = smov 0  }
   0x2   :  { %s1350_s17 = smov 0   ;;  %s1352_s18 = smov 0  }
   0x3 LB: > { %s1367_s19 = sadd.s32 4294967295, %s1317_s18   ;;  %s1091_s20 = sadd.s32 4294967294, %s1317_s18   ;;  %s1317_s18 = sphi %s1352_s18, %s2392_s18   ;;  %s1313_s17 = sphi %s1350_s17, %s2391_s17   ;;  %s1309_s16 = sphi %s1348_s16, %s2390_s16   ;;  %s1305_s15 = sphi %s1346_s15, %s2389_s15  }
   0x4   : > { %s1371_s21 = sadd.s32 1, %s1317_s18   ;;  %s118_s22 = sadd.s32 1, %s1313_s17 }
   0x5   : > { %s115_s23 = ssub.s32 %s1317_s18, %s1371_s21  ;;  %p128_p0 = scmp.ne.s32.totalorder %s1313_s17, %s1309_s16 }
   0x6   : > { %p116_p1 = scmp.eq.s32.totalorder %s115_s23, 0  ;;  %p129_p2 = scmp.eq.s32.totalorder %s1367_s19, 1 }
   0x7   : > { %p134_p3 = scmp.ne.s32.totalorder %s1309_s16, %s1305_s15  ;;  %p135_p4 = scmp.eq.s32.totalorder %s1091_s20, 1 }
   0x8   : > { %s1382_s24 = scalar_select %p116_p1, %s1313_s17, %s118_s22  }
   0x9   : > { %p1384_p5 = por %p129_p2, %p128_p0  ;;  %p1388_p6 = por %p135_p4, %p134_p3 }
   0xa   : > { %p1094_p7 = scmp.ge.s32.totalorder %s1317_s18, 1  ;;  %p178_p8 = scmp.lt.s32.totalorder %s1317_s18, 3 }
   0xc   : > { %p179_p9 = pnand %p1094_p7, %p178_p8 }
   0xe   : > { %182 = sbr.rel (%p179_p9) target bundleno = 851 (0x353), region = 36 }
  0x15   : > { %s1099_s27 = sshll.u32 %s1367_s19, 4  ;;  %v1319_v0 = vmov 0   ;;  %s1096_s6 = sshll.u32 %s1367_s19, 2  ;;  %v340_v27 = vlaneseq  ;;  %v258_v44 = vld [vmem:[%s2287_s3] sm:$0x3] }
  0x16   : > { %1150 = vset.pattern.permute.xlu1 %v1319_v0  ;;  %1149 = vset.pattern.permute.xlu0 %v1319_v0  ;;  %p218_p10 = scmp.lt.s32.totalorder %s1099_s27, 31  ;;  %p211_p11 = scmp.lt.s32.totalorder %s1096_s6, 7 }
  0x17   : > { %v341_v32 = vshrl.u32 %v340_v27, 7  ;;  %s207_s20 = sand.u32 1, %s1309_s16   ;;  %s1105_s23 = sshll.u32 %s1367_s19, 7 }
  0x18   : > { %s2394_s27 = smov (!%p218_p10, %s1099_s27), 31  ;;  %s2396_s6 = smov (!%p211_p11, %s1096_s6), 7 }
  0x19   : > { %s1100_s28 = sshll.u32 %s2394_s27, 3  ;;  %s1108_s7 = sshll.u32 %s2396_s6, 4  ;;  %v342_v41 = vsub.s32 0, %v341_v32  ;;  %v346_v42 = vsub.s32 1, %v341_v32 }
  0x1a   : > { %s221_s5 = scalar_lea.vmem %s2286_s2, %s1100_s28  ;;  %s1404_s10 = scalar_lea.vmem %s2284_s0, %s1108_s7 }
  0x1b   : > { %v244_v1 = vld [vmem:[%s221_s5 + $0x10] sm:$0xff]  ;;  %v242_v2 = vld [vmem:[%s221_s5] sm:$0xff]  ;;  %v245_v3 = vld [vmem:[%s221_s5 + $0x18] sm:$0xff]  ;;  %v1429_v56 = vrot.slane %v258_v44, %v342_v41  ;;  %v1431_v57 = vrot.slane %v258_v44, %v346_v42  ;;  %s1095_s22 = sshll.u32 %s207_s20, 3  ;;  %s1007_s6 = scalar_lea.sflag [#allocation3], %s207_s20 }
  0x1c   : > { %271 = vperm.xlu1 %1150, %v244_v1   ;;  %261 = vperm.xlu0 %1149, %v242_v2   ;;  %v243_v4 = vld [vmem:[%s221_s5 + $0x8] sm:$0xff]  ;;  %v246_v6 = vld [vmem:[%s221_s5 + $0x20] sm:$0xff]  ;;  %v249_v7 = vld [vmem:[%s221_s5 + $0x38] sm:$0xff]  ;;  %s209_s27 = scalar_lea.vmem [#allocation2], %s1095_s22  ;;  %s1320_s19 = smov [#allocation2]  }
  0x1d   : > { %v247_v5 = vld [vmem:[%s221_s5 + $0x28] sm:$0xff]  ;;  %v248_v8 = vld [vmem:[%s221_s5 + $0x30] sm:$0xff]  ;;  %v250_v10 = vld [vmem:[%s221_s5 + $0x40] sm:$0xff]  ;;  %s1020_s28 = sshll.u32 %s209_s27, 4  ;;  %s1259_s8 = sshll.u32 %s1320_s19, 4  ;;  %s2244_s28 = int_to_ptr.vmem [resolvable:$true] %s1020_s28  ;;  %s1260_s8 = int_to_ptr.vmem [resolvable:$false] %s1259_s8 }
  0x1e   : > { %v251_v9 = vld [vmem:[%s221_s5 + $0x48] sm:$0xff]  ;;  %v253_v11 = vld [vmem:[%s221_s5 + $0x58] sm:$0xff]  ;;  %v252_v12 = vld [vmem:[%s221_s5 + $0x50] sm:$0xff]  ;;  %s1255_s7 = scalar_lea.vmem %s2244_s28, 128  ;;  %s1261_s9 = scalar_lea.vmem %s1260_s8, 256 }
  0x1f   : > { %v255_v13 = vld [vmem:[%s221_s5 + $0x68] sm:$0xff]  ;;  %v254_v14 = vld [vmem:[%s221_s5 + $0x60] sm:$0xff]  ;;  %v257_v15 = vld [vmem:[%s221_s5 + $0x78] sm:$0xff]  ;;  %p1256_p12 = scmp.ne.s32.totalorder %s2244_s28, %s1255_s7  ;;  %p1262_p1 = scmp.lt.s32.totalorder %s2244_s28, %s1260_s8 }
  0x20   : > { %276 = vperm.xlu1 %1150, %v245_v3   ;;  %266 = vperm.xlu0 %1149, %v243_v4   ;;  %v256_v16 = vld [vmem:[%s221_s5 + $0x70] sm:$0xff]  ;;  %v226_v17 = vld [vmem:[%s1404_s10] sm:$0xff]  ;;  %v227_v18 = vld [vmem:[%s1404_s10 + $0x8] sm:$0xff]  ;;  %s2242_s5 = scalar_lea.hbm %s2288_s4, %s1105_s23  ;;  %p1263_p2 = scmp.lt.s32.totalorder %s1261_s9, %s1255_s7 }
  0x21   : > { %vm234_vm0 = vnez %v226_v17  ;;  %vm235_vm1 = vnez %v227_v18  ;;  %v228_v21 = vld [vmem:[%s1404_s10 + $0x10] sm:$0xff]  ;;  %v229_v22 = vld [vmem:[%s1404_s10 + $0x18] sm:$0xff]  ;;  %v230_v39 = vld [vmem:[%s1404_s10 + $0x20] sm:$0xff]  ;;  %p1257_p13 = pnand %p1256_p12, %p1384_p5 }
  0x22   : > { %v478_v19 = vsel %vm234_vm0, 16843009, %v1319_v0  ;;  %v479_v20 = vsel %vm235_vm1, 16843009, %v1319_v0  ;;  %vm236_vm2 = vnez %v228_v21  ;;  %vm237_vm3 = vnez %v229_v22  ;;  %v231_v40 = vld [vmem:[%s1404_s10 + $0x28] sm:$0xff]  ;;  %v232_v54 = vld [vmem:[%s1404_s10 + $0x30] sm:$0xff]  ;;  %p1264_p3 = por %p1263_p2, %p1262_p1 }
  0x23   : > { %v486_v23 = vunpack.c.0.s8 %v478_v19  ;;  %v487_v24 = vunpack.c.0.s8 %v479_v20  ;;  %v488_v25 = vunpack.c.1.s8 %v478_v19  ;;  %v489_v26 = vunpack.c.1.s8 %v479_v20  ;;  %v233_v55 = vld [vmem:[%s1404_s10 + $0x38] sm:$0xff]  ;;  %p1258_p0 = pneg %p1257_p13 }
  0x24   : > { %286 = vperm.xlu1 %1150, %v247_v5   ;;  %281 = vperm.xlu0 %1149, %v246_v6   ;;  %v480_v30 = vsel %vm236_vm2, 16843009, %v1319_v0  ;;  %v481_v31 = vsel %vm237_vm3, 16843009, %v1319_v0  ;;  %v490_v33 = vunpack.c.2.s8 %v478_v19  ;;  %v491_v34 = vunpack.c.2.s8 %v479_v20 }
  0x25   : > { %v518_v28 = vpack.c.b16 %v487_v24, %v486_v23  ;;  %v520_v29 = vpack.c.b16 %v489_v26, %v488_v25  ;;  %v494_v35 = vunpack.c.0.s8 %v480_v30  ;;  %v495_v36 = vunpack.c.0.s8 %v481_v31  ;;  %p1265_p4 = pnand %p1264_p3, %p1258_p0 }
  0x26   : > { %v522_v43 = vpack.c.b16 %v491_v34, %v490_v33  ;;  %v492_v46 = vunpack.c.3.s8 %v478_v19  ;;  %v493_v47 = vunpack.c.3.s8 %v479_v20  ;;  %vm238_vm6 = vnez %v230_v39 }
  0x27   : > { %v519_v37 = vpack.c.b8 %v518_v28, %v518_v28  ;;  %v521_v38 = vpack.c.b8 %v520_v29, %v520_v29  ;;  %v526_v45 = vpack.c.b16 %v495_v36, %v494_v35  ;;  %vm239_vm7 = vnez %v231_v40 }
  0x28   : > { %296 = vperm.xlu1 %1150, %v249_v7   ;;  %291 = vperm.xlu0 %1149, %v248_v8   ;;  %v498_v50 = vunpack.c.2.s8 %v480_v30  ;;  %v499_v51 = vunpack.c.2.s8 %v481_v31  ;;  %v496_v52 = vunpack.c.1.s8 %v480_v30  ;;  %v497_v53 = vunpack.c.1.s8 %v481_v31 }
  0x29   : > { %vm1419_vm4 = vnez %v519_v37  ;;  %vm1423_vm5 = vnez %v521_v38  ;;  %v523_v58 = vpack.c.b8 %v522_v43, %v522_v43  ;;  %v527_v59 = vpack.c.b8 %v526_v45, %v526_v45 }
  0x2a   : > { %v524_v60 = vpack.c.b16 %v493_v47, %v492_v46  ;;  %v482_v61 = vsel %vm238_vm6, 16843009, %v1319_v0  ;;  %v483_v62 = vsel %vm239_vm7, 16843009, %v1319_v0  ;;  %v1438_v63 = vsel %vm1419_vm4, 16843009, %v1319_v0 }
  0x2b   : > { %v1443_v1 = vsel %vm1423_vm5, 16843009, %v1319_v0  ;;  %vm240_vm8 = vnez %v232_v54  ;;  %vm241_vm9 = vnez %v233_v55  ;;  %v530_v2 = vpack.c.b16 %v499_v51, %v498_v50 }
  0x2c   : > { %306 = vperm.xlu1 %1150, %v251_v9   ;;  %301 = vperm.xlu0 %1149, %v250_v10   ;;  %v528_v3 = vpack.c.b16 %v497_v53, %v496_v52  ;;  %v500_v4 = vunpack.c.3.s8 %v480_v30  ;;  %v501_v5 = vunpack.c.3.s8 %v481_v31  ;;  %v502_v6 = vunpack.c.0.s8 %v482_v61 }
  0x2d   : > { %v503_v7 = vunpack.c.0.s8 %v483_v62  ;;  %v504_v8 = vunpack.c.1.s8 %v482_v61  ;;  %v505_v9 = vunpack.c.1.s8 %v483_v62  ;;  %v506_v10 = vunpack.c.2.s8 %v482_v61 }
  0x2e   : > { %vm1449_vm10 = vnez %v523_v58  ;;  %v525_v17 = vpack.c.b8 %v524_v60, %v524_v60  ;;  %v584_v18 = vunpack.c.0.s8 %v1443_v1  ;;  %vm1454_vm11 = vnez %v527_v59 }
  0x2f   : > { %v531_v20 = vpack.c.b8 %v530_v2, %v530_v2  ;;  %v532_v21 = vpack.c.b16 %v501_v5, %v500_v4  ;;  %v508_v24 = vunpack.c.3.s8 %v482_v61  ;;  %v509_v25 = vunpack.c.3.s8 %v483_v62 }
  0x30   : > { %316 = vperm.xlu1 %1150, %v253_v11   ;;  %311 = vperm.xlu0 %1149, %v252_v12   ;;  %v507_v11 = vunpack.c.2.s8 %v483_v62  ;;  %v484_v12 = vsel %vm240_vm8, 16843009, %v1319_v0  ;;  %v529_v26 = vpack.c.b8 %v528_v3, %v528_v3  ;;  %v534_v27 = vpack.c.b16 %v503_v7, %v502_v6 }
  0x31   : > { %v510_v22 = vunpack.c.0.s8 %v484_v12  ;;  %v536_v29 = vpack.c.b16 %v505_v9, %v504_v8  ;;  %v514_v30 = vunpack.c.2.s8 %v484_v12  ;;  %v512_v32 = vunpack.c.1.s8 %v484_v12 }
  0x32   : > { %v538_v28 = vpack.c.b16 %v507_v11, %v506_v10  ;;  %v585_v34 = vunpack.c.1.s8 %v1443_v1  ;;  %v1462_v35 = vsel %vm1449_vm10, 16843009, %v1319_v0  ;;  %v1467_v36 = vsel %vm1454_vm11, 16843009, %v1319_v0 }
  0x33   : > { %vm1469_vm12 = vnez %v525_v17  ;;  %vm1473_vm13 = vnez %v531_v20  ;;  %v533_v39 = vpack.c.b8 %v532_v21, %v532_v21  ;;  %v540_v41 = vpack.c.b16 %v509_v25, %v508_v24 }
  0x34   : > { %326 = vperm.xlu1 %1150, %v255_v13   ;;  %321 = vperm.xlu0 %1149, %v254_v14   ;;  %v485_v13 = vsel %vm241_vm9, 16843009, %v1319_v0  ;;  %v582_v14 = vunpack.c.0.s8 %v1438_v63  ;;  %vm1477_vm14 = vnez %v529_v26  ;;  %v535_v43 = vpack.c.b8 %v534_v27, %v534_v27 }
  0x35   : > { %v511_v23 = vunpack.c.0.s8 %v485_v13  ;;  %v515_v31 = vunpack.c.2.s8 %v485_v13  ;;  %v513_v33 = vunpack.c.1.s8 %v485_v13  ;;  %v516_v44 = vunpack.c.3.s8 %v484_v12 }
  0x36   : > { %v517_v45 = vunpack.c.3.s8 %v485_v13  ;;  %v539_v46 = vpack.c.b8 %v538_v28, %v538_v28  ;;  %v537_v47 = vpack.c.b8 %v536_v29, %v536_v29  ;;  %v586_v50 = vunpack.c.0.s8 %v1462_v35 }
  0x37   : > { %v542_v40 = vpack.c.b16 %v511_v23, %v510_v22  ;;  %v546_v48 = vpack.c.b16 %v515_v31, %v514_v30  ;;  %v544_v49 = vpack.c.b16 %v513_v33, %v512_v32  ;;  %v587_v51 = vunpack.c.1.s8 %v1462_v35 }
  0x38   : > { %336 = vperm.xlu1 %1150, %v257_v15   ;;  %331 = vperm.xlu0 %1149, %v256_v16   ;;  %v583_v15 = vunpack.c.1.s8 %v1438_v63  ;;  %v590_v52 = vunpack.c.0.s8 %v1467_v36  ;;  %v1487_v53 = vsel %vm1469_vm12, 16843009, %v1319_v0  ;;  %v1492_v54 = vsel %vm1473_vm13, 16843009, %v1319_v0 }
  0x39   : > { %vm557_vm15 = vnez %v533_v39  ;;  %v543_v55 = vpack.c.b8 %v542_v40, %v542_v40  ;;  %v541_v58 = vpack.c.b8 %v540_v41, %v540_v41  ;;  %v591_v59 = vunpack.c.1.s8 %v1467_v36 }
  0x3a   : > { %v1498_v60 = vsel %vm1477_vm14, 16843009, %v1319_v0  ;;  %vm558_vm0 = vnez %v535_v43  ;;  %v548_v61 = vpack.c.b16 %v517_v45, %v516_v44  ;;  %vm560_vm1 = vnez %v539_v46 }
  0x3b   : > { %vm559_vm2 = vnez %v537_v47  ;;  %v547_v62 = vpack.c.b8 %v546_v48, %v546_v48  ;;  %v545_v2 = vpack.c.b8 %v544_v49, %v544_v49  ;;  %v588_v3 = vunpack.c.0.s8 %v1487_v53 }
  0x3c   : > { %v589_v4 = vunpack.c.1.s8 %v1487_v53  ;;  %v594_v5 = vunpack.c.0.s8 %v1492_v54  ;;  %v1504_v6 = vsel %vm557_vm15, 16843009, %v1319_v0  ;;  %v595_v7 = vunpack.c.1.s8 %v1492_v54 }
  0x3d   : > { %v1508_v8 = vsel %vm558_vm0, 16843009, %v1319_v0  ;;  %vm562_vm3 = vnez %v543_v55  ;;  %vm561_vm4 = vnez %v541_v58  ;;  %v592_v9 = vunpack.c.0.s8 %v1498_v60 }
  0x3e   : > { %v1512_v10 = vsel %vm560_vm1, 16843009, %v1319_v0  ;;  %v1515_v11 = vsel %vm559_vm2, 16843009, %v1319_v0  ;;  %v549_v12 = vpack.c.b8 %v548_v61, %v548_v61  ;;  %v593_v13 = vunpack.c.1.s8 %v1498_v60 }
  0x3f   : > { %v596_v16 = vunpack.c.0.s8 %v1504_v6  ;;  %vm564_vm5 = vnez %v547_v62  ;;  %vm563_vm6 = vnez %v545_v2  ;;  %vm1521_vm7 = vcmp.ne.s32.totalorder %v582_v14, 0 }
  0x40   : > { %vm1527_vm8 = vcmp.ne.s32.totalorder %v583_v15, 0  ;;  %v598_v20 = vunpack.c.0.s8 %v1508_v8  ;;  %v599_v21 = vunpack.c.1.s8 %v1508_v8  ;;  %v1534_v22 = vsel %vm562_vm3, 16843009, %v1319_v0 }
  0x41   : > { %v1537_v23 = vsel %vm561_vm4, 16843009, %v1319_v0  ;;  %v597_v14 = vunpack.c.1.s8 %v1504_v6  ;;  %v602_v24 = vunpack.c.0.s8 %v1512_v10  ;;  %v603_v63 = vunpack.c.1.s8 %v1512_v10 }
  0x42   : > { %v600_v15 = vunpack.c.0.s8 %v1515_v11  ;;  %vm1543_vm9 = vcmp.ne.s32.totalorder %v586_v50, 0  ;;  %v1549_v27 = vsel %vm564_vm5, 16843009, %v1319_v0  ;;  %v1552_v28 = vsel %vm563_vm6, 16843009, %v1319_v0 }
  0x43   : > { %vm1554_vm10 = vnez %v549_v12  ;;  %vm1568_vm11 = vcmp.ne.s32.totalorder %v584_v18, 0  ;;  %vm1572_vm12 = vcmp.ne.s32.totalorder %v587_v51, 0  ;;  %vm1586_vm13 = vcmp.ne.s32.totalorder %v585_v34, 0 }
  0x44   : > { %v1582_v47 = vsel %vm1554_vm10, 16843009, %v1319_v0  ;;  %vm1608_vm2 = vcmp.ne.s32.totalorder %v590_v52, 0  ;;  %vm1614_vm3 = vcmp.ne.s32.totalorder %v591_v59, 0  ;;  %vm1636_vm4 = vcmp.ne.s32.totalorder %v588_v3, 0 }
  0x9b   : > { %v272_v30 = vpop.permute.xlu1 %271  ;;  %v262_v31 = vpop.permute.xlu0 %261 }
  0x9c   : > { %v354_v38 = vadd.f32 %v1429_v56, %v272_v30  ;;  %v355_v39 = vadd.f32 %v1431_v57, %v272_v30  ;;  %v350_v40 = vadd.f32 %v1429_v56, %v262_v31  ;;  %v351_v41 = vadd.f32 %v1431_v57, %v262_v31 }
  0x9e   : > { %v418_v48 = vmul.f32 0.2, %v354_v38  ;;  %v419_v18 = vmul.f32 0.2, %v355_v39  ;;  %v414_v49 = vmul.f32 0.2, %v350_v40 }
  0x9f   : > { %v415_v55 = vmul.f32 0.2, %v351_v41  ;;  %v277_v58 = vpop.permute.xlu1 %276  ;;  %v267_v61 = vpop.permute.xlu0 %266  ;;  %vm382_vm14 = vcmp.gt.f32.partialorder %v350_v40, 0.0  ;;  %vm383_vm15 = vcmp.gt.f32.partialorder %v351_v41, 0.0  ;;  %vm386_vm0 = vcmp.gt.f32.partialorder %v354_v38, 0.0 }
  0xa0   : > { %v1592_v0 = vadd.f32 %v1429_v56, %v277_v58  ;;  %v1595_v62 = vadd.f32 %v1431_v57, %v277_v58  ;;  %v352_v1 = vadd.f32 %v1429_v56, %v267_v61  ;;  %v353_v34 = vadd.f32 %v1431_v57, %v267_v61 }
  0xa1   : > { %v446_v2 = vsel %vm382_vm14, %v350_v40, %v414_v49  ;;  %v447_v12 = vsel %vm383_vm15, %v351_v41, %v415_v55  ;;  %vm387_vm1 = vcmp.gt.f32.partialorder %v355_v39, 0.0  ;;  %v450_v46 = vsel %vm386_vm0, %v354_v38, %v418_v48 }
  0xa2   : > { %v1601_v30 = vmul.f32 0.2, %v1592_v0  ;;  %v1604_v31 = vmul.f32 0.2, %v1595_v62  ;;  %v416_v51 = vmul.f32 0.2, %v352_v1  ;;  %v451_v52 = vsel %vm387_vm1, %v355_v39, %v419_v18 }
  0xa3   : > { %v417_v41 = vmul.f32 0.2, %v353_v34  ;;  %v287_v49 = vpop.permute.xlu1 %286  ;;  %v282_v55 = vpop.permute.xlu0 %281  ;;  %v1620_v61 = vsel %vm1521_vm7, %v446_v2, -9e+15  ;;  %v1624_v38 = vsel %vm1527_vm8, %v447_v12, -9e+15 }
  0xa4   : > { %v1627_v48 = vadd.f32 %v1429_v56, %v287_v49  ;;  %v1630_v36 = vadd.f32 %v1431_v57, %v287_v49  ;;  %v358_v59 = vadd.f32 %v1429_v56, %v282_v55  ;;  %v359_v29 = vadd.f32 %v1431_v57, %v282_v55 }
  0xa5   : > { %v678_v19 = vmax.f32 %v1620_v61, %v1624_v38  ;;  %vm384_vm5 = vcmp.gt.f32.partialorder %v352_v1, 0.0  ;;  %vm385_vm6 = vcmp.gt.f32.partialorder %v353_v34, 0.0  ;;  %v1644_v39 = vsel %vm1543_vm9, %v450_v46, -9e+15 }
  0xa6   : > { %vm1648_vm7 = vcmp.ne.s32.totalorder %v589_v4, 0  ;;  %v1653_v3 = vmul.f32 0.2, %v1627_v48  ;;  %v1656_v2 = vmul.f32 0.2, %v1630_v36  ;;  %v448_v49 = vsel %vm384_vm5, %v352_v1, %v416_v51 }
  0xa7   : > { %v422_v12 = vmul.f32 0.2, %v358_v59  ;;  %v423_v55 = vmul.f32 0.2, %v359_v29  ;;  %679 = vmax.xlane.f32.xlu0 %v678_v19  ;;  %v297_v45 = vpop.permute.xlu1 %296  ;;  %v292_v25 = vpop.permute.xlu0 %291  ;;  %v449_v46 = vsel %vm385_vm6, %v353_v34, %v417_v41  ;;  %v1660_v53 = vsel %vm1568_vm11, %v448_v49, -9e+15 }
  0xa8   : > { %v1664_v4 = vsel %vm1572_vm12, %v451_v52, -9e+15  ;;  %v1667_v44 = vadd.f32 %v1429_v56, %v297_v45  ;;  %v1670_v37 = vadd.f32 %v1431_v57, %v297_v45  ;;  %v362_v51 = vadd.f32 %v1429_v56, %v292_v25 }
  0xa9   : > { %v363_v1 = vadd.f32 %v1431_v57, %v292_v25  ;;  %vm1676_vm8 = vcmp.ne.s32.totalorder %v594_v5, 0  ;;  %vm1682_vm9 = vcmp.ne.s32.totalorder %v595_v7, 0  ;;  %v1688_v45 = vsel %vm1586_vm13, %v449_v46, -9e+15 }
  0xaa   : > { %v684_v34 = vmax.f32 %v1644_v39, %v1664_v4  ;;  %vm390_vm10 = vcmp.gt.f32.partialorder %v358_v59, 0.0  ;;  %vm391_vm11 = vcmp.gt.f32.partialorder %v359_v29, 0.0  ;;  %v1693_v5 = vmul.f32 0.2, %v1667_v44 }
  0xab   : > { %v1696_v41 = vmul.f32 0.2, %v1670_v37  ;;  %v426_v54 = vmul.f32 0.2, %v362_v51  ;;  %v681_v7 = vmax.f32 %v1660_v53, %v1688_v45  ;;  %v427_v52 = vmul.f32 0.2, %v363_v1  ;;  %v307_v50 = vpop.permute.xlu1 %306  ;;  %v302_v19 = vpop.permute.xlu0 %301 }
  0xac   : > { %685 = vmax.xlane.f32.xlu0 %v684_v34  ;;  %v454_v49 = vsel %vm390_vm10, %v358_v59, %v422_v12  ;;  %v455_v25 = vsel %vm391_vm11, %v359_v29, %v423_v55  ;;  %vm388_vm12 = vcmp.gt.f32.partialorder %v1592_v0, 0.0  ;;  %vm1703_vm13 = vcmp.ne.s32.totalorder %v592_v9, 0 }
  0xad   : > { %vm1709_vm14 = vcmp.ne.s32.totalorder %v593_v13, 0  ;;  %682 = vmax.xlane.f32.xlu1 %v681_v7  ;;  %v1714_v34 = vadd.f32 %v1429_v56, %v307_v50  ;;  %v1717_v29 = vadd.f32 %v1431_v57, %v307_v50  ;;  %v1720_v59 = vadd.f32 %v1429_v56, %v302_v19 }
  0xae   : > { %v1723_v9 = vadd.f32 %v1431_v57, %v302_v19  ;;  %v1727_v60 = vsel %vm1608_vm2, %v454_v49, -9e+15  ;;  %v1731_v13 = vsel %vm1614_vm3, %v455_v25, -9e+15  ;;  %vm389_vm15 = vcmp.gt.f32.partialorder %v1595_v62, 0.0 }
  0xaf   : > { %v452_v12 = vsel %vm388_vm12, %v1592_v0, %v1601_v30  ;;  %v1737_v55 = vmul.f32 0.2, %v1714_v34  ;;  %v1740_v7 = vmul.f32 0.2, %v1717_v29  ;;  %v430_v50 = vmul.f32 0.2, %v1720_v59  ;;  %v317_v49 = vpop.permute.xlu1 %316  ;;  %v312_v25 = vpop.permute.xlu0 %311 }
  0xb0   : > { %v690_v58 = vmax.f32 %v1727_v60, %v1731_v13  ;;  %vm1747_vm0 = vcmp.ne.s32.totalorder %v598_v20, 0  ;;  %v431_v19 = vmul.f32 0.2, %v1723_v9  ;;  %v453_v0 = vsel %vm389_vm15, %v1595_v62, %v1604_v31 }
  0xb1   : > { %v1756_v30 = vsel %vm1636_vm4, %v452_v12, -9e+15  ;;  %vm394_vm1 = vcmp.gt.f32.partialorder %v362_v51, 0.0  ;;  %vm1760_vm2 = vcmp.ne.s32.totalorder %v599_v21, 0  ;;  %vm1766_vm3 = vcmp.ne.s32.totalorder %v596_v16, 0 }
  0xb2   : > { %691 = vmax.xlane.f32.xlu1 %v690_v58  ;;  %v1772_v62 = vsel %vm1648_vm7, %v453_v0, -9e+15  ;;  %v1775_v31 = vadd.f32 %v1429_v56, %v317_v49  ;;  %v1778_v8 = vadd.f32 %v1431_v57, %v317_v49  ;;  %v1781_v21 = vadd.f32 %v1429_v56, %v312_v25 }
  0xb3   : > { %vm1785_vm4 = vcmp.ne.s32.totalorder %v597_v14, 0  ;;  %v687_v17 = vmax.f32 %v1756_v30, %v1772_v62  ;;  %v1792_v18 = vadd.f32 %v1431_v57, %v312_v25  ;;  %vm395_vm5 = vcmp.gt.f32.partialorder %v363_v1, 0.0  ;;  %v322_v32 = vpop.permute.xlu0 %321 }
  0xb4   : > { %v458_v12 = vsel %vm394_vm1, %v362_v51, %v426_v54  ;;  %v1795_v58 = vmul.f32 0.2, %v1775_v31  ;;  %v1798_v0 = vmul.f32 0.2, %v1778_v8  ;;  %v1801_v6 = vmul.f32 0.2, %v1781_v21  ;;  %v327_v54 = vpop.permute.xlu1 %326 }
  0xb5   : > { %v459_v14 = vsel %vm395_vm5, %v363_v1, %v427_v52  ;;  %688 = vmax.xlane.f32.xlu0 %v687_v17  ;;  %v1804_v49 = vmul.f32 0.2, %v1792_v18  ;;  %v1808_v25 = vsel %vm1676_vm8, %v458_v12, -9e+15  ;;  %vm1816_vm6 = vcmp.ne.s32.totalorder %v602_v24, 0 }
  0xb6   : > { %v1812_v51 = vsel %vm1682_vm9, %v459_v14, -9e+15  ;;  %vm392_vm7 = vcmp.gt.f32.partialorder %v1627_v48, 0.0  ;;  %vm393_vm8 = vcmp.gt.f32.partialorder %v1630_v36, 0.0  ;;  %v1826_v42 = vadd.f32 %v1429_v56, %v327_v54 }
  0xb7   : > { %2346 = vst [vmem:[#allocation5_spill] sm:$0xff] %v1812_v51  ;;  %v696_v52 = vmax.f32 %v1808_v25, %v1812_v51  ;;  %vm1830_vm9 = vcmp.ne.s32.totalorder %v603_v63, 0  ;;  %v456_v24 = vsel %vm392_vm7, %v1627_v48, %v1653_v3  ;;  %v457_v17 = vsel %vm393_vm8, %v1630_v36, %v1656_v2 }
  0xb8   : > { %v1839_v12 = vadd.f32 %v1431_v57, %v327_v54  ;;  %v1842_v14 = vadd.f32 %v1429_v56, %v322_v32  ;;  %vm1846_vm10 = vcmp.ne.s32.totalorder %v600_v15, 0  ;;  %v1852_v63 = vsel %vm1703_vm13, %v456_v24, -9e+15 }
  0xb9   : > { %697 = vmax.xlane.f32.xlu1 %v696_v52  ;;  %2353 = vst [vmem:[#allocation6_spill] sm:$0xff] %v1852_v63  ;;  %v1856_v48 = vsel %vm1709_vm14, %v457_v17, -9e+15  ;;  %v1859_v36 = vmul.f32 0.2, %v1826_v42  ;;  %v375_v3 = vadd.f32 %v1431_v57, %v322_v32  ;;  %v2355_v2 = vunpack.c.1.s8 %v1515_v11  ;;  %v337_v52 = vpop.permute.xlu1 %336 }
  0xba   : > { %2354 = vst [vmem:[#allocation7_spill] sm:$0xff] %v1856_v48  ;;  %v693_v46 = vmax.f32 %v1852_v63, %v1856_v48  ;;  %v1871_v54 = vmul.f32 0.2, %v1839_v12  ;;  %v438_v35 = vmul.f32 0.2, %v1842_v14  ;;  %vm398_vm12 = vcmp.gt.f32.partialorder %v1720_v59, 0.0  ;;  %v332_v48 = vpop.permute.xlu0 %331 }
  0xbb   : > { %vm1864_vm11 = vcmp.ne.s32.totalorder %v2355_v2, 0  ;;  %v2358_v24 = vunpack.c.0.s8 %v1534_v22  ;;  %v2361_v11 = vunpack.c.1.s8 %v1534_v22  ;;  %v439_v2 = vmul.f32 0.2, %v375_v3 }
  0xbc   : > { %vm399_vm15 = vcmp.gt.f32.partialorder %v1723_v9, 0.0  ;;  %v462_v1 = vsel %vm398_vm12, %v1720_v59, %v430_v50  ;;  %vm396_vm1 = vcmp.gt.f32.partialorder %v1667_v44, 0.0  ;;  %694 = vmax.xlane.f32.xlu0 %v693_v46  ;;  %vm397_vm5 = vcmp.gt.f32.partialorder %v1670_v37, 0.0 }
  0xbd   : > { %vm1877_vm13 = vcmp.ne.s32.totalorder %v2358_v24, 0  ;;  %vm1883_vm14 = vcmp.ne.s32.totalorder %v2361_v11, 0  ;;  %v463_v24 = vsel %vm399_vm15, %v1723_v9, %v431_v19  ;;  %v1893_v63 = vsel %vm1747_vm0, %v462_v1, -9e+15 }
  0xbe   : > { %v460_v22 = vsel %vm396_vm1, %v1667_v44, %v1693_v5  ;;  %v2364_v11 = vunpack.c.0.s8 %v1537_v23  ;;  %v2367_v59 = vunpack.c.1.s8 %v1537_v23  ;;  %v1912_v9 = vsel %vm1760_vm2, %v463_v24, -9e+15 }
  0xbf   : > { %v461_v40 = vsel %vm397_vm5, %v1670_v37, %v1696_v41  ;;  %v1918_v44 = vsel %vm1766_vm3, %v460_v22, -9e+15  ;;  %v1921_v5 = vadd.f32 %v1429_v56, %v337_v52  ;;  %v2370_v23 = vunpack.c.0.s8 %v1549_v27 }
  0xc0   : > { %vm1900_vm7 = vcmp.ne.s32.totalorder %v2364_v11, 0  ;;  %vm1906_vm8 = vcmp.ne.s32.totalorder %v2367_v59, 0  ;;  %v702_v33 = vmax.f32 %v1893_v63, %v1912_v9  ;;  %v1933_v1 = vsel %vm1785_vm4, %v461_v40, -9e+15 }
  0xc1   : > { %vm1925_vm0 = vcmp.ne.s32.totalorder %v2370_v23, 0  ;;  %v1936_v37 = vadd.f32 %v1431_v57, %v337_v52  ;;  %v378_v41 = vadd.f32 %v1429_v56, %v332_v48  ;;  %v2373_v20 = vunpack.c.1.s8 %v1549_v27 }
  0xc2   : > { %v699_v24 = vmax.f32 %v1918_v44, %v1933_v1  ;;  %v444_v22 = vmul.f32 0.2, %v1921_v5  ;;  %v379_v16 = vadd.f32 %v1431_v57, %v332_v48  ;;  %vm402_vm3 = vcmp.gt.f32.partialorder %v1781_v21, 0.0  ;;  %703 = vmax.xlane.f32.xlu1 %v702_v33 }
  0xc3   : > { %vm1941_vm2 = vcmp.ne.s32.totalorder %v2373_v20, 0  ;;  %v2376_v52 = vunpack.c.0.s8 %v1552_v28  ;;  %v445_v56 = vmul.f32 0.2, %v1936_v37  ;;  %v442_v27 = vmul.f32 0.2, %v378_v41 }
  0xc4   : > { %vm403_vm12 = vcmp.gt.f32.partialorder %v1792_v18, 0.0  ;;  %v466_v59 = vsel %vm402_vm3, %v1781_v21, %v1801_v6  ;;  %v2379_v40 = vunpack.c.1.s8 %v1552_v28  ;;  %700 = vmax.xlane.f32.xlu0 %v699_v24  ;;  %v443_v48 = vmul.f32 0.2, %v379_v16 }
  0xc5   : > { %vm1952_vm4 = vcmp.ne.s32.totalorder %v2376_v52, 0  ;;  %v467_v23 = vsel %vm403_vm12, %v1792_v18, %v1804_v49  ;;  %v1970_v33 = vsel %vm1816_vm6, %v466_v59, -9e+15  ;;  %vm400_vm1 = vcmp.gt.f32.partialorder %v1714_v34, 0.0 }
  0xc6   : > { %vm1962_vm15 = vcmp.ne.s32.totalorder %v2379_v40, 0  ;;  %v1975_v21 = vsel %vm1830_vm9, %v467_v23, -9e+15  ;;  %vm401_vm5 = vcmp.gt.f32.partialorder %v1717_v29, 0.0  ;;  %v464_v28 = vsel %vm400_vm1, %v1714_v34, %v1737_v55 }
  0xc7   : > { %vm406_vm3 = vcmp.gt.f32.partialorder %v1842_v14, 0.0  ;;  %v708_v18 = vmax.f32 %v1970_v33, %v1975_v21  ;;  %v465_v26 = vsel %vm401_vm5, %v1717_v29, %v1740_v7  ;;  %v1987_v6 = vsel %vm1846_vm10, %v464_v28, -9e+15 }
  0xc8   : > { %vm407_vm6 = vcmp.gt.f32.partialorder %v375_v3, 0.0  ;;  %v2382_v49 = vunpack.c.0.s8 %v1582_v47  ;;  %v1997_v34 = vsel %vm1864_vm11, %v465_v26, -9e+15  ;;  %v470_v55 = vsel %vm406_vm3, %v1842_v14, %v438_v35 }
  0xc9   : > { %v471_v20 = vsel %vm407_vm6, %v375_v3, %v439_v2  ;;  %vm404_vm12 = vcmp.gt.f32.partialorder %v1775_v31, 0.0  ;;  %709 = vmax.xlane.f32.xlu1 %v708_v18  ;;  %v705_v29 = vmax.f32 %v1987_v6, %v1997_v34  ;;  %v2005_v7 = vsel %vm1877_vm13, %v470_v55, -9e+15 }
  0xca   : > { %vm1991_vm9 = vcmp.ne.s32.totalorder %v2382_v49, 0  ;;  %v2009_v10 = vsel %vm1883_vm14, %v471_v20, -9e+15  ;;  %vm405_vm10 = vcmp.gt.f32.partialorder %v1778_v8, 0.0  ;;  %v468_v3 = vsel %vm404_vm12, %v1775_v31, %v1795_v58 }
  0xcb   : > { %v714_v14 = vmax.f32 %v2005_v7, %v2009_v10  ;;  %v469_v15 = vsel %vm405_vm10, %v1778_v8, %v1798_v0  ;;  %vm410_vm11 = vcmp.gt.f32.partialorder %v378_v41, 0.0  ;;  %706 = vmax.xlane.f32.xlu0 %v705_v29  ;;  %v2020_v35 = vsel %vm1900_vm7, %v468_v3, -9e+15 }
  0xcc   : > { %v2024_v32 = vsel %vm1906_vm8, %v469_v15, -9e+15  ;;  %vm411_vm13 = vcmp.gt.f32.partialorder %v379_v16, 0.0  ;;  %v474_v17 = vsel %vm410_vm11, %v378_v41, %v442_v27  ;;  %vm408_vm14 = vcmp.gt.f32.partialorder %v1826_v42, 0.0 }
  0xcd   : > { %v711_v2 = vmax.f32 %v2020_v35, %v2024_v32  ;;  %v475_v24 = vsel %vm411_vm13, %v379_v16, %v443_v48  ;;  %v2030_v31 = vsel %vm1925_vm0, %v474_v17, -9e+15  ;;  %715 = vmax.xlane.f32.xlu1 %v714_v14  ;;  %vm409_vm7 = vcmp.gt.f32.partialorder %v1839_v12, 0.0 }
  0xce   : > { %v2035_v8 = vsel %vm1941_vm2, %v475_v24, -9e+15  ;;  %v472_v58 = vsel %vm408_vm14, %v1826_v42, %v1859_v36  ;;  %vm412_vm8 = vcmp.gt.f32.partialorder %v1921_v5, 0.0  ;;  %v473_v51 = vsel %vm409_vm7, %v1839_v12, %v1871_v54  ;;  %v2387_v24 = vld [vmem:[#allocation6_spill] sm:$0xff] }
  0xcf   : > { %v720_v0 = vmax.f32 %v2030_v31, %v2035_v8  ;;  %v2047_v50 = vsel %vm1952_vm4, %v472_v58, -9e+15  ;;  %vm413_vm0 = vcmp.gt.f32.partialorder %v1936_v37, 0.0  ;;  %712 = vmax.xlane.f32.xlu0 %v711_v2  ;;  %v2052_v19 = vsel %vm1962_vm15, %v473_v51, -9e+15 }
  0xd0   : > { %v476_v42 = vsel %vm412_vm8, %v1921_v5, %v444_v22  ;;  %v477_v36 = vsel %vm413_vm0, %v1936_v37, %v445_v56  ;;  %v2385_v41 = vunpack.c.1.s8 %v1582_v47  ;;  %v717_v12 = vmax.f32 %v2047_v50, %v2052_v19 }
  0xd1   : > { %721 = vmax.xlane.f32.xlu1 %v720_v0  ;;  %v2062_v54 = vsel %vm1991_vm9, %v476_v42, -9e+15  ;;  %v2388_v0 = vld [vmem:[#allocation7_spill] sm:$0xff] }
  0xd2   : > { %vm645_vm2 = vcmp.ne.s32.totalorder %v2385_v41, 0 }
  0xd3   : > { %v2064_v46 = vsel %vm645_vm2, %v477_v36, -9e+15  ;;  %718 = vmax.xlane.f32.xlu0 %v717_v12 }
  0xd4   : > { %v723_v16 = vmax.f32 %v2062_v54, %v2064_v46 }
  0xd7   : > { %724 = vmax.xlane.f32.xlu0 %v723_v16 }
 0x134   : > { %v680_v5 = vpop.xlane.xlu0 %679 }
 0x135   : > { %v726_v37 = vsub.f32 %v1620_v61, %v680_v5  ;;  %v727_v47 = vsub.f32 %v1624_v38, %v680_v5 }
 0x137   : > { %v758_v22 = vmul.f32 1.442695, %v726_v37  ;;  %v760_v52 = vmul.f32 1.442695, %v727_v47 }
 0x139   : > { %v686_v11 = vpop.xlane.xlu0 %685  ;;  %1153 = vpow2.f32 %v758_v22 }
 0x13a   : > { %v683_v56 = vpop.xlane.xlu1 %682  ;;  %v730_v27 = vsub.f32 %v1644_v39, %v686_v11  ;;  %v731_v59 = vsub.f32 %v1664_v4, %v686_v11  ;;  %1155 = vpow2.f32 %v760_v52 }
 0x13b   : > { %v728_v40 = vsub.f32 %v1660_v53, %v683_v56  ;;  %v729_v57 = vsub.f32 %v1688_v45, %v683_v56 }
 0x13c   : > { %v766_v48 = vmul.f32 1.442695, %v730_v27  ;;  %v768_v61 = vmul.f32 1.442695, %v731_v59 }
 0x13d   : > { %v762_v23 = vmul.f32 1.442695, %v728_v40  ;;  %v764_v28 = vmul.f32 1.442695, %v729_v57 }
 0x13e   : > { %1157 = vpow2.f32 %v766_v48 }
 0x13f   : > { %v692_v38 = vpop.xlane.xlu1 %691  ;;  %1159 = vpow2.f32 %v762_v23 }
 0x140   : > { %v734_v18 = vsub.f32 %v1727_v60, %v692_v38  ;;  %v735_v26 = vsub.f32 %v1731_v13, %v692_v38  ;;  %1161 = vpow2.f32 %v764_v28  ;;  %v2386_v13 = vld [vmem:[#allocation5_spill] sm:$0xff] }
 0x141   : > { %1163 = vpow2.f32 %v768_v61 }
 0x142   : > { %v774_v39 = vmul.f32 1.442695, %v734_v18  ;;  %v776_v4 = vmul.f32 1.442695, %v735_v26  ;;  %v689_v49 = vpop.xlane.xlu0 %688 }
 0x143   : > { %v732_v53 = vsub.f32 %v1756_v30, %v689_v49  ;;  %v733_v45 = vsub.f32 %v1772_v62, %v689_v49  ;;  %v2078_v43 = vpop.eup %1153 }
 0x144   : > { %1165 = vpow2.f32 %v774_v39  ;;  %v2080_v14 = vpop.eup %1155 }
 0x145   : > { %1167 = vpow2.f32 %v776_v4  ;;  %v770_v55 = vmul.f32 1.442695, %v732_v53  ;;  %v772_v20 = vmul.f32 1.442695, %v733_v45  ;;  %v822_v15 = vadd.f32 %v2080_v14, %v2078_v43 }
 0x146   : > { %v698_v29 = vpop.xlane.xlu1 %697 }
 0x147   : > { %v738_v60 = vsub.f32 %v1808_v25, %v698_v29  ;;  %v739_v3 = vsub.f32 %v2386_v13, %v698_v29  ;;  %1169 = vpow2.f32 %v770_v55  ;;  %823 = vadd.xlane.f32.xlu1 %v822_v15 }
 0x148   : > { %1171 = vpow2.f32 %v772_v20  ;;  %v2086_v2 = vpop.eup %1157 }
 0x149   : > { %v782_v30 = vmul.f32 1.442695, %v738_v60  ;;  %v784_v62 = vmul.f32 1.442695, %v739_v3  ;;  %v695_v17 = vpop.xlane.xlu0 %694  ;;  %v2090_v42 = vpop.eup %1159 }
 0x14a   : > { %v736_v58 = vsub.f32 %v2387_v24, %v695_v17  ;;  %v737_v51 = vsub.f32 %v2388_v0, %v695_v17  ;;  %v2092_v25 = vpop.eup %1161 }
 0x14b   : > { %1173 = vpow2.f32 %v782_v30  ;;  %v2094_v12 = vpop.eup %1163  ;;  %v825_v5 = vadd.f32 %v2092_v25, %v2090_v42 }
 0x14c   : > { %1175 = vpow2.f32 %v784_v62  ;;  %v778_v36 = vmul.f32 1.442695, %v736_v58  ;;  %v780_v41 = vmul.f32 1.442695, %v737_v51  ;;  %v828_v52 = vadd.f32 %v2094_v12, %v2086_v2 }
 0x14d   : > { %826 = vadd.xlane.f32.xlu0 %v825_v5 }
 0x14e   : > { %1177 = vpow2.f32 %v778_v36  ;;  %v2102_v11 = vpop.eup %1165  ;;  %829 = vadd.xlane.f32.xlu1 %v828_v52 }
 0x14f   : > { %v704_v16 = vpop.xlane.xlu1 %703  ;;  %1179 = vpow2.f32 %v780_v41  ;;  %v2106_v59 = vpop.eup %1167 }
 0x150   : > { %v742_v37 = vsub.f32 %v1893_v63, %v704_v16  ;;  %v743_v47 = vsub.f32 %v1912_v9, %v704_v16  ;;  %v834_v9 = vadd.f32 %v2106_v59, %v2102_v11 }
 0x151   : > { %v701_v22 = vpop.xlane.xlu0 %700  ;;  %v2110_v23 = vpop.eup %1169 }
 0x152   : > { %v740_v56 = vsub.f32 %v1918_v44, %v701_v22  ;;  %v741_v27 = vsub.f32 %v1933_v1, %v701_v22  ;;  %v790_v40 = vmul.f32 1.442695, %v742_v37  ;;  %v792_v57 = vmul.f32 1.442695, %v743_v47  ;;  %v2112_v61 = vpop.eup %1171  ;;  %835 = vadd.xlane.f32.xlu1 %v834_v9 }
 0x153   : > { %v831_v18 = vadd.f32 %v2112_v61, %v2110_v23 }
 0x154   : > { %v786_v63 = vmul.f32 1.442695, %v740_v56  ;;  %v788_v48 = vmul.f32 1.442695, %v741_v27  ;;  %1181 = vpow2.f32 %v790_v40 }
 0x155   : > { %1183 = vpow2.f32 %v792_v57  ;;  %v2118_v26 = vpop.eup %1173  ;;  %832 = vadd.xlane.f32.xlu0 %v831_v18 }
 0x156   : > { %v710_v28 = vpop.xlane.xlu1 %709  ;;  %1185 = vpow2.f32 %v786_v63  ;;  %v2121_v53 = vpop.eup %1175 }
 0x157   : > { %v746_v44 = vsub.f32 %v1970_v33, %v710_v28  ;;  %v747_v1 = vsub.f32 %v1975_v21, %v710_v28  ;;  %1187 = vpow2.f32 %v788_v48 }
 0x158   : > { %v707_v38 = vpop.xlane.xlu0 %706  ;;  %v2126_v29 = vpop.eup %1177 }
 0x159   : > { %v798_v39 = vmul.f32 1.442695, %v746_v44  ;;  %v800_v4 = vmul.f32 1.442695, %v747_v1  ;;  %v744_v49 = vsub.f32 %v1987_v6, %v707_v38  ;;  %v745_v45 = vsub.f32 %v1997_v34, %v707_v38  ;;  %v2130_v3 = vpop.eup %1179 }
 0x15a   : > { %v716_v33 = vpop.xlane.xlu1 %715  ;;  %v840_v6 = vadd.f32 %v2121_v53, %v2118_v26 }
 0x15b   : > { %1189 = vpow2.f32 %v798_v39  ;;  %v794_v21 = vmul.f32 1.442695, %v744_v49  ;;  %v750_v55 = vsub.f32 %v2005_v7, %v716_v33  ;;  %v751_v20 = vsub.f32 %v2009_v10, %v716_v33 }
 0x15c   : > { %1191 = vpow2.f32 %v800_v4  ;;  %v796_v60 = vmul.f32 1.442695, %v745_v45  ;;  %v713_v13 = vpop.xlane.xlu0 %712  ;;  %841 = vadd.xlane.f32.xlu1 %v840_v6  ;;  %v837_v10 = vadd.f32 %v2130_v3, %v2126_v29  ;;  %v2199_v6 = vld [vmem:[%s2285_s1] sm:$0xff] }
 0x15d   : > { %1193 = vpow2.f32 %v794_v21  ;;  %v806_v34 = vmul.f32 1.442695, %v750_v55  ;;  %v808_v15 = vmul.f32 1.442695, %v751_v20  ;;  %v748_v30 = vsub.f32 %v2020_v35, %v713_v13 }
 0x15e   : > { %1195 = vpow2.f32 %v796_v60  ;;  %v749_v7 = vsub.f32 %v2024_v32, %v713_v13  ;;  %v722_v62 = vpop.xlane.xlu1 %721  ;;  %v2138_v0 = vpop.eup %1181  ;;  %838 = vadd.xlane.f32.xlu0 %v837_v10 }
 0x15f   : > { %1197 = vpow2.f32 %v806_v34  ;;  %v802_v17 = vmul.f32 1.442695, %v748_v30  ;;  %v754_v24 = vsub.f32 %v2030_v31, %v722_v62  ;;  %v755_v58 = vsub.f32 %v2035_v8, %v722_v62  ;;  %v2140_v35 = vpop.eup %1183 }
 0x160   : > { %1199 = vpow2.f32 %v808_v15  ;;  %v804_v51 = vmul.f32 1.442695, %v749_v7  ;;  %v719_v36 = vpop.xlane.xlu0 %718  ;;  %v2143_v5 = vpop.eup %1185  ;;  %v846_v8 = vadd.f32 %v2140_v35, %v2138_v0  ;;  %v1102_v34 = vcombine.high %v2199_v6, %v2199_v6 }
 0x161   : > { %1201 = vpow2.f32 %v802_v17  ;;  %v814_v32 = vmul.f32 1.442695, %v754_v24  ;;  %v816_v41 = vmul.f32 1.442695, %v755_v58  ;;  %v752_v16 = vsub.f32 %v2047_v50, %v719_v36  ;;  %v2148_v37 = vpop.eup %1187 }
 0x162   : > { %1203 = vpow2.f32 %v804_v51  ;;  %v753_v31 = vsub.f32 %v2052_v19, %v719_v36  ;;  %847 = vadd.xlane.f32.xlu1 %v846_v8  ;;  %v843_v56 = vadd.f32 %v2148_v37, %v2143_v5  ;;  %974 = vmatprep.mubr.bf16.mxu0 %v1102_v34 }
 0x163   : > { %1205 = vpow2.f32 %v814_v32  ;;  %v810_v47 = vmul.f32 1.442695, %v752_v16 }
 0x164   : > { %1207 = vpow2.f32 %v816_v41  ;;  %v812_v22 = vmul.f32 1.442695, %v753_v31  ;;  %v725_v52 = vpop.xlane.xlu0 %724  ;;  %844 = vadd.xlane.f32.xlu0 %v843_v56 }
 0x165   : > { %v2152_v50 = vpop.eup %1189  ;;  %1209 = vpow2.f32 %v810_v47  ;;  %v756_v27 = vsub.f32 %v2062_v54, %v725_v52  ;;  %v757_v19 = vsub.f32 %v2064_v46, %v725_v52 }
 0x166   : > { %v2156_v40 = vpop.eup %1191  ;;  %1211 = vpow2.f32 %v812_v22 }
 0x167   : > { %v2158_v57 = vpop.eup %1193  ;;  %v818_v63 = vmul.f32 1.442695, %v756_v27  ;;  %v820_v48 = vmul.f32 1.442695, %v757_v19  ;;  %v852_v9 = vadd.f32 %v2156_v40, %v2152_v50 }
 0x168   : > { %v2162_v28 = vpop.eup %1195 }
 0x169   : > { %v2164_v44 = vpop.eup %1197  ;;  %1213 = vpow2.f32 %v818_v63  ;;  %853 = vadd.xlane.f32.xlu1 %v852_v9  ;;  %v849_v54 = vadd.f32 %v2162_v28, %v2158_v57 }
 0x16a   : > { %v2168_v46 = vpop.eup %1199  ;;  %1215 = vpow2.f32 %v820_v48 }
 0x16b   : > { %v2170_v1 = vpop.eup %1201  ;;  %850 = vadd.xlane.f32.xlu0 %v849_v54  ;;  %v858_v38 = vadd.f32 %v2168_v46, %v2164_v44 }
 0x16c   : > { %v2174_v18 = vpop.eup %1203 }
 0x16d   : > { %v2176_v39 = vpop.eup %1205  ;;  %859 = vadd.xlane.f32.xlu1 %v858_v38  ;;  %v855_v4 = vadd.f32 %v2174_v18, %v2170_v1 }
 0x16e   : > { %v2180_v49 = vpop.eup %1207 }
 0x16f   : > { %v2182_v45 = vpop.eup %1209  ;;  %856 = vadd.xlane.f32.xlu0 %v855_v4  ;;  %v864_v33 = vadd.f32 %v2180_v49, %v2176_v39 }
 0x170   : > { %v2186_v21 = vpop.eup %1211 }
 0x171   : > { %865 = vadd.xlane.f32.xlu1 %v864_v33  ;;  %v861_v55 = vadd.f32 %v2186_v21, %v2182_v45 }
 0x173   : > { %v2190_v20 = vpop.eup %1213  ;;  %862 = vadd.xlane.f32.xlu0 %v861_v55 }
 0x174   : > { %v2192_v60 = vpop.eup %1215 }
 0x175   : > { %v867_v13 = vadd.f32 %v2192_v60, %v2190_v20 }
 0x177   : > { %868 = vadd.xlane.f32.xlu0 %v867_v13 }
 0x1d4   : > { %v824_v15 = vpop.xlane.xlu1 %823 }
 0x1d5   : > { %1217 = vrcp.f32 %v824_v15 }
 0x1da   : > { %v827_v30 = vpop.xlane.xlu0 %826 }
 0x1db   : > { %1219 = vrcp.f32 %v827_v30  ;;  %v830_v7 = vpop.xlane.xlu1 %829 }
 0x1dc   : > { %1221 = vrcp.f32 %v830_v7 }
 0x1df   : > { %v836_v10 = vpop.xlane.xlu1 %835  ;;  %v1218_v17 = vpop.eup %1217 }
 0x1e0   : > { %v887_v58 = vmul.f32 %v1218_v17, %v2080_v14  ;;  %v886_v36 = vmul.f32 %v1218_v17, %v2078_v43 }
 0x1e2   : > { %v833_v62 = vpop.xlane.xlu0 %832 }
 0x1e3   : > { %1223 = vrcp.f32 %v833_v62 }
 0x1e4   : > { %1225 = vrcp.f32 %v836_v10 }
 0x1e5   : > { %v1220_v24 = vpop.eup %1219 }
 0x1e6   : > { %v889_v51 = vmul.f32 %v1220_v24, %v2092_v25  ;;  %v888_v32 = vmul.f32 %v1220_v24, %v2090_v42  ;;  %v1222_v47 = vpop.eup %1221 }
 0x1e7   : > { %v891_v56 = vmul.f32 %v1222_v47, %v2094_v12  ;;  %v890_v19 = vmul.f32 %v1222_v47, %v2086_v2 }
 0x1e8   : > { %v920_v16 = vpack.c.bf16 %v889_v51, %v887_v58  ;;  %v919_v31 = vpack.c.bf16 %v888_v32, %v886_v36 }
 0x1e9   : > { %v842_v8 = vpop.xlane.xlu1 %841 }
 0x1ea   : > { %942 = vmatprep.subr.bf16.mxu0 %v920_v16 }
 0x1eb   : > { %v839_v41 = vpop.xlane.xlu0 %838  ;;  %943 = vmatpush1.bf16.xpose.msra.mxu0 %v919_v31 }
 0x1ec   : > { %1227 = vrcp.f32 %v839_v41 }
 0x1ed   : > { %v1224_v22 = vpop.eup %1223  ;;  %1229 = vrcp.f32 %v842_v8 }
 0x1ee   : > { %v893_v14 = vmul.f32 %v1224_v22, %v2112_v61  ;;  %v892_v25 = vmul.f32 %v1224_v22, %v2110_v23  ;;  %v1226_v43 = vpop.eup %1225 }
 0x1ef   : > { %v848_v42 = vpop.xlane.xlu1 %847  ;;  %v895_v54 = vmul.f32 %v1226_v43, %v2106_v59  ;;  %v894_v33 = vmul.f32 %v1226_v43, %v2102_v11 }
 0x1f0   : > { %v922_v27 = vpack.c.bf16 %v893_v14, %v891_v56  ;;  %v921_v63 = vpack.c.bf16 %v892_v25, %v890_v19 }
 0x1f1   : > { %v845_v52 = vpop.xlane.xlu0 %844 }
 0x1f2   : > { %1231 = vrcp.f32 %v845_v52  ;;  %944 = vmatprep.subr.bf16.mxu0 %v922_v27  ;;  %v1101_v27 = vcombine.low %v2199_v6, %v2199_v6 }
 0x1f3   : > { %1233 = vrcp.f32 %v848_v42  ;;  %945 = vmatpush1.bf16.xpose.msra.mxu0 %v921_v63 }
 0x1f6   : > { %v1228_v48 = vpop.eup %1227  ;;  %v854_v55 = vpop.xlane.xlu1 %853 }
 0x1f7   : > { %v897_v12 = vmul.f32 %v1228_v48, %v2130_v3  ;;  %v896_v23 = vmul.f32 %v1228_v48, %v2126_v29  ;;  %v1230_v38 = vpop.eup %1229 }
 0x1f8   : > { %v851_v9 = vpop.xlane.xlu0 %850  ;;  %v899_v34 = vmul.f32 %v1230_v38, %v2121_v53  ;;  %v898_v11 = vmul.f32 %v1230_v38, %v2118_v26 }
 0x1f9   : > { %1235 = vrcp.f32 %v851_v9  ;;  %v924_v61 = vpack.c.bf16 %v897_v12, %v895_v54  ;;  %v923_v13 = vpack.c.bf16 %v896_v23, %v894_v33 }
 0x1fa   : > { %v860_v10 = vpop.xlane.xlu1 %859 }
 0x1fb   : > { %946 = vmatprep.subr.bf16.mxu0 %v924_v61 }
 0x1fc   : > { %v857_v4 = vpop.xlane.xlu0 %856  ;;  %v1232_v2 = vpop.eup %1231  ;;  %947 = vmatpush1.bf16.xpose.msra.mxu0 %v923_v13 }
 0x1fd   : > { %1237 = vrcp.f32 %v857_v4  ;;  %v901_v15 = vmul.f32 %v1232_v2, %v2148_v37  ;;  %v1234_v3 = vpop.eup %1233  ;;  %v900_v29 = vmul.f32 %v1232_v2, %v2143_v5 }
 0x1fe   : > { %1239 = vrcp.f32 %v854_v55  ;;  %v903_v17 = vmul.f32 %v1234_v3, %v2140_v35  ;;  %v866_v32 = vpop.xlane.xlu1 %865 }
 0x1ff   : > { %v926_v59 = vpack.c.bf16 %v901_v15, %v899_v34  ;;  %v925_v53 = vpack.c.bf16 %v900_v29, %v898_v11 }
 0x200   : > { %v863_v7 = vpop.xlane.xlu0 %862 }
 0x201   : > { %948 = vmatprep.subr.bf16.mxu0 %v926_v59  ;;  %1241 = vrcp.f32 %v863_v7 }
 0x202   : > { %1243 = vrcp.f32 %v860_v10 }
 0x203   : > { %v1236_v30 = vpop.eup %1235 }
 0x204   : > { %v905_v62 = vmul.f32 %v1236_v30, %v2162_v28  ;;  %949 = vmatpush1.bf16.xpose.msra.mxu0 %v925_v53  ;;  %v904_v51 = vmul.f32 %v1236_v30, %v2158_v57  ;;  %v869_v36 = vpop.xlane.xlu0 %868  ;;  %v902_v28 = vmul.f32 %v1234_v3, %v2138_v0 }
 0x205   : > { %1245 = vrcp.f32 %v869_v36 }
 0x206   : > { %v928_v24 = vpack.c.bf16 %v905_v62, %v903_v17  ;;  %v927_v35 = vpack.c.bf16 %v904_v51, %v902_v28  ;;  %1247 = vrcp.f32 %v866_v32 }
 0x207   : > { %v1238_v37 = vpop.eup %1237 }
 0x208   : > { %950 = vmatprep.subr.bf16.mxu0 %v928_v24  ;;  %v1240_v58 = vpop.eup %1239  ;;  %v909_v5 = vmul.f32 %v1238_v37, %v2174_v18  ;;  %v908_v8 = vmul.f32 %v1238_v37, %v2170_v1 }
 0x209   : > { %v907_v26 = vmul.f32 %v1240_v58, %v2156_v40  ;;  %v906_v47 = vmul.f32 %v1240_v58, %v2152_v50 }
 0x20b   : > { %v930_v41 = vpack.c.bf16 %v909_v5, %v907_v26  ;;  %v1242_v16 = vpop.eup %1241  ;;  %v929_v0 = vpack.c.bf16 %v908_v8, %v906_v47 }
 0x20c   : > { %951 = vmatpush1.bf16.xpose.msra.mxu0 %v927_v35  ;;  %v1244_v31 = vpop.eup %1243  ;;  %v913_v57 = vmul.f32 %v1242_v16, %v2186_v21  ;;  %v912_v56 = vmul.f32 %v1242_v16, %v2182_v45 }
 0x20d   : > { %952 = vmatprep.subr.bf16.mxu0 %v930_v41  ;;  %v911_v18 = vmul.f32 %v1244_v31, %v2168_v46  ;;  %v910_v25 = vmul.f32 %v1244_v31, %v2164_v44 }
 0x20f   : > { %v932_v22 = vpack.c.bf16 %v913_v57, %v911_v18  ;;  %v1246_v52 = vpop.eup %1245  ;;  %v931_v43 = vpack.c.bf16 %v912_v56, %v910_v25 }
 0x210   : > { %v1248_v40 = vpop.eup %1247  ;;  %v917_v14 = vmul.f32 %v1246_v52, %v2192_v60  ;;  %v916_v50 = vmul.f32 %v1246_v52, %v2190_v20 }
 0x211   : > { %v915_v1 = vmul.f32 %v1248_v40, %v2180_v49  ;;  %v914_v46 = vmul.f32 %v1248_v40, %v2176_v39 }
 0x213   : > { %v934_v21 = vpack.c.bf16 %v917_v14, %v915_v1  ;;  %v933_v42 = vpack.c.bf16 %v916_v50, %v914_v46 }
 0x214   : > { %953 = vmatpush1.bf16.xpose.msra.mxu0 %v929_v0 }
 0x215   : > { %954 = vmatprep.subr.bf16.mxu0 %v932_v22 }
 0x21c   : > { %955 = vmatpush1.bf16.xpose.msra.mxu0 %v931_v43 }
 0x21d   : > { %956 = vmatprep.subr.bf16.mxu0 %v934_v21 }
 0x224   : > { %957 = vmatpush1.bf16.xpose.msra.mxu0 %v933_v42 }
 0x22b   : > { %975 = vmatmul.mubr.bf16.vlgmr.msra.gmra.mrb[0].mxu0 %v1101_v27 }
 0x2fe   : > { %v976_v45 = vpop.f32.mrb[0].mxu0 }
 0x2ff   : > { %v983_v60 = vmul.f32 1.442695, %v976_v45  ;;  %v978_v19 = vpop.f32.mrb[1].mxu0  ;;  %vm982_vm4 = vcmp.gt.f32.partialorder %v976_v45, 0.0 }
 0x300   : > { %v979_v44 = vpop.f32.mrb[2].mxu0 }
 0x301   : > { %1249 = vpow2.f32 %v983_v60  ;;  %v980_v49 = vpop.f32.mrb[3].mxu0 }
 0x30b   : > { %v1250_v63 = vpop.eup %1249 }
 0x30c   : > { %v1103_v48 = vadd.f32 -1.0, %v1250_v63 }
 0x30e   : > { %v986_v9 = vsel %vm982_vm4, %v976_v45, %v1103_v48 }
 0x30f   : > { %v987_v54 = vrot.slane %v986_v9, 4 }
 0x311   : > { %v988_v20 = vmax.f32 %v986_v9, %v987_v54 }
 0x313   : > { %v989_v39 = vrot.slane %v988_v20, 2 }
 0x315   : > { %v990_v12 = vmax.f32 %v988_v20, %v989_v39 }
 0x317   : > { %v991_v61 = vrot.slane %v990_v12, 1 }
 0x319   : > { %v992_v23 = vmax.f32 %v990_v12, %v991_v61 }
 0x31b   : > { %v993_v6 = vsub.f32 %v986_v9, %v992_v23 }
 0x31d   : > { %v994_v38 = vmul.f32 1.442695, %v993_v6 }
 0x31f   : > { %1251 = vpow2.f32 %v994_v38 }
 0x329   : > { %v1252_v4 = vpop.eup %1251 }
 0x32a   : > { %v996_v33 = vrot.slane %v1252_v4, 4 }
 0x32c   : > { %v997_v2 = vadd.f32 %v1252_v4, %v996_v33 }
 0x32e   : > { %v998_v55 = vrot.slane %v997_v2, 2 }
 0x330   : > { %v999_v13 = vadd.f32 %v998_v55, %v997_v2 }
 0x332   : > { %v1000_v34 = vrot.slane %v999_v13, 1 }
 0x334   : > { %v1001_v15 = vadd.f32 %v1000_v34, %v999_v13 }
 0x336   : > { %1253 = vlog2.f32 %v1001_v15 }
 0x340   : > { %v1254_v59 = vpop.eup %1253 }
 0x341   : > { %v1003_v3 = vmul.f32 0.6931472, %v1254_v59 }
 0x343   : > { %v1004_v30 = vsub.f32 %v993_v6, %v1003_v3 }
 0x345   : > { %1005 = vst [vmem:[%s209_s27] sm:$0xff] %v1004_v30 }
 0x346   : > { %1268 = shalt.err (!%p1265_p4)
}
 0x347   : > { %s1269_s10 = scalar_lea.hbm %s2242_s5, 128  ;;  %s1273_s13 = scalar_lea.hbm %s2288_s4, 256 }
 0x348   : > { %p1270_p7 = scmp.ne.s32.totalorder %s2242_s5, %s1269_s10  ;;  %p1274_p10 = scmp.lt.u32.totalorder %s2242_s5, %s2288_s4 }
 0x349   : > { %p1275_p11 = scmp.lt.u32.totalorder %s1273_s13, %s1269_s10  ;;  %p1277_p13 = scmp.lt.u32.totalorder %s1269_s10, %s2242_s5 }
 0x34a   : > { %p1271_p8 = pnand %p1270_p7, %p1384_p5 }
 0x34b   : > { %p1276_p12 = por %p1275_p11, %p1274_p10 }
 0x34c   : > { %p1272_p9 = pneg %p1271_p8 }
 0x34d   : > { %p1278_p0 = por %p1277_p13, %p1276_p12 }
 0x34f   : > { %p1279_p1 = pnand %p1278_p0, %p1272_p9 }
 0x351   : > { %1282 = shalt.err (!%p1279_p1)
}
 0x352   : > { %1109 = dma.vmem_to_hbm [thread:$0]  (%p1384_p5), %s2244_s28, 128, %s2242_s5, %s1007_s6  }
 0x353 PF: > { %p1115_p2 = scmp.ge.s32.totalorder %s1317_s18, 2  ;;  %s1032_s22 = sand.u32 1, %s1305_s15  }
 0x354   : > { %s1033_s23 = scalar_lea.sflag [#allocation3], %s1032_s22 }
 0x355   : > { %p1112_p3 = pnand %p1115_p2, %p1388_p6 }
 0x357   : > { %1300 = dma.done.wait (!%p1112_p3), %s1033_s23, 128  }
 0x358   : > { %1302 = vsyncadd (!%p1112_p3), %s1033_s23, 4294967168  ;;  %p14_p4 = scmp.ge.s32.totalorder %s1371_s21, 4   ;;  %s2389_s15 = smov %s1309_s16 }
 0x359   : > { %s2390_s16 = smov %s1313_s17  ;;  %s2391_s17 = smov %s1382_s24 }
 0x35a   : > { %s2392_s18 = smov %s1371_s21  ;;  %16 = sbr.rel (!%p14_p4) target bundleno = 3 (0x3), region = 74 }
 0x361   :  { %1038 = vsyncpa [#allocation3], 1 }
 0x362   :  { %1040 = vsyncpa [#allocation3 + $0x1], 1 }

// kernel: gat_model_forward.4
= control target key start
LH: loop header
LB: loop body
LE: loop exit
PB: predicated region body
PF: predicated region fallthrough
CT: control target
= control target key end

     0   :  { %s3857_s24 = smov 0   ;;  %s6088_s0 = inlined_call_operand.vmem [shape: s8[256,256], index: 0, kind: input, shape index: {}]   ;;  %s6089_s1 = inlined_call_operand.vmem [shape: bf16[64,256], index: 1, kind: input, shape index: {}]   ;;  %s6090_s2 = inlined_call_operand.vmem [shape: f32[256,4], index: 2, kind: input, shape index: {}]   ;;  %s6091_s3 = inlined_call_operand.vmem [shape: f32[4,256], index: 3, kind: input, shape index: {}]   ;;  %s6092_s4 = inlined_call_operand.vmem [shape: f32[8,64], index: 4, kind: input, shape index: {}]   ;;  %s6093_s5 = inlined_call_operand.vmem [shape: f32[8,2], index: 5, kind: input, shape index: {}]   ;;  %s6094_s6 = inlined_call_operand.vmem [shape: bf16[8,256], index: 6, kind: output, shape index: {0}]   ;;  %s6095_s7 = inlined_call_operand.vmem [shape: f32[256,2], index: 7, kind: output, shape index: {1}]  }
   0x1 LB: > { %s3863_s25 = sadd.s32 4294967295, %s3808_s24   ;;  %p3207_p0 = scmp.ge.s32.totalorder %s3808_s24, 1  ;;  %s3808_s24 = sphi %s3857_s24, %s18_s24  }
   0x2   : > { %p253_p1 = scmp.lt.s32.totalorder %s3808_s24, 3 }
   0x4   : > { %p254_p2 = pnand %p3207_p0, %p253_p1 }
   0x6   : > { %257 = sbr.rel (%p254_p2) target bundleno = 1730 (0x6c2), region = 44 }
   0xd   : > { %s3211_s26 = sshll.u32 %s3863_s25, 4  ;;  %v3810_v0 = vmov 1   ;;  %v6099_v1 = vmov 0   ;;  %v6097_v17 = vmov 3   ;;  %s3208_s8 = sshll.u32 %s3863_s25, 2  ;;  %v6096_v19 = vmov 2  }
   0xe   : > { %3353 = vset.pattern.permute.xlu1 %v3810_v0  ;;  %3352 = vset.pattern.permute.xlu0 %v6099_v1  ;;  %p303_p3 = scmp.lt.s32.totalorder %s3211_s26, 31  ;;  %p296_p4 = scmp.lt.s32.totalorder %s3208_s8, 7  ;;  %v435_v30 = vlaneseq  ;;  %v353_v49 = vld [vmem:[%s6091_s3] sm:$0xff] }
   0xf   : > { %p308_p5 = scmp.lt.s32.totalorder %s3863_s25, 1 }
  0x10   : > { %s6937_s26 = smov (!%p303_p3, %s3211_s26), 31  ;;  %s6939_s8 = smov (!%p296_p4, %s3208_s8), 7  ;;  %v3961_v37 = vshrl.u32 %v435_v30, 7  ;;  %v6405_v30 = vmov 0 }
  0x11   : > { %s3212_s27 = sshll.u32 %s6937_s26, 3  ;;  %s3251_s9 = sshll.u32 %s6939_s8, 4 }
  0x12   : > { %s3878_s30 = scalar_lea.vmem %s6090_s2, %s3212_s27  ;;  %s3953_s12 = scalar_lea.vmem %s6088_s0, %s3251_s9  ;;  %v1166_v46 = vsub.s32 1, %v3961_v37  ;;  %v1170_v47 = vsub.s32 5, %v3961_v37  ;;  %v437_v48 = vsub.s32 0, %v3961_v37  ;;  %v441_v50 = vsub.s32 4, %v3961_v37 }
  0x13   : > { %v3881_v2 = vld [vmem:[%s3878_s30] sm:$0xff]  ;;  %v338_v3 = vld [vmem:[%s3878_s30 + $0x8] sm:$0xff]  ;;  %v3887_v4 = vld [vmem:[%s3878_s30 + $0x10] sm:$0xff]  ;;  %s6941_s25 = smov (!%p308_p5, %s3863_s25), 1  ;;  %s6051_s23 = scalar_lea.vmem %s6095_s7, %s3212_s27 }
  0x14   : > { %1101 = vperm.xlu1 %3353, %v3881_v2   ;;  %356 = vperm.xlu0 %3352, %v3881_v2   ;;  %v3890_v5 = vld [vmem:[%s3878_s30 + $0x18] sm:$0xff]  ;;  %v3896_v6 = vld [vmem:[%s3878_s30 + $0x28] sm:$0xff]  ;;  %v343_v7 = vld [vmem:[%s3878_s30 + $0x30] sm:$0xff]  ;;  %v1167_v54 = vrot.slane %v353_v49, %v1166_v46  ;;  %v1171_v55 = vrot.slane %v353_v49, %v1170_v47  ;;  %v438_v56 = vrot.slane %v353_v49, %v437_v48  ;;  %s3213_s16 = sshll.u32 %s6941_s25, 2 }
  0x15   : > { %v3903_v8 = vld [vmem:[%s3878_s30 + $0x20] sm:$0xff]  ;;  %v3906_v9 = vld [vmem:[%s3878_s30 + $0x48] sm:$0xff]  ;;  %v3912_v10 = vld [vmem:[%s3878_s30 + $0x50] sm:$0xff]  ;;  %v442_v58 = vrot.slane %v353_v49, %v441_v50  ;;  %s311_s19 = scalar_lea.vmem %s6094_s6, %s3213_s16 }
  0x16   : > { %v350_v11 = vld [vmem:[%s3878_s30 + $0x68] sm:$0xff]  ;;  %v351_v12 = vld [vmem:[%s3878_s30 + $0x70] sm:$0xff]  ;;  %v3921_v13 = vld [vmem:[%s3878_s30 + $0x38] sm:$0xff] }
  0x17   : > { %v3930_v14 = vld [vmem:[%s3878_s30 + $0x40] sm:$0xff]  ;;  %v348_v15 = vld [vmem:[%s3878_s30 + $0x58] sm:$0xff]  ;;  %v322_v21 = vld [vmem:[%s3953_s12 + $0x8] sm:$0xff] }
  0x18   : > { %1105 = vperm.xlu1 %3353, %v338_v3   ;;  %361 = vperm.xlu0 %3352, %v338_v3   ;;  %v349_v16 = vld [vmem:[%s3878_s30 + $0x60] sm:$0xff]  ;;  %v352_v18 = vld [vmem:[%s3878_s30 + $0x78] sm:$0xff]  ;;  %vm330_vm1 = vnez %v322_v21  ;;  %v323_v26 = vld [vmem:[%s3953_s12 + $0x10] sm:$0xff] }
  0x19   : > { %v321_v20 = vld [vmem:[%s3953_s12] sm:$0xff]  ;;  %v582_v23 = vsel %vm330_vm1, 16843009, %v6099_v1  ;;  %v324_v29 = vld [vmem:[%s3953_s12 + $0x18] sm:$0xff]  ;;  %vm331_vm2 = vnez %v323_v26  ;;  %v6400_v26 = vmov 0 }
  0x1a   : > { %vm329_vm0 = vnez %v321_v20  ;;  %v590_v25 = vunpack.c.0.s8 %v582_v23  ;;  %v592_v28 = vunpack.c.1.s8 %v582_v23  ;;  %v594_v32 = vunpack.c.2.s8 %v582_v23 }
  0x1b   : > { %v581_v22 = vsel %vm329_vm0, 16843009, %v6099_v1  ;;  %v596_v35 = vunpack.c.3.s8 %v582_v23  ;;  %vm332_vm3 = vnez %v324_v29  ;;  %v3964_v38 = vsel %vm331_vm2, 16843009, %v6099_v1 }
  0x1c   : > { %3354 = vset.pattern.permute.xlu1 %v6099_v1  ;;  %366 = vperm.xlu0 %3352, %v3887_v4   ;;  %v589_v24 = vunpack.c.0.s8 %v581_v22  ;;  %v591_v27 = vunpack.c.1.s8 %v581_v22  ;;  %v593_v31 = vunpack.c.2.s8 %v581_v22  ;;  %v595_v34 = vunpack.c.3.s8 %v581_v22 }
  0x1d   : > { %371 = vperm.xlu1 %3354, %v3890_v5   ;;  %v3967_v39 = vsel %vm332_vm3, 16843009, %v6099_v1  ;;  %v599_v44 = vunpack.c.1.s8 %v3964_v38  ;;  %v597_v60 = vunpack.c.0.s8 %v3964_v38  ;;  %v601_v62 = vunpack.c.2.s8 %v3964_v38 }
  0x1e   : > { %v621_v33 = vpack.c.b16 %v590_v25, %v589_v24  ;;  %v623_v36 = vpack.c.b16 %v592_v28, %v591_v27  ;;  %v625_v41 = vpack.c.b16 %v594_v32, %v593_v31  ;;  %v627_v42 = vpack.c.b16 %v596_v35, %v595_v34 }
  0x1f   : > { %v600_v45 = vunpack.c.1.s8 %v3967_v39  ;;  %v598_v61 = vunpack.c.0.s8 %v3967_v39  ;;  %v602_v63 = vunpack.c.2.s8 %v3967_v39  ;;  %v3990_v20 = vrot.slane %v442_v58, %v437_v48 }
  0x20   : > { %381 = vperm.xlu0 %3352, %v3896_v6   ;;  %v622_v40 = vpack.c.b8 %v621_v33, %v621_v33  ;;  %v624_v43 = vpack.c.b8 %v623_v36, %v623_v36  ;;  %v626_v51 = vpack.c.b8 %v625_v41, %v625_v41  ;;  %v628_v52 = vpack.c.b8 %v627_v42, %v627_v42 }
  0x21   : > { %3355 = vset.pattern.permute.xlu1 %v3810_v0  ;;  %v631_v53 = vpack.c.b16 %v600_v45, %v599_v44  ;;  %v629_v23 = vpack.c.b16 %v598_v61, %v597_v60  ;;  %v3994_v24 = vpack.c.b16 %v602_v63, %v601_v62  ;;  %v6402_v29 = vmov 0 }
  0x22   : > { %1113 = vperm.xlu1 %3355, %v3890_v5   ;;  %vm653_vm4 = vnez %v622_v40  ;;  %vm654_vm5 = vnez %v624_v43  ;;  %vm655_vm6 = vnez %v626_v51  ;;  %vm656_vm7 = vnez %v628_v52 }
  0x23   : > { %v669_v57 = vsel %vm653_vm4, 16843009, %v6099_v1  ;;  %v670_v59 = vsel %vm654_vm5, 16843009, %v6099_v1  ;;  %v671_v21 = vsel %vm655_vm6, 16843009, %v6099_v1  ;;  %v630_v42 = vpack.c.b8 %v629_v23, %v629_v23 }
  0x24   : > { %386 = vperm.xlu0 %3352, %v343_v7   ;;  %v686_v3 = vunpack.c.1.s8 %v669_v57  ;;  %v672_v22 = vsel %vm656_vm7, 16843009, %v6099_v1  ;;  %v689_v31 = vunpack.c.0.s8 %v671_v21  ;;  %v690_v32 = vunpack.c.1.s8 %v671_v21 }
  0x25   : > { %v691_v33 = vunpack.c.0.s8 %v672_v22  ;;  %v692_v41 = vunpack.c.1.s8 %v672_v22  ;;  %v634_v44 = vpack.c.b8 %v3994_v24, %v3994_v24  ;;  %v603_v50 = vunpack.c.3.s8 %v3964_v38 }
  0x26   : > { %3356 = vset.pattern.permute.xlu1 %v6099_v1  ;;  %vm4000_vm9 = vcmp.ne.s32.totalorder %v686_v3, 0  ;;  %v604_v51 = vunpack.c.3.s8 %v3967_v39  ;;  %vm4027_vm1 = vcmp.ne.s32.totalorder %v689_v31, 0  ;;  %vm4039_vm4 = vcmp.ne.s32.totalorder %v690_v32, 0 }
  0x27   : > { %376 = vperm.xlu1 %3356, %v3903_v8   ;;  %v6401_v26 = vsel %vm4000_vm9, 4294967295, %v6400_v26  ;;  %v6411_v60 = vmov 0  ;;  %vm4043_vm5 = vnez %v630_v42  ;;  %v6416_v31 = vmov 0 }
  0x28   : > { %401 = vperm.xlu0 %3352, %v3906_v9   ;;  %v6412_v60 = vsel %vm4039_vm4, 4294967295, %v6411_v60  ;;  %v6419_v32 = vmov 0  ;;  %v6426_v24 = vmov 0 }
  0x29   : > { %6413 = vst [vmem:[#allocation5_spill] sm:$0xff] %v6412_v60 }
  0x2b   : > { %3357 = vset.pattern.permute.xlu1 %v3810_v0 }
  0x2c   : > { %1117 = vperm.xlu1 %3357, %v3903_v8   ;;  %406 = vperm.xlu0 %3352, %v3912_v10  }
  0x30   : > { %1121 = vperm.xlu1 %3357, %v3896_v6   ;;  %421 = vperm.xlu0 %3352, %v350_v11  }
  0x34   : > { %426 = vperm.xlu0 %3352, %v351_v12   ;;  %3358 = vset.pattern.permute.xlu1 %v6099_v1 }
  0x35   : > { %391 = vperm.xlu1 %3358, %v3921_v13  }
  0x38   : > { %3366 = vset.pattern.permute.xlu0 %v3810_v0 }
  0x39   : > { %1109 = vperm.xlu0 %3366, %v3887_v4   ;;  %3359 = vset.pattern.permute.xlu1 %v3810_v0 }
  0x3a   : > { %1129 = vperm.xlu1 %3359, %v3921_v13  }
  0x3d   : > { %1125 = vperm.xlu0 %3366, %v343_v7   ;;  %v632_v7 = vpack.c.b8 %v631_v53, %v631_v53 }
  0x3e   : > { %3360 = vset.pattern.permute.xlu1 %v6099_v1 }
  0x3f   : > { %396 = vperm.xlu1 %3360, %v3930_v14   ;;  %vm658_vm10 = vnez %v632_v7 }
  0x40   : > { %v4017_v43 = vsel %vm658_vm10, 16843009, %v6099_v1  ;;  %vm4055_vm10 = vcmp.ne.s32.totalorder %v691_v33, 0 }
  0x41   : > { %1141 = vperm.xlu0 %3366, %v3912_v10   ;;  %v6417_v31 = vsel %vm4055_vm10, 4294967295, %v6416_v31 }
  0x42   : > { %6418 = vst [vmem:[#allocation6_spill] sm:$0xff] %v6417_v31 }
  0x43   : > { %3361 = vset.pattern.permute.xlu1 %v3810_v0 }
  0x44   : > { %1133 = vperm.xlu1 %3361, %v3930_v14  }
  0x45   : > { %1157 = vperm.xlu0 %3366, %v351_v12   ;;  %v3986_v12 = vrot.slane %v1171_v55, %v1166_v46 }
  0x48   : > { %1137 = vperm.xlu1 %3361, %v3906_v9  }
  0x49   : > { %3369 = vset.pattern.permute.xlu0 %v6097_v17 }
  0x4c   : > { %3362 = vset.pattern.permute.xlu1 %v6099_v1 }
  0x4d   : > { %411 = vperm.xlu1 %3362, %v348_v15  }
  0x51   : > { %3363 = vset.pattern.permute.xlu1 %v3810_v0 }
  0x52   : > { %1145 = vperm.xlu1 %3363, %v348_v15   ;;  %v687_v15 = vunpack.c.0.s8 %v670_v59 }
  0x54   : > { %vm4004_vm11 = vcmp.ne.s32.totalorder %v687_v15, 0 }
  0x55   : > { %v6403_v29 = vsel %vm4004_vm11, 4294967295, %v6402_v29 }
  0x56   : > { %3364 = vset.pattern.permute.xlu1 %v6099_v1  ;;  %6404 = vst [vmem:[#allocation2_spill] sm:$0xff] %v6403_v29 }
  0x57   : > { %416 = vperm.xlu1 %3364, %v349_v16  }
  0x5b   : > { %3365 = vset.pattern.permute.xlu1 %v3810_v0 }
  0x5c   : > { %1149 = vperm.xlu1 %3365, %v349_v16   ;;  %v688_v16 = vunpack.c.1.s8 %v670_v59  ;;  %v6408_v59 = vmov 0 }
  0x5d   : > { %v6409_v59 = vsel %vm4027_vm1, 4294967295, %v6408_v59 }
  0x5e   : > { %vm4008_vm12 = vcmp.ne.s32.totalorder %v688_v16, 0  ;;  %6410 = vst [vmem:[#allocation4_spill] sm:$0xff] %v6409_v59 }
  0x5f   : > { %v6406_v30 = vsel %vm4008_vm12, 4294967295, %v6405_v30 }
  0x60   : > { %1153 = vperm.xlu1 %3365, %v350_v11   ;;  %v3984_v11 = vrot.slane %v1167_v54, %v1166_v46  ;;  %6407 = vst [vmem:[#allocation3_spill] sm:$0xff] %v6406_v30 }
  0x64   : > { %3367 = vset.pattern.permute.xlu1 %v6099_v1 }
  0x65   : > { %431 = vperm.xlu1 %3367, %v352_v18  }
  0x69   : > { %3368 = vset.pattern.permute.xlu1 %v3810_v0  ;;  %v685_v0 = vunpack.c.0.s8 %v669_v57 }
  0x6a   : > { %1161 = vperm.xlu1 %3368, %v352_v18   ;;  %v3988_v18 = vrot.slane %v438_v56, %v437_v48 }
  0x6b   : > { %vm3996_vm8 = vcmp.ne.s32.totalorder %v685_v0, 0 }
  0x6e   : > { %3370 = vset.pattern.permute.xlu1 %v6096_v19 }
  0x93   : > { %v1102_v27 = vpop.permute.xlu1 %1101  ;;  %v357_v28 = vpop.permute.xlu0 %356 }
  0x94   : > { %v1182_v34 = vadd.f32 %v3984_v11, %v1102_v27  ;;  %v1183_v35 = vadd.f32 %v3986_v12, %v1102_v27  ;;  %v453_v36 = vadd.f32 %v3988_v18, %v357_v28  ;;  %v454_v40 = vadd.f32 %v3990_v20, %v357_v28 }
  0x96   : > { %vm485_vm13 = vcmp.gt.f32.partialorder %v453_v36, 0.0  ;;  %vm486_vm14 = vcmp.gt.f32.partialorder %v454_v40, 0.0  ;;  %v517_v45 = vmul.f32 0.2, %v453_v36  ;;  %v518_v46 = vmul.f32 0.2, %v454_v40 }
  0x97   : > { %v1106_v47 = vpop.permute.xlu1 %1105  ;;  %v362_v48 = vpop.permute.xlu0 %361  ;;  %vm1214_vm15 = vcmp.gt.f32.partialorder %v1182_v34, 0.0  ;;  %v1246_v49 = vmul.f32 0.2, %v1182_v34  ;;  %v1247_v55 = vmul.f32 0.2, %v1183_v35  ;;  %vm1215_vm0 = vcmp.gt.f32.partialorder %v1183_v35, 0.0 }
  0x98   : > { %v1184_v52 = vadd.f32 %v3984_v11, %v1106_v47  ;;  %v455_v53 = vadd.f32 %v3988_v18, %v362_v48  ;;  %v456_v54 = vadd.f32 %v3990_v20, %v362_v48  ;;  %v1185_v56 = vadd.f32 %v3986_v12, %v1106_v47 }
  0x99   : > { %v549_v57 = vsel %vm485_vm13, %v453_v36, %v517_v45  ;;  %v550_v58 = vsel %vm486_vm14, %v454_v40, %v518_v46  ;;  %v1278_v21 = vsel %vm1214_vm15, %v1182_v34, %v1246_v49  ;;  %v1279_v22 = vsel %vm1215_vm0, %v1183_v35, %v1247_v55 }
  0x9a   : > { %v4033_v38 = vsel %vm3996_vm8, %v549_v57, -9e+15  ;;  %v4037_v39 = vsel %vm4000_vm9, %v550_v58, -9e+15  ;;  %vm487_vm2 = vcmp.gt.f32.partialorder %v455_v53, 0.0  ;;  %vm488_vm3 = vcmp.gt.f32.partialorder %v456_v54, 0.0 }
  0x9b   : > { %v367_v62 = vpop.permute.xlu0 %366  ;;  %v781_v63 = vmax.f32 %v4033_v38, %v4037_v39  ;;  %v519_v0 = vmul.f32 0.2, %v455_v53  ;;  %v520_v3 = vmul.f32 0.2, %v456_v54  ;;  %vm1216_vm6 = vcmp.gt.f32.partialorder %v1184_v52, 0.0 }
  0x9c   : > { %v457_v7 = vadd.f32 %v3988_v18, %v367_v62  ;;  %v372_v15 = vpop.permute.xlu1 %371  ;;  %v1248_v16 = vmul.f32 0.2, %v1184_v52  ;;  %v458_v23 = vadd.f32 %v3990_v20, %v367_v62  ;;  %vm1217_vm7 = vcmp.gt.f32.partialorder %v1185_v56, 0.0 }
  0x9d   : > { %782 = vmax.xlane.f32.xlu0 %v781_v63  ;;  %v551_v27 = vsel %vm487_vm2, %v455_v53, %v519_v0  ;;  %v552_v28 = vsel %vm488_vm3, %v456_v54, %v520_v3  ;;  %vm4059_vm13 = vcmp.ne.s32.totalorder %v692_v41, 0  ;;  %v1249_v36 = vmul.f32 0.2, %v1185_v56 }
  0x9e   : > { %v6420_v32 = vsel %vm4059_vm13, 4294967295, %v6419_v32  ;;  %v4065_v34 = vsel %vm4004_vm11, %v551_v27, -9e+15  ;;  %v4069_v35 = vsel %vm4008_vm12, %v552_v28, -9e+15  ;;  %v1280_v40 = vsel %vm1216_vm6, %v1184_v52, %v1248_v16 }
  0x9f   : > { %6421 = vst [vmem:[#allocation7_spill] sm:$0xff] %v6420_v32  ;;  %v459_v33 = vadd.f32 %v3988_v18, %v372_v15  ;;  %v4073_v42 = vpop.permute.xlu0 %381  ;;  %v784_v41 = vmax.f32 %v4065_v34, %v4069_v35  ;;  %v4079_v45 = vsel %vm4004_vm11, %v1280_v40, -9e+15  ;;  %v635_v46 = vpack.c.b16 %v604_v51, %v603_v50 }
  0xa0   : > { %v460_v47 = vadd.f32 %v3990_v20, %v372_v15  ;;  %v1281_v48 = vsel %vm1217_vm7, %v1185_v56, %v1249_v36  ;;  %v4084_v49 = vsel %vm3996_vm8, %v1278_v21, -9e+15  ;;  %v4088_v52 = vsel %vm4000_vm9, %v1279_v22, -9e+15 }
  0xa1   : > { %785 = vmax.xlane.f32.xlu1 %v784_v41  ;;  %v4092_v53 = vsel %vm4008_vm12, %v1281_v48, -9e+15  ;;  %v1114_v54 = vpop.permute.xlu1 %1113  ;;  %vm489_vm14 = vcmp.gt.f32.partialorder %v457_v7, 0.0  ;;  %vm490_vm15 = vcmp.gt.f32.partialorder %v458_v23, 0.0  ;;  %v521_v50 = vmul.f32 0.2, %v457_v7 }
  0xa2   : > { %v1345_v51 = vmax.f32 %v4079_v45, %v4092_v53  ;;  %v1188_v55 = vadd.f32 %v3984_v11, %v1114_v54  ;;  %v1189_v56 = vadd.f32 %v3986_v12, %v1114_v54  ;;  %v522_v57 = vmul.f32 0.2, %v458_v23 }
  0xa3   : > { %v4098_v58 = vpop.permute.xlu0 %386  ;;  %v1342_v62 = vmax.f32 %v4084_v49, %v4088_v52  ;;  %v553_v63 = vsel %vm489_vm14, %v457_v7, %v521_v50  ;;  %vm491_vm0 = vcmp.gt.f32.partialorder %v459_v33, 0.0  ;;  %v523_v0 = vmul.f32 0.2, %v459_v33 }
  0xa4   : > { %1346 = vmax.xlane.f32.xlu0 %v1345_v51  ;;  %v554_v3 = vsel %vm490_vm15, %v458_v23, %v522_v57  ;;  %v4104_v15 = vsel %vm4027_vm1, %v553_v63, -9e+15  ;;  %vm492_vm2 = vcmp.gt.f32.partialorder %v460_v47, 0.0  ;;  %v636_v16 = vpack.c.b8 %v635_v46, %v635_v46 }
  0xa5   : > { %1343 = vmax.xlane.f32.xlu1 %v1342_v62  ;;  %v4108_v21 = vsel %vm4039_vm4, %v554_v3, -9e+15  ;;  %v524_v22 = vmul.f32 0.2, %v460_v47  ;;  %v555_v27 = vsel %vm491_vm0, %v459_v33, %v523_v0  ;;  %v673_v7 = vsel %vm4043_vm5, 16843009, %v6099_v1 }
  0xa6   : > { %v377_v28 = vpop.permute.xlu1 %376  ;;  %v787_v23 = vmax.f32 %v4104_v15, %v4108_v21  ;;  %vm1220_vm3 = vcmp.gt.f32.partialorder %v1188_v55, 0.0  ;;  %vm1221_vm6 = vcmp.gt.f32.partialorder %v1189_v56, 0.0  ;;  %v1252_v36 = vmul.f32 0.2, %v1188_v55 }
  0xa7   : > { %v461_v40 = vadd.f32 %v3988_v18, %v377_v28  ;;  %v462_v41 = vadd.f32 %v3990_v20, %v377_v28  ;;  %v4117_v46 = vpop.permute.xlu0 %401  ;;  %v556_v48 = vsel %vm492_vm2, %v460_v47, %v524_v22  ;;  %v1253_v54 = vmul.f32 0.2, %v1189_v56 }
  0xa8   : > { %v4121_v33 = vsel %vm4055_vm10, %v555_v27, -9e+15  ;;  %v4125_v61 = vsel %vm4059_vm13, %v556_v48, -9e+15  ;;  %v695_v50 = vunpack.c.0.s8 %v4017_v43  ;;  %vm660_vm5 = vnez %v636_v16 }
  0xa9   : > { %788 = vmax.xlane.f32.xlu1 %v787_v23  ;;  %v1284_v51 = vsel %vm1220_vm3, %v1188_v55, %v1252_v36  ;;  %v1285_v57 = vsel %vm1221_vm6, %v1189_v56, %v1253_v54  ;;  %v693_v62 = vunpack.c.0.s8 %v673_v7  ;;  %v694_v63 = vunpack.c.1.s8 %v673_v7 }
  0xaa   : > { %vm493_vm7 = vcmp.gt.f32.partialorder %v461_v40, 0.0  ;;  %vm494_vm14 = vcmp.gt.f32.partialorder %v462_v41, 0.0  ;;  %v525_v47 = vmul.f32 0.2, %v461_v40  ;;  %v696_v0 = vunpack.c.1.s8 %v4017_v43 }
  0xab   : > { %v1118_v3 = vpop.permute.xlu1 %1117  ;;  %v4129_v22 = vpop.permute.xlu0 %406  ;;  %v790_v27 = vmax.f32 %v4121_v33, %v4125_v61  ;;  %v526_v28 = vmul.f32 0.2, %v462_v41  ;;  %v676_v48 = vsel %vm660_vm5, 16843009, %v6099_v1  ;;  %vm659_vm15 = vnez %v634_v44 }
  0xac   : > { %v1190_v55 = vadd.f32 %v3984_v11, %v1118_v3  ;;  %v1191_v56 = vadd.f32 %v3986_v12, %v1118_v3  ;;  %v4141_v43 = vsel %vm4055_vm10, %v1284_v51, -9e+15  ;;  %v4145_v16 = vsel %vm4059_vm13, %v1285_v57, -9e+15 }
  0xad   : > { %6422 = vst [vmem:[#allocation8_spill] sm:$0xff] %v4145_v16  ;;  %791 = vmax.xlane.f32.xlu1 %v790_v27  ;;  %v557_v7 = vsel %vm493_vm7, %v461_v40, %v525_v47  ;;  %v558_v23 = vsel %vm494_vm14, %v462_v41, %v526_v28  ;;  %vm4147_vm0 = vcmp.ne.s32.totalorder %v693_v62, 0  ;;  %v6423_v36 = vmov 0 }
  0xae   : > { %v6424_v36 = vsel %vm4147_vm0, 4294967295, %v6423_v36  ;;  %vm4151_vm2 = vcmp.ne.s32.totalorder %v694_v63, 0  ;;  %vm4155_vm3 = vcmp.ne.s32.totalorder %v695_v50, 0  ;;  %v6429_v44 = vmov 0 }
  0xaf   : > { %6425 = vst [vmem:[#allocation9_spill] sm:$0xff] %v6424_v36  ;;  %v6427_v24 = vsel %vm4151_vm2, 4294967295, %v6426_v24  ;;  %v6430_v44 = vsel %vm4155_vm3, 4294967295, %v6429_v44  ;;  %vm1222_vm6 = vcmp.gt.f32.partialorder %v1190_v55, 0.0  ;;  %vm1223_vm5 = vcmp.gt.f32.partialorder %v1191_v56, 0.0  ;;  %v1122_v40 = vpop.permute.xlu1 %1121  ;;  %v4162_v41 = vpop.permute.xlu0 %421 }
  0xb0   : > { %6428 = vst [vmem:[#allocation10_spill] sm:$0xff] %v6427_v24  ;;  %6431 = vst [vmem:[#allocation11_spill] sm:$0xff] %v6430_v44  ;;  %v699_v54 = vunpack.c.0.s8 %v676_v48  ;;  %v4160_v51 = vsel %vm659_vm15, 16843009, %v6099_v1  ;;  %v1351_v57 = vmax.f32 %v4141_v43, %v4145_v16  ;;  %v1254_v62 = vmul.f32 0.2, %v1190_v55 }
  0xb1   : > { %v1255_v63 = vmul.f32 0.2, %v1191_v56  ;;  %v700_v47 = vunpack.c.1.s8 %v676_v48  ;;  %v1192_v50 = vadd.f32 %v3984_v11, %v1122_v40  ;;  %v1193_v3 = vadd.f32 %v3986_v12, %v1122_v40 }
  0xb2   : > { %v4170_v27 = vsel %vm4147_vm0, %v557_v7, -9e+15  ;;  %v4174_v28 = vsel %vm4151_vm2, %v558_v23, -9e+15  ;;  %1352 = vmax.xlane.f32.xlu1 %v1351_v57  ;;  %v1286_v19 = vsel %vm1222_vm6, %v1190_v55, %v1254_v62  ;;  %vm4176_vm7 = vcmp.ne.s32.totalorder %v696_v0, 0 }
  0xb3   : > { %6432 = vst [vmem:[#allocation12_spill] sm:$0xff] %v4170_v27  ;;  %6433 = vst [vmem:[#allocation13_spill] sm:$0xff] %v4174_v28  ;;  %v1287_v17 = vsel %vm1223_vm5, %v1191_v56, %v1255_v63  ;;  %v6434_v1 = vmov 0  ;;  %v463_v40 = vadd.f32 %v3988_v18, %v4073_v42  ;;  %v4185_v7 = vsel %vm4147_vm0, %v1286_v19, -9e+15  ;;  %v4187_v23 = vpop.permute.xlu0 %426 }
  0xb4   : > { %v6435_v1 = vsel %vm4176_vm7, 4294967295, %v6434_v1  ;;  %6437 = vst [vmem:[#allocation15_spill] sm:$0xff] %v4185_v7  ;;  %vm1224_vm14 = vcmp.gt.f32.partialorder %v1192_v50, 0.0  ;;  %vm1225_vm15 = vcmp.gt.f32.partialorder %v1193_v3, 0.0  ;;  %v793_v55 = vmax.f32 %v4170_v27, %v4174_v28  ;;  %v392_v63 = vpop.permute.xlu1 %391 }
  0xb5   : > { %6436 = vst [vmem:[#allocation14_spill] sm:$0xff] %v6435_v1  ;;  %v4193_v0 = vsel %vm4151_vm2, %v1287_v17, -9e+15  ;;  %v1256_v56 = vmul.f32 0.2, %v1192_v50  ;;  %v464_v62 = vadd.f32 %v3990_v20, %v4073_v42  ;;  %vm4197_vm6 = vcmp.ne.s32.totalorder %v699_v54, 0 }
  0xb6   : > { %6438 = vst [vmem:[#allocation16_spill] sm:$0xff] %v4193_v0  ;;  %v1257_v57 = vmul.f32 0.2, %v1193_v3  ;;  %v6439_v19 = vmov 0  ;;  %vm4201_vm5 = vcmp.ne.s32.totalorder %v700_v47, 0  ;;  %v6442_v48 = vmov 0  ;;  %794 = vmax.xlane.f32.xlu1 %v793_v55 }
  0xb7   : > { %v6440_v19 = vsel %vm4197_vm6, 4294967295, %v6439_v19  ;;  %v6443_v48 = vsel %vm4201_vm5, 4294967295, %v6442_v48  ;;  %v698_v36 = vunpack.c.1.s8 %v4160_v51  ;;  %v467_v17 = vadd.f32 %v3988_v18, %v392_v63 }
  0xb8   : > { %6441 = vst [vmem:[#allocation17_spill] sm:$0xff] %v6440_v19  ;;  %6444 = vst [vmem:[#allocation18_spill] sm:$0xff] %v6443_v48  ;;  %v468_v24 = vadd.f32 %v3990_v20, %v392_v63  ;;  %v1288_v32 = vsel %vm1224_vm14, %v1192_v50, %v1256_v56  ;;  %v1289_v31 = vsel %vm1225_vm15, %v1193_v3, %v1257_v57  ;;  %vm495_vm2 = vcmp.gt.f32.partialorder %v463_v40, 0.0  ;;  %v1110_v56 = vpop.permute.xlu0 %1109 }
  0xb9   : > { %v1354_v42 = vmax.f32 %v4185_v7, %v4193_v0  ;;  %v4212_v54 = vsel %vm4155_vm3, %v1288_v32, -9e+15  ;;  %v527_v47 = vmul.f32 0.2, %v463_v40  ;;  %v4216_v30 = vsel %vm4176_vm7, %v1289_v31, -9e+15 }
  0xba   : > { %6445 = vst [vmem:[#allocation19_spill] sm:$0xff] %v4212_v54  ;;  %6446 = vst [vmem:[#allocation20_spill] sm:$0xff] %v4216_v30  ;;  %vm499_vm0 = vcmp.gt.f32.partialorder %v467_v17, 0.0  ;;  %vm500_vm13 = vcmp.gt.f32.partialorder %v468_v24, 0.0  ;;  %v531_v55 = vmul.f32 0.2, %v467_v17  ;;  %v465_v50 = vadd.f32 %v3988_v18, %v4098_v58 }
  0xbb   : > { %v466_v3 = vadd.f32 %v3990_v20, %v4098_v58  ;;  %v532_v57 = vmul.f32 0.2, %v468_v24  ;;  %v528_v63 = vmul.f32 0.2, %v464_v62  ;;  %v1186_v32 = vadd.f32 %v3984_v11, %v1110_v56  ;;  %1355 = vmax.xlane.f32.xlu1 %v1354_v42 }
  0xbc   : > { %v1187_v29 = vadd.f32 %v3986_v12, %v1110_v56  ;;  %v563_v0 = vsel %vm499_vm0, %v467_v17, %v531_v55  ;;  %vm496_vm14 = vcmp.gt.f32.partialorder %v464_v62, 0.0  ;;  %v1357_v31 = vmax.f32 %v4212_v54, %v4216_v30  ;;  %v1126_v42 = vpop.permute.xlu0 %1125 }
  0xbd   : > { %v564_v7 = vsel %vm500_vm13, %v468_v24, %v532_v57  ;;  %v4228_v28 = vsel %vm4197_vm6, %v563_v0, -9e+15  ;;  %v559_v58 = vsel %vm495_vm2, %v463_v40, %v527_v47  ;;  %vm1218_vm15 = vcmp.gt.f32.partialorder %v1186_v32, 0.0 }
  0xbe   : > { %6447 = vst [vmem:[#allocation21_spill] sm:$0xff] %v4228_v28  ;;  %v4233_v27 = vsel %vm4201_vm5, %v564_v7, -9e+15  ;;  %vm1219_vm10 = vcmp.gt.f32.partialorder %v1187_v29, 0.0  ;;  %v1250_v56 = vmul.f32 0.2, %v1186_v32  ;;  %v560_v55 = vsel %vm496_vm14, %v464_v62, %v528_v63 }
  0xbf   : > { %6448 = vst [vmem:[#allocation22_spill] sm:$0xff] %v4233_v27  ;;  %v1251_v17 = vmul.f32 0.2, %v1187_v29  ;;  %vm497_vm0 = vcmp.gt.f32.partialorder %v465_v50, 0.0  ;;  %vm498_vm12 = vcmp.gt.f32.partialorder %v466_v3, 0.0  ;;  %v1194_v24 = vadd.f32 %v3984_v11, %v1126_v42  ;;  %1358 = vmax.xlane.f32.xlu1 %v1357_v31 }
  0xc0   : > { %v1195_v57 = vadd.f32 %v3986_v12, %v1126_v42  ;;  %v802_v40 = vmax.f32 %v4228_v28, %v4233_v27  ;;  %v1282_v0 = vsel %vm1218_vm15, %v1186_v32, %v1250_v56  ;;  %v529_v30 = vmul.f32 0.2, %v465_v50 }
  0xc1   : > { %v1283_v47 = vsel %vm1219_vm10, %v1187_v29, %v1251_v17  ;;  %v4241_v7 = vsel %vm4027_vm1, %v1282_v0, -9e+15  ;;  %v530_v54 = vmul.f32 0.2, %v466_v3  ;;  %vm1226_vm13 = vcmp.gt.f32.partialorder %v1194_v24, 0.0 }
  0xc2   : > { %6449 = vst [vmem:[#allocation23_spill] sm:$0xff] %v4241_v7  ;;  %v4245_v62 = vsel %vm4039_vm4, %v1283_v47, -9e+15  ;;  %vm1227_vm2 = vcmp.gt.f32.partialorder %v1195_v57, 0.0  ;;  %v1258_v63 = vmul.f32 0.2, %v1194_v24  ;;  %v6451_v42 = vunpack.c.0.s8 %v4160_v51 }
  0xc3   : > { %6450 = vst [vmem:[#allocation24_spill] sm:$0xff] %v4245_v62  ;;  %v1348_v31 = vmax.f32 %v4241_v7, %v4245_v62  ;;  %v6452_v29 = vmov 0  ;;  %v1259_v32 = vmul.f32 0.2, %v1195_v57  ;;  %803 = vmax.xlane.f32.xlu1 %v802_v40  ;;  %vm4255_vm10 = vcmp.ne.s32.totalorder %v698_v36, 0 }
  0xc4   : > { %vm4251_vm14 = vcmp.ne.s32.totalorder %v6451_v42, 0  ;;  %v6455_v56 = vmov 0  ;;  %v1290_v17 = vsel %vm1226_vm13, %v1194_v24, %v1258_v63  ;;  %v4261_v0 = vsel %vm4155_vm3, %v559_v58, -9e+15 }
  0xc5   : > { %v6453_v29 = vsel %vm4251_vm14, 4294967295, %v6452_v29  ;;  %v6456_v56 = vsel %vm4255_vm10, 4294967295, %v6455_v56  ;;  %6458 = vst [vmem:[#allocation27_spill] sm:$0xff] %v4261_v0  ;;  %v4265_v47 = vsel %vm4176_vm7, %v560_v55, -9e+15  ;;  %1349 = vmax.xlane.f32.xlu0 %v1348_v31  ;;  %v1291_v51 = vsel %vm1227_vm2, %v1195_v57, %v1259_v32 }
  0xc6   : > { %6454 = vst [vmem:[#allocation25_spill] sm:$0xff] %v6453_v29  ;;  %6457 = vst [vmem:[#allocation26_spill] sm:$0xff] %v6456_v56  ;;  %v4269_v40 = vsel %vm4251_vm14, %v1290_v17, -9e+15  ;;  %v561_v36 = vsel %vm497_vm0, %v465_v50, %v529_v30  ;;  %v562_v24 = vsel %vm498_vm12, %v466_v3, %v530_v54  ;;  %v4275_v58 = vsel %vm4255_vm10, %v1291_v51, -9e+15 }
  0xc7   : > { %6459 = vst [vmem:[#allocation28_spill] sm:$0xff] %v4265_v47  ;;  %6460 = vst [vmem:[#allocation29_spill] sm:$0xff] %v4269_v40  ;;  %v1360_v55 = vmax.f32 %v4269_v40, %v4275_v58  ;;  %v796_v63 = vmax.f32 %v4261_v0, %v4265_v47  ;;  %v4283_v57 = vsel %vm4251_vm14, %v561_v36, -9e+15  ;;  %v4287_v31 = vsel %vm4255_vm10, %v562_v24, -9e+15  ;;  %v1130_v24 = vpop.permute.xlu1 %1129 }
  0xc8   : > { %6461 = vst [vmem:[#allocation30_spill] sm:$0xff] %v4275_v58  ;;  %6462 = vst [vmem:[#allocation31_spill] sm:$0xff] %v4283_v57  ;;  %v799_v30 = vmax.f32 %v4283_v57, %v4287_v31  ;;  %v325_v54 = vld [vmem:[%s3953_s12 + $0x20] sm:$0xff]  ;;  %v326_v50 = vld [vmem:[%s3953_s12 + $0x28] sm:$0xff]  ;;  %v6464_v3 = vmov 0   ;;  %v6465_v57 = vmov 3  }
  0xc9   : > { %6463 = vst [vmem:[#allocation32_spill] sm:$0xff] %v4287_v31  ;;  %1361 = vmax.xlane.f32.xlu1 %v1360_v55  ;;  %797 = vmax.xlane.f32.xlu0 %v796_v63  ;;  %vm333_vm12 = vnez %v325_v54  ;;  %vm334_vm15 = vnez %v326_v50  ;;  %v327_v50 = vld [vmem:[%s3953_s12 + $0x30] sm:$0xff]  ;;  %v6466_v58 = vmov 2   ;;  %v6476_v29 = vmov 0 }
  0xca   : > { %v585_v42 = vsel %vm333_vm12, 16843009, %v6464_v3  ;;  %v586_v32 = vsel %vm334_vm15, 16843009, %v6464_v3  ;;  %vm335_vm0 = vnez %v327_v50 }
  0xcb   : > { %v607_v17 = vunpack.c.1.s8 %v585_v42  ;;  %v610_v51 = vunpack.c.2.s8 %v586_v32  ;;  %v611_v63 = vunpack.c.3.s8 %v585_v42 }
  0xcd   : > { %800 = vmax.xlane.f32.xlu0 %v799_v30  ;;  %v612_v30 = vunpack.c.3.s8 %v586_v32 }
  0xda   : > { %1662 = vperm.xlu1 %3370, %v3881_v2   ;;  %v608_v2 = vunpack.c.1.s8 %v586_v32 }
  0xdc   : > { %v639_v36 = vpack.c.b16 %v608_v2, %v607_v17  ;;  %v397_v17 = vpop.permute.xlu1 %396 }
  0xde   : > { %1674 = vperm.xlu1 %3370, %v3890_v5   ;;  %v605_v5 = vunpack.c.0.s8 %v585_v42  ;;  %v640_v54 = vpack.c.b8 %v639_v36, %v639_v36  ;;  %v470_v36 = vadd.f32 %v3990_v20, %v397_v17 }
  0xe0   : > { %vm662_vm2 = vnez %v640_v54  ;;  %v471_v54 = vadd.f32 %v3988_v18, %v4117_v46  ;;  %vm502_vm10 = vcmp.gt.f32.partialorder %v470_v36, 0.0 }
  0xe2   : > { %1678 = vperm.xlu1 %3370, %v3903_v8   ;;  %v606_v8 = vunpack.c.0.s8 %v586_v32  ;;  %v678_v32 = vsel %vm662_vm2, 16843009, %v6464_v3  ;;  %vm503_vm2 = vcmp.gt.f32.partialorder %v471_v54, 0.0  ;;  %v535_v44 = vmul.f32 0.2, %v471_v54 }
  0xe3   : > { %2231 = vperm.xlu0 %3369, %v3887_v4   ;;  %v609_v4 = vunpack.c.2.s8 %v585_v42 }
  0xe4   : > { %v637_v55 = vpack.c.b16 %v606_v8, %v605_v5 }
  0xe6   : > { %1690 = vperm.xlu1 %3370, %v3921_v13   ;;  %v638_v31 = vpack.c.b8 %v637_v55, %v637_v55  ;;  %v703_v55 = vunpack.c.0.s8 %v678_v32 }
  0xe7   : > { %2243 = vperm.xlu0 %3369, %v3896_v6   ;;  %v641_v6 = vpack.c.b16 %v610_v51, %v609_v4  ;;  %v469_v51 = vadd.f32 %v3988_v18, %v397_v17  ;;  %v472_v17 = vadd.f32 %v3990_v20, %v4117_v46 }
  0xe8   : > { %vm661_vm12 = vnez %v638_v31  ;;  %v1197_v31 = vadd.f32 %v3986_v12, %v1130_v24 }
  0xe9   : > { %v642_v47 = vpack.c.b8 %v641_v6, %v641_v6  ;;  %v677_v8 = vsel %vm661_vm12, 16843009, %v6464_v3  ;;  %vm4333_vm12 = vcmp.ne.s32.totalorder %v703_v55, 0  ;;  %v536_v62 = vmul.f32 0.2, %v472_v17 }
  0xea   : > { %1698 = vperm.xlu1 %3370, %v3906_v9   ;;  %v328_v9 = vld [vmem:[%s3953_s12 + $0x38] sm:$0xff]  ;;  %v701_v6 = vunpack.c.0.s8 %v677_v8  ;;  %vm6479_vm3 = vcmp.gt.f32.partialorder %v1197_v31, 0.0 }
  0xeb   : > { %2251 = vperm.xlu0 %3369, %v3921_v13   ;;  %v643_v13 = vpack.c.b16 %v612_v30, %v611_v63  ;;  %vm336_vm13 = vnez %v328_v9  ;;  %vm663_vm15 = vnez %v642_v47  ;;  %v1134_v47 = vpop.permute.xlu1 %1133  ;;  %v704_v63 = vunpack.c.1.s8 %v678_v32 }
  0xec   : > { %v4313_v42 = vsel %vm336_vm13, 16843009, %v6464_v3  ;;  %v4322_v4 = vsel %vm663_vm15, 16843009, %v6464_v3  ;;  %v702_v9 = vunpack.c.1.s8 %v677_v8  ;;  %v534_v32 = vmul.f32 0.2, %v470_v36 }
  0xed   : > { %v614_v5 = vunpack.c.0.s8 %v4313_v42  ;;  %vm501_vm15 = vcmp.gt.f32.partialorder %v469_v51, 0.0  ;;  %vm4337_vm14 = vcmp.ne.s32.totalorder %v701_v6, 0  ;;  %v6470_v8 = vmov 0 }
  0xee   : > { %1702 = vperm.xlu1 %3370, %v3912_v10   ;;  %v644_v10 = vpack.c.b8 %v643_v13, %v643_v13  ;;  %v1261_v13 = vmul.f32 0.2, %v1197_v31  ;;  %v6471_v8 = vsel %vm4337_vm14, 4294967295, %v6470_v8  ;;  %vm4341_vm7 = vcmp.ne.s32.totalorder %v704_v63, 0 }
  0xef   : > { %2255 = vperm.xlu0 %3369, %v3930_v14   ;;  %v4310_v14 = vsel %vm335_vm0, 16843009, %v6464_v3  ;;  %6472 = vst [vmem:[#allocation34_spill] sm:$0xff] %v6471_v8  ;;  %v1198_v0 = vadd.f32 %v3984_v11, %v1134_v47  ;;  %v1199_v1 = vadd.f32 %v3986_v12, %v1134_v47  ;;  %v566_v59 = vsel %vm502_vm10, %v470_v36, %v534_v32 }
  0xf0   : > { %v613_v2 = vunpack.c.0.s8 %v4310_v14  ;;  %vm664_vm0 = vnez %v644_v10  ;;  %v533_v10 = vmul.f32 0.2, %v469_v51  ;;  %v1293_v6 = vsel %vm6479_vm3, %v1197_v31, %v1261_v13 }
  0xf1   : > { %v680_v40 = vsel %vm664_vm0, 16843009, %v6464_v3  ;;  %vm4345_vm0 = vcmp.ne.s32.totalorder %v702_v9, 0  ;;  %v473_v9 = vadd.f32 %v3988_v18, %v4129_v22  ;;  %v474_v31 = vadd.f32 %v3990_v20, %v4129_v22 }
  0xf2   : > { %3372 = vset.pattern.permute.xlu1 %v6465_v57  ;;  %v645_v30 = vpack.c.b16 %v614_v5, %v613_v2  ;;  %v706_v57 = vunpack.c.1.s8 %v4322_v4  ;;  %v6467_v2 = vmov 0  ;;  %v1138_v5 = vpop.permute.xlu1 %1137  ;;  %v6477_v29 = vsel %vm4345_vm0, 4294967295, %v6476_v29 }
  0xf3   : > { %3371 = vset.pattern.permute.xlu0 %v6466_v58  ;;  %v1196_v58 = vadd.f32 %v3984_v11, %v1130_v24  ;;  %v705_v24 = vunpack.c.0.s8 %v4322_v4  ;;  %v6468_v2 = vsel %vm4333_vm12, 4294967295, %v6467_v2  ;;  %v6473_v4 = vmov 0  ;;  %6478 = vst [vmem:[#allocation36_spill] sm:$0xff] %v6477_v29 }
  0xf4   : > { %6469 = vst [vmem:[#allocation33_spill] sm:$0xff] %v6468_v2  ;;  %v6474_v4 = vsel %vm4341_vm7, 4294967295, %v6473_v4  ;;  %v646_v56 = vpack.c.b8 %v645_v30, %v645_v30  ;;  %v707_v55 = vunpack.c.0.s8 %v680_v40  ;;  %v1200_v63 = vadd.f32 %v3984_v11, %v1138_v5 }
  0xf5   : > { %v1260_v50 = vmul.f32 0.2, %v1196_v58  ;;  %vm1228_vm13 = vcmp.gt.f32.partialorder %v1196_v58, 0.0  ;;  %6475 = vst [vmem:[#allocation35_spill] sm:$0xff] %v6474_v4  ;;  %v565_v60 = vsel %vm501_vm15, %v469_v51, %v533_v10  ;;  %v708_v30 = vunpack.c.1.s8 %v680_v40  ;;  %v1142_v40 = vpop.permute.xlu0 %1141 }
  0xf6   : > { %vm4354_vm4 = vnez %v646_v56  ;;  %v412_v47 = vpop.permute.xlu1 %411  ;;  %v4368_v36 = vsel %vm4201_vm5, %v1293_v6, -9e+15  ;;  %v4372_v56 = vsel %vm4337_vm14, %v565_v60, -9e+15  ;;  %v4376_v13 = vsel %vm4345_vm0, %v566_v59, -9e+15 }
  0xf7   : > { %v1292_v46 = vsel %vm1228_vm13, %v1196_v58, %v1260_v50  ;;  %v1201_v58 = vadd.f32 %v3986_v12, %v1138_v5  ;;  %vm504_vm13 = vcmp.gt.f32.partialorder %v472_v17, 0.0  ;;  %6483 = vst [vmem:[#allocation38_spill] sm:$0xff] %v4368_v36  ;;  %6484 = vst [vmem:[#allocation39_spill] sm:$0xff] %v4372_v56  ;;  %v567_v22 = vsel %vm503_vm2, %v471_v54, %v535_v44 }
  0xf8   : > { %v4364_v51 = vsel %vm4197_vm6, %v1292_v46, -9e+15  ;;  %6485 = vst [vmem:[#allocation40_spill] sm:$0xff] %v4376_v13  ;;  %vm1230_vm3 = vcmp.gt.f32.partialorder %v1198_v0, 0.0  ;;  %v568_v10 = vsel %vm504_vm13, %v472_v17, %v536_v62  ;;  %v1262_v32 = vmul.f32 0.2, %v1198_v0 }
  0xf9   : > { %6482 = vst [vmem:[#allocation37_spill] sm:$0xff] %v4364_v51  ;;  %v1263_v5 = vmul.f32 0.2, %v1199_v1  ;;  %v1264_v46 = vmul.f32 0.2, %v1200_v63  ;;  %v475_v48 = vadd.f32 %v3988_v18, %v412_v47  ;;  %vm1231_vm10 = vcmp.gt.f32.partialorder %v1199_v1, 0.0 }
  0xfa   : > { %v1265_v6 = vmul.f32 0.2, %v1201_v58  ;;  %v1202_v19 = vadd.f32 %v3984_v11, %v1142_v40  ;;  %v476_v60 = vadd.f32 %v3990_v20, %v412_v47  ;;  %vm1233_vm5 = vcmp.gt.f32.partialorder %v1201_v58, 0.0  ;;  %v1146_v7 = vpop.permute.xlu1 %1145 }
  0xfb   : > { %vm4382_vm6 = vcmp.ne.s32.totalorder %v705_v24, 0  ;;  %v6486_v59 = vmov 0  ;;  %vm4386_vm2 = vcmp.ne.s32.totalorder %v706_v57, 0  ;;  %v6489_v44 = vmov 0 }
  0xfc   : > { %v6487_v59 = vsel %vm4382_vm6, 4294967295, %v6486_v59  ;;  %v6490_v44 = vsel %vm4386_vm2, 4294967295, %v6489_v44  ;;  %v4393_v62 = vsel %vm4354_vm4, 16843009, %v6464_v3  ;;  %v1203_v54 = vadd.f32 %v3986_v12, %v1142_v40 }
  0xfd   : > { %6488 = vst [vmem:[#allocation41_spill] sm:$0xff] %v6487_v59  ;;  %6491 = vst [vmem:[#allocation42_spill] sm:$0xff] %v6490_v44  ;;  %v1363_v17 = vmax.f32 %v4364_v51, %v4368_v36  ;;  %v805_v24 = vmax.f32 %v4372_v56, %v4376_v13  ;;  %v4402_v47 = vsel %vm4333_vm12, %v567_v22, -9e+15  ;;  %vm4404_vm13 = vcmp.ne.s32.totalorder %v707_v55, 0 }
  0xfe   : > { %6492 = vst [vmem:[#allocation43_spill] sm:$0xff] %v4402_v47  ;;  %v6493_v57 = vmov 0  ;;  %vm4408_vm15 = vcmp.ne.s32.totalorder %v708_v30, 0  ;;  %v6496_v50 = vmov 0  ;;  %v4414_v40 = vsel %vm4341_vm7, %v568_v10, -9e+15 }
  0xff   : > { %v6494_v57 = vsel %vm4404_vm13, 4294967295, %v6493_v57  ;;  %v6497_v50 = vsel %vm4408_vm15, 4294967295, %v6496_v50  ;;  %6499 = vst [vmem:[#allocation46_spill] sm:$0xff] %v4414_v40  ;;  %v1294_v36 = vsel %vm1230_vm3, %v1198_v0, %v1262_v32  ;;  %v1295_v13 = vsel %vm1231_vm10, %v1199_v1, %v1263_v5  ;;  %v417_v5 = vpop.permute.xlu1 %416 }
 0x100   : > { %6495 = vst [vmem:[#allocation44_spill] sm:$0xff] %v6494_v57  ;;  %6498 = vst [vmem:[#allocation45_spill] sm:$0xff] %v6497_v50  ;;  %vm6500_vm4 = vcmp.gt.f32.partialorder %v1200_v63, 0.0  ;;  %v1297_v56 = vsel %vm1233_vm5, %v1201_v58, %v1265_v6  ;;  %v537_v55 = vmul.f32 0.2, %v473_v9  ;;  %vm505_vm1 = vcmp.gt.f32.partialorder %v473_v9, 0.0 }
 0x101   : > { %v1296_v22 = vsel %vm6500_vm4, %v1200_v63, %v1264_v46  ;;  %v538_v51 = vmul.f32 0.2, %v474_v31  ;;  %v539_v27 = vmul.f32 0.2, %v475_v48  ;;  %vm506_vm11 = vcmp.gt.f32.partialorder %v474_v31, 0.0 }
 0x102   : > { %vm507_vm9 = vcmp.gt.f32.partialorder %v475_v48, 0.0  ;;  %v540_v30 = vmul.f32 0.2, %v476_v60  ;;  %v1204_v28 = vadd.f32 %v3984_v11, %v1146_v7  ;;  %v1205_v16 = vadd.f32 %v3986_v12, %v1146_v7 }
 0x103   : > { %v4423_v0 = vsel %vm4337_vm14, %v1294_v36, -9e+15  ;;  %vm508_vm3 = vcmp.gt.f32.partialorder %v476_v60, 0.0  ;;  %v808_v1 = vmax.f32 %v4402_v47, %v4414_v40  ;;  %v4429_v63 = vsel %vm4345_vm0, %v1295_v13, -9e+15 }
 0x104   : > { %6501 = vst [vmem:[#allocation47_spill] sm:$0xff] %v4423_v0  ;;  %6502 = vst [vmem:[#allocation48_spill] sm:$0xff] %v4429_v63  ;;  %v4433_v58 = vsel %vm4333_vm12, %v1296_v22, -9e+15  ;;  %v4437_v7 = vsel %vm4341_vm7, %v1297_v56, -9e+15  ;;  %v569_v10 = vsel %vm505_vm1, %v473_v9, %v537_v55  ;;  %v570_v32 = vsel %vm506_vm11, %v474_v31, %v538_v51 }
 0x105   : > { %6503 = vst [vmem:[#allocation49_spill] sm:$0xff] %v4433_v58  ;;  %6504 = vst [vmem:[#allocation50_spill] sm:$0xff] %v4437_v7  ;;  %v571_v36 = vsel %vm507_vm9, %v475_v48, %v539_v27  ;;  %vm1234_vm5 = vcmp.gt.f32.partialorder %v1202_v19, 0.0  ;;  %v572_v46 = vsel %vm508_vm3, %v476_v60, %v540_v30  ;;  %vm1235_vm10 = vcmp.gt.f32.partialorder %v1203_v54, 0.0 }
 0x106   : > { %v1266_v6 = vmul.f32 0.2, %v1202_v19  ;;  %v477_v13 = vadd.f32 %v3988_v18, %v417_v5  ;;  %v478_v40 = vadd.f32 %v3990_v20, %v417_v5  ;;  %v1268_v22 = vmul.f32 0.2, %v1204_v28 }
 0x107   : > { %v1269_v47 = vmul.f32 0.2, %v1205_v16  ;;  %vm1236_vm4 = vcmp.gt.f32.partialorder %v1204_v28, 0.0  ;;  %vm1237_vm0 = vcmp.gt.f32.partialorder %v1205_v16, 0.0  ;;  %v709_v9 = vunpack.c.0.s8 %v4393_v62 }
 0x108   : > { %v710_v27 = vunpack.c.1.s8 %v4393_v62  ;;  %v1366_v48 = vmax.f32 %v4423_v0, %v4429_v63  ;;  %v1369_v31 = vmax.f32 %v4433_v58, %v4437_v7  ;;  %v4449_v51 = vsel %vm4382_vm6, %v569_v10, -9e+15 }
 0x109   : > { %6505 = vst [vmem:[#allocation51_spill] sm:$0xff] %v4449_v51  ;;  %v4453_v56 = vsel %vm4386_vm2, %v570_v32, -9e+15  ;;  %v4457_v60 = vsel %vm4404_vm13, %v571_v36, -9e+15  ;;  %v1300_v30 = vsel %vm1236_vm4, %v1204_v28, %v1268_v22  ;;  %vm509_vm9 = vcmp.gt.f32.partialorder %v477_v13, 0.0 }
 0x10a   : > { %6506 = vst [vmem:[#allocation52_spill] sm:$0xff] %v4453_v56  ;;  %6507 = vst [vmem:[#allocation53_spill] sm:$0xff] %v4457_v60  ;;  %v4461_v62 = vsel %vm4408_vm15, %v572_v46, -9e+15  ;;  %v541_v10 = vmul.f32 0.2, %v477_v13  ;;  %v811_v32 = vmax.f32 %v4449_v51, %v4453_v56  ;;  %v619_v56 = vunpack.c.3.s8 %v4310_v14 }
 0x10b   : > { %6508 = vst [vmem:[#allocation54_spill] sm:$0xff] %v4461_v62  ;;  %v542_v5 = vmul.f32 0.2, %v478_v40  ;;  %vm510_vm11 = vcmp.gt.f32.partialorder %v478_v40, 0.0  ;;  %v814_v36 = vmax.f32 %v4457_v60, %v4461_v62  ;;  %vm4485_vm1 = vcmp.ne.s32.totalorder %v709_v9, 0 }
 0x10c   : > { %v6522_v58 = vmov 0  ;;  %v6528_v57 = vmov 0  ;;  %v1727_v44 = vsub.s32 2, %v3961_v37 }
 0x10e   : > { %1364 = vmax.xlane.f32.xlu0 %v1363_v17  ;;  %v1267_v17 = vmul.f32 0.2, %v1203_v54 }
 0x110   : > { %v1299_v55 = vsel %vm1235_vm10, %v1203_v54, %v1267_v17  ;;  %v573_v54 = vsel %vm509_vm9, %v477_v13, %v541_v10  ;;  %v6516_v17 = vmov 0  ;;  %v3789_v10 = vld [vmem:[%s3878_s30 + $0x18] sm:$0xff] }
 0x111   : > { %v4499_v13 = vsel %vm4485_vm1, %v573_v54, -9e+15 }
 0x112   : > { %806 = vmax.xlane.f32.xlu1 %v805_v24  ;;  %809 = vmax.xlane.f32.xlu0 %v808_v1  ;;  %v1298_v24 = vsel %vm1234_vm5, %v1202_v19, %v1266_v6  ;;  %v1301_v1 = vsel %vm1237_vm0, %v1205_v16, %v1269_v47  ;;  %v4475_v19 = vsel %vm4386_vm2, %v1299_v55, -9e+15  ;;  %v4479_v16 = vsel %vm4404_vm13, %v1300_v30, -9e+15  ;;  %6519 = vst [vmem:[#allocation61_spill] sm:$0xff] %v4499_v13  ;;  %v3787_v55 = vld [vmem:[%s3878_s30 + $0x8] sm:$0xff] }
 0x113   : > { %v4471_v46 = vsel %vm4382_vm6, %v1298_v24, -9e+15  ;;  %6510 = vst [vmem:[#allocation56_spill] sm:$0xff] %v4475_v19  ;;  %6511 = vst [vmem:[#allocation57_spill] sm:$0xff] %v4479_v16  ;;  %v4483_v28 = vsel %vm4408_vm15, %v1301_v1, -9e+15  ;;  %v574_v47 = vsel %vm510_vm11, %v478_v40, %v542_v5 }
 0x114   : > { %6509 = vst [vmem:[#allocation55_spill] sm:$0xff] %v4471_v46  ;;  %6512 = vst [vmem:[#allocation58_spill] sm:$0xff] %v4483_v28  ;;  %v6513_v6 = vmov 0  ;;  %vm4489_vm0 = vcmp.ne.s32.totalorder %v710_v27, 0  ;;  %v1372_v22 = vmax.f32 %v4471_v46, %v4475_v19  ;;  %v4507_v27 = vpop.permute.xlu1 %1149  ;;  %v3786_v24 = vld [vmem:[%s3878_s30] sm:$0xff]  ;;  %v3788_v1 = vld [vmem:[%s3878_s30 + $0x10] sm:$0xff] }
 0x115   : > { %v6514_v6 = vsel %vm4485_vm1, 4294967295, %v6513_v6  ;;  %v6517_v17 = vsel %vm4489_vm0, 4294967295, %v6516_v17  ;;  %v4503_v40 = vsel %vm4489_vm0, %v574_v47, -9e+15  ;;  %v3792_v47 = vld [vmem:[%s3878_s30 + $0x30] sm:$0xff] }
 0x116   : > { %1367 = vmax.xlane.f32.xlu1 %v1366_v48  ;;  %1370 = vmax.xlane.f32.xlu0 %v1369_v31  ;;  %6515 = vst [vmem:[#allocation59_spill] sm:$0xff] %v6514_v6  ;;  %6518 = vst [vmem:[#allocation60_spill] sm:$0xff] %v6517_v17  ;;  %v1375_v48 = vmax.f32 %v4479_v16, %v4483_v28  ;;  %v817_v9 = vmax.f32 %v4499_v13, %v4503_v40  ;;  %v3800_v28 = vld [vmem:[%s3878_s30 + $0x78] sm:$0xff] }
 0x117   : > { %6520 = vst [vmem:[#allocation62_spill] sm:$0xff] %v4503_v40  ;;  %v618_v40 = vunpack.c.2.s8 %v4313_v42 }
 0x118   : > { %v4509_v31 = vpop.permute.xlu1 %1153 }
 0x119   : > { %v1208_v51 = vadd.f32 %v3984_v11, %v4509_v31 }
 0x11a   : > { %812 = vmax.xlane.f32.xlu1 %v811_v32  ;;  %815 = vmax.xlane.f32.xlu0 %v814_v36  ;;  %v3790_v32 = vld [vmem:[%s3878_s30 + $0x28] sm:$0xff]  ;;  %v3791_v36 = vld [vmem:[%s3878_s30 + $0x20] sm:$0xff] }
 0x11c   : > { %v4513_v30 = vpop.permute.xlu1 %431 }
 0x11d   : > { %v483_v29 = vadd.f32 %v3988_v18, %v4513_v30 }
 0x11e   : > { %1373 = vmax.xlane.f32.xlu1 %v1372_v22  ;;  %1376 = vmax.xlane.f32.xlu0 %v1375_v48  ;;  %v3793_v22 = vld [vmem:[%s3878_s30 + $0x40] sm:$0xff] }
 0x120   : > { %v4517_v5 = vpop.permute.xlu1 %1161 }
 0x122   : > { %818 = vmax.xlane.f32.xlu1 %v817_v9  ;;  %v3794_v9 = vld [vmem:[%s3878_s30 + $0x48] sm:$0xff] }
 0x12e   : > { %v4521_v54 = vpop.xlane.xlu1 %785 }
 0x132   : > { %v4525_v48 = vpop.xlane.xlu1 %1343 }
 0x133   : > { %2223 = vperm.xlu1 %3372, %v3786_v24   ;;  %v3795_v24 = vld [vmem:[%s3878_s30 + $0x58] sm:$0xff] }
 0x134   : > { %1666 = vperm.xlu0 %3371, %v3787_v55  }
 0x137   : > { %2227 = vperm.xlu1 %3372, %v3787_v55   ;;  %v3796_v55 = vld [vmem:[%s3878_s30 + $0x50] sm:$0xff] }
 0x138   : > { %1670 = vperm.xlu0 %3371, %v3788_v1   ;;  %v4530_v1 = vpop.xlane.xlu1 %788 }
 0x13b   : > { %2235 = vperm.xlu1 %3372, %v3789_v10   ;;  %v3797_v10 = vld [vmem:[%s3878_s30 + $0x60] sm:$0xff] }
 0x13c   : > { %1682 = vperm.xlu0 %3371, %v3790_v32   ;;  %v3798_v32 = vld [vmem:[%s3878_s30 + $0x68] sm:$0xff] }
 0x13f   : > { %2239 = vperm.xlu1 %3372, %v3791_v36   ;;  %v4534_v36 = vpop.xlane.xlu1 %791 }
 0x140   : > { %1686 = vperm.xlu0 %3371, %v3792_v47  }
 0x143   : > { %2247 = vperm.xlu1 %3372, %v3792_v47   ;;  %v3799_v47 = vld [vmem:[%s3878_s30 + $0x70] sm:$0xff]  ;;  %v4541_v13 = vpop.xlane.xlu1 %1352 }
 0x144   : > { %1694 = vperm.xlu0 %3371, %v3793_v22   ;;  %v615_v22 = vunpack.c.1.s8 %v4310_v14 }
 0x147   : > { %2259 = vperm.xlu1 %3372, %v3794_v9   ;;  %v616_v9 = vunpack.c.1.s8 %v4313_v42  ;;  %v4544_v19 = vpop.xlane.xlu1 %794 }
 0x148   : > { %1706 = vperm.xlu0 %3371, %v3795_v24  }
 0x14b   : > { %2263 = vperm.xlu1 %3372, %v3796_v55   ;;  %v617_v55 = vunpack.c.2.s8 %v4310_v14  ;;  %v4546_v62 = vpop.xlane.xlu1 %1355  ;;  %v1209_v14 = vadd.f32 %v3986_v12, %v4509_v31  ;;  %v482_v31 = vadd.f32 %v3990_v20, %v4187_v23 }
 0x14c   : > { %1710 = vperm.xlu0 %3371, %v3797_v10  }
 0x14d   : > { %v649_v16 = vpack.c.b16 %v618_v40, %v617_v55  ;;  %v480_v40 = vadd.f32 %v3990_v20, %v4162_v41  ;;  %v1273_v50 = vmul.f32 0.2, %v1209_v14  ;;  %vm1241_vm15 = vcmp.gt.f32.partialorder %v1209_v14, 0.0 }
 0x14e   : > { %v546_v59 = vmul.f32 0.2, %v482_v31  ;;  %vm514_vm2 = vcmp.gt.f32.partialorder %v482_v31, 0.0 }
 0x14f   : > { %2267 = vperm.xlu1 %3372, %v3795_v24   ;;  %v647_v24 = vpack.c.b16 %v616_v9, %v615_v22  ;;  %v650_v46 = vpack.c.b8 %v649_v16, %v649_v16  ;;  %v620_v22 = vunpack.c.3.s8 %v4313_v42  ;;  %v4560_v7 = vpop.xlane.xlu1 %1358  ;;  %v544_v42 = vmul.f32 0.2, %v480_v40 }
 0x150   : > { %1714 = vperm.xlu0 %3371, %v3798_v32   ;;  %6521 = vst [vmem:[#allocation63_spill] sm:$0xff] %v4560_v7  ;;  %vm512_vm4 = vcmp.gt.f32.partialorder %v480_v40, 0.0  ;;  %v1305_v4 = vsel %vm1241_vm15, %v1209_v14, %v1273_v50  ;;  %vm515_vm15 = vcmp.gt.f32.partialorder %v483_v29, 0.0 }
 0x151   : > { %vm667_vm5 = vnez %v650_v46  ;;  %v576_v0 = vsel %vm512_vm4, %v480_v40, %v544_v42  ;;  %v1206_v40 = vadd.f32 %v3984_v11, %v4507_v27 }
 0x153   : > { %2271 = vperm.xlu1 %3372, %v3797_v10   ;;  %v648_v10 = vpack.c.b8 %v647_v24, %v647_v24  ;;  %vm1238_vm6 = vcmp.gt.f32.partialorder %v1206_v40, 0.0 }
 0x154   : > { %1718 = vperm.xlu0 %3371, %v3799_v47  }
 0x155   : > { %vm666_vm3 = vnez %v648_v10  ;;  %v651_v10 = vpack.c.b16 %v620_v22, %v619_v56  ;;  %v481_v56 = vadd.f32 %v3988_v18, %v4187_v23  ;;  %v1731_v23 = vsub.s32 6, %v3961_v37 }
 0x156   : > { %v682_v60 = vsel %vm666_vm3, 16843009, %v6464_v3 }
 0x157   : > { %2275 = vperm.xlu1 %3372, %v3798_v32   ;;  %v479_v32 = vadd.f32 %v3988_v18, %v4162_v41  ;;  %v711_v16 = vunpack.c.0.s8 %v682_v60  ;;  %v712_v9 = vunpack.c.1.s8 %v682_v60  ;;  %v6525_v60 = vmov 0 }
 0x158   : > { %1722 = vperm.xlu0 %3371, %v3800_v28   ;;  %vm513_vm13 = vcmp.gt.f32.partialorder %v481_v56, 0.0 }
 0x159   : > { %v543_v46 = vmul.f32 0.2, %v479_v32  ;;  %vm511_vm10 = vcmp.gt.f32.partialorder %v479_v32, 0.0  ;;  %vm4564_vm9 = vcmp.ne.s32.totalorder %v711_v16, 0  ;;  %vm4568_vm11 = vcmp.ne.s32.totalorder %v712_v9, 0 }
 0x15a   : > { %v6523_v58 = vsel %vm4564_vm9, 4294967295, %v6522_v58  ;;  %v6526_v60 = vsel %vm4568_vm11, 4294967295, %v6525_v60  ;;  %v1272_v16 = vmul.f32 0.2, %v1208_v51  ;;  %v6531_v9 = vmov 0 }
 0x15b   : > { %2279 = vperm.xlu1 %3372, %v3799_v47   ;;  %v683_v47 = vsel %vm667_vm5, 16843009, %v6464_v3  ;;  %6524 = vst [vmem:[#allocation64_spill] sm:$0xff] %v6523_v58  ;;  %6527 = vst [vmem:[#allocation65_spill] sm:$0xff] %v6526_v60  ;;  %v575_v22 = vsel %vm511_vm10, %v479_v32, %v543_v46  ;;  %vm1240_vm10 = vcmp.gt.f32.partialorder %v1208_v51, 0.0  ;;  %v1207_v46 = vadd.f32 %v3986_v12, %v4507_v27 }
 0x15c   : > { %v713_v55 = vunpack.c.0.s8 %v683_v47  ;;  %v714_v24 = vunpack.c.1.s8 %v683_v47  ;;  %v652_v47 = vpack.c.b8 %v651_v10, %v651_v10  ;;  %v4606_v42 = vsel %vm4568_vm11, %v576_v0, -9e+15 }
 0x15d   : > { %6536 = vst [vmem:[#allocation70_spill] sm:$0xff] %v4606_v42  ;;  %v484_v27 = vadd.f32 %v3990_v20, %v4513_v30  ;;  %v1304_v8 = vsel %vm1240_vm10, %v1208_v51, %v1272_v16  ;;  %vm1239_vm14 = vcmp.gt.f32.partialorder %v1207_v46, 0.0  ;;  %v4630_v30 = vsel %vm4568_vm11, %v1305_v4, -9e+15 }
 0x15e   : > { %vm4579_vm3 = vcmp.ne.s32.totalorder %v713_v55, 0  ;;  %vm4583_vm5 = vcmp.ne.s32.totalorder %v714_v24, 0  ;;  %v4596_v55 = vpop.xlane.xlu1 %803  ;;  %v4600_v24 = vsel %vm4564_vm9, %v575_v22, -9e+15  ;;  %vm668_vm4 = vnez %v652_v47  ;;  %v4615_v22 = vld [vmem:[%s6091_s3] sm:$0xff]  ;;  %6540 = vst [vmem:[#allocation74_spill] sm:$0xff] %v4630_v30 }
 0x15f   : > { %2283 = vperm.xlu1 %3372, %v3800_v28   ;;  %v1158_v28 = vpop.permute.xlu0 %1157  ;;  %v6529_v57 = vsel %vm4579_vm3, 4294967295, %v6528_v57  ;;  %v6532_v9 = vsel %vm4583_vm5, 4294967295, %v6531_v9  ;;  %6534 = vst [vmem:[#allocation68_spill] sm:$0xff] %v4596_v55  ;;  %6535 = vst [vmem:[#allocation69_spill] sm:$0xff] %v4600_v24  ;;  %v1728_v2 = vrot.slane %v4615_v22, %v1727_v44  ;;  %v1732_v0 = vrot.slane %v4615_v22, %v1731_v23 }
 0x160   : > { %v4577_v63 = vadd.f32 %v3984_v11, %v1158_v28  ;;  %6530 = vst [vmem:[#allocation66_spill] sm:$0xff] %v6529_v57  ;;  %6533 = vst [vmem:[#allocation67_spill] sm:$0xff] %v6532_v9  ;;  %v4590_v32 = vadd.f32 %v3986_v12, %v1158_v28  ;;  %v545_v28 = vmul.f32 0.2, %v481_v56  ;;  %v1270_v47 = vmul.f32 0.2, %v1206_v40 }
 0x161   : > { %6537 = vst [vmem:[#allocation71_spill] sm:$0xff] %v4615_v22  ;;  %v684_v18 = vsel %vm668_vm4, 16843009, %v6464_v3  ;;  %v1271_v55 = vmul.f32 0.2, %v1207_v46  ;;  %v820_v50 = vmax.f32 %v4600_v24, %v4606_v42  ;;  %v578_v23 = vsel %vm514_vm2, %v482_v31, %v546_v59 }
 0x162   : > { %v4626_v51 = vsel %vm4564_vm9, %v1304_v8, -9e+15  ;;  %v4632_v14 = vpop.xlane.xlu1 %1361  ;;  %v577_v16 = vsel %vm513_vm13, %v481_v56, %v545_v28  ;;  %v547_v22 = vmul.f32 0.2, %v483_v29  ;;  %v548_v3 = vmul.f32 0.2, %v484_v27 }
 0x163   : > { %v4562_v41 = vpop.xlane.xlu0 %782  ;;  %6539 = vst [vmem:[#allocation73_spill] sm:$0xff] %v4626_v51  ;;  %vm516_vm10 = vcmp.gt.f32.partialorder %v484_v27, 0.0  ;;  %v716_v7 = vunpack.c.1.s8 %v684_v18  ;;  %v4634_v42 = vrot.slane %v1728_v2, %v1727_v44  ;;  %v4636_v24 = vrot.slane %v1732_v0, %v1727_v44 }
 0x164   : > { %v1381_v8 = vmax.f32 %v4626_v51, %v4630_v30  ;;  %v1212_v4 = vadd.f32 %v3984_v11, %v4517_v5  ;;  %v4644_v59 = vsel %vm4579_vm3, %v577_v16, -9e+15  ;;  %v4648_v56 = vsel %vm4583_vm5, %v578_v23, -9e+15 }
 0x165   : > { %6541 = vst [vmem:[#allocation75_spill] sm:$0xff] %v4644_v59  ;;  %6542 = vst [vmem:[#allocation76_spill] sm:$0xff] %v4648_v56  ;;  %v1302_v31 = vsel %vm1238_vm6, %v1206_v40, %v1270_v47  ;;  %v1213_v2 = vadd.f32 %v3986_v12, %v4517_v5  ;;  %v1303_v44 = vsel %vm1239_vm14, %v1207_v46, %v1271_v55  ;;  %v6543_v11 = vmov 0 }
 0x166   : > { %v579_v28 = vsel %vm515_vm15, %v483_v29, %v547_v22  ;;  %v580_v0 = vsel %vm516_vm10, %v484_v27, %v548_v3  ;;  %vm4660_vm13 = vcmp.ne.s32.totalorder %v716_v7, 0  ;;  %v1274_v40 = vmul.f32 0.2, %v4577_v63  ;;  %v1663_v12 = vpop.permute.xlu1 %1662 }
 0x167   : > { %v4602_v10 = vpop.xlane.xlu0 %1346  ;;  %v1275_v47 = vmul.f32 0.2, %v4590_v32  ;;  %vm1242_vm6 = vcmp.gt.f32.partialorder %v4577_v63, 0.0  ;;  %vm1243_vm14 = vcmp.gt.f32.partialorder %v4590_v32, 0.0  ;;  %v823_v29 = vmax.f32 %v4644_v59, %v4648_v56 }
 0x168   : > { %v4672_v5 = vsel %vm4485_vm1, %v1302_v31, -9e+15  ;;  %v4676_v7 = vsel %vm4489_vm0, %v1303_v44, -9e+15  ;;  %v1276_v46 = vmul.f32 0.2, %v1212_v4  ;;  %v1744_v16 = vadd.f32 %v4636_v24, %v1663_v12 }
 0x169   : > { %6549 = vst [vmem:[#allocation79_spill] sm:$0xff] %v4672_v5  ;;  %6550 = vst [vmem:[#allocation80_spill] sm:$0xff] %v4676_v7  ;;  %v4684_v27 = vsel %vm4660_vm13, %v580_v0, -9e+15  ;;  %v1277_v22 = vmul.f32 0.2, %v1213_v2  ;;  %v1306_v23 = vsel %vm1242_vm6, %v4577_v63, %v1274_v40  ;;  %v1307_v3 = vsel %vm1243_vm14, %v4590_v32, %v1275_v47 }
 0x16a   : > { %6552 = vst [vmem:[#allocation82_spill] sm:$0xff] %v4684_v27  ;;  %vm1244_vm4 = vcmp.gt.f32.partialorder %v1212_v4, 0.0  ;;  %vm1245_vm15 = vcmp.gt.f32.partialorder %v1213_v2, 0.0  ;;  %v1378_v31 = vmax.f32 %v4672_v5, %v4676_v7  ;;  %v4702_v0 = vsel %vm4583_vm5, %v1307_v3, -9e+15  ;;  %v4704_v63 = vpop.permute.xlu1 %1674 }
 0x16b   : > { %v4620_v20 = vpop.xlane.xlu0 %1349  ;;  %6554 = vst [vmem:[#allocation84_spill] sm:$0xff] %v4702_v0  ;;  %v1308_v32 = vsel %vm1244_vm4, %v1212_v4, %v1276_v46  ;;  %v1309_v40 = vsel %vm1245_vm15, %v1213_v2, %v1277_v22  ;;  %vm1776_vm6 = vcmp.gt.f32.partialorder %v1744_v16, 0.0  ;;  %vm6558_vm14 = vnez %v6401_v26 }
 0x16c   : > { %6538 = vst [vmem:[#allocation72_spill] sm:$0xff] %v4620_v20  ;;  %v715_v20 = vunpack.c.0.s8 %v684_v18  ;;  %v4716_v3 = vsel %vm4660_vm13, %v1309_v40, -9e+15 }
 0x16d   : > { %6556 = vst [vmem:[#allocation86_spill] sm:$0xff] %v4716_v3 }
 0x16e   : > { %vm4656_vm2 = vcmp.ne.s32.totalorder %v715_v20, 0  ;;  %v1743_v20 = vadd.f32 %v4634_v42, %v1663_v12  ;;  %v1808_v12 = vmul.f32 0.2, %v1744_v16  ;;  %v4718_v46 = vpop.permute.xlu1 %1678 }
 0x16f   : > { %v4654_v18 = vpop.xlane.xlu0 %797  ;;  %v6544_v11 = vsel %vm4656_vm2, 4294967295, %v6543_v11  ;;  %v4680_v55 = vsel %vm4656_vm2, %v579_v28, -9e+15  ;;  %v4698_v28 = vsel %vm4579_vm3, %v1306_v23, -9e+15 }
 0x170   : > { %6545 = vst [vmem:[#allocation77_spill] sm:$0xff] %v6544_v11  ;;  %6551 = vst [vmem:[#allocation81_spill] sm:$0xff] %v4680_v55  ;;  %v826_v44 = vmax.f32 %v4680_v55, %v4684_v27  ;;  %v1807_v47 = vmul.f32 0.2, %v1743_v20  ;;  %vm1775_vm10 = vcmp.gt.f32.partialorder %v1743_v20, 0.0  ;;  %v1384_v23 = vmax.f32 %v4698_v28, %v4702_v0  ;;  %v6586_v55 = vld [vmem:[#allocation21_spill] sm:$0xff] }
 0x171   : > { %6553 = vst [vmem:[#allocation83_spill] sm:$0xff] %v4698_v28  ;;  %v4712_v56 = vsel %vm4656_vm2, %v1308_v32, -9e+15  ;;  %v1840_v2 = vsel %vm1776_vm6, %v1744_v16, %v1808_v12  ;;  %v829_v12 = vsub.f32 %v4033_v38, %v4562_v41  ;;  %v1393_v0 = vsub.f32 %v4092_v53, %v4602_v10 }
 0x172   : > { %6555 = vst [vmem:[#allocation85_spill] sm:$0xff] %v4712_v56  ;;  %v1839_v4 = vsel %vm1775_vm10, %v1743_v20, %v1807_v47  ;;  %v1387_v22 = vmax.f32 %v4712_v56, %v4716_v3  ;;  %v4734_v16 = vpop.permute.xlu1 %1690 }
 0x176   : > { %v4738_v47 = vpop.permute.xlu1 %1698 }
 0x177   : > { %821 = vmax.xlane.f32.xlu0 %v820_v50  ;;  %v6546_v50 = vmov 0 }
 0x178   : > { %v6547_v50 = vsel %vm4660_vm13, 4294967295, %v6546_v50 }
 0x179   : > { %6548 = vst [vmem:[#allocation78_spill] sm:$0xff] %v6547_v50 }
 0x17a   : > { %v4754_v38 = vpop.permute.xlu1 %1702 }
 0x17b   : > { %1382 = vmax.xlane.f32.xlu0 %v1381_v8  ;;  %v4690_v8 = vpop.xlane.xlu0 %800 }
 0x17f   : > { %824 = vmax.xlane.f32.xlu0 %v823_v29  ;;  %v4706_v29 = vpop.permute.xlu0 %2231 }
 0x183   : > { %1379 = vmax.xlane.f32.xlu1 %v1378_v31  ;;  %827 = vmax.xlane.f32.xlu0 %v826_v44  ;;  %v4724_v31 = vsel %vm3996_vm8, %v1839_v4, -9e+15  ;;  %v4728_v44 = vsel %vm6558_vm14, %v1840_v2, -9e+15  ;;  %v4730_v32 = vpop.permute.xlu0 %2243  ;;  %v831_v2 = vsub.f32 %v4065_v34, %v4521_v54 }
 0x184   : > { %6557 = vst [vmem:[#allocation87_spill] sm:$0xff] %v4724_v31  ;;  %6559 = vst [vmem:[#allocation88_spill] sm:$0xff] %v4728_v44  ;;  %v1903_v20 = vmax.f32 %v4724_v31, %v4728_v44  ;;  %v861_v44 = vmul.f32 1.442695, %v829_v12 }
 0x186   : > { %3386 = vpow2.f32 %v861_v44 }
 0x187   : > { %1385 = vmax.xlane.f32.xlu0 %v1384_v23  ;;  %v4736_v40 = vpop.permute.xlu0 %2251  ;;  %v830_v23 = vsub.f32 %v4037_v39, %v4562_v41  ;;  %v865_v39 = vmul.f32 1.442695, %v831_v2  ;;  %v1390_v41 = vsub.f32 %v4084_v49, %v4525_v48  ;;  %v834_v49 = vsub.f32 %v4108_v21, %v4530_v1  ;;  %v6565_v21 = vld [vmem:[#allocation8_spill] sm:$0xff] }
 0x189   : > { %v863_v31 = vmul.f32 1.442695, %v830_v23  ;;  %v1422_v53 = vmul.f32 1.442695, %v1390_v41 }
 0x18b   : > { %1388 = vmax.xlane.f32.xlu0 %v1387_v22  ;;  %v4744_v4 = vpop.permute.xlu0 %2255  ;;  %v832_v22 = vsub.f32 %v4069_v35, %v4521_v54  ;;  %v1391_v35 = vsub.f32 %v4088_v52, %v4525_v48  ;;  %3388 = vpow2.f32 %v863_v31  ;;  %v835_v52 = vsub.f32 %v4121_v33, %v4534_v36  ;;  %v6566_v33 = vld [vmem:[#allocation12_spill] sm:$0xff] }
 0x18c   : > { %3390 = vpow2.f32 %v865_v39  ;;  %v836_v48 = vsub.f32 %v4125_v61, %v4534_v36  ;;  %v837_v39 = vsub.f32 %v6566_v33, %v4544_v19  ;;  %v6567_v61 = vld [vmem:[#allocation13_spill] sm:$0xff] }
 0x18d   : > { %v867_v34 = vmul.f32 1.442695, %v832_v22  ;;  %v1424_v2 = vmul.f32 1.442695, %v1391_v35  ;;  %v871_v22 = vmul.f32 1.442695, %v834_v49  ;;  %v838_v36 = vsub.f32 %v6567_v61, %v4544_v19 }
 0x18e   : > { %v875_v41 = vmul.f32 1.442695, %v836_v48  ;;  %v6572_v49 = vld [vmem:[#allocation16_spill] sm:$0xff] }
 0x18f   : > { %1904 = vmax.xlane.f32.xlu0 %v1903_v20  ;;  %v1392_v20 = vsub.f32 %v4079_v45, %v4602_v10  ;;  %v1428_v45 = vmul.f32 1.442695, %v1393_v0  ;;  %v833_v10 = vsub.f32 %v4104_v15, %v4530_v1  ;;  %3392 = vpow2.f32 %v867_v34 }
 0x190   : > { %v1396_v15 = vsub.f32 %v4141_v43, %v4541_v13  ;;  %v1397_v1 = vsub.f32 %v6565_v21, %v4541_v13  ;;  %v2288_v34 = vsub.s32 3, %v3961_v37  ;;  %v2292_v13 = vsub.s32 7, %v3961_v37 }
 0x191   : > { %v1426_v54 = vmul.f32 1.442695, %v1392_v20  ;;  %v869_v44 = vmul.f32 1.442695, %v833_v10  ;;  %v873_v20 = vmul.f32 1.442695, %v835_v52  ;;  %v1399_v19 = vsub.f32 %v6572_v49, %v4546_v62 }
 0x192   : > { %v1434_v43 = vmul.f32 1.442695, %v1396_v15  ;;  %v877_v21 = vmul.f32 1.442695, %v837_v39  ;;  %v6576_v15 = vld [vmem:[#allocation19_spill] sm:$0xff] }
 0x193   : > { %3394 = vpow2.f32 %v1426_v54  ;;  %v4789_v54 = vpop.eup %3386  ;;  %v879_v37 = vmul.f32 1.442695, %v838_v36  ;;  %v6581_v49 = vld [vmem:[#allocation71_spill] sm:$0xff] }
 0x194   : > { %3396 = vpow2.f32 %v1428_v45  ;;  %6569 = vst [vmem:[#allocation12_spill] sm:$0xff] %v4789_v54  ;;  %v6570_v45 = vld [vmem:[#allocation15_spill] sm:$0xff]  ;;  %v2289_v28 = vrot.slane %v6581_v49, %v2288_v34 }
 0x195   : > { %3398 = vpow2.f32 %v1422_v53  ;;  %v1398_v53 = vsub.f32 %v6570_v45, %v4546_v62  ;;  %v4794_v10 = vpop.eup %3388  ;;  %v6578_v45 = vld [vmem:[#allocation20_spill] sm:$0xff] }
 0x196   : > { %3400 = vpow2.f32 %v1424_v2  ;;  %6571 = vst [vmem:[#allocation13_spill] sm:$0xff] %v4794_v10  ;;  %v1436_v2 = vmul.f32 1.442695, %v1397_v1  ;;  %v4800_v48 = vpop.eup %3390 }
 0x197   : > { %3402 = vpow2.f32 %v869_v44  ;;  %6574 = vst [vmem:[#allocation16_spill] sm:$0xff] %v4800_v48  ;;  %v6575_v44 = vld [vmem:[#allocation63_spill] sm:$0xff]  ;;  %v1438_v62 = vmul.f32 1.442695, %v1398_v53 }
 0x198   : > { %3404 = vpow2.f32 %v871_v22  ;;  %v1400_v33 = vsub.f32 %v6576_v15, %v6575_v44  ;;  %v1401_v22 = vsub.f32 %v6578_v45, %v6575_v44  ;;  %v1440_v15 = vmul.f32 1.442695, %v1399_v19  ;;  %v6585_v45 = vld [vmem:[#allocation68_spill] sm:$0xff] }
 0x199   : > { %3406 = vpow2.f32 %v873_v20  ;;  %v4804_v61 = vpop.eup %3392  ;;  %v2293_v20 = vrot.slane %v6581_v49, %v2292_v13  ;;  %v1749_v13 = vadd.f32 %v4634_v42, %v4704_v63 }
 0x19a   : > { %6577 = vst [vmem:[#allocation63_spill] sm:$0xff] %v4804_v61  ;;  %3408 = vpow2.f32 %v875_v41  ;;  %v1442_v41 = vmul.f32 1.442695, %v1400_v33  ;;  %v1444_v44 = vmul.f32 1.442695, %v1401_v22  ;;  %v4836_v33 = vadd.f32 %v4804_v61, %v4800_v48 }
 0x19b   : > { %v4756_v3 = vpop.xlane.xlu0 %1364  ;;  %3410 = vpow2.f32 %v1434_v43  ;;  %v843_v43 = vsub.f32 %v6586_v55, %v6585_v45  ;;  %v4830_v19 = vrot.slane %v2293_v20, %v2288_v34  ;;  %v4840_v55 = vadd.f32 %v4794_v10, %v4789_v54  ;;  %v6592_v20 = vld [vmem:[#allocation72_spill] sm:$0xff] }
 0x19c   : > { %6560 = vst [vmem:[#allocation89_spill] sm:$0xff] %v4756_v3  ;;  %3412 = vpow2.f32 %v1436_v2  ;;  %v4828_v2 = vrot.slane %v2289_v28, %v2288_v34  ;;  %v6590_v28 = vld [vmem:[#allocation22_spill] sm:$0xff]  ;;  %vm6600_vm5 = vcmp.gt.f32.partialorder %v1749_v13, 0.0 }
 0x19d   : > { %v4810_v56 = vpop.eup %3394  ;;  %3414 = vpow2.f32 %v877_v21  ;;  %v1750_v21 = vadd.f32 %v4636_v24, %v4704_v63  ;;  %v844_v22 = vsub.f32 %v6590_v28, %v6585_v45  ;;  %v4856_v49 = vmul.f32 1.442695, %v843_v43 }
 0x19e   : > { %6580 = vst [vmem:[#allocation20_spill] sm:$0xff] %v4810_v56  ;;  %v4814_v39 = vpop.eup %3396  ;;  %3416 = vpow2.f32 %v879_v37  ;;  %v2308_v10 = vadd.f32 %v4828_v2, %v4706_v29  ;;  %v4876_v7 = vadd.f32 %v4830_v19, %v4706_v29  ;;  %v2315_v25 = vadd.f32 %v4830_v19, %v4730_v32 }
 0x19f   : > { %v4762_v12 = vpop.xlane.xlu1 %806  ;;  %v4764_v23 = vpop.xlane.xlu0 %809  ;;  %6582 = vst [vmem:[#allocation71_spill] sm:$0xff] %v4814_v39  ;;  %3418 = vpow2.f32 %v1438_v62  ;;  %v4848_v34 = vadd.f32 %v4814_v39, %v4810_v56  ;;  %v1813_v56 = vmul.f32 0.2, %v1749_v13  ;;  %v1814_v43 = vmul.f32 0.2, %v1750_v21 }
 0x1a0   : > { %6561 = vst [vmem:[#allocation90_spill] sm:$0xff] %v4762_v12  ;;  %6562 = vst [vmem:[#allocation91_spill] sm:$0xff] %v4764_v23  ;;  %v4816_v27 = vpop.eup %3398  ;;  %3420 = vpow2.f32 %v1440_v15  ;;  %v6593_v15 = vld [vmem:[#allocation23_spill] sm:$0xff]  ;;  %vm6602_vm3 = vcmp.gt.f32.partialorder %v1750_v21, 0.0 }
 0x1a1   : > { %6583 = vst [vmem:[#allocation94_spill] sm:$0xff] %v4816_v27  ;;  %v4818_v36 = vpop.eup %3400  ;;  %3422 = vpow2.f32 %v1442_v41  ;;  %v1394_v54 = vsub.f32 %v6593_v15, %v6592_v20  ;;  %v6594_v41 = vld [vmem:[#allocation24_spill] sm:$0xff]  ;;  %v1845_v50 = vsel %vm6600_vm5, %v1749_v13, %v1813_v56  ;;  %v6609_v13 = vld [vmem:[#allocation3_spill] sm:$0xff] }
 0x1a2   : > { %6584 = vst [vmem:[#allocation95_spill] sm:$0xff] %v4818_v36  ;;  %v4842_v37 = vpop.eup %3402  ;;  %v4852_v63 = vadd.f32 %v4818_v36, %v4816_v27  ;;  %3424 = vpow2.f32 %v1444_v44  ;;  %vm6610_vm5 = vnez %v6609_v13 }
 0x1a3   : > { %v4774_v0 = vpop.xlane.xlu1 %1367  ;;  %v4776_v31 = vpop.xlane.xlu0 %1370  ;;  %6589 = vst [vmem:[#allocation96_spill] sm:$0xff] %v4842_v37  ;;  %3426 = vpow2.f32 %v4856_v49 }
 0x1a4   : > { %6563 = vst [vmem:[#allocation92_spill] sm:$0xff] %v4774_v0  ;;  %6564 = vst [vmem:[#allocation93_spill] sm:$0xff] %v4776_v31  ;;  %v4854_v62 = vpop.eup %3404  ;;  %v6615_v31 = vld [vmem:[#allocation6_spill] sm:$0xff] }
 0x1a5   : > { %6591 = vst [vmem:[#allocation22_spill] sm:$0xff] %v4854_v62  ;;  %v4862_v48 = vpop.eup %3406 }
 0x1a6   : > { %6595 = vst [vmem:[#allocation72_spill] sm:$0xff] %v4862_v48  ;;  %v4867_v44 = vpop.eup %3408 }
 0x1a7   : > { %v4787_v35 = vpop.xlane.xlu1 %812  ;;  %v4798_v52 = vpop.xlane.xlu0 %815  ;;  %6596 = vst [vmem:[#allocation23_spill] sm:$0xff] %v4867_v44 }
 0x1a8   : > { %6568 = vst [vmem:[#allocation8_spill] sm:$0xff] %v4787_v35  ;;  %6573 = vst [vmem:[#allocation15_spill] sm:$0xff] %v4798_v52  ;;  %v4870_v61 = vpop.eup %3410  ;;  %v1846_v52 = vsel %vm6602_vm3, %v1750_v21, %v1814_v43  ;;  %v4904_v43 = vmul.f32 1.442695, %v844_v22  ;;  %vm6616_vm3 = vnez %v6615_v31  ;;  %v2372_v22 = vmul.f32 0.2, %v2308_v10 }
 0x1a9   : > { %6597 = vst [vmem:[#allocation24_spill] sm:$0xff] %v4870_v61  ;;  %v4878_v5 = vpop.eup %3412  ;;  %v6635_v31 = vld [vmem:[#allocation11_spill] sm:$0xff] }
 0x1aa   : > { %6598 = vst [vmem:[#allocation97_spill] sm:$0xff] %v4878_v5  ;;  %v4880_v9 = vpop.eup %3414  ;;  %3428 = vpow2.f32 %v4904_v43 }
 0x1ab   : > { %v4808_v1 = vpop.xlane.xlu1 %1373  ;;  %v4822_v53 = vpop.xlane.xlu0 %1376  ;;  %6599 = vst [vmem:[#allocation98_spill] sm:$0xff] %v4880_v9 }
 0x1ac   : > { %6579 = vst [vmem:[#allocation19_spill] sm:$0xff] %v4808_v1  ;;  %6587 = vst [vmem:[#allocation68_spill] sm:$0xff] %v4822_v53  ;;  %v4885_v29 = vpop.eup %3416 }
 0x1ad   : > { %6601 = vst [vmem:[#allocation99_spill] sm:$0xff] %v4885_v29  ;;  %v4888_v17 = vpop.eup %3418 }
 0x1ae   : > { %6603 = vst [vmem:[#allocation100_spill] sm:$0xff] %v4888_v17  ;;  %v4891_v35 = vpop.eup %3420 }
 0x1af   : > { %v4824_v59 = vpop.xlane.xlu1 %818  ;;  %6605 = vst [vmem:[#allocation101_spill] sm:$0xff] %v4891_v35  ;;  %v4902_v21 = vpop.eup %3422 }
 0x1b0   : > { %6588 = vst [vmem:[#allocation21_spill] sm:$0xff] %v4824_v59  ;;  %6613 = vst [vmem:[#allocation102_spill] sm:$0xff] %v4902_v21 }
 0x1b3   : > { %v2224_v45 = vpop.permute.xlu1 %2223  ;;  %v1667_v28 = vpop.permute.xlu0 %1666 }
 0x1b4   : > { %v2304_v39 = vadd.f32 %v4828_v2, %v2224_v45  ;;  %v2305_v27 = vadd.f32 %v4830_v19, %v2224_v45  ;;  %v1745_v36 = vadd.f32 %v4634_v42, %v1667_v28  ;;  %v1746_v15 = vadd.f32 %v4636_v24, %v1667_v28 }
 0x1b6   : > { %vm1777_vm10 = vcmp.gt.f32.partialorder %v1745_v36, 0.0  ;;  %v1809_v45 = vmul.f32 0.2, %v1745_v36  ;;  %vm1778_vm6 = vcmp.gt.f32.partialorder %v1746_v15, 0.0  ;;  %v1810_v51 = vmul.f32 0.2, %v1746_v15 }
 0x1b7   : > { %v2228_v30 = vpop.permute.xlu1 %2227  ;;  %v2368_v59 = vmul.f32 0.2, %v2304_v39  ;;  %v2369_v1 = vmul.f32 0.2, %v2305_v27  ;;  %vm6604_vm13 = vcmp.gt.f32.partialorder %v2304_v39, 0.0 }
 0x1b8   : > { %v2306_v28 = vadd.f32 %v4828_v2, %v2228_v30  ;;  %v2307_v57 = vadd.f32 %v4830_v19, %v2228_v30  ;;  %v1841_v11 = vsel %vm1777_vm10, %v1745_v36, %v1809_v45  ;;  %v1842_v53 = vsel %vm1778_vm6, %v1746_v15, %v1810_v51  ;;  %v6606_v30 = vld [vmem:[#allocation2_spill] sm:$0xff]  ;;  %v1671_v45 = vpop.permute.xlu0 %1670 }
 0x1b9   : > { %v2400_v58 = vsel %vm6604_vm13, %v2304_v39, %v2368_v59  ;;  %vm6607_vm4 = vnez %v6606_v30  ;;  %v4899_v51 = vsel %vm6610_vm5, %v1842_v53, -9e+15  ;;  %vm6612_vm10 = vcmp.gt.f32.partialorder %v2305_v27, 0.0 }
 0x1ba   : > { %vm2338_vm15 = vcmp.gt.f32.partialorder %v2306_v28, 0.0  ;;  %v2370_v6 = vmul.f32 0.2, %v2306_v28  ;;  %v2371_v60 = vmul.f32 0.2, %v2307_v57  ;;  %vm2339_vm2 = vcmp.gt.f32.partialorder %v2307_v57, 0.0 }
 0x1bb   : > { %v4895_v56 = vsel %vm6607_vm4, %v1841_v11, -9e+15  ;;  %6611 = vst [vmem:[#allocation3_spill] sm:$0xff] %v4899_v51  ;;  %v2401_v36 = vsel %vm6612_vm10, %v2305_v27, %v2369_v1  ;;  %v4906_v15 = vmul.f32 1.442695, %v1394_v54  ;;  %v1751_v59 = vadd.f32 %v4634_v42, %v4718_v46  ;;  %v4912_v11 = vpop.eup %3424  ;;  %v6618_v1 = vld [vmem:[#allocation7_spill] sm:$0xff] }
 0x1bc   : > { %6608 = vst [vmem:[#allocation2_spill] sm:$0xff] %v4895_v56  ;;  %v1752_v39 = vadd.f32 %v4636_v24, %v4718_v46  ;;  %6614 = vst [vmem:[#allocation103_spill] sm:$0xff] %v4912_v11  ;;  %v1906_v53 = vmax.f32 %v4895_v56, %v4899_v51  ;;  %v4918_v27 = vsel %vm6616_vm3, %v1845_v50, -9e+15  ;;  %vm6619_vm13 = vnez %v6618_v1  ;;  %v1683_v13 = vpop.permute.xlu0 %1682  ;;  %v6625_v56 = vld [vmem:[#allocation4_spill] sm:$0xff] }
 0x1bd   : > { %6617 = vst [vmem:[#allocation6_spill] sm:$0xff] %v4918_v27  ;;  %v4922_v54 = vsel %vm6619_vm13, %v1846_v52, -9e+15  ;;  %v2402_v0 = vsel %vm2338_vm15, %v2306_v28, %v2370_v6  ;;  %v2403_v23 = vsel %vm2339_vm2, %v2307_v57, %v2371_v60  ;;  %v4928_v46 = vsel %vm3996_vm8, %v2400_v58, -9e+15  ;;  %v2236_v60 = vpop.permute.xlu1 %2235 }
 0x1be   : > { %6620 = vst [vmem:[#allocation7_spill] sm:$0xff] %v4922_v54  ;;  %6621 = vst [vmem:[#allocation104_spill] sm:$0xff] %v4928_v46  ;;  %v4932_v51 = vsel %vm6558_vm14, %v2401_v36, -9e+15  ;;  %v4936_v50 = vadd.f32 %v4634_v42, %v4734_v16  ;;  %v2314_v52 = vadd.f32 %v4828_v2, %v4730_v32  ;;  %1907 = vmax.xlane.f32.xlu0 %v1906_v53  ;;  %vm2340_vm6 = vcmp.gt.f32.partialorder %v2308_v10, 0.0 }
 0x1bf   : > { %6622 = vst [vmem:[#allocation105_spill] sm:$0xff] %v4932_v51  ;;  %vm2341_vm15 = vcmp.gt.f32.partialorder %v4876_v7, 0.0  ;;  %v1747_v57 = vadd.f32 %v4634_v42, %v1671_v45  ;;  %v1912_v26 = vmax.f32 %v4918_v27, %v4922_v54  ;;  %v2373_v58 = vmul.f32 0.2, %v4876_v7 }
 0x1c0   : > { %v1748_v6 = vadd.f32 %v4636_v24, %v1671_v45  ;;  %v4950_v28 = vsel %vm6607_vm4, %v2402_v0, -9e+15  ;;  %v4954_v36 = vsel %vm6610_vm5, %v2403_v23, -9e+15  ;;  %v2464_v32 = vmax.f32 %v4928_v46, %v4932_v51 }
 0x1c1   : > { %6623 = vst [vmem:[#allocation106_spill] sm:$0xff] %v4950_v28  ;;  %6624 = vst [vmem:[#allocation107_spill] sm:$0xff] %v4954_v36  ;;  %v4960_v53 = vadd.f32 %v4636_v24, %v4734_v16  ;;  %v2404_v54 = vsel %vm2340_vm6, %v2308_v10, %v2372_v22  ;;  %vm1783_vm8 = vcmp.gt.f32.partialorder %v1751_v59, 0.0  ;;  %v1815_v27 = vmul.f32 0.2, %v1751_v59 }
 0x1c2   : > { %v4963_v45 = vmul.f32 0.2, %v4936_v50  ;;  %2465 = vmax.xlane.f32.xlu0 %v2464_v32  ;;  %vm1784_vm14 = vcmp.gt.f32.partialorder %v1752_v39, 0.0  ;;  %v1816_v0 = vmul.f32 0.2, %v1752_v39  ;;  %v2310_v23 = vadd.f32 %v4828_v2, %v2236_v60 }
 0x1c3   : > { %v2311_v30 = vadd.f32 %v4830_v19, %v2236_v60  ;;  %v2467_v16 = vmax.f32 %v4950_v28, %v4954_v36  ;;  %vm1779_vm5 = vcmp.gt.f32.partialorder %v1747_v57, 0.0  ;;  %vm1780_vm10 = vcmp.gt.f32.partialorder %v1748_v6, 0.0  ;;  %v2240_v36 = vpop.permute.xlu1 %2239 }
 0x1c4   : > { %v1811_v10 = vmul.f32 0.2, %v1747_v57  ;;  %v1812_v22 = vmul.f32 0.2, %v1748_v6  ;;  %v2378_v51 = vmul.f32 0.2, %v2314_v52  ;;  %v2405_v32 = vsel %vm2341_vm15, %v4876_v7, %v2373_v58 }
 0x1c5   : > { %v2379_v46 = vmul.f32 0.2, %v2315_v25  ;;  %2468 = vmax.xlane.f32.xlu1 %v2467_v16  ;;  %vm6626_vm6 = vnez %v6625_v56  ;;  %v1753_v60 = vadd.f32 %v4634_v42, %v1683_v13  ;;  %v1754_v3 = vadd.f32 %v4636_v24, %v1683_v13  ;;  %v1687_v56 = vpop.permute.xlu0 %1686 }
 0x1c6   : > { %v4974_v12 = vsel %vm6626_vm6, %v2404_v54, -9e+15  ;;  %v1847_v28 = vsel %vm1783_vm8, %v1751_v59, %v1815_v27  ;;  %v1848_v11 = vsel %vm1784_vm14, %v1752_v39, %v1816_v0  ;;  %v2374_v21 = vmul.f32 0.2, %v2310_v23  ;;  %v6627_v54 = vld [vmem:[#allocation5_spill] sm:$0xff]  ;;  %v6631_v0 = vld [vmem:[#allocation10_spill] sm:$0xff] }
 0x1c7   : > { %v2375_v35 = vmul.f32 0.2, %v2311_v30  ;;  %v1843_v16 = vsel %vm1779_vm5, %v1747_v57, %v1811_v10  ;;  %v1844_v17 = vsel %vm1780_vm10, %v1748_v6, %v1812_v22  ;;  %vm1789_vm15 = vcmp.gt.f32.partialorder %v4936_v50, 0.0  ;;  %v6629_v57 = vld [vmem:[#allocation9_spill] sm:$0xff] }
 0x1c8   : > { %vm2342_vm4 = vcmp.gt.f32.partialorder %v2310_v23, 0.0  ;;  %vm2343_vm2 = vcmp.gt.f32.partialorder %v2311_v30, 0.0  ;;  %v4985_v7 = vsel %vm6626_vm6, %v1843_v16, -9e+15  ;;  %vm6628_vm0 = vnez %v6627_v54 }
 0x1c9   : > { %v4989_v58 = vsel %vm6628_vm0, %v1844_v17, -9e+15  ;;  %v2312_v59 = vadd.f32 %v4828_v2, %v2240_v36  ;;  %1913 = vmax.xlane.f32.xlu1 %v1912_v26  ;;  %v4996_v27 = vsel %vm6628_vm0, %v2405_v32, -9e+15  ;;  %vm6630_vm8 = vnez %v6629_v57  ;;  %v6644_v57 = vld [vmem:[#allocation18_spill] sm:$0xff] }
 0x1ca   : > { %v1909_v39 = vmax.f32 %v4985_v7, %v4989_v58  ;;  %v5000_v6 = vsel %vm6630_vm8, %v1847_v28, -9e+15  ;;  %vm1785_vm14 = vcmp.gt.f32.partialorder %v1753_v60, 0.0  ;;  %vm6632_vm5 = vnez %v6631_v0 }
 0x1cb   : > { %v5004_v17 = vsel %vm6632_vm5, %v1848_v11, -9e+15  ;;  %vm6633_vm10 = vcmp.gt.f32.partialorder %v2314_v52, 0.0  ;;  %vm6634_vm6 = vcmp.gt.f32.partialorder %v2315_v25, 0.0  ;;  %v1817_v10 = vmul.f32 0.2, %v1753_v60 }
 0x1cc   : > { %v2410_v13 = vsel %vm6633_vm10, %v2314_v52, %v2378_v51  ;;  %v2411_v26 = vsel %vm6634_vm6, %v2315_v25, %v2379_v46  ;;  %v1818_v22 = vmul.f32 0.2, %v1754_v3  ;;  %1910 = vmax.xlane.f32.xlu0 %v1909_v39  ;;  %v2406_v32 = vsel %vm2342_vm4, %v2310_v23, %v2374_v21 }
 0x1cd   : > { %v2407_v16 = vsel %vm2343_vm2, %v2311_v30, %v2375_v35  ;;  %vm1786_vm0 = vcmp.gt.f32.partialorder %v1754_v3, 0.0  ;;  %v2313_v28 = vadd.f32 %v4830_v19, %v2240_v36  ;;  %v5013_v54 = vsel %vm6616_vm3, %v2406_v32, -9e+15  ;;  %v6637_v30 = vld [vmem:[#allocation14_spill] sm:$0xff] }
 0x1ce   : > { %v5017_v11 = vsel %vm6619_vm13, %v2407_v16, -9e+15  ;;  %v2376_v51 = vmul.f32 0.2, %v2312_v59  ;;  %v1755_v46 = vadd.f32 %v4634_v42, %v1687_v56  ;;  %v2470_v35 = vmax.f32 %v4974_v12, %v4996_v27 }
 0x1cf   : > { %v2473_v52 = vmax.f32 %v5013_v54, %v5017_v11  ;;  %vm1790_vm2 = vcmp.gt.f32.partialorder %v4960_v53, 0.0  ;;  %v1822_v21 = vmul.f32 0.2, %v4960_v53  ;;  %vm2344_vm4 = vcmp.gt.f32.partialorder %v2312_v59, 0.0 }
 0x1d0   : > { %vm6636_vm3 = vnez %v6635_v31  ;;  %2471 = vmax.xlane.f32.xlu0 %v2470_v35  ;;  %v1915_v1 = vmax.f32 %v5000_v6, %v5004_v17  ;;  %v1849_v36 = vsel %vm1785_vm14, %v1753_v60, %v1817_v10  ;;  %v1850_v23 = vsel %vm1786_vm0, %v1754_v3, %v1818_v22  ;;  %v2248_v60 = vpop.permute.xlu1 %2247 }
 0x1d1   : > { %v5028_v25 = vsel %vm6636_vm3, %v2410_v13, -9e+15  ;;  %2474 = vmax.xlane.f32.xlu1 %v2473_v52  ;;  %vm6638_vm13 = vnez %v6637_v30  ;;  %v2377_v32 = vmul.f32 0.2, %v2313_v28  ;;  %v1756_v16 = vadd.f32 %v4636_v24, %v1687_v56  ;;  %v6647_v30 = vld [vmem:[#allocation27_spill] sm:$0xff] }
 0x1d2   : > { %v5036_v39 = vsel %vm6638_vm13, %v2411_v26, -9e+15  ;;  %v5041_v13 = vsel %vm6636_vm3, %v1849_v36, -9e+15  ;;  %v5045_v52 = vsel %vm6638_vm13, %v1850_v23, -9e+15  ;;  %v2408_v26 = vsel %vm2344_vm4, %v2312_v59, %v2376_v51 }
 0x1d3   : > { %vm2345_vm10 = vcmp.gt.f32.partialorder %v2313_v28, 0.0  ;;  %v1819_v35 = vmul.f32 0.2, %v1755_v46  ;;  %v1918_v3 = vmax.f32 %v5041_v13, %v5045_v52  ;;  %v6639_v10 = vsub.f32 %v6594_v41, %v6592_v20 }
 0x1d4   : > { %v2318_v22 = vadd.f32 %v4828_v2, %v4736_v40  ;;  %v2319_v31 = vadd.f32 %v4830_v19, %v4736_v40  ;;  %vm1787_vm14 = vcmp.gt.f32.partialorder %v1755_v46, 0.0  ;;  %1916 = vmax.xlane.f32.xlu0 %v1915_v1  ;;  %v2479_v36 = vmax.f32 %v5028_v25, %v5036_v39 }
 0x1d5   : > { %v1432_v56 = vmul.f32 1.442695, %v6639_v10  ;;  %1919 = vmax.xlane.f32.xlu1 %v1918_v3  ;;  %v1853_v20 = vsel %vm1789_vm15, %v4936_v50, %v4963_v45  ;;  %v1854_v41 = vsel %vm1790_vm2, %v4960_v53, %v1822_v21  ;;  %v1820_v59 = vmul.f32 0.2, %v1756_v16  ;;  %v6641_v45 = vld [vmem:[#allocation17_spill] sm:$0xff]  ;;  %v1695_v10 = vpop.permute.xlu0 %1694 }
 0x1d6   : > { %v2316_v40 = vadd.f32 %v4828_v2, %v2248_v60  ;;  %v2409_v51 = vsel %vm2345_vm10, %v2313_v28, %v2377_v32  ;;  %v5071_v49 = vsel %vm6630_vm8, %v2408_v26, -9e+15  ;;  %vm1788_vm6 = vcmp.gt.f32.partialorder %v1756_v16, 0.0 }
 0x1d7   : > { %v2317_v1 = vadd.f32 %v4830_v19, %v2248_v60  ;;  %v5076_v23 = vsel %vm6632_vm5, %v2409_v51, -9e+15  ;;  %v1851_v50 = vsel %vm1787_vm14, %v1755_v46, %v1819_v35  ;;  %vm6642_vm15 = vnez %v6641_v45  ;;  %v6648_v35 = vld [vmem:[#allocation25_spill] sm:$0xff] }
 0x1d8   : > { %6640 = vst [vmem:[#allocation4_spill] sm:$0xff] %v5076_v23  ;;  %v2476_v53 = vmax.f32 %v5071_v49, %v5076_v23  ;;  %v5083_v28 = vsel %vm6642_vm15, %v1853_v20, -9e+15  ;;  %vm6645_vm8 = vnez %v6644_v57  ;;  %v839_v32 = vsub.f32 %v6647_v30, %v4654_v18 }
 0x1d9   : > { %6643 = vst [vmem:[#allocation5_spill] sm:$0xff] %v5083_v28  ;;  %v5087_v21 = vsel %vm6645_vm8, %v1854_v41, -9e+15  ;;  %vm2350_vm0 = vcmp.gt.f32.partialorder %v2318_v22, 0.0  ;;  %v2382_v0 = vmul.f32 0.2, %v2318_v22  ;;  %2480 = vmax.xlane.f32.xlu1 %v2479_v36  ;;  %v1852_v46 = vsel %vm1788_vm6, %v1756_v16, %v1820_v59 }
 0x1da   : > { %6646 = vst [vmem:[#allocation9_spill] sm:$0xff] %v5087_v21  ;;  %v2383_v60 = vmul.f32 0.2, %v2319_v31  ;;  %vm2351_vm5 = vcmp.gt.f32.partialorder %v2319_v31, 0.0  ;;  %v2380_v43 = vmul.f32 0.2, %v2316_v40  ;;  %2477 = vmax.xlane.f32.xlu0 %v2476_v53  ;;  %vm6649_vm2 = vnez %v6648_v35 }
 0x1db   : > { %v5094_v3 = vsel %vm6649_vm2, %v1851_v50, -9e+15  ;;  %vm2348_vm4 = vcmp.gt.f32.partialorder %v2316_v40, 0.0  ;;  %v2381_v26 = vmul.f32 0.2, %v2317_v1  ;;  %v1924_v20 = vmax.f32 %v5083_v28, %v5087_v21  ;;  %v6651_v41 = vld [vmem:[#allocation26_spill] sm:$0xff] }
 0x1dc   : > { %6650 = vst [vmem:[#allocation10_spill] sm:$0xff] %v5094_v3  ;;  %vm6652_vm3 = vnez %v6651_v41  ;;  %v6654_v36 = vld [vmem:[#allocation29_spill] sm:$0xff]  ;;  %v1761_v16 = vadd.f32 %v4634_v42, %v4738_v47  ;;  %vm2349_vm13 = vcmp.gt.f32.partialorder %v2317_v1, 0.0  ;;  %v6655_v50 = vld [vmem:[#allocation30_spill] sm:$0xff]  ;;  %v1762_v21 = vadd.f32 %v4636_v24, %v4738_v47 }
 0x1dd   : > { %v5100_v51 = vsel %vm6652_vm3, %v1852_v46, -9e+15  ;;  %v1402_v30 = vsub.f32 %v6654_v36, %v4632_v14  ;;  %v1403_v53 = vsub.f32 %v6655_v50, %v4632_v14  ;;  %1925 = vmax.xlane.f32.xlu1 %v1924_v20  ;;  %v2414_v46 = vsel %vm2350_vm0, %v2318_v22, %v2382_v0  ;;  %v6657_v14 = vld [vmem:[#allocation28_spill] sm:$0xff] }
 0x1de   : > { %6653 = vst [vmem:[#allocation11_spill] sm:$0xff] %v5100_v51  ;;  %v1921_v59 = vmax.f32 %v5094_v3, %v5100_v51  ;;  %v2415_v28 = vsel %vm2351_vm5, %v2319_v31, %v2383_v60  ;;  %3430 = vpow2.f32 %v4906_v15  ;;  %v1759_v36 = vadd.f32 %v4634_v42, %v1695_v10  ;;  %v5118_v3 = vpop.eup %3426  ;;  %v6658_v31 = vld [vmem:[#allocation31_spill] sm:$0xff] }
 0x1df   : > { %v1760_v23 = vadd.f32 %v4636_v24, %v1695_v10  ;;  %v2412_v51 = vsel %vm2348_vm4, %v2316_v40, %v2380_v43  ;;  %6656 = vst [vmem:[#allocation14_spill] sm:$0xff] %v5118_v3  ;;  %3432 = vpow2.f32 %v1432_v56  ;;  %v840_v47 = vsub.f32 %v6657_v14, %v4654_v18  ;;  %v6659_v56 = vld [vmem:[#allocation32_spill] sm:$0xff]  ;;  %v2260_v18 = vpop.permute.xlu1 %2259 }
 0x1e0   : > { %1922 = vmax.xlane.f32.xlu0 %v1921_v59  ;;  %v881_v20 = vmul.f32 1.442695, %v839_v32  ;;  %v2413_v22 = vsel %vm2349_vm13, %v2317_v1, %v2381_v26  ;;  %v841_v0 = vsub.f32 %v6658_v31, %v4690_v8  ;;  %v1825_v15 = vmul.f32 0.2, %v1761_v16  ;;  %v5144_v32 = vpop.eup %3428 }
 0x1e1   : > { %v5127_v60 = vsel %vm6642_vm15, %v2414_v46, -9e+15  ;;  %v5131_v40 = vsel %vm6645_vm8, %v2415_v28, -9e+15  ;;  %v842_v43 = vsub.f32 %v6659_v56, %v4690_v8  ;;  %v1826_v10 = vmul.f32 0.2, %v1762_v21  ;;  %929 = vadd.xlane.f32.xlu1 %v4836_v33 }
 0x1e2   : > { %v5138_v1 = vsel %vm6649_vm2, %v2412_v51, -9e+15  ;;  %v5142_v45 = vsel %vm6652_vm3, %v2413_v22, -9e+15  ;;  %6661 = vst [vmem:[#allocation18_spill] sm:$0xff] %v5144_v32  ;;  %vm1793_vm10 = vcmp.gt.f32.partialorder %v1761_v16, 0.0  ;;  %v2320_v8 = vadd.f32 %v4828_v2, %v4744_v4 }
 0x1e3   : > { %6660 = vst [vmem:[#allocation17_spill] sm:$0xff] %v5142_v45  ;;  %vm1794_vm14 = vcmp.gt.f32.partialorder %v1762_v21, 0.0  ;;  %v1823_v28 = vmul.f32 0.2, %v1759_v36  ;;  %v1824_v57 = vmul.f32 0.2, %v1760_v23  ;;  %v2485_v33 = vmax.f32 %v5127_v60, %v5131_v40 }
 0x1e4   : > { %926 = vadd.xlane.f32.xlu0 %v4840_v55  ;;  %vm1791_vm6 = vcmp.gt.f32.partialorder %v1759_v36, 0.0  ;;  %vm1792_vm15 = vcmp.gt.f32.partialorder %v1760_v23, 0.0  ;;  %v1446_v35 = vmul.f32 1.442695, %v1402_v30  ;;  %v883_v26 = vmul.f32 1.442695, %v840_v47 }
 0x1e5   : > { %v2322_v41 = vadd.f32 %v4828_v2, %v2260_v18  ;;  %v2482_v51 = vmax.f32 %v5138_v1, %v5142_v45  ;;  %v885_v59 = vmul.f32 1.442695, %v841_v0  ;;  %v2323_v50 = vadd.f32 %v4830_v19, %v2260_v18  ;;  %2486 = vmax.xlane.f32.xlu1 %v2485_v33 }
 0x1e6   : > { %v1857_v55 = vsel %vm1793_vm10, %v1761_v16, %v1825_v15  ;;  %v1858_v46 = vsel %vm1794_vm14, %v1762_v21, %v1826_v10  ;;  %v887_v14 = vmul.f32 1.442695, %v842_v43  ;;  %v2321_v22 = vadd.f32 %v4830_v19, %v4744_v4 }
 0x1e7   : > { %v1855_v30 = vsel %vm1791_vm6, %v1759_v36, %v1823_v28  ;;  %v1856_v47 = vsel %vm1792_vm15, %v1760_v23, %v1824_v57  ;;  %v1448_v31 = vmul.f32 1.442695, %v1403_v53  ;;  %3434 = vpow2.f32 %v881_v20  ;;  %v6667_v53 = vld [vmem:[#allocation34_spill] sm:$0xff]  ;;  %v6670_v20 = vld [vmem:[#allocation36_spill] sm:$0xff]  ;;  %v1707_v28 = vpop.permute.xlu0 %1706 }
 0x1e8   : > { %2483 = vmax.xlane.f32.xlu0 %v2482_v51  ;;  %vm2352_vm8 = vcmp.gt.f32.partialorder %v2320_v8, 0.0  ;;  %v2384_v56 = vmul.f32 0.2, %v2320_v8  ;;  %v5159_v45 = vpop.eup %3430  ;;  %3436 = vpow2.f32 %v883_v26  ;;  %v2386_v0 = vmul.f32 0.2, %v2322_v41  ;;  %v2264_v26 = vpop.permute.xlu1 %2263 }
 0x1e9   : > { %6662 = vst [vmem:[#allocation27_spill] sm:$0xff] %v5159_v45  ;;  %v5163_v16 = vsel %vm4333_vm12, %v1857_v55, -9e+15  ;;  %v5167_v15 = vsel %vm4341_vm7, %v1858_v46, -9e+15  ;;  %v5169_v4 = vpop.eup %3432  ;;  %3438 = vpow2.f32 %v885_v59  ;;  %1490 = vadd.xlane.f32.xlu1 %v4848_v34  ;;  %vm6668_vm0 = vnez %v6667_v53 }
 0x1ea   : > { %6665 = vst [vmem:[#allocation25_spill] sm:$0xff] %v5167_v15  ;;  %6666 = vst [vmem:[#allocation26_spill] sm:$0xff] %v5169_v4  ;;  %v2387_v23 = vmul.f32 0.2, %v2323_v50  ;;  %v5174_v36 = vsel %vm6668_vm0, %v1855_v30, -9e+15  ;;  %vm6671_vm5 = vnez %v6670_v20  ;;  %3440 = vpow2.f32 %v887_v14 }
 0x1eb   : > { %6669 = vst [vmem:[#allocation29_spill] sm:$0xff] %v5174_v36  ;;  %v5178_v43 = vsel %vm6671_vm5, %v1856_v47, -9e+15  ;;  %v2385_v10 = vmul.f32 0.2, %v2321_v22  ;;  %vm2354_vm2 = vcmp.gt.f32.partialorder %v2322_v41, 0.0  ;;  %v1763_v57 = vadd.f32 %v4634_v42, %v4754_v38 }
 0x1ec   : > { %6672 = vst [vmem:[#allocation30_spill] sm:$0xff] %v5178_v43  ;;  %vm2355_vm4 = vcmp.gt.f32.partialorder %v2323_v50, 0.0  ;;  %1487 = vadd.xlane.f32.xlu0 %v4852_v63  ;;  %v1764_v34 = vadd.f32 %v4636_v24, %v4754_v38  ;;  %vm2353_vm3 = vcmp.gt.f32.partialorder %v2321_v22, 0.0  ;;  %v1930_v33 = vmax.f32 %v5163_v16, %v5167_v15 }
 0x1ed   : > { %3442 = vpow2.f32 %v1446_v35  ;;  %v1927_v51 = vmax.f32 %v5174_v36, %v5178_v43  ;;  %v2416_v59 = vsel %vm2352_vm8, %v2320_v8, %v2384_v56  ;;  %v1765_v55 = vadd.f32 %v4634_v42, %v1707_v28 }
 0x1ee   : > { %v1766_v63 = vadd.f32 %v4636_v24, %v1707_v28  ;;  %1931 = vmax.xlane.f32.xlu1 %v1930_v33  ;;  %v2418_v46 = vsel %vm2354_vm2, %v2322_v41, %v2386_v0  ;;  %v2419_v14 = vsel %vm2355_vm4, %v2323_v50, %v2387_v23  ;;  %3444 = vpow2.f32 %v1448_v31  ;;  %v2268_v28 = vpop.permute.xlu1 %2267  ;;  %v6679_v33 = vld [vmem:[#allocation100_spill] sm:$0xff] }
 0x1ef   : > { %v934_v38 = vadd.f32 %v4867_v44, %v4862_v48  ;;  %v931_v35 = vadd.f32 %v4854_v62, %v4842_v37  ;;  %v2417_v30 = vsel %vm2353_vm3, %v2321_v22, %v2385_v10  ;;  %vm1795_vm13 = vcmp.gt.f32.partialorder %v1763_v57, 0.0  ;;  %v5212_v10 = vpop.permute.xlu0 %1710  ;;  %v6698_v48 = vld [vmem:[#allocation40_spill] sm:$0xff] }
 0x1f0   : > { %1928 = vmax.xlane.f32.xlu0 %v1927_v51  ;;  %vm1796_vm10 = vcmp.gt.f32.partialorder %v1764_v34, 0.0  ;;  %v1827_v47 = vmul.f32 0.2, %v1763_v57  ;;  %v1828_v8 = vmul.f32 0.2, %v1764_v34  ;;  %v1495_v31 = vadd.f32 %v4878_v5, %v4870_v61  ;;  %v6680_v51 = vld [vmem:[#allocation101_spill] sm:$0xff] }
 0x1f1   : > { %v5198_v56 = vsel %vm4333_vm12, %v2418_v46, -9e+15  ;;  %v5202_v41 = vsel %vm4341_vm7, %v2419_v14, -9e+15  ;;  %v5206_v50 = vsel %vm6668_vm0, %v2416_v59, -9e+15  ;;  %v5210_v22 = vpop.eup %3434  ;;  %v5220_v21 = vadd.f32 %v4885_v29, %v4880_v9 }
 0x1f2   : > { %6673 = vst [vmem:[#allocation28_spill] sm:$0xff] %v5198_v56  ;;  %6674 = vst [vmem:[#allocation31_spill] sm:$0xff] %v5202_v41  ;;  %v1829_v0 = vmul.f32 0.2, %v1765_v55  ;;  %v1830_v23 = vmul.f32 0.2, %v1766_v63  ;;  %935 = vadd.xlane.f32.xlu1 %v934_v38  ;;  %v5222_v53 = vpop.eup %3436  ;;  %v5226_v59 = vadd.f32 %v6680_v51, %v6679_v33  ;;  %v2491_v29 = vmax.f32 %v5198_v56, %v5202_v41 }
 0x1f3   : > { %6675 = vst [vmem:[#allocation32_spill] sm:$0xff] %v5206_v50  ;;  %6676 = vst [vmem:[#allocation33_spill] sm:$0xff] %v5210_v22  ;;  %v5216_v18 = vsel %vm6671_vm5, %v2417_v30, -9e+15  ;;  %vm1797_vm7 = vcmp.gt.f32.partialorder %v1765_v55, 0.0  ;;  %vm1798_vm12 = vcmp.gt.f32.partialorder %v1766_v63, 0.0  ;;  %v5232_v20 = vpop.eup %3438  ;;  %v1859_v5 = vsel %vm1795_vm13, %v1763_v57, %v1827_v47 }
 0x1f4   : > { %6677 = vst [vmem:[#allocation35_spill] sm:$0xff] %v5216_v18  ;;  %6678 = vst [vmem:[#allocation34_spill] sm:$0xff] %v5222_v53  ;;  %932 = vadd.xlane.f32.xlu0 %v931_v35  ;;  %v6681_v46 = vld [vmem:[#allocation102_spill] sm:$0xff]  ;;  %v6682_v14 = vld [vmem:[#allocation103_spill] sm:$0xff]  ;;  %v1860_v35 = vsel %vm1796_vm10, %v1764_v34, %v1828_v8  ;;  %v5240_v37 = vpop.eup %3440  ;;  %v2326_v62 = vadd.f32 %v4828_v2, %v2268_v28  ;;  %v2327_v57 = vadd.f32 %v4830_v19, %v2268_v28 }
 0x1f5   : > { %v5230_v38 = vadd.f32 %v6682_v14, %v6681_v46  ;;  %6683 = vst [vmem:[#allocation36_spill] sm:$0xff] %v5232_v20  ;;  %v6684_v30 = vld [vmem:[#allocation89_spill] sm:$0xff]  ;;  %v6687_v33 = vld [vmem:[#allocation38_spill] sm:$0xff]  ;;  %v2488_v46 = vmax.f32 %v5206_v50, %v5216_v18  ;;  %v1492_v14 = vadd.f32 %v5169_v4, %v5159_v45  ;;  %v1861_v34 = vsel %vm1797_vm7, %v1765_v55, %v1829_v0  ;;  %v6696_v55 = vld [vmem:[#allocation39_spill] sm:$0xff] }
 0x1f6   : > { %v6685_v61 = vld [vmem:[#allocation37_spill] sm:$0xff]  ;;  %6686 = vst [vmem:[#allocation89_spill] sm:$0xff] %v5240_v37  ;;  %v1405_v51 = vsub.f32 %v6687_v33, %v6684_v30  ;;  %2492 = vmax.xlane.f32.xlu1 %v2491_v29  ;;  %v1862_v47 = vsel %vm1798_vm12, %v1766_v63, %v1830_v23  ;;  %v2324_v33 = vadd.f32 %v4828_v2, %v2264_v26  ;;  %v6695_v28 = vld [vmem:[#allocation90_spill] sm:$0xff]  ;;  %v1715_v63 = vpop.permute.xlu0 %1714  ;;  %v6705_v50 = vld [vmem:[#allocation91_spill] sm:$0xff]  ;;  %v2390_v41 = vmul.f32 0.2, %v2326_v62 }
 0x1f7   : > { %v1404_v9 = vsub.f32 %v6685_v61, %v6684_v30  ;;  %v5250_v61 = vadd.f32 %v5144_v32, %v5118_v3  ;;  %v5256_v8 = vpop.eup %3442  ;;  %v2325_v30 = vadd.f32 %v4830_v19, %v2264_v26  ;;  %v6689_v45 = vld [vmem:[#allocation41_spill] sm:$0xff]  ;;  %v6692_v32 = vld [vmem:[#allocation42_spill] sm:$0xff]  ;;  %v845_v0 = vsub.f32 %v6696_v55, %v6695_v28 }
 0x1f8   : > { %6688 = vst [vmem:[#allocation37_spill] sm:$0xff] %v5256_v8  ;;  %2489 = vmax.xlane.f32.xlu0 %v2488_v46  ;;  %vm6690_vm14 = vnez %v6689_v45  ;;  %vm6693_vm6 = vnez %v6692_v32  ;;  %v940_v23 = vadd.f32 %v5222_v53, %v5210_v22  ;;  %v5274_v26 = vadd.f32 %v5240_v37, %v5232_v20  ;;  %v5276_v46 = vpop.eup %3444  ;;  %v6702_v18 = vld [vmem:[#allocation45_spill] sm:$0xff]  ;;  %v6706_v22 = vld [vmem:[#allocation43_spill] sm:$0xff]  ;;  %v6707_v20 = vld [vmem:[#allocation46_spill] sm:$0xff] }
 0x1f9   : > { %v5262_v3 = vsel %vm6690_vm14, %v1859_v5, -9e+15  ;;  %v5266_v4 = vsel %vm6693_vm6, %v1860_v35, -9e+15  ;;  %v1450_v29 = vmul.f32 1.442695, %v1404_v9  ;;  %v846_v44 = vsub.f32 %v6698_v48, %v6695_v28 }
 0x1fa   : > { %6691 = vst [vmem:[#allocation38_spill] sm:$0xff] %v5262_v3  ;;  %6694 = vst [vmem:[#allocation41_spill] sm:$0xff] %v5266_v4  ;;  %v1452_v5 = vmul.f32 1.442695, %v1405_v51  ;;  %v6699_v35 = vld [vmem:[#allocation44_spill] sm:$0xff]  ;;  %vm6703_vm8 = vnez %v6702_v18  ;;  %v847_v53 = vsub.f32 %v6706_v22, %v6705_v50  ;;  %v848_v37 = vsub.f32 %v6707_v20, %v6705_v50  ;;  %1496 = vadd.xlane.f32.xlu1 %v1495_v31  ;;  %v5302_v20 = vpop.permute.xlu0 %1718  ;;  %v6715_v18 = vld [vmem:[#allocation93_spill] sm:$0xff] }
 0x1fb   : > { %6697 = vst [vmem:[#allocation42_spill] sm:$0xff] %v5276_v46  ;;  %vm6700_vm15 = vnez %v6699_v35  ;;  %v5286_v55 = vsel %vm6703_vm8, %v1862_v47, -9e+15  ;;  %v2391_v56 = vmul.f32 0.2, %v2327_v57  ;;  %vm2358_vm0 = vcmp.gt.f32.partialorder %v2326_v62, 0.0 }
 0x1fc   : > { %v5282_v9 = vsel %vm6700_vm15, %v1861_v34, -9e+15  ;;  %6704 = vst [vmem:[#allocation39_spill] sm:$0xff] %v5286_v55  ;;  %v2388_v51 = vmul.f32 0.2, %v2324_v33  ;;  %vm2359_vm5 = vcmp.gt.f32.partialorder %v2327_v57, 0.0  ;;  %1493 = vadd.xlane.f32.xlu0 %v1492_v14  ;;  %v2272_v34 = vpop.permute.xlu1 %2271  ;;  %3446 = vpow2.f32 %v1450_v29 }
 0x1fd   : > { %6701 = vst [vmem:[#allocation90_spill] sm:$0xff] %v5282_v9  ;;  %v2389_v43 = vmul.f32 0.2, %v2325_v30  ;;  %v893_v48 = vmul.f32 1.442695, %v845_v0  ;;  %vm2356_vm2 = vcmp.gt.f32.partialorder %v2324_v33, 0.0  ;;  %v1936_v47 = vmax.f32 %v5282_v9, %v5286_v55 }
 0x1fe   : > { %vm2357_vm4 = vcmp.gt.f32.partialorder %v2325_v30, 0.0  ;;  %v1769_v22 = vadd.f32 %v4634_v42, %v1715_v63  ;;  %v1933_v50 = vmax.f32 %v5262_v3, %v5266_v4  ;;  %v5299_v31 = vadd.f32 %v5276_v46, %v5256_v8  ;;  %v6709_v55 = vld [vmem:[#allocation47_spill] sm:$0xff]  ;;  %v6717_v32 = vld [vmem:[#allocation50_spill] sm:$0xff] }
 0x1ff   : > { %3448 = vpow2.f32 %v1452_v5  ;;  %v1770_v14 = vadd.f32 %v4636_v24, %v1715_v63  ;;  %1937 = vmax.xlane.f32.xlu1 %v1936_v47  ;;  %v2422_v28 = vsel %vm2358_vm0, %v2326_v62, %v2390_v41  ;;  %v2423_v0 = vsel %vm2359_vm5, %v2327_v57, %v2391_v56  ;;  %v6708_v47 = vld [vmem:[#allocation92_spill] sm:$0xff] }
 0x200   : > { %v1767_v29 = vadd.f32 %v4634_v42, %v5212_v10  ;;  %v1768_v4 = vadd.f32 %v4636_v24, %v5212_v10  ;;  %1934 = vmax.xlane.f32.xlu0 %v1933_v50  ;;  %v2420_v8 = vsel %vm2356_vm2, %v2324_v33, %v2388_v51  ;;  %v2421_v5 = vsel %vm2357_vm4, %v2325_v30, %v2389_v43  ;;  %v6712_v57 = vld [vmem:[#allocation48_spill] sm:$0xff]  ;;  %v2276_v30 = vpop.permute.xlu1 %2275 }
 0x201   : > { %3450 = vpow2.f32 %v893_v48  ;;  %v895_v63 = vmul.f32 1.442695, %v846_v44  ;;  %v897_v46 = vmul.f32 1.442695, %v847_v53  ;;  %v899_v3 = vmul.f32 1.442695, %v848_v37 }
 0x202   : > { %v1406_v62 = vsub.f32 %v6709_v55, %v6708_v47  ;;  %v1833_v41 = vmul.f32 0.2, %v1769_v22  ;;  %v5316_v56 = vsel %vm6700_vm15, %v2422_v28, -9e+15  ;;  %v5320_v10 = vsel %vm6703_vm8, %v2423_v0, -9e+15 }
 0x203   : > { %6710 = vst [vmem:[#allocation40_spill] sm:$0xff] %v5316_v56  ;;  %6711 = vst [vmem:[#allocation44_spill] sm:$0xff] %v5320_v10  ;;  %v1407_v33 = vsub.f32 %v6712_v57, %v6708_v47  ;;  %v1834_v43 = vmul.f32 0.2, %v1770_v14  ;;  %941 = vadd.xlane.f32.xlu1 %v940_v23  ;;  %v5326_v37 = vsel %vm6690_vm14, %v2420_v8, -9e+15  ;;  %v1723_v23 = vpop.permute.xlu0 %1722  ;;  %v2497_v45 = vmax.f32 %v5316_v56, %v5320_v10 }
 0x204   : > { %6713 = vst [vmem:[#allocation45_spill] sm:$0xff] %v5326_v37  ;;  %v5330_v44 = vsel %vm6693_vm6, %v2421_v5, -9e+15  ;;  %v1831_v53 = vmul.f32 0.2, %v1767_v29  ;;  %vm1801_vm3 = vcmp.gt.f32.partialorder %v1769_v22, 0.0  ;;  %938 = vadd.xlane.f32.xlu0 %v5220_v21  ;;  %3452 = vpow2.f32 %v895_v63 }
 0x205   : > { %6714 = vst [vmem:[#allocation91_spill] sm:$0xff] %v5330_v44  ;;  %v1832_v35 = vmul.f32 0.2, %v1768_v4  ;;  %vm1802_vm13 = vcmp.gt.f32.partialorder %v1770_v14, 0.0  ;;  %v6716_v55 = vld [vmem:[#allocation49_spill] sm:$0xff]  ;;  %vm1799_vm10 = vcmp.gt.f32.partialorder %v1767_v29, 0.0  ;;  %v1409_v8 = vsub.f32 %v6717_v32, %v6715_v18 }
 0x206   : > { %v1408_v51 = vsub.f32 %v6716_v55, %v6715_v18  ;;  %vm1800_vm7 = vcmp.gt.f32.partialorder %v1768_v4, 0.0  ;;  %v2330_v48 = vadd.f32 %v4828_v2, %v2276_v30  ;;  %v2494_v50 = vmax.f32 %v5326_v37, %v5330_v44  ;;  %v5343_v5 = vpop.eup %3446  ;;  %v6731_v10 = vld [vmem:[#allocation53_spill] sm:$0xff] }
 0x207   : > { %3454 = vpow2.f32 %v897_v46  ;;  %v2331_v21 = vadd.f32 %v4830_v19, %v2276_v30  ;;  %2498 = vmax.xlane.f32.xlu1 %v2497_v45  ;;  %v1865_v28 = vsel %vm1801_vm3, %v1769_v22, %v1833_v41  ;;  %v1866_v0 = vsel %vm1802_vm13, %v1770_v14, %v1834_v43  ;;  %6718 = vst [vmem:[#allocation43_spill] sm:$0xff] %v5343_v5  ;;  %v5351_v45 = vpop.xlane.xlu0 %821  ;;  %v6720_v22 = vld [vmem:[#allocation8_spill] sm:$0xff]  ;;  %v6721_v14 = vld [vmem:[#allocation51_spill] sm:$0xff] }
 0x208   : > { %v2328_v47 = vadd.f32 %v4828_v2, %v2272_v34  ;;  %v2329_v63 = vadd.f32 %v4830_v19, %v2272_v34  ;;  %2495 = vmax.xlane.f32.xlu0 %v2494_v50  ;;  %v1863_v57 = vsel %vm1799_vm10, %v1767_v29, %v1831_v53  ;;  %v1864_v18 = vsel %vm1800_vm7, %v1768_v4, %v1832_v35 }
 0x209   : > { %v5349_v55 = vpop.eup %3448  ;;  %3456 = vpow2.f32 %v899_v3  ;;  %v1454_v46 = vmul.f32 1.442695, %v1406_v62  ;;  %v1456_v32 = vmul.f32 1.442695, %v1407_v33  ;;  %v1458_v30 = vmul.f32 1.442695, %v1408_v51 }
 0x20a   : > { %6719 = vst [vmem:[#allocation46_spill] sm:$0xff] %v5349_v55  ;;  %v849_v41 = vsub.f32 %v6721_v14, %v6720_v22  ;;  %v2394_v43 = vmul.f32 0.2, %v2330_v48  ;;  %v5357_v34 = vsel %vm4564_vm9, %v1865_v28, -9e+15  ;;  %v6724_v3 = vld [vmem:[#allocation52_spill] sm:$0xff]  ;;  %v1774_v9 = vadd.f32 %v4636_v24, %v1723_v23 }
 0x20b   : > { %v5361_v29 = vsel %vm4568_vm11, %v1866_v0, -9e+15  ;;  %v5363_v4 = vpop.eup %3450  ;;  %v850_v62 = vsub.f32 %v6724_v3, %v6720_v22  ;;  %v2395_v33 = vmul.f32 0.2, %v2331_v21  ;;  %1502 = vadd.xlane.f32.xlu1 %v5230_v38  ;;  %v5370_v35 = vsel %vm4485_vm1, %v1863_v57, -9e+15  ;;  %v2280_v38 = vpop.permute.xlu1 %2279 }
 0x20c   : > { %6726 = vst [vmem:[#allocation92_spill] sm:$0xff] %v5370_v35  ;;  %v6727_v51 = vld [vmem:[#allocation60_spill] sm:$0xff]  ;;  %v2392_v14 = vmul.f32 0.2, %v2328_v47  ;;  %v2393_v37 = vmul.f32 0.2, %v2329_v63  ;;  %1499 = vadd.xlane.f32.xlu0 %v5226_v59  ;;  %v1942_v57 = vmax.f32 %v5357_v34, %v5361_v29  ;;  %3458 = vpow2.f32 %v1454_v46  ;;  %v5385_v59 = vpop.xlane.xlu0 %1382 }
 0x20d   : > { %vm6728_vm12 = vnez %v6727_v51  ;;  %vm2362_vm14 = vcmp.gt.f32.partialorder %v2330_v48, 0.0  ;;  %vm2363_vm6 = vcmp.gt.f32.partialorder %v2331_v21, 0.0  ;;  %v6730_v0 = vld [vmem:[#allocation15_spill] sm:$0xff]  ;;  %vm2360_vm15 = vcmp.gt.f32.partialorder %v2328_v47, 0.0 }
 0x20e   : > { %v5374_v28 = vsel %vm6728_vm12, %v1864_v18, -9e+15  ;;  %v851_v22 = vsub.f32 %v6731_v10, %v6730_v0  ;;  %vm2361_vm8 = vcmp.gt.f32.partialorder %v2329_v63, 0.0  ;;  %v1460_v3 = vmul.f32 1.442695, %v1409_v8  ;;  %v5389_v15 = vpop.eup %3452 }
 0x20f   : > { %6729 = vst [vmem:[#allocation47_spill] sm:$0xff] %v5374_v28  ;;  %v1773_v18 = vadd.f32 %v4634_v42, %v1723_v23  ;;  %v1939_v56 = vmax.f32 %v5370_v35, %v5374_v28  ;;  %3460 = vpow2.f32 %v1456_v32  ;;  %1943 = vmax.xlane.f32.xlu1 %v1942_v57  ;;  %v2426_v10 = vsel %vm2362_vm14, %v2330_v48, %v2394_v43  ;;  %v6732_v48 = vld [vmem:[#allocation54_spill] sm:$0xff] }
 0x210   : > { %v2427_v36 = vsel %vm2363_vm6, %v2331_v21, %v2395_v33  ;;  %v1771_v8 = vadd.f32 %v4634_v42, %v5302_v20  ;;  %v1772_v46 = vadd.f32 %v4636_v24, %v5302_v20  ;;  %v2424_v32 = vsel %vm2360_vm15, %v2328_v47, %v2392_v14 }
 0x211   : > { %1940 = vmax.xlane.f32.xlu0 %v1939_v56  ;;  %v2425_v23 = vsel %vm2361_vm8, %v2329_v63, %v2393_v37  ;;  %v5397_v57 = vpop.eup %3454  ;;  %v901_v28 = vmul.f32 1.442695, %v849_v41  ;;  %v903_v35 = vmul.f32 1.442695, %v850_v62  ;;  %v852_v21 = vsub.f32 %v6732_v48, %v6730_v0  ;;  %v2284_v37 = vpop.permute.xlu1 %2283  ;;  %v6738_v41 = vld [vmem:[#allocation55_spill] sm:$0xff]  ;;  %v6739_v0 = vld [vmem:[#allocation56_spill] sm:$0xff] }
 0x212   : > { %v905_v43 = vmul.f32 1.442695, %v851_v22  ;;  %3462 = vpow2.f32 %v1458_v30  ;;  %v1837_v33 = vmul.f32 0.2, %v1773_v18  ;;  %v5403_v42 = vsel %vm4564_vm9, %v2426_v10, -9e+15  ;;  %v5425_v62 = vpop.xlane.xlu0 %824 }
 0x213   : > { %6733 = vst [vmem:[#allocation48_spill] sm:$0xff] %v5403_v42  ;;  %v5407_v24 = vsel %vm4568_vm11, %v2427_v36, -9e+15  ;;  %v5409_v20 = vpop.eup %3456  ;;  %3464 = vpow2.f32 %v1460_v3  ;;  %v1838_v56 = vmul.f32 0.2, %v1774_v9  ;;  %947 = vadd.xlane.f32.xlu1 %v5250_v61  ;;  %vm1805_vm9 = vcmp.gt.f32.partialorder %v1773_v18, 0.0 }
 0x214   : > { %6734 = vst [vmem:[#allocation93_spill] sm:$0xff] %v5407_v24  ;;  %v5414_v47 = vsel %vm4485_vm1, %v2424_v32, -9e+15  ;;  %v5418_v44 = vsel %vm6728_vm12, %v2425_v23, -9e+15  ;;  %vm1806_vm11 = vcmp.gt.f32.partialorder %v1774_v9, 0.0  ;;  %v2503_v61 = vmax.f32 %v5403_v42, %v5407_v24 }
 0x215   : > { %6735 = vst [vmem:[#allocation49_spill] sm:$0xff] %v5414_v47  ;;  %6736 = vst [vmem:[#allocation50_spill] sm:$0xff] %v5418_v44  ;;  %v1835_v63 = vmul.f32 0.2, %v1771_v8  ;;  %v1836_v30 = vmul.f32 0.2, %v1772_v46  ;;  %944 = vadd.xlane.f32.xlu0 %v5274_v26  ;;  %3466 = vpow2.f32 %v901_v28  ;;  %v2334_v51 = vadd.f32 %v4828_v2, %v2284_v37 }
 0x216   : > { %v6737_v36 = vld [vmem:[#allocation19_spill] sm:$0xff]  ;;  %vm1803_vm0 = vcmp.gt.f32.partialorder %v1771_v8, 0.0  ;;  %vm1804_vm5 = vcmp.gt.f32.partialorder %v1772_v46, 0.0  ;;  %v907_v53 = vmul.f32 1.442695, %v852_v21  ;;  %v2500_v14 = vmax.f32 %v5414_v47, %v5418_v44  ;;  %v5433_v32 = vpop.eup %3458  ;;  %v6756_v47 = vld [vmem:[#allocation69_spill] sm:$0xff] }
 0x217   : > { %v1410_v50 = vsub.f32 %v6738_v41, %v6737_v36  ;;  %v1411_v26 = vsub.f32 %v6739_v0, %v6737_v36  ;;  %v2335_v22 = vadd.f32 %v4830_v19, %v2284_v37  ;;  %2504 = vmax.xlane.f32.xlu1 %v2503_v61  ;;  %v1869_v3 = vsel %vm1805_vm9, %v1773_v18, %v1837_v33  ;;  %v6740_v0 = vld [vmem:[#allocation68_spill] sm:$0xff]  ;;  %v6741_v37 = vld [vmem:[#allocation57_spill] sm:$0xff]  ;;  %v6742_v18 = vld [vmem:[#allocation58_spill] sm:$0xff] }
 0x218   : > { %v1870_v10 = vsel %vm1806_vm11, %v1774_v9, %v1838_v56  ;;  %v2332_v23 = vadd.f32 %v4828_v2, %v2280_v38  ;;  %v2333_v28 = vadd.f32 %v4830_v19, %v2280_v38  ;;  %v1867_v48 = vsel %vm1803_vm0, %v1771_v8, %v1835_v63  ;;  %v6743_v19 = vld [vmem:[#allocation77_spill] sm:$0xff]  ;;  %v6745_v8 = vld [vmem:[#allocation78_spill] sm:$0xff]  ;;  %v5455_v56 = vpop.xlane.xlu0 %827 }
 0x219   : > { %2501 = vmax.xlane.f32.xlu0 %v2500_v14  ;;  %v1868_v21 = vsel %vm1804_vm5, %v1772_v46, %v1836_v30  ;;  %v5439_v41 = vpop.eup %3460  ;;  %3468 = vpow2.f32 %v903_v35  ;;  %v1462_v36 = vmul.f32 1.442695, %v1410_v50  ;;  %v1412_v61 = vsub.f32 %v6741_v37, %v6740_v0  ;;  %v6748_v63 = vld [vmem:[#allocation66_spill] sm:$0xff]  ;;  %v6751_v50 = vld [vmem:[#allocation67_spill] sm:$0xff] }
 0x21a   : > { %v1507_v9 = vadd.f32 %v5349_v55, %v5343_v5  ;;  %v1413_v2 = vsub.f32 %v6742_v18, %v6740_v0  ;;  %v2398_v33 = vmul.f32 0.2, %v2334_v51  ;;  %vm6744_vm1 = vnez %v6743_v19  ;;  %v6755_v18 = vld [vmem:[#allocation61_spill] sm:$0xff] }
 0x21b   : > { %v5449_v38 = vsel %vm6744_vm1, %v1869_v3, -9e+15  ;;  %vm6746_vm2 = vnez %v6745_v8  ;;  %3470 = vpow2.f32 %v905_v43  ;;  %v2399_v35 = vmul.f32 0.2, %v2335_v22  ;;  %v6761_v8 = vld [vmem:[#allocation79_spill] sm:$0xff] }
 0x21c   : > { %v5453_v46 = vsel %vm6746_vm2, %v1870_v10, -9e+15  ;;  %1508 = vadd.xlane.f32.xlu1 %v1507_v9  ;;  %vm6749_vm4 = vnez %v6748_v63  ;;  %vm6752_vm3 = vnez %v6751_v50  ;;  %v5465_v0 = vpop.eup %3462  ;;  %v2396_v3 = vmul.f32 0.2, %v2332_v23  ;;  %v6763_v50 = vld [vmem:[#allocation75_spill] sm:$0xff] }
 0x21d   : > { %6747 = vst [vmem:[#allocation8_spill] sm:$0xff] %v5453_v46  ;;  %v5459_v30 = vsel %vm6749_vm4, %v1867_v48, -9e+15  ;;  %v5463_v14 = vsel %vm6752_vm3, %v1868_v21, -9e+15  ;;  %vm2366_vm13 = vcmp.gt.f32.partialorder %v2334_v51, 0.0  ;;  %1505 = vadd.xlane.f32.xlu0 %v5299_v31  ;;  %v5468_v43 = vpop.eup %3464  ;;  %v1948_v48 = vmax.f32 %v5449_v38, %v5453_v46 }
 0x21e   : > { %6750 = vst [vmem:[#allocation51_spill] sm:$0xff] %v5459_v30  ;;  %6753 = vst [vmem:[#allocation64_spill] sm:$0xff] %v5463_v14  ;;  %v2397_v37 = vmul.f32 0.2, %v2333_v28  ;;  %vm2367_vm10 = vcmp.gt.f32.partialorder %v2335_v22, 0.0  ;;  %vm2364_vm7 = vcmp.gt.f32.partialorder %v2332_v23, 0.0  ;;  %3472 = vpow2.f32 %v907_v53 }
 0x21f   : > { %v1466_v10 = vmul.f32 1.442695, %v1412_v61  ;;  %vm2365_vm12 = vcmp.gt.f32.partialorder %v2333_v28, 0.0  ;;  %v1464_v9 = vmul.f32 1.442695, %v1411_v26  ;;  %v6754_v21 = vld [vmem:[#allocation21_spill] sm:$0xff]  ;;  %v1945_v55 = vmax.f32 %v5459_v30, %v5463_v14  ;;  %v5478_v42 = vpop.eup %3466  ;;  %v1380_v30 = vpop.xlane.xlu1 %1379 }
 0x220   : > { %v853_v5 = vsub.f32 %v6755_v18, %v6754_v21  ;;  %v1468_v44 = vmul.f32 1.442695, %v1413_v2  ;;  %v855_v31 = vsub.f32 %v6756_v47, %v5351_v45  ;;  %1949 = vmax.xlane.f32.xlu1 %v1948_v48  ;;  %v2430_v24 = vsel %vm2366_vm13, %v2334_v51, %v2398_v33  ;;  %v6757_v46 = vld [vmem:[#allocation70_spill] sm:$0xff]  ;;  %v5486_v47 = vpop.xlane.xlu0 %1385 }
 0x221   : > { %v2431_v61 = vsel %vm2367_vm10, %v2335_v22, %v2399_v35  ;;  %3474 = vpow2.f32 %v1462_v36  ;;  %v856_v53 = vsub.f32 %v6757_v46, %v5351_v45  ;;  %1946 = vmax.xlane.f32.xlu0 %v1945_v55  ;;  %v2428_v26 = vsel %vm2364_vm7, %v2332_v23, %v2396_v3  ;;  %v6758_v2 = vld [vmem:[#allocation62_spill] sm:$0xff]  ;;  %v6759_v55 = vld [vmem:[#allocation73_spill] sm:$0xff] }
 0x222   : > { %v2429_v18 = vsel %vm2365_vm12, %v2333_v28, %v2397_v37  ;;  %3476 = vpow2.f32 %v1466_v10  ;;  %v854_v14 = vsub.f32 %v6758_v2, %v6754_v21  ;;  %v949_v51 = vadd.f32 %v5389_v15, %v5363_v4  ;;  %v6760_v35 = vld [vmem:[#allocation74_spill] sm:$0xff]  ;;  %v6762_v21 = vld [vmem:[#allocation80_spill] sm:$0xff] }
 0x223   : > { %v952_v22 = vadd.f32 %v5409_v20, %v5397_v57  ;;  %v909_v36 = vmul.f32 1.442695, %v853_v5  ;;  %v1416_v45 = vsub.f32 %v6759_v55, %v5385_v59  ;;  %v5496_v23 = vsel %vm6744_vm1, %v2430_v24, -9e+15  ;;  %v5502_v33 = vpop.eup %3468  ;;  %v6765_v2 = vld [vmem:[#allocation82_spill] sm:$0xff] }
 0x224   : > { %v5500_v28 = vsel %vm6746_vm2, %v2431_v61, -9e+15  ;;  %v913_v46 = vmul.f32 1.442695, %v855_v31  ;;  %v1417_v3 = vsub.f32 %v6760_v35, %v5385_v59  ;;  %v5508_v5 = vsel %vm6749_vm4, %v2428_v26, -9e+15 }
 0x225   : > { %953 = vadd.xlane.f32.xlu1 %v952_v22  ;;  %v5512_v19 = vsel %vm6752_vm3, %v2429_v18, -9e+15  ;;  %3478 = vpow2.f32 %v1468_v44  ;;  %v915_v24 = vmul.f32 1.442695, %v856_v53  ;;  %v1414_v37 = vsub.f32 %v6761_v8, %v1380_v30  ;;  %950 = vadd.xlane.f32.xlu0 %v949_v51  ;;  %v5515_v10 = vpop.eup %3470  ;;  %v6764_v26 = vld [vmem:[#allocation81_spill] sm:$0xff]  ;;  %v6766_v22 = vld [vmem:[#allocation76_spill] sm:$0xff] }
 0x226   : > { %3480 = vpow2.f32 %v1464_v9  ;;  %v911_v48 = vmul.f32 1.442695, %v854_v14  ;;  %v1415_v59 = vsub.f32 %v6762_v21, %v1380_v30  ;;  %v2509_v63 = vmax.f32 %v5496_v23, %v5500_v28  ;;  %v1389_v9 = vpop.xlane.xlu0 %1388 }
 0x227   : > { %3482 = vpow2.f32 %v909_v36  ;;  %v1474_v31 = vmul.f32 1.442695, %v1416_v45  ;;  %v857_v61 = vsub.f32 %v6763_v50, %v5425_v62  ;;  %v2506_v44 = vmax.f32 %v5508_v5, %v5512_v19  ;;  %v6770_v50 = vld [vmem:[#allocation84_spill] sm:$0xff] }
 0x228   : > { %3484 = vpow2.f32 %v913_v46  ;;  %v1476_v53 = vmul.f32 1.442695, %v1417_v3  ;;  %v859_v18 = vsub.f32 %v6764_v26, %v5455_v56  ;;  %v5526_v14 = vpop.eup %3472  ;;  %v1470_v30 = vmul.f32 1.442695, %v1414_v37  ;;  %v6767_v3 = vld [vmem:[#allocation83_spill] sm:$0xff] }
 0x229   : > { %2510 = vmax.xlane.f32.xlu1 %v2509_v63  ;;  %3486 = vpow2.f32 %v915_v24  ;;  %v860_v51 = vsub.f32 %v6765_v2, %v5455_v56  ;;  %2507 = vmax.xlane.f32.xlu0 %v2506_v44  ;;  %v858_v36 = vsub.f32 %v6766_v22, %v5425_v62  ;;  %v1472_v55 = vmul.f32 1.442695, %v1415_v59  ;;  %v6769_v59 = vld [vmem:[#allocation86_spill] sm:$0xff]  ;;  %v6771_v22 = vld [vmem:[#allocation87_spill] sm:$0xff] }
 0x22a   : > { %3488 = vpow2.f32 %v911_v48  ;;  %v1513_v45 = vadd.f32 %v5468_v43, %v5465_v0  ;;  %v917_v35 = vmul.f32 1.442695, %v857_v61  ;;  %v1418_v24 = vsub.f32 %v6767_v3, %v5486_v47  ;;  %v6768_v48 = vld [vmem:[#allocation85_spill] sm:$0xff]  ;;  %v1905_v44 = vpop.xlane.xlu0 %1904 }
 0x22b   : > { %v5534_v46 = vpop.eup %3474  ;;  %3490 = vpow2.f32 %v1474_v31  ;;  %v1510_v8 = vadd.f32 %v5439_v41, %v5433_v32  ;;  %v921_v37 = vmul.f32 1.442695, %v859_v18  ;;  %v1420_v62 = vsub.f32 %v6768_v48, %v1389_v9 }
 0x22c   : > { %v5540_v56 = vpop.eup %3476  ;;  %3492 = vpow2.f32 %v1476_v53  ;;  %v923_v21 = vmul.f32 1.442695, %v860_v51  ;;  %v1421_v63 = vsub.f32 %v6769_v59, %v1389_v9  ;;  %v919_v31 = vmul.f32 1.442695, %v858_v36 }
 0x22d   : > { %1514 = vadd.xlane.f32.xlu1 %v1513_v45  ;;  %3494 = vpow2.f32 %v1470_v30  ;;  %1511 = vadd.xlane.f32.xlu0 %v1510_v8  ;;  %v1419_v61 = vsub.f32 %v6770_v50, %v5486_v47  ;;  %v958_v26 = vadd.f32 %v5526_v14, %v5515_v10  ;;  %v1478_v53 = vmul.f32 1.442695, %v1418_v24 }
 0x22e   : > { %3496 = vpow2.f32 %v1472_v55  ;;  %v955_v18 = vadd.f32 %v5502_v33, %v5478_v42  ;;  %v1482_v9 = vmul.f32 1.442695, %v1420_v62  ;;  %v1484_v47 = vmul.f32 1.442695, %v1421_v63 }
 0x22f   : > { %v5548_v2 = vpop.eup %3478  ;;  %3498 = vpow2.f32 %v917_v35  ;;  %v1951_v36 = vsub.f32 %v6771_v22, %v1905_v44  ;;  %v1480_v45 = vmul.f32 1.442695, %v1419_v61  ;;  %v6772_v35 = vld [vmem:[#allocation88_spill] sm:$0xff]  ;;  %vm3815_vm9 = vmmov 0  }
 0x230   : > { %v5552_v30 = vpop.eup %3480  ;;  %3500 = vpow2.f32 %v921_v37  ;;  %v1952_v3 = vsub.f32 %v6772_v35, %v1905_v44  ;;  %v1519_v24 = vadd.f32 %v5548_v2, %v5540_v56  ;;  %vm2784_vm2 = vcmask 523264  }
 0x231   : > { %959 = vadd.xlane.f32.xlu1 %v958_v26  ;;  %v5554_v51 = vpop.eup %3482  ;;  %3502 = vpow2.f32 %v923_v21  ;;  %956 = vadd.xlane.f32.xlu0 %v955_v18  ;;  %v1516_v37 = vadd.f32 %v5552_v30, %v5534_v46  ;;  %v1983_v21 = vmul.f32 1.442695, %v1951_v36  ;;  %vm2891_vm4 = vcmask 64512  }
 0x232   : > { %v5557_v55 = vpop.eup %3484  ;;  %3504 = vpow2.f32 %v919_v31  ;;  %v1985_v63 = vmul.f32 1.442695, %v1952_v3  ;;  %vm3085_vm3 = vcmask 15360  }
 0x233   : > { %v5562_v8 = vpop.eup %3486  ;;  %3506 = vpow2.f32 %v1478_v53 }
 0x234   : > { %v5566_v48 = vpop.eup %3488  ;;  %3508 = vpow2.f32 %v1482_v9  ;;  %v964_v31 = vadd.f32 %v5562_v8, %v5557_v55 }
 0x235   : > { %1520 = vadd.xlane.f32.xlu1 %v1519_v24  ;;  %v5568_v62 = vpop.eup %3490  ;;  %3510 = vpow2.f32 %v1484_v47  ;;  %1517 = vadd.xlane.f32.xlu0 %v1516_v37  ;;  %v961_v61 = vadd.f32 %v5566_v48, %v5554_v51 }
 0x236   : > { %6773 = vst [vmem:[#allocation65_spill] sm:$0xff] %v5568_v62  ;;  %v5570_v59 = vpop.eup %3492  ;;  %3512 = vpow2.f32 %v1480_v45 }
 0x237   : > { %6774 = vst [vmem:[#allocation52_spill] sm:$0xff] %v5570_v59  ;;  %v5574_v50 = vpop.eup %3494  ;;  %3514 = vpow2.f32 %v1983_v21  ;;  %v1525_v18 = vadd.f32 %v5570_v59, %v5568_v62 }
 0x238   : > { %6775 = vst [vmem:[#allocation59_spill] sm:$0xff] %v5574_v50  ;;  %v5578_v44 = vpop.eup %3496  ;;  %3516 = vpow2.f32 %v1985_v63 }
 0x239   : > { %6776 = vst [vmem:[#allocation60_spill] sm:$0xff] %v5578_v44  ;;  %965 = vadd.xlane.f32.xlu1 %v964_v31  ;;  %v5580_v26 = vpop.eup %3498  ;;  %962 = vadd.xlane.f32.xlu0 %v961_v61  ;;  %v1522_v47 = vadd.f32 %v5578_v44, %v5574_v50  ;;  %v6791_v44 = vld [vmem:[#allocation106_spill] sm:$0xff] }
 0x23a   : > { %6777 = vst [vmem:[#allocation15_spill] sm:$0xff] %v5580_v26  ;;  %v5582_v53 = vpop.eup %3500 }
 0x23b   : > { %6778 = vst [vmem:[#allocation53_spill] sm:$0xff] %v5582_v53  ;;  %v5586_v9 = vpop.eup %3502 }
 0x23c   : > { %6779 = vst [vmem:[#allocation54_spill] sm:$0xff] %v5586_v9  ;;  %v5590_v22 = vpop.eup %3504  ;;  %v970_v35 = vadd.f32 %v5586_v9, %v5582_v53  ;;  %v6789_v9 = vld [vmem:[#allocation104_spill] sm:$0xff] }
 0x23d   : > { %6780 = vst [vmem:[#allocation19_spill] sm:$0xff] %v5590_v22  ;;  %1526 = vadd.xlane.f32.xlu1 %v1525_v18  ;;  %v5592_v36 = vpop.eup %3506  ;;  %1523 = vadd.xlane.f32.xlu0 %v1522_v47  ;;  %v967_v24 = vadd.f32 %v5590_v22, %v5580_v26  ;;  %v6787_v26 = vld [vmem:[#allocation2_spill] sm:$0xff] }
 0x23e   : > { %6781 = vst [vmem:[#allocation55_spill] sm:$0xff] %v5592_v36  ;;  %v5594_v45 = vpop.eup %3508 }
 0x23f   : > { %6782 = vst [vmem:[#allocation56_spill] sm:$0xff] %v5594_v45  ;;  %v5598_v3 = vpop.eup %3510 }
 0x240   : > { %6783 = vst [vmem:[#allocation68_spill] sm:$0xff] %v5598_v3  ;;  %v5602_v37 = vpop.eup %3512  ;;  %v1531_v21 = vadd.f32 %v5598_v3, %v5594_v45 }
 0x241   : > { %6784 = vst [vmem:[#allocation57_spill] sm:$0xff] %v5602_v37  ;;  %971 = vadd.xlane.f32.xlu1 %v970_v35  ;;  %968 = vadd.xlane.f32.xlu0 %v967_v24  ;;  %v5606_v63 = vpop.eup %3514  ;;  %v1528_v31 = vadd.f32 %v5602_v37, %v5592_v36  ;;  %v6788_v24 = vld [vmem:[#allocation3_spill] sm:$0xff]  ;;  %v6790_v36 = vld [vmem:[#allocation105_spill] sm:$0xff] }
 0x242   : > { %6785 = vst [vmem:[#allocation58_spill] sm:$0xff] %v5606_v63  ;;  %v5610_v61 = vpop.eup %3516 }
 0x243   : > { %6786 = vst [vmem:[#allocation77_spill] sm:$0xff] %v5610_v61  ;;  %v2047_v18 = vadd.f32 %v5610_v61, %v5606_v63 }
 0x245   : > { %1532 = vadd.xlane.f32.xlu1 %v1531_v21  ;;  %1529 = vadd.xlane.f32.xlu0 %v1528_v31 }
 0x249   : > { %2048 = vadd.xlane.f32.xlu0 %v2047_v18  ;;  %v6792_v18 = vld [vmem:[#allocation107_spill] sm:$0xff] }
 0x24b   : > { %v1908_v47 = vpop.xlane.xlu0 %1907 }
 0x24c   : > { %v1953_v35 = vsub.f32 %v6787_v26, %v1908_v47  ;;  %v1954_v22 = vsub.f32 %v6788_v24, %v1908_v47 }
 0x24e   : > { %v1987_v53 = vmul.f32 1.442695, %v1953_v35  ;;  %v1989_v45 = vmul.f32 1.442695, %v1954_v22  ;;  %v6793_v22 = vld [vmem:[#allocation6_spill] sm:$0xff]  ;;  %v6794_v35 = vld [vmem:[#allocation7_spill] sm:$0xff] }
 0x24f   : > { %v2466_v3 = vpop.xlane.xlu0 %2465 }
 0x250   : > { %3518 = vpow2.f32 %v1987_v53  ;;  %v2512_v62 = vsub.f32 %v6789_v9, %v2466_v3  ;;  %v2513_v37 = vsub.f32 %v6790_v36, %v2466_v3 }
 0x251   : > { %3520 = vpow2.f32 %v1989_v45 }
 0x252   : > { %v2469_v21 = vpop.xlane.xlu1 %2468  ;;  %v2544_v31 = vmul.f32 1.442695, %v2512_v62  ;;  %v2546_v50 = vmul.f32 1.442695, %v2513_v37 }
 0x253   : > { %v2514_v63 = vsub.f32 %v6791_v44, %v2469_v21  ;;  %v2515_v61 = vsub.f32 %v6792_v18, %v2469_v21 }
 0x254   : > { %3522 = vpow2.f32 %v2544_v31 }
 0x255   : > { %v2548_v26 = vmul.f32 1.442695, %v2514_v63  ;;  %v2550_v59 = vmul.f32 1.442695, %v2515_v61  ;;  %3524 = vpow2.f32 %v2546_v50 }
 0x256   : > { %v1914_v47 = vpop.xlane.xlu1 %1913 }
 0x257   : > { %3526 = vpow2.f32 %v2548_v26  ;;  %v1957_v53 = vsub.f32 %v6793_v22, %v1914_v47  ;;  %v1958_v9 = vsub.f32 %v6794_v35, %v1914_v47 }
 0x258   : > { %3528 = vpow2.f32 %v2550_v59 }
 0x259   : > { %v1911_v36 = vpop.xlane.xlu0 %1910  ;;  %v1995_v45 = vmul.f32 1.442695, %v1957_v53  ;;  %v1997_v3 = vmul.f32 1.442695, %v1958_v9 }
 0x25a   : > { %v1955_v62 = vsub.f32 %v4985_v7, %v1911_v36  ;;  %v1956_v44 = vsub.f32 %v4989_v58, %v1911_v36  ;;  %v5624_v37 = vpop.eup %3518 }
 0x25b   : > { %v5626_v24 = vpop.eup %3520  ;;  %3530 = vpow2.f32 %v1995_v45 }
 0x25c   : > { %v1991_v50 = vmul.f32 1.442695, %v1955_v62  ;;  %v1993_v63 = vmul.f32 1.442695, %v1956_v44  ;;  %3532 = vpow2.f32 %v1997_v3  ;;  %v2050_v59 = vadd.f32 %v5626_v24, %v5624_v37 }
 0x25d   : > { %v2472_v21 = vpop.xlane.xlu0 %2471 }
 0x25e   : > { %v2475_v61 = vpop.xlane.xlu1 %2474  ;;  %3534 = vpow2.f32 %v1991_v50  ;;  %v2516_v58 = vsub.f32 %v4974_v12, %v2472_v21  ;;  %v5633_v18 = vpop.eup %3522  ;;  %v2517_v26 = vsub.f32 %v4996_v27, %v2472_v21  ;;  %2051 = vadd.xlane.f32.xlu1 %v2050_v59 }
 0x25f   : > { %v2518_v31 = vsub.f32 %v5013_v54, %v2475_v61  ;;  %v2519_v7 = vsub.f32 %v5017_v11, %v2475_v61  ;;  %3536 = vpow2.f32 %v1993_v63  ;;  %v5636_v47 = vpop.eup %3524 }
 0x260   : > { %v2552_v35 = vmul.f32 1.442695, %v2516_v58  ;;  %v2554_v9 = vmul.f32 1.442695, %v2517_v26  ;;  %v2608_v54 = vadd.f32 %v5636_v47, %v5633_v18  ;;  %v6795_v26 = vld [vmem:[#allocation4_spill] sm:$0xff] }
 0x261   : > { %v2556_v22 = vmul.f32 1.442695, %v2518_v31  ;;  %v2558_v53 = vmul.f32 1.442695, %v2519_v7  ;;  %v1917_v45 = vpop.xlane.xlu0 %1916  ;;  %v5640_v11 = vpop.eup %3526 }
 0x262   : > { %v1920_v36 = vpop.xlane.xlu1 %1919  ;;  %v1959_v27 = vsub.f32 %v5000_v6, %v1917_v45  ;;  %v5645_v62 = vpop.eup %3528  ;;  %v1960_v44 = vsub.f32 %v5004_v17, %v1917_v45  ;;  %2609 = vadd.xlane.f32.xlu0 %v2608_v54 }
 0x263   : > { %3538 = vpow2.f32 %v2556_v22  ;;  %v1961_v12 = vsub.f32 %v5041_v13, %v1920_v36  ;;  %v1962_v3 = vsub.f32 %v5045_v52, %v1920_v36  ;;  %v2611_v13 = vadd.f32 %v5645_v62, %v5640_v11 }
 0x264   : > { %3540 = vpow2.f32 %v2558_v53  ;;  %v1999_v61 = vmul.f32 1.442695, %v1959_v27  ;;  %v2001_v21 = vmul.f32 1.442695, %v1960_v44 }
 0x265   : > { %3542 = vpow2.f32 %v2552_v35  ;;  %v2003_v50 = vmul.f32 1.442695, %v1961_v12  ;;  %v2005_v63 = vmul.f32 1.442695, %v1962_v3  ;;  %v5650_v31 = vpop.eup %3530  ;;  %2612 = vadd.xlane.f32.xlu1 %v2611_v13  ;;  %v6796_v12 = vld [vmem:[#allocation5_spill] sm:$0xff] }
 0x266   : > { %3544 = vpow2.f32 %v2554_v9  ;;  %v2481_v59 = vpop.xlane.xlu1 %2480  ;;  %v5654_v17 = vpop.eup %3532  ;;  %v6797_v3 = vld [vmem:[#allocation9_spill] sm:$0xff] }
 0x267   : > { %3546 = vpow2.f32 %v2003_v50  ;;  %v2522_v6 = vsub.f32 %v5028_v25, %v2481_v59  ;;  %v2523_v52 = vsub.f32 %v5036_v39, %v2481_v59  ;;  %v2478_v7 = vpop.xlane.xlu0 %2477  ;;  %v2056_v36 = vadd.f32 %v5654_v17, %v5650_v31  ;;  %v6799_v59 = vld [vmem:[#allocation11_spill] sm:$0xff] }
 0x268   : > { %3548 = vpow2.f32 %v2005_v63  ;;  %v2520_v58 = vsub.f32 %v5071_v49, %v2478_v7  ;;  %v2521_v22 = vsub.f32 %v6795_v26, %v2478_v7  ;;  %v5658_v53 = vpop.eup %3534  ;;  %v6798_v63 = vld [vmem:[#allocation10_spill] sm:$0xff] }
 0x269   : > { %3550 = vpow2.f32 %v1999_v61  ;;  %v2564_v35 = vmul.f32 1.442695, %v2522_v6  ;;  %v2566_v9 = vmul.f32 1.442695, %v2523_v52  ;;  %v5662_v25 = vpop.eup %3536  ;;  %2057 = vadd.xlane.f32.xlu1 %v2056_v36 }
 0x26a   : > { %3552 = vpow2.f32 %v2001_v21  ;;  %v2560_v39 = vmul.f32 1.442695, %v2520_v58  ;;  %v2562_v45 = vmul.f32 1.442695, %v2521_v22  ;;  %v1926_v54 = vpop.xlane.xlu1 %1925  ;;  %v2053_v50 = vadd.f32 %v5662_v25, %v5658_v53 }
 0x26b   : > { %3554 = vpow2.f32 %v2564_v35  ;;  %v1965_v49 = vsub.f32 %v6796_v12, %v1926_v54  ;;  %v1966_v27 = vsub.f32 %v6797_v3, %v1926_v54 }
 0x26c   : > { %3556 = vpow2.f32 %v2566_v9  ;;  %2054 = vadd.xlane.f32.xlu0 %v2053_v50 }
 0x26d   : > { %v1923_v44 = vpop.xlane.xlu0 %1922  ;;  %v5670_v6 = vpop.eup %3538  ;;  %3558 = vpow2.f32 %v2560_v39  ;;  %v2011_v21 = vmul.f32 1.442695, %v1965_v49  ;;  %v2013_v52 = vmul.f32 1.442695, %v1966_v27 }
 0x26e   : > { %v1963_v61 = vsub.f32 %v6798_v63, %v1923_v44  ;;  %v1964_v13 = vsub.f32 %v6799_v59, %v1923_v44  ;;  %v5672_v7 = vpop.eup %3540  ;;  %3560 = vpow2.f32 %v2562_v45  ;;  %v930_v22 = vpop.xlane.xlu1 %929 }
 0x26f   : > { %v5674_v35 = vpop.eup %3542  ;;  %3562 = vpow2.f32 %v2011_v21  ;;  %v2617_v54 = vadd.f32 %v5672_v7, %v5670_v6 }
 0x270   : > { %v2007_v58 = vmul.f32 1.442695, %v1963_v61  ;;  %v2009_v26 = vmul.f32 1.442695, %v1964_v13  ;;  %v5678_v36 = vpop.eup %3544  ;;  %3564 = vpow2.f32 %v2013_v52  ;;  %v6804_v13 = vld [vmem:[#allocation17_spill] sm:$0xff] }
 0x271   : > { %v927_v9 = vpop.xlane.xlu0 %926  ;;  %v5680_v39 = vpop.eup %3546  ;;  %2618 = vadd.xlane.f32.xlu1 %v2617_v54  ;;  %v2614_v45 = vadd.f32 %v5678_v36, %v5674_v35 }
 0x272   : > { %6800 = vst [vmem:[#allocation78_spill] sm:$0xff] %v5680_v39  ;;  %3566 = vpow2.f32 %v2007_v58  ;;  %v5684_v12 = vpop.eup %3548  ;;  %v2487_v49 = vpop.xlane.xlu1 %2486 }
 0x273   : > { %6801 = vst [vmem:[#allocation66_spill] sm:$0xff] %v5684_v12  ;;  %3568 = vpow2.f32 %v2009_v26  ;;  %v5686_v3 = vpop.eup %3550  ;;  %2615 = vadd.xlane.f32.xlu0 %v2614_v45  ;;  %v2526_v27 = vsub.f32 %v5127_v60, %v2487_v49  ;;  %v2527_v44 = vsub.f32 %v5131_v40, %v2487_v49  ;;  %v2062_v63 = vadd.f32 %v5684_v12, %v5680_v39  ;;  %v6816_v39 = vld [vmem:[#allocation63_spill] sm:$0xff] }
 0x274   : > { %6802 = vst [vmem:[#allocation67_spill] sm:$0xff] %v5686_v3  ;;  %3570 = vrcp.f32 %v930_v22  ;;  %v5692_v61 = vpop.eup %3552 }
 0x275   : > { %v2484_v50 = vpop.xlane.xlu0 %2483  ;;  %6803 = vst [vmem:[#allocation21_spill] sm:$0xff] %v5692_v61  ;;  %3572 = vrcp.f32 %v927_v9  ;;  %v5696_v52 = vpop.eup %3554  ;;  %v2572_v58 = vmul.f32 1.442695, %v2526_v27  ;;  %v2574_v26 = vmul.f32 1.442695, %v2527_v44  ;;  %2063 = vadd.xlane.f32.xlu1 %v2062_v63  ;;  %v2059_v60 = vadd.f32 %v5692_v61, %v5686_v3 }
 0x276   : > { %v2524_v59 = vsub.f32 %v5138_v1, %v2484_v50  ;;  %v2525_v21 = vsub.f32 %v6804_v13, %v2484_v50  ;;  %6805 = vst [vmem:[#allocation61_spill] sm:$0xff] %v5696_v52  ;;  %v5700_v40 = vpop.eup %3556  ;;  %v1491_v45 = vpop.xlane.xlu1 %1490 }
 0x277   : > { %6806 = vst [vmem:[#allocation69_spill] sm:$0xff] %v5700_v40  ;;  %v5702_v49 = vpop.eup %3558  ;;  %3574 = vpow2.f32 %v2572_v58  ;;  %2060 = vadd.xlane.f32.xlu0 %v2059_v60  ;;  %v2623_v9 = vadd.f32 %v5700_v40, %v5696_v52  ;;  %v6812_v58 = vld [vmem:[#allocation25_spill] sm:$0xff]  ;;  %v6815_v52 = vld [vmem:[#allocation30_spill] sm:$0xff] }
 0x278   : > { %v2568_v22 = vmul.f32 1.442695, %v2524_v59  ;;  %v2570_v54 = vmul.f32 1.442695, %v2525_v21  ;;  %6807 = vst [vmem:[#allocation70_spill] sm:$0xff] %v5702_v49  ;;  %v5706_v50 = vpop.eup %3560  ;;  %3576 = vpow2.f32 %v2574_v26 }
 0x279   : > { %v1488_v1 = vpop.xlane.xlu0 %1487  ;;  %6808 = vst [vmem:[#allocation62_spill] sm:$0xff] %v5706_v50  ;;  %v5708_v27 = vpop.eup %3562  ;;  %2624 = vadd.xlane.f32.xlu1 %v2623_v9  ;;  %v2620_v44 = vadd.f32 %v5706_v50, %v5702_v49  ;;  %v6814_v49 = vld [vmem:[#allocation29_spill] sm:$0xff] }
 0x27a   : > { %6809 = vst [vmem:[#allocation73_spill] sm:$0xff] %v5708_v27  ;;  %3578 = vpow2.f32 %v2568_v22  ;;  %v5712_v63 = vpop.eup %3564 }
 0x27b   : > { %6810 = vst [vmem:[#allocation74_spill] sm:$0xff] %v5712_v63  ;;  %3580 = vpow2.f32 %v2570_v54  ;;  %v1932_v59 = vpop.xlane.xlu1 %1931  ;;  %2621 = vadd.xlane.f32.xlu0 %v2620_v44  ;;  %v2068_v22 = vadd.f32 %v5712_v63, %v5708_v27  ;;  %v6817_v63 = vld [vmem:[#allocation16_spill] sm:$0xff] }
 0x27c   : > { %v5714_v13 = vpop.eup %3566  ;;  %3582 = vrcp.f32 %v1491_v45  ;;  %v1969_v21 = vsub.f32 %v5163_v16, %v1932_v59  ;;  %v1970_v60 = vsub.f32 %v6812_v58, %v1932_v59 }
 0x27d   : > { %6811 = vst [vmem:[#allocation79_spill] sm:$0xff] %v5714_v13  ;;  %v1929_v26 = vpop.xlane.xlu0 %1928  ;;  %v5720_v9 = vpop.eup %3568  ;;  %3584 = vrcp.f32 %v1488_v1  ;;  %2069 = vadd.xlane.f32.xlu1 %v2068_v22 }
 0x27e   : > { %6813 = vst [vmem:[#allocation80_spill] sm:$0xff] %v5720_v9  ;;  %v1967_v50 = vsub.f32 %v6814_v49, %v1929_v26  ;;  %v1968_v54 = vsub.f32 %v6815_v52, %v1929_v26  ;;  %v3571_v40 = vpop.eup %3570  ;;  %v2019_v3 = vmul.f32 1.442695, %v1969_v21  ;;  %v2021_v61 = vmul.f32 1.442695, %v1970_v60  ;;  %v6818_v49 = vld [vmem:[#allocation13_spill] sm:$0xff] }
 0x27f   : > { %v2065_v16 = vadd.f32 %v5720_v9, %v5714_v13  ;;  %v3573_v45 = vpop.eup %3572  ;;  %v936_v58 = vpop.xlane.xlu1 %935  ;;  %v992_v27 = vmul.f32 %v3571_v40, %v6816_v39  ;;  %v991_v12 = vmul.f32 %v3571_v40, %v6817_v63  ;;  %v6819_v26 = vld [vmem:[#allocation12_spill] sm:$0xff] }
 0x280   : > { %v2015_v44 = vmul.f32 1.442695, %v1967_v50  ;;  %v2017_v59 = vmul.f32 1.442695, %v1968_v54  ;;  %3586 = vpow2.f32 %v2019_v3  ;;  %v990_v1 = vmul.f32 %v3573_v45, %v6818_v49  ;;  %v3376_v50 = vld [vmem:[%s6089_s1 + $0x4] ss:$8 sps:$4 sm:$0xff]  }
 0x281   : > { %2066 = vadd.xlane.f32.xlu0 %v2065_v16  ;;  %v933_v52 = vpop.xlane.xlu0 %932  ;;  %v989_v21 = vmul.f32 %v3573_v45, %v6819_v26  ;;  %3588 = vpow2.f32 %v2021_v61  ;;  %v5730_v60 = vpop.eup %3574  ;;  %v6823_v63 = vld [vmem:[#allocation28_spill] sm:$0xff]  ;;  %v6824_v61 = vld [vmem:[#allocation31_spill] sm:$0xff]  ;;  %1081 = vmatprep.mubr.bf16.mxu0 %v3376_v50 }
 0x282   : > { %6820 = vst [vmem:[#allocation75_spill] sm:$0xff] %v5730_v60  ;;  %3590 = vpow2.f32 %v2015_v44  ;;  %v1024_v22 = vpack.c.bf16 %v992_v27, %v990_v1  ;;  %v5735_v39 = vpop.eup %3576  ;;  %v6826_v44 = vld [vmem:[#allocation32_spill] sm:$0xff]  ;;  %v6827_v49 = vld [vmem:[#allocation35_spill] sm:$0xff] }
 0x283   : > { %v1023_v13 = vpack.c.bf16 %v991_v12, %v989_v21  ;;  %6821 = vst [vmem:[#allocation81_spill] sm:$0xff] %v5735_v39  ;;  %3592 = vpow2.f32 %v2017_v59  ;;  %v2493_v3 = vpop.xlane.xlu1 %2492  ;;  %v2629_v12 = vadd.f32 %v5735_v39, %v5730_v60  ;;  %v6828_v50 = vld [vmem:[#allocation71_spill] sm:$0xff]  ;;  %v6829_v9 = vld [vmem:[#allocation20_spill] sm:$0xff] }
 0x284   : > { %v5737_v40 = vpop.eup %3578  ;;  %3594 = vrcp.f32 %v936_v58  ;;  %1049 = vmatprep.subr.bf16.mxu0 %v1024_v22  ;;  %v2530_v54 = vsub.f32 %v6823_v63, %v2493_v3  ;;  %v2531_v16 = vsub.f32 %v6824_v61, %v2493_v3 }
 0x285   : > { %6822 = vst [vmem:[#allocation82_spill] sm:$0xff] %v5737_v40  ;;  %v2490_v45 = vpop.xlane.xlu0 %2489  ;;  %v5743_v27 = vpop.eup %3580  ;;  %3596 = vrcp.f32 %v933_v52  ;;  %1050 = vmatpush1.bf16.xpose.msra.mxu0 %v1023_v13  ;;  %2630 = vadd.xlane.f32.xlu1 %v2629_v12  ;;  %v3379_v13 = vld [vmem:[%s6089_s1 + $0x14] ss:$8 sps:$4 sm:$0xff]   ;;  %v6831_v12 = vld [vmem:[#allocation94_spill] sm:$0xff] }
 0x286   : > { %6825 = vst [vmem:[#allocation76_spill] sm:$0xff] %v5743_v27  ;;  %v2528_v59 = vsub.f32 %v6826_v44, %v2490_v45  ;;  %v2529_v1 = vsub.f32 %v6827_v49, %v2490_v45  ;;  %v3583_v26 = vpop.eup %3582  ;;  %v2580_v58 = vmul.f32 1.442695, %v2530_v54  ;;  %v2582_v21 = vmul.f32 1.442695, %v2531_v16  ;;  %v6830_v54 = vld [vmem:[#allocation95_spill] sm:$0xff]  ;;  %1642 = vmatprep.mubr.bf16.mxu1 %v3379_v13 }
 0x287   : > { %v2626_v22 = vadd.f32 %v5743_v27, %v5737_v40  ;;  %v3585_v3 = vpop.eup %3584  ;;  %v1497_v60 = vpop.xlane.xlu1 %1496  ;;  %v1553_v39 = vmul.f32 %v3583_v26, %v6828_v50  ;;  %v1552_v52 = vmul.f32 %v3583_v26, %v6829_v9  ;;  %v6841_v27 = vld [vmem:[#allocation72_spill] sm:$0xff] }
 0x288   : > { %v2576_v63 = vmul.f32 1.442695, %v2528_v59  ;;  %v2578_v61 = vmul.f32 1.442695, %v2529_v1  ;;  %3598 = vpow2.f32 %v2580_v58  ;;  %v1551_v16 = vmul.f32 %v3585_v3, %v6830_v54  ;;  %v6835_v58 = vld [vmem:[#allocation90_spill] sm:$0xff]  ;;  %v6836_v54 = vld [vmem:[#allocation39_spill] sm:$0xff] }
 0x289   : > { %2627 = vadd.xlane.f32.xlu0 %v2626_v22  ;;  %v1494_v45 = vpop.xlane.xlu0 %1493  ;;  %v1550_v44 = vmul.f32 %v3585_v3, %v6831_v12  ;;  %3600 = vpow2.f32 %v2582_v21 }
 0x28a   : > { %v5756_v59 = vpop.eup %3586  ;;  %3602 = vpow2.f32 %v2576_v63  ;;  %v1585_v49 = vpack.c.bf16 %v1553_v39, %v1551_v16  ;;  %v6838_v39 = vld [vmem:[#allocation38_spill] sm:$0xff] }
 0x28b   : > { %6832 = vst [vmem:[#allocation83_spill] sm:$0xff] %v5756_v59  ;;  %v1584_v1 = vpack.c.bf16 %v1552_v52, %v1550_v44  ;;  %v5758_v50 = vpop.eup %3588  ;;  %3604 = vpow2.f32 %v2578_v61  ;;  %v6839_v61 = vld [vmem:[#allocation41_spill] sm:$0xff] }
 0x28c   : > { %6833 = vst [vmem:[#allocation85_spill] sm:$0xff] %v5758_v50  ;;  %v1938_v9 = vpop.xlane.xlu1 %1937  ;;  %v5760_v26 = vpop.eup %3590  ;;  %3606 = vrcp.f32 %v1497_v60  ;;  %1610 = vmatprep.subr.bf16.mxu1 %v1585_v49  ;;  %v2074_v21 = vadd.f32 %v5758_v50, %v5756_v59  ;;  %v6840_v59 = vld [vmem:[#allocation23_spill] sm:$0xff] }
 0x28d   : > { %6834 = vst [vmem:[#allocation86_spill] sm:$0xff] %v5760_v26  ;;  %v1973_v22 = vsub.f32 %v6835_v58, %v1938_v9  ;;  %v1974_v40 = vsub.f32 %v6836_v54, %v1938_v9  ;;  %v1935_v3 = vpop.xlane.xlu0 %1934  ;;  %v5766_v13 = vpop.eup %3592  ;;  %3608 = vrcp.f32 %v1494_v45  ;;  %1611 = vmatpush1.bf16.xpose.msra.mxu1 %v1584_v1  ;;  %v6842_v1 = vld [vmem:[#allocation22_spill] sm:$0xff] }
 0x28e   : > { %6837 = vst [vmem:[#allocation84_spill] sm:$0xff] %v5766_v13  ;;  %v1971_v63 = vsub.f32 %v6838_v39, %v1935_v3  ;;  %v1972_v52 = vsub.f32 %v6839_v61, %v1935_v3  ;;  %v3595_v16 = vpop.eup %3594  ;;  %2075 = vadd.xlane.f32.xlu1 %v2074_v21  ;;  %v2071_v44 = vadd.f32 %v5766_v13, %v5760_v26  ;;  %v6843_v61 = vld [vmem:[#allocation96_spill] sm:$0xff] }
 0x28f   : > { %v2027_v12 = vmul.f32 1.442695, %v1973_v22  ;;  %v2029_v60 = vmul.f32 1.442695, %v1974_v40  ;;  %v3597_v49 = vpop.eup %3596  ;;  %v996_v50 = vmul.f32 %v3595_v16, %v6840_v59  ;;  %v995_v45 = vmul.f32 %v3595_v16, %v6841_v27  ;;  %v6847_v27 = vld [vmem:[#allocation40_spill] sm:$0xff] }
 0x290   : > { %v2023_v9 = vmul.f32 1.442695, %v1971_v63  ;;  %v2025_v58 = vmul.f32 1.442695, %v1972_v52  ;;  %v942_v54 = vpop.xlane.xlu1 %941  ;;  %2072 = vadd.xlane.f32.xlu0 %v2071_v44  ;;  %v994_v39 = vmul.f32 %v3597_v49, %v6842_v1  ;;  %v993_v22 = vmul.f32 %v3597_v49, %v6843_v61  ;;  %v6852_v13 = vld [vmem:[#allocation24_spill] sm:$0xff] }
 0x291   : > { %3610 = vpow2.f32 %v2027_v12  ;;  %v939_v3 = vpop.xlane.xlu0 %938  ;;  %v6848_v12 = vld [vmem:[#allocation44_spill] sm:$0xff] }
 0x292   : > { %3612 = vpow2.f32 %v2029_v60  ;;  %v5776_v40 = vpop.eup %3598  ;;  %v1026_v21 = vpack.c.bf16 %v996_v50, %v994_v39  ;;  %v1025_v26 = vpack.c.bf16 %v995_v45, %v993_v22  ;;  %v6849_v50 = vld [vmem:[#allocation45_spill] sm:$0xff] }
 0x293   : > { %6844 = vst [vmem:[#allocation87_spill] sm:$0xff] %v5776_v40  ;;  %3614 = vpow2.f32 %v2023_v9  ;;  %v5778_v63 = vpop.eup %3600 }
 0x294   : > { %6845 = vst [vmem:[#allocation88_spill] sm:$0xff] %v5778_v63  ;;  %3616 = vpow2.f32 %v2025_v58  ;;  %v2499_v52 = vpop.xlane.xlu1 %2498  ;;  %v5780_v59 = vpop.eup %3602  ;;  %1051 = vmatprep.subr.bf16.mxu0 %v1026_v21  ;;  %v2635_v60 = vadd.f32 %v5778_v63, %v5776_v40  ;;  %v6850_v58 = vld [vmem:[#allocation91_spill] sm:$0xff]  ;;  %v6851_v40 = vld [vmem:[#allocation97_spill] sm:$0xff] }
 0x295   : > { %6846 = vst [vmem:[#allocation2_spill] sm:$0xff] %v5780_v59  ;;  %3618 = vrcp.f32 %v942_v54  ;;  %v2534_v16 = vsub.f32 %v6847_v27, %v2499_v52  ;;  %v2535_v44 = vsub.f32 %v6848_v12, %v2499_v52  ;;  %v2496_v1 = vpop.xlane.xlu0 %2495  ;;  %v5786_v49 = vpop.eup %3604  ;;  %1052 = vmatpush1.bf16.xpose.msra.mxu0 %v1025_v26  ;;  %v6853_v26 = vld [vmem:[#allocation26_spill] sm:$0xff] }
 0x296   : > { %3620 = vrcp.f32 %v939_v3  ;;  %v2532_v9 = vsub.f32 %v6849_v50, %v2496_v1  ;;  %v2533_v45 = vsub.f32 %v6850_v58, %v2496_v1  ;;  %v3607_v39 = vpop.eup %3606  ;;  %2636 = vadd.xlane.f32.xlu1 %v2635_v60  ;;  %v2632_v22 = vadd.f32 %v5786_v49, %v5780_v59  ;;  %v6854_v58 = vld [vmem:[#allocation27_spill] sm:$0xff] }
 0x297   : > { %v2588_v61 = vmul.f32 1.442695, %v2534_v16  ;;  %v2590_v54 = vmul.f32 1.442695, %v2535_v44  ;;  %v3609_v21 = vpop.eup %3608  ;;  %v1557_v63 = vmul.f32 %v3607_v39, %v6851_v40  ;;  %v1556_v3 = vmul.f32 %v3607_v39, %v6852_v13 }
 0x298   : > { %v2584_v52 = vmul.f32 1.442695, %v2532_v9  ;;  %v2586_v27 = vmul.f32 1.442695, %v2533_v45  ;;  %v1503_v12 = vpop.xlane.xlu1 %1502  ;;  %2633 = vadd.xlane.f32.xlu0 %v2632_v22  ;;  %v1555_v50 = vmul.f32 %v3609_v21, %v6853_v26  ;;  %v1554_v16 = vmul.f32 %v3609_v21, %v6854_v58 }
 0x299   : > { %3622 = vpow2.f32 %v2588_v61  ;;  %v1500_v1 = vpop.xlane.xlu0 %1499 }
 0x29a   : > { %3624 = vpow2.f32 %v2590_v54  ;;  %v1587_v60 = vpack.c.bf16 %v1557_v63, %v1555_v50  ;;  %v1586_v59 = vpack.c.bf16 %v1556_v3, %v1554_v16  ;;  %v6858_v63 = vld [vmem:[#allocation92_spill] sm:$0xff] }
 0x29b   : > { %v5796_v44 = vpop.eup %3610  ;;  %3626 = vpow2.f32 %v2584_v52  ;;  %v6859_v52 = vld [vmem:[#allocation47_spill] sm:$0xff] }
 0x29c   : > { %6855 = vst [vmem:[#allocation3_spill] sm:$0xff] %v5796_v44  ;;  %v5798_v9 = vpop.eup %3612  ;;  %3628 = vpow2.f32 %v2586_v27  ;;  %v1944_v45 = vpop.xlane.xlu1 %1943  ;;  %1612 = vmatprep.subr.bf16.mxu1 %v1587_v60  ;;  %v6860_v60 = vld [vmem:[#allocation34_spill] sm:$0xff] }
 0x29d   : > { %v5800_v40 = vpop.eup %3614  ;;  %3630 = vrcp.f32 %v1503_v12  ;;  %v1977_v13 = vsub.f32 %v5357_v34, %v1944_v45  ;;  %v1978_v39 = vsub.f32 %v5361_v29, %v1944_v45  ;;  %v2080_v54 = vadd.f32 %v5798_v9, %v5796_v44  ;;  %1613 = vmatpush1.bf16.xpose.msra.mxu1 %v1586_v59  ;;  %v6861_v44 = vld [vmem:[#allocation33_spill] sm:$0xff]  ;;  %v6862_v59 = vld [vmem:[#allocation99_spill] sm:$0xff] }
 0x29e   : > { %6856 = vst [vmem:[#allocation104_spill] sm:$0xff] %v5800_v40  ;;  %v1941_v61 = vpop.xlane.xlu0 %1940  ;;  %v5806_v22 = vpop.eup %3616  ;;  %3632 = vrcp.f32 %v1500_v1 }
 0x29f   : > { %6857 = vst [vmem:[#allocation105_spill] sm:$0xff] %v5806_v22  ;;  %v1975_v21 = vsub.f32 %v6858_v63, %v1941_v61  ;;  %v1976_v27 = vsub.f32 %v6859_v52, %v1941_v61  ;;  %v3619_v3 = vpop.eup %3618  ;;  %v2035_v26 = vmul.f32 1.442695, %v1977_v13  ;;  %v2037_v12 = vmul.f32 1.442695, %v1978_v39  ;;  %2081 = vadd.xlane.f32.xlu1 %v2080_v54  ;;  %v6863_v52 = vld [vmem:[#allocation98_spill] sm:$0xff] }
 0x2a0   : > { %v2077_v34 = vadd.f32 %v5806_v22, %v5800_v40  ;;  %v3621_v29 = vpop.eup %3620  ;;  %v948_v16 = vpop.xlane.xlu1 %947  ;;  %v1000_v45 = vmul.f32 %v3619_v3, %v6860_v60  ;;  %v999_v1 = vmul.f32 %v3619_v3, %v6861_v44  ;;  %v6867_v44 = vld [vmem:[#allocation48_spill] sm:$0xff]  ;;  %v6872_v22 = vld [vmem:[#allocation102_spill] sm:$0xff] }
 0x2a1   : > { %v2031_v50 = vmul.f32 1.442695, %v1975_v21  ;;  %v2033_v58 = vmul.f32 1.442695, %v1976_v27  ;;  %3634 = vpow2.f32 %v2035_v26  ;;  %v998_v63 = vmul.f32 %v3621_v29, %v6862_v59  ;;  %v6868_v26 = vld [vmem:[#allocation93_spill] sm:$0xff] }
 0x2a2   : > { %2078 = vadd.xlane.f32.xlu0 %v2077_v34  ;;  %v945_v61 = vpop.xlane.xlu0 %944  ;;  %v997_v13 = vmul.f32 %v3621_v29, %v6863_v52  ;;  %3636 = vpow2.f32 %v2037_v12 }
 0x2a3   : > { %v5816_v39 = vpop.eup %3622  ;;  %3638 = vpow2.f32 %v2031_v50  ;;  %v1028_v54 = vpack.c.bf16 %v1000_v45, %v998_v63  ;;  %v6869_v50 = vld [vmem:[#allocation49_spill] sm:$0xff] }
 0x2a4   : > { %6864 = vst [vmem:[#allocation106_spill] sm:$0xff] %v5816_v39  ;;  %v1027_v40 = vpack.c.bf16 %v999_v1, %v997_v13  ;;  %v5818_v21 = vpop.eup %3624  ;;  %3640 = vpow2.f32 %v2033_v58  ;;  %v2505_v27 = vpop.xlane.xlu1 %2504  ;;  %v6870_v58 = vld [vmem:[#allocation50_spill] sm:$0xff] }
 0x2a5   : > { %6865 = vst [vmem:[#allocation107_spill] sm:$0xff] %v5818_v21  ;;  %v5820_v60 = vpop.eup %3626  ;;  %3642 = vrcp.f32 %v948_v16  ;;  %1053 = vmatprep.subr.bf16.mxu0 %v1028_v54  ;;  %v2538_v3 = vsub.f32 %v6867_v44, %v2505_v27  ;;  %v2539_v34 = vsub.f32 %v6868_v26, %v2505_v27  ;;  %v2641_v12 = vadd.f32 %v5818_v21, %v5816_v39  ;;  %v6871_v39 = vld [vmem:[#allocation103_spill] sm:$0xff] }
 0x2a6   : > { %6866 = vst [vmem:[#allocation6_spill] sm:$0xff] %v5820_v60  ;;  %v2502_v59 = vpop.xlane.xlu0 %2501  ;;  %v5826_v29 = vpop.eup %3628  ;;  %3644 = vrcp.f32 %v945_v61  ;;  %1054 = vmatpush1.bf16.xpose.msra.mxu0 %v1027_v40  ;;  %v6873_v40 = vld [vmem:[#allocation101_spill] sm:$0xff] }
 0x2a7   : > { %v2536_v45 = vsub.f32 %v6869_v50, %v2502_v59  ;;  %v2537_v1 = vsub.f32 %v6870_v58, %v2502_v59  ;;  %v3631_v63 = vpop.eup %3630  ;;  %v2596_v52 = vmul.f32 1.442695, %v2538_v3  ;;  %v2598_v16 = vmul.f32 1.442695, %v2539_v34  ;;  %2642 = vadd.xlane.f32.xlu1 %v2641_v12  ;;  %v6874_v58 = vld [vmem:[#allocation100_spill] sm:$0xff] }
 0x2a8   : > { %v2638_v13 = vadd.f32 %v5826_v29, %v5820_v60  ;;  %v3633_v54 = vpop.eup %3632  ;;  %v1561_v21 = vmul.f32 %v3631_v63, %v6871_v39  ;;  %v1560_v61 = vmul.f32 %v3631_v63, %v6872_v22  ;;  %v6878_v63 = vld [vmem:[#allocation8_spill] sm:$0xff] }
 0x2a9   : > { %v2592_v27 = vmul.f32 1.442695, %v2536_v45  ;;  %v2594_v44 = vmul.f32 1.442695, %v2537_v1  ;;  %v1509_v26 = vpop.xlane.xlu1 %1508  ;;  %3646 = vpow2.f32 %v2596_v52  ;;  %v1559_v50 = vmul.f32 %v3633_v54, %v6873_v40 }
 0x2aa   : > { %2639 = vadd.xlane.f32.xlu0 %v2638_v13  ;;  %v1506_v59 = vpop.xlane.xlu0 %1505  ;;  %v1558_v3 = vmul.f32 %v3633_v54, %v6874_v58  ;;  %3648 = vpow2.f32 %v2598_v16 }
 0x2ab   : > { %v5836_v34 = vpop.eup %3634  ;;  %3650 = vpow2.f32 %v2592_v27  ;;  %v1589_v12 = vpack.c.bf16 %v1561_v21, %v1559_v50  ;;  %v6879_v21 = vld [vmem:[#allocation51_spill] sm:$0xff] }
 0x2ac   : > { %6875 = vst [vmem:[#allocation7_spill] sm:$0xff] %v5836_v34  ;;  %v1588_v60 = vpack.c.bf16 %v1560_v61, %v1558_v3  ;;  %v5838_v45 = vpop.eup %3636  ;;  %3652 = vpow2.f32 %v2594_v44  ;;  %v6880_v44 = vld [vmem:[#allocation64_spill] sm:$0xff] }
 0x2ad   : > { %6876 = vst [vmem:[#allocation4_spill] sm:$0xff] %v5838_v45  ;;  %v1950_v1 = vpop.xlane.xlu1 %1949  ;;  %v5840_v39 = vpop.eup %3638  ;;  %3654 = vrcp.f32 %v1509_v26  ;;  %1614 = vmatprep.subr.bf16.mxu1 %v1589_v12  ;;  %v2086_v16 = vadd.f32 %v5838_v45, %v5836_v34  ;;  %v6882_v45 = vld [vmem:[#allocation14_spill] sm:$0xff] }
 0x2ae   : > { %6877 = vst [vmem:[#allocation5_spill] sm:$0xff] %v5840_v39  ;;  %v1981_v22 = vsub.f32 %v5449_v38, %v1950_v1  ;;  %v1982_v52 = vsub.f32 %v6878_v63, %v1950_v1  ;;  %v1947_v13 = vpop.xlane.xlu0 %1946  ;;  %v5846_v54 = vpop.eup %3640  ;;  %3656 = vrcp.f32 %v1506_v59  ;;  %1615 = vmatpush1.bf16.xpose.msra.mxu1 %v1588_v60  ;;  %v6881_v63 = vld [vmem:[#allocation18_spill] sm:$0xff]  ;;  %v6883_v60 = vld [vmem:[#allocation89_spill] sm:$0xff] }
 0x2af   : > { %v1979_v27 = vsub.f32 %v6879_v21, %v1947_v13  ;;  %v1980_v61 = vsub.f32 %v6880_v44, %v1947_v13  ;;  %v3643_v40 = vpop.eup %3642  ;;  %2087 = vadd.xlane.f32.xlu1 %v2086_v16  ;;  %v2083_v38 = vadd.f32 %v5846_v54, %v5840_v39  ;;  %v6884_v44 = vld [vmem:[#allocation36_spill] sm:$0xff] }
 0x2b0   : > { %v2043_v50 = vmul.f32 1.442695, %v1981_v22  ;;  %v2045_v26 = vmul.f32 1.442695, %v1982_v52  ;;  %v3645_v58 = vpop.eup %3644  ;;  %v1004_v34 = vmul.f32 %v3643_v40, %v6881_v63  ;;  %v1003_v59 = vmul.f32 %v3643_v40, %v6882_v45 }
 0x2b1   : > { %v2039_v3 = vmul.f32 1.442695, %v1979_v27  ;;  %v2041_v12 = vmul.f32 1.442695, %v1980_v61  ;;  %2084 = vadd.xlane.f32.xlu0 %v2083_v38  ;;  %v1002_v21 = vmul.f32 %v3645_v58, %v6883_v60  ;;  %v1001_v22 = vmul.f32 %v3645_v58, %v6884_v44  ;;  %v6885_v44 = vld [vmem:[#allocation46_spill] sm:$0xff] }
 0x2b2   : > { %v954_v1 = vpop.xlane.xlu1 %953  ;;  %3658 = vpow2.f32 %v2043_v50  ;;  %v951_v13 = vpop.xlane.xlu0 %950 }
 0x2b3   : > { %3660 = vpow2.f32 %v2045_v26  ;;  %v5856_v52 = vpop.eup %3646  ;;  %v1030_v16 = vpack.c.bf16 %v1004_v34, %v1002_v21  ;;  %v1029_v39 = vpack.c.bf16 %v1003_v59, %v1001_v22 }
 0x2b4   : > { %3662 = vpow2.f32 %v2039_v3  ;;  %v5858_v27 = vpop.eup %3648 }
 0x2b5   : > { %3664 = vpow2.f32 %v2041_v12  ;;  %v5860_v63 = vpop.eup %3650  ;;  %1055 = vmatprep.subr.bf16.mxu0 %v1030_v16  ;;  %v2647_v26 = vadd.f32 %v5858_v27, %v5856_v52  ;;  %v6886_v16 = vld [vmem:[#allocation43_spill] sm:$0xff] }
 0x2b6   : > { %v2511_v61 = vpop.xlane.xlu1 %2510  ;;  %3666 = vrcp.f32 %v954_v1  ;;  %v2508_v50 = vpop.xlane.xlu0 %2507  ;;  %1056 = vmatpush1.bf16.xpose.msra.mxu0 %v1029_v39 }
 0x2b7   : > { %v2542_v45 = vsub.f32 %v5496_v23, %v2511_v61  ;;  %v2543_v40 = vsub.f32 %v5500_v28, %v2511_v61  ;;  %v5866_v38 = vpop.eup %3652  ;;  %3668 = vrcp.f32 %v951_v13  ;;  %v2540_v34 = vsub.f32 %v5508_v5, %v2508_v50  ;;  %2648 = vadd.xlane.f32.xlu1 %v2647_v26  ;;  %v6887_v5 = vld [vmem:[#allocation42_spill] sm:$0xff]  ;;  %v6888_v61 = vld [vmem:[#allocation37_spill] sm:$0xff] }
 0x2b8   : > { %v2541_v58 = vsub.f32 %v5512_v19, %v2508_v50  ;;  %v3655_v3 = vpop.eup %3654  ;;  %v2644_v23 = vadd.f32 %v5866_v38, %v5860_v63 }
 0x2b9   : > { %v2604_v12 = vmul.f32 1.442695, %v2542_v45  ;;  %v2606_v1 = vmul.f32 1.442695, %v2543_v40  ;;  %v3657_v28 = vpop.eup %3656  ;;  %v2600_v59 = vmul.f32 1.442695, %v2540_v34  ;;  %v1565_v22 = vmul.f32 %v3655_v3, %v6885_v44 }
 0x2ba   : > { %v2602_v60 = vmul.f32 1.442695, %v2541_v58  ;;  %v1515_v21 = vpop.xlane.xlu1 %1514  ;;  %v1564_v13 = vmul.f32 %v3655_v3, %v6886_v16  ;;  %2645 = vadd.xlane.f32.xlu0 %v2644_v23  ;;  %v1563_v39 = vmul.f32 %v3657_v28, %v6887_v5  ;;  %v1512_v19 = vpop.xlane.xlu0 %1511  ;;  %v1562_v45 = vmul.f32 %v3657_v28, %v6888_v61 }
 0x2bb   : > { %3670 = vpow2.f32 %v2604_v12 }
 0x2bc   : > { %3672 = vpow2.f32 %v2606_v1  ;;  %v5876_v40 = vpop.eup %3658  ;;  %v1591_v50 = vpack.c.bf16 %v1565_v22, %v1563_v39  ;;  %v1590_v26 = vpack.c.bf16 %v1564_v13, %v1562_v45 }
 0x2bd   : > { %3674 = vpow2.f32 %v2600_v59  ;;  %v5878_v34 = vpop.eup %3660 }
 0x2be   : > { %3676 = vpow2.f32 %v2602_v60  ;;  %v960_v58 = vpop.xlane.xlu1 %959  ;;  %v5880_v44 = vpop.eup %3662  ;;  %1616 = vmatprep.subr.bf16.mxu1 %v1591_v50  ;;  %v2092_v12 = vadd.f32 %v5878_v34, %v5876_v40 }
 0x2bf   : > { %3678 = vrcp.f32 %v1515_v21  ;;  %v957_v3 = vpop.xlane.xlu0 %956  ;;  %v5884_v23 = vpop.eup %3664  ;;  %1617 = vmatpush1.bf16.xpose.msra.mxu1 %v1590_v26 }
 0x2c0   : > { %3680 = vrcp.f32 %v1512_v19  ;;  %v3667_v1 = vpop.eup %3666  ;;  %2093 = vadd.xlane.f32.xlu1 %v2092_v12  ;;  %v2089_v28 = vadd.f32 %v5884_v23, %v5880_v44 }
 0x2c1   : > { %3682 = vrcp.f32 %v960_v58  ;;  %v3669_v59 = vpop.eup %3668  ;;  %v1008_v21 = vmul.f32 %v3667_v1, %v5409_v20  ;;  %v1007_v22 = vmul.f32 %v3667_v1, %v5397_v57 }
 0x2c2   : > { %3684 = vrcp.f32 %v957_v3  ;;  %v1521_v60 = vpop.xlane.xlu1 %1520  ;;  %2090 = vadd.xlane.f32.xlu0 %v2089_v28  ;;  %v1006_v16 = vmul.f32 %v3669_v59, %v5389_v15  ;;  %v1005_v5 = vmul.f32 %v3669_v59, %v5363_v4 }
 0x2c3   : > { %3686 = vrcp.f32 %v1521_v60  ;;  %v1518_v13 = vpop.xlane.xlu0 %1517 }
 0x2c4   : > { %3688 = vrcp.f32 %v1518_v13  ;;  %v1032_v19 = vpack.c.bf16 %v1008_v21, %v1006_v16  ;;  %v1031_v61 = vpack.c.bf16 %v1007_v22, %v1005_v5 }
 0x2c5   : > { %v5892_v39 = vpop.eup %3670 }
 0x2c6   : > { %v5894_v45 = vpop.eup %3672  ;;  %v966_v50 = vpop.xlane.xlu1 %965  ;;  %1057 = vmatprep.subr.bf16.mxu0 %v1032_v19 }
 0x2c7   : > { %v5896_v26 = vpop.eup %3674  ;;  %3690 = vrcp.f32 %v966_v50  ;;  %v963_v57 = vpop.xlane.xlu0 %962  ;;  %v2653_v20 = vadd.f32 %v5894_v45, %v5892_v39  ;;  %1058 = vmatpush1.bf16.xpose.msra.mxu0 %v1031_v61 }
 0x2c8   : > { %v5900_v15 = vpop.eup %3676  ;;  %3692 = vrcp.f32 %v963_v57 }
 0x2c9   : > { %v3679_v4 = vpop.eup %3678  ;;  %2654 = vadd.xlane.f32.xlu1 %v2653_v20  ;;  %v2650_v58 = vadd.f32 %v5900_v15, %v5896_v26 }
 0x2ca   : > { %v3681_v3 = vpop.eup %3680  ;;  %v1527_v12 = vpop.xlane.xlu1 %1526  ;;  %v1569_v1 = vmul.f32 %v3679_v4, %v5468_v43  ;;  %v1568_v28 = vmul.f32 %v3679_v4, %v5465_v0 }
 0x2cb   : > { %v3683_v59 = vpop.eup %3682  ;;  %2651 = vadd.xlane.f32.xlu0 %v2650_v58  ;;  %3694 = vrcp.f32 %v1527_v12  ;;  %v1567_v60 = vmul.f32 %v3681_v3, %v5439_v41  ;;  %v1524_v21 = vpop.xlane.xlu0 %1523  ;;  %v1566_v22 = vmul.f32 %v3681_v3, %v5433_v32 }
 0x2cc   : > { %v3685_v16 = vpop.eup %3684  ;;  %3696 = vrcp.f32 %v1524_v21  ;;  %v1012_v13 = vmul.f32 %v3683_v59, %v5526_v14  ;;  %v1011_v5 = vmul.f32 %v3683_v59, %v5515_v10 }
 0x2cd   : > { %v3687_v19 = vpop.eup %3686  ;;  %v1593_v61 = vpack.c.bf16 %v1569_v1, %v1567_v60  ;;  %v1592_v50 = vpack.c.bf16 %v1568_v28, %v1566_v22  ;;  %v1010_v43 = vmul.f32 %v3685_v16, %v5502_v33  ;;  %v1009_v0 = vmul.f32 %v3685_v16, %v5478_v42 }
 0x2ce   : > { %v3689_v57 = vpop.eup %3688  ;;  %v972_v20 = vpop.xlane.xlu1 %971  ;;  %v1573_v41 = vmul.f32 %v3687_v19, %v5548_v2  ;;  %v1572_v3 = vmul.f32 %v3687_v19, %v5540_v56  ;;  %v6890_v19 = vld [vmem:[#allocation60_spill] sm:$0xff] }
 0x2cf   : > { %1618 = vmatprep.subr.bf16.mxu1 %v1593_v61  ;;  %3698 = vrcp.f32 %v972_v20  ;;  %v1034_v32 = vpack.c.bf16 %v1012_v13, %v1010_v43  ;;  %v969_v4 = vpop.xlane.xlu0 %968  ;;  %v1033_v58 = vpack.c.bf16 %v1011_v5, %v1009_v0  ;;  %v1571_v14 = vmul.f32 %v3689_v57, %v5552_v30  ;;  %v6889_v13 = vld [vmem:[#allocation52_spill] sm:$0xff] }
 0x2d0   : > { %1619 = vmatpush1.bf16.xpose.msra.mxu1 %v1592_v50  ;;  %3700 = vrcp.f32 %v969_v4  ;;  %v1570_v10 = vmul.f32 %v3689_v57, %v5534_v46  ;;  %v6892_v50 = vld [vmem:[#allocation65_spill] sm:$0xff]  ;;  %v6895_v4 = vld [vmem:[#allocation19_spill] sm:$0xff] }
 0x2d1   : > { %v3691_v33 = vpop.eup %3690  ;;  %1059 = vmatprep.subr.bf16.mxu0 %v1034_v32  ;;  %v1595_v42 = vpack.c.bf16 %v1573_v41, %v1571_v14  ;;  %v6894_v41 = vld [vmem:[#allocation53_spill] sm:$0xff]  ;;  %v6896_v14 = vld [vmem:[#allocation15_spill] sm:$0xff] }
 0x2d2   : > { %v3693_v12 = vpop.eup %3692  ;;  %1060 = vmatpush1.bf16.xpose.msra.mxu0 %v1033_v58  ;;  %v1533_v1 = vpop.xlane.xlu1 %1532  ;;  %v1016_v2 = vmul.f32 %v3691_v33, %v5562_v8  ;;  %v1015_v28 = vmul.f32 %v3691_v33, %v5557_v55  ;;  %v1594_v46 = vpack.c.bf16 %v1572_v3, %v1570_v10  ;;  %v6891_v55 = vld [vmem:[#allocation59_spill] sm:$0xff] }
 0x2d3   : > { %3702 = vrcp.f32 %v1533_v1  ;;  %1620 = vmatprep.subr.bf16.mxu1 %v1595_v42  ;;  %v1530_v59 = vpop.xlane.xlu0 %1529  ;;  %v1014_v30 = vmul.f32 %v3693_v12, %v5566_v48  ;;  %v1013_v60 = vmul.f32 %v3693_v12, %v5554_v51  ;;  %v6893_v51 = vld [vmem:[#allocation54_spill] sm:$0xff] }
 0x2d4   : > { %3704 = vrcp.f32 %v1530_v59  ;;  %v6898_v59 = vld [vmem:[#allocation57_spill] sm:$0xff] }
 0x2d5   : > { %v3695_v56 = vpop.eup %3694  ;;  %v1036_v21 = vpack.c.bf16 %v1016_v2, %v1014_v30  ;;  %v1035_v16 = vpack.c.bf16 %v1015_v28, %v1013_v60  ;;  %v6897_v2 = vld [vmem:[#allocation68_spill] sm:$0xff]  ;;  %v6899_v60 = vld [vmem:[#allocation55_spill] sm:$0xff] }
 0x2d6   : > { %v3697_v22 = vpop.eup %3696  ;;  %v1577_v5 = vmul.f32 %v3695_v56, %v6889_v13  ;;  %v1576_v43 = vmul.f32 %v3695_v56, %v6892_v50  ;;  %v6900_v56 = vld [vmem:[#allocation56_spill] sm:$0xff]  ;;  %v3374_v13 = vld [vmem:[%s6089_s1] ss:$8 sps:$4 sm:$0xff]  }
 0x2d7   : > { %1061 = vmatprep.subr.bf16.mxu0 %v1036_v21  ;;  %v1575_v8 = vmul.f32 %v3697_v22, %v6890_v19  ;;  %v1574_v61 = vmul.f32 %v3697_v22, %v6891_v55  ;;  %v3377_v19 = vld [vmem:[%s6089_s1 + $0x10] ss:$8 sps:$4 sm:$0xff]   ;;  %v2049_v55 = vpop.xlane.xlu0 %2048 }
 0x2d8   : > { %1621 = vmatpush1.bf16.xpose.msra.mxu1 %v1594_v46  ;;  %3706 = vrcp.f32 %v2049_v55 }
 0x2d9   : > { %v3699_v0 = vpop.eup %3698  ;;  %v1597_v48 = vpack.c.bf16 %v1577_v5, %v1575_v8  ;;  %v1596_v3 = vpack.c.bf16 %v1576_v43, %v1574_v61  ;;  %v3382_v5 = vld [vmem:[%s6089_s1 + $0x24] ss:$8 sps:$4 sm:$0xff]   ;;  %v3385_v8 = vld [vmem:[%s6089_s1 + $0x34] ss:$8 sps:$4 sm:$0xff]  }
 0x2da   : > { %v3701_v57 = vpop.eup %3700  ;;  %1062 = vmatpush1.bf16.xpose.msra.mxu0 %v1035_v16  ;;  %v1020_v20 = vmul.f32 %v3699_v0, %v6893_v51  ;;  %v1019_v32 = vmul.f32 %v3699_v0, %v6894_v41  ;;  %v6901_v51 = vld [vmem:[#allocation77_spill] sm:$0xff] }
 0x2db   : > { %1622 = vmatprep.subr.bf16.mxu1 %v1597_v48  ;;  %v1018_v58 = vmul.f32 %v3701_v57, %v6895_v4  ;;  %v1017_v10 = vmul.f32 %v3701_v57, %v6896_v14 }
 0x2dd   : > { %v3703_v33 = vpop.eup %3702  ;;  %v1038_v42 = vpack.c.bf16 %v1020_v20, %v1018_v58  ;;  %v1037_v1 = vpack.c.bf16 %v1019_v32, %v1017_v10  ;;  %v6902_v32 = vld [vmem:[#allocation58_spill] sm:$0xff] }
 0x2de   : > { %v3705_v12 = vpop.eup %3704  ;;  %v1581_v28 = vmul.f32 %v3703_v33, %v6897_v2  ;;  %v1580_v21 = vmul.f32 %v3703_v33, %v6900_v56 }
 0x2df   : > { %1063 = vmatprep.subr.bf16.mxu0 %v1038_v42  ;;  %v1579_v30 = vmul.f32 %v3705_v12, %v6898_v59  ;;  %v1578_v46 = vmul.f32 %v3705_v12, %v6899_v60 }
 0x2e0   : > { %1623 = vmatpush1.bf16.xpose.msra.mxu1 %v1596_v3 }
 0x2e1   : > { %v1599_v22 = vpack.c.bf16 %v1581_v28, %v1579_v30  ;;  %v1598_v16 = vpack.c.bf16 %v1580_v21, %v1578_v46 }
 0x2e2   : > { %1064 = vmatpush1.bf16.xpose.msra.mxu0 %v1037_v1  ;;  %v3707_v0 = vpop.eup %3706 }
 0x2e3   : > { %1624 = vmatprep.subr.bf16.mxu1 %v1599_v22  ;;  %v2112_v20 = vmul.f32 %v3707_v0, %v6901_v51  ;;  %v2111_v4 = vmul.f32 %v3707_v0, %v6902_v32  ;;  %v6904_v51 = vld [vmem:[#allocation78_spill] sm:$0xff]  ;;  %v6906_v32 = vld [vmem:[#allocation67_spill] sm:$0xff] }
 0x2e8   : > { %1625 = vmatpush1.bf16.xpose.msra.mxu1 %v1598_v16 }
 0x2e9   : > { %1082 = vmatmul.mubr.bf16.vlgmr.msra.gmra.mrb[0].mxu0 %v3374_v13 }
 0x2ea   : > { %2203 = vmatprep.mubr.bf16.mxu0 %v3382_v5 }
 0x2eb   : > { %v2052_v61 = vpop.xlane.xlu1 %2051 }
 0x2ec   : > { %3708 = vrcp.f32 %v2052_v61 }
 0x2ef   : > { %1643 = vmatmul.mubr.bf16.vlgmr.msra.gmra.mrb[0].mxu1 %v3377_v19  ;;  %v2610_v50 = vpop.xlane.xlu0 %2609 }
 0x2f0   : > { %2764 = vmatprep.mubr.bf16.mxu1 %v3385_v8  ;;  %3710 = vrcp.f32 %v2610_v50 }
 0x2f2   : > { %v2613_v43 = vpop.xlane.xlu1 %2612 }
 0x2f3   : > { %3712 = vrcp.f32 %v2613_v43 }
 0x2f6   : > { %v3709_v48 = vpop.eup %3708  ;;  %v2058_v57 = vpop.xlane.xlu1 %2057 }
 0x2f7   : > { %v2114_v41 = vmul.f32 %v3709_v48, %v5626_v24  ;;  %v2113_v58 = vmul.f32 %v3709_v48, %v5624_v37  ;;  %3714 = vrcp.f32 %v2058_v57  ;;  %v6903_v48 = vld [vmem:[#allocation66_spill] sm:$0xff] }
 0x2f9   : > { %v2055_v14 = vpop.xlane.xlu0 %2054  ;;  %v2146_v10 = vpack.c.bf16 %v2114_v41, %v2112_v20  ;;  %v2145_v3 = vpack.c.bf16 %v2113_v58, %v2111_v4 }
 0x2fa   : > { %3716 = vrcp.f32 %v2055_v14  ;;  %v3711_v33 = vpop.eup %3710 }
 0x2fb   : > { %2171 = vmatprep.subr.bf16.mxu0 %v2146_v10  ;;  %v2673_v12 = vmul.f32 %v3711_v33, %v5636_v47  ;;  %v2672_v1 = vmul.f32 %v3711_v33, %v5633_v18  ;;  %v6908_v33 = vld [vmem:[#allocation61_spill] sm:$0xff] }
 0x2fc   : > { %2172 = vmatpush1.bf16.xpose.msra.mxu0 %v2145_v3 }
 0x2fd   : > { %v3713_v2 = vpop.eup %3712 }
 0x2fe   : > { %v2619_v42 = vpop.xlane.xlu1 %2618  ;;  %v2675_v28 = vmul.f32 %v3713_v2, %v5645_v62  ;;  %v2674_v37 = vmul.f32 %v3713_v2, %v5640_v11  ;;  %v6909_v2 = vld [vmem:[#allocation62_spill] sm:$0xff] }
 0x2ff   : > { %3718 = vrcp.f32 %v2619_v42 }
 0x300   : > { %v2616_v24 = vpop.xlane.xlu0 %2615  ;;  %v2707_v30 = vpack.c.bf16 %v2675_v28, %v2673_v12  ;;  %v2706_v60 = vpack.c.bf16 %v2674_v37, %v2672_v1  ;;  %v6910_v28 = vld [vmem:[#allocation70_spill] sm:$0xff] }
 0x301   : > { %3720 = vrcp.f32 %v2616_v24  ;;  %v3715_v46 = vpop.eup %3714 }
 0x302   : > { %v2064_v59 = vpop.xlane.xlu1 %2063  ;;  %2732 = vmatprep.subr.bf16.mxu1 %v2707_v30  ;;  %v2118_v47 = vmul.f32 %v3715_v46, %v5654_v17  ;;  %v2117_v18 = vmul.f32 %v3715_v46, %v5650_v31  ;;  %v6911_v46 = vld [vmem:[#allocation74_spill] sm:$0xff] }
 0x303   : > { %3722 = vrcp.f32 %v2064_v59  ;;  %2733 = vmatpush1.bf16.xpose.msra.mxu1 %v2706_v60 }
 0x304   : > { %v2061_v56 = vpop.xlane.xlu0 %2060  ;;  %v3717_v21 = vpop.eup %3716 }
 0x305   : > { %3724 = vrcp.f32 %v2061_v56  ;;  %v2116_v16 = vmul.f32 %v3717_v21, %v5662_v25  ;;  %v2115_v62 = vmul.f32 %v3717_v21, %v5658_v53  ;;  %v6912_v21 = vld [vmem:[#allocation73_spill] sm:$0xff] }
 0x306   : > { %v2625_v22 = vpop.xlane.xlu1 %2624 }
 0x307   : > { %3726 = vrcp.f32 %v2625_v22  ;;  %v2148_v13 = vpack.c.bf16 %v2118_v47, %v2116_v16  ;;  %v2147_v5 = vpack.c.bf16 %v2117_v18, %v2115_v62  ;;  %v6913_v22 = vld [vmem:[#allocation80_spill] sm:$0xff]  ;;  %v6914_v62 = vld [vmem:[#allocation79_spill] sm:$0xff] }
 0x308   : > { %v2622_v11 = vpop.xlane.xlu0 %2621 }
 0x309   : > { %v3719_v19 = vpop.eup %3718  ;;  %3728 = vrcp.f32 %v2622_v11  ;;  %2173 = vmatprep.subr.bf16.mxu0 %v2148_v13 }
 0x30a   : > { %v2070_v8 = vpop.xlane.xlu1 %2069  ;;  %v2679_v55 = vmul.f32 %v3719_v19, %v5672_v7  ;;  %v2678_v17 = vmul.f32 %v3719_v19, %v5670_v6  ;;  %2174 = vmatpush1.bf16.xpose.msra.mxu0 %v2147_v5  ;;  %v6905_v7 = vld [vmem:[#allocation21_spill] sm:$0xff] }
 0x30b   : > { %v3721_v61 = vpop.eup %3720  ;;  %3730 = vrcp.f32 %v2070_v8 }
 0x30c   : > { %v2677_v25 = vmul.f32 %v3721_v61, %v5678_v36  ;;  %v2676_v53 = vmul.f32 %v3721_v61, %v5674_v35  ;;  %v6907_v35 = vld [vmem:[#allocation69_spill] sm:$0xff] }
 0x30d   : > { %v3723_v50 = vpop.eup %3722 }
 0x30e   : > { %v2067_v31 = vpop.xlane.xlu0 %2066  ;;  %v2709_v43 = vpack.c.bf16 %v2679_v55, %v2677_v25  ;;  %v2708_v0 = vpack.c.bf16 %v2678_v17, %v2676_v53  ;;  %v2122_v57 = vmul.f32 %v3723_v50, %v6903_v48  ;;  %v2121_v20 = vmul.f32 %v3723_v50, %v6904_v51  ;;  %v6915_v17 = vld [vmem:[#allocation81_spill] sm:$0xff]  ;;  %v6917_v50 = vld [vmem:[#allocation76_spill] sm:$0xff] }
 0x30f   : > { %3732 = vrcp.f32 %v2067_v31  ;;  %v3725_v41 = vpop.eup %3724  ;;  %v6916_v31 = vld [vmem:[#allocation75_spill] sm:$0xff] }
 0x310   : > { %2734 = vmatprep.subr.bf16.mxu1 %v2709_v43  ;;  %v2120_v6 = vmul.f32 %v3725_v41, %v6905_v7  ;;  %v2119_v4 = vmul.f32 %v3725_v41, %v6906_v32 }
 0x311   : > { %v3727_v58 = vpop.eup %3726  ;;  %2735 = vmatpush1.bf16.xpose.msra.mxu1 %v2708_v0  ;;  %v6918_v0 = vld [vmem:[#allocation82_spill] sm:$0xff] }
 0x312   : > { %v2631_v14 = vpop.xlane.xlu1 %2630  ;;  %v2150_v36 = vpack.c.bf16 %v2122_v57, %v2120_v6  ;;  %v2149_v10 = vpack.c.bf16 %v2121_v20, %v2119_v4  ;;  %v2683_v3 = vmul.f32 %v3727_v58, %v6907_v35  ;;  %v2682_v42 = vmul.f32 %v3727_v58, %v6908_v33  ;;  %v6919_v6 = vld [vmem:[#allocation85_spill] sm:$0xff]  ;;  %v6920_v4 = vld [vmem:[#allocation83_spill] sm:$0xff]  ;;  %v6922_v35 = vld [vmem:[#allocation86_spill] sm:$0xff] }
 0x313   : > { %v3729_v12 = vpop.eup %3728  ;;  %3734 = vrcp.f32 %v2631_v14 }
 0x314   : > { %2175 = vmatprep.subr.bf16.mxu0 %v2150_v36  ;;  %v2681_v24 = vmul.f32 %v3729_v12, %v6909_v2  ;;  %v2680_v37 = vmul.f32 %v3729_v12, %v6910_v28  ;;  %v6921_v36 = vld [vmem:[#allocation84_spill] sm:$0xff] }
 0x315   : > { %v3731_v59 = vpop.eup %3730  ;;  %2176 = vmatpush1.bf16.xpose.msra.mxu0 %v2149_v10 }
 0x316   : > { %v2628_v1 = vpop.xlane.xlu0 %2627  ;;  %v2711_v30 = vpack.c.bf16 %v2683_v3, %v2681_v24  ;;  %v2710_v60 = vpack.c.bf16 %v2682_v42, %v2680_v37  ;;  %v2126_v56 = vmul.f32 %v3731_v59, %v6911_v46  ;;  %v2125_v47 = vmul.f32 %v3731_v59, %v6912_v21  ;;  %v6923_v24 = vld [vmem:[#allocation88_spill] sm:$0xff]  ;;  %v6924_v37 = vld [vmem:[#allocation87_spill] sm:$0xff]  ;;  %v6925_v46 = vld [vmem:[#allocation2_spill] sm:$0xff] }
 0x317   : > { %3736 = vrcp.f32 %v2628_v1 }
 0x318   : > { %2736 = vmatprep.subr.bf16.mxu1 %v2711_v30 }
 0x319   : > { %v3733_v18 = vpop.eup %3732  ;;  %2737 = vmatpush1.bf16.xpose.msra.mxu1 %v2710_v60 }
 0x31a   : > { %v2124_v16 = vmul.f32 %v3733_v18, %v6913_v22  ;;  %v2123_v11 = vmul.f32 %v3733_v18, %v6914_v62 }
 0x31b   : > { %v2076_v13 = vpop.xlane.xlu1 %2075 }
 0x31c   : > { %v2152_v5 = vpack.c.bf16 %v2126_v56, %v2124_v16  ;;  %v2151_v19 = vpack.c.bf16 %v2125_v47, %v2123_v11  ;;  %3738 = vrcp.f32 %v2076_v13  ;;  %v6926_v11 = vld [vmem:[#allocation3_spill] sm:$0xff] }
 0x31d   : > { %v2073_v8 = vpop.xlane.xlu0 %2072  ;;  %v3735_v55 = vpop.eup %3734 }
 0x31e   : > { %2177 = vmatprep.subr.bf16.mxu0 %v2152_v5  ;;  %3740 = vrcp.f32 %v2073_v8  ;;  %v2687_v61 = vmul.f32 %v3735_v55, %v6915_v17  ;;  %v2686_v25 = vmul.f32 %v3735_v55, %v6916_v31  ;;  %v6928_v55 = vld [vmem:[#allocation104_spill] sm:$0xff] }
 0x31f   : > { %2178 = vmatpush1.bf16.xpose.msra.mxu0 %v2151_v19  ;;  %v6927_v19 = vld [vmem:[#allocation105_spill] sm:$0xff] }
 0x321   : > { %v3737_v53 = vpop.eup %3736 }
 0x322   : > { %v2685_v43 = vmul.f32 %v3737_v53, %v6917_v50  ;;  %v2684_v48 = vmul.f32 %v3737_v53, %v6918_v0  ;;  %v6929_v50 = vld [vmem:[#allocation107_spill] sm:$0xff]  ;;  %v6930_v0 = vld [vmem:[#allocation106_spill] sm:$0xff] }
 0x323   : > { %v2637_v57 = vpop.xlane.xlu1 %2636 }
 0x324   : > { %v2713_v51 = vpack.c.bf16 %v2687_v61, %v2685_v43  ;;  %v2712_v20 = vpack.c.bf16 %v2686_v25, %v2684_v48  ;;  %3742 = vrcp.f32 %v2637_v57 }
 0x325   : > { %v2634_v41 = vpop.xlane.xlu0 %2633 }
 0x326   : > { %2738 = vmatprep.subr.bf16.mxu1 %v2713_v51  ;;  %v3739_v7 = vpop.eup %3738  ;;  %3744 = vrcp.f32 %v2634_v41  ;;  %v6931_v51 = vld [vmem:[#allocation6_spill] sm:$0xff] }
 0x327   : > { %2739 = vmatpush1.bf16.xpose.msra.mxu1 %v2712_v20  ;;  %v2130_v32 = vmul.f32 %v3739_v7, %v6919_v6  ;;  %v2129_v58 = vmul.f32 %v3739_v7, %v6920_v4 }
 0x328   : > { %v3741_v14 = vpop.eup %3740 }
 0x329   : > { %v2128_v10 = vmul.f32 %v3741_v14, %v6921_v36  ;;  %v2127_v3 = vmul.f32 %v3741_v14, %v6922_v35  ;;  %v6933_v36 = vld [vmem:[#allocation7_spill] sm:$0xff] }
 0x32b   : > { %v2154_v42 = vpack.c.bf16 %v2130_v32, %v2128_v10  ;;  %v2153_v12 = vpack.c.bf16 %v2129_v58, %v2127_v3  ;;  %v6932_v58 = vld [vmem:[#allocation4_spill] sm:$0xff] }
 0x32c   : > { %v2082_v33 = vpop.xlane.xlu1 %2081 }
 0x32d   : > { %3746 = vrcp.f32 %v2082_v33  ;;  %2179 = vmatprep.subr.bf16.mxu0 %v2154_v42  ;;  %v6934_v33 = vld [vmem:[#allocation5_spill] sm:$0xff] }
 0x32e   : > { %v3743_v2 = vpop.eup %3742  ;;  %2180 = vmatpush1.bf16.xpose.msra.mxu0 %v2153_v12 }
 0x32f   : > { %v2079_v1 = vpop.xlane.xlu0 %2078  ;;  %v2691_v28 = vmul.f32 %v3743_v2, %v6923_v24  ;;  %v2690_v59 = vmul.f32 %v3743_v2, %v6924_v37 }
 0x330   : > { %3748 = vrcp.f32 %v2079_v1  ;;  %v3745_v30 = vpop.eup %3744 }
 0x331   : > { %v2689_v60 = vmul.f32 %v3745_v30, %v5786_v49  ;;  %v2688_v56 = vmul.f32 %v3745_v30, %v6925_v46 }
 0x333   : > { %v2715_v47 = vpack.c.bf16 %v2691_v28, %v2689_v60  ;;  %v2714_v18 = vpack.c.bf16 %v2690_v59, %v2688_v56 }
 0x334   : > { %v2643_v21 = vpop.xlane.xlu1 %2642 }
 0x335   : > { %3750 = vrcp.f32 %v2643_v21  ;;  %2740 = vmatprep.subr.bf16.mxu1 %v2715_v47 }
 0x336   : > { %2741 = vmatpush1.bf16.xpose.msra.mxu1 %v2714_v18 }
 0x337   : > { %v2640_v22 = vpop.xlane.xlu0 %2639  ;;  %v3747_v16 = vpop.eup %3746 }
 0x338   : > { %3752 = vrcp.f32 %v2640_v22  ;;  %v2134_v62 = vmul.f32 %v3747_v16, %v5798_v9  ;;  %v2133_v13 = vmul.f32 %v3747_v16, %v6926_v11 }
 0x33a   : > { %v3749_v5 = vpop.eup %3748 }
 0x33b   : > { %v2132_v8 = vmul.f32 %v3749_v5, %v6927_v19  ;;  %v2131_v49 = vmul.f32 %v3749_v5, %v6928_v55  ;;  %v3814_v5 = vmov 0.0|0.0  }
 0x33c   : > { %v2088_v17 = vpop.xlane.xlu1 %2087 }
 0x33d   : > { %v2156_v61 = vpack.c.bf16 %v2134_v62, %v2132_v8  ;;  %v2155_v31 = vpack.c.bf16 %v2133_v13, %v2131_v49  ;;  %3754 = vrcp.f32 %v2088_v17 }
 0x33e   : > { %v2085_v25 = vpop.xlane.xlu0 %2084 }
 0x33f   : > { %2181 = vmatprep.subr.bf16.mxu0 %v2156_v61  ;;  %v3751_v53 = vpop.eup %3750  ;;  %3756 = vrcp.f32 %v2085_v25 }
 0x340   : > { %2182 = vmatpush1.bf16.xpose.msra.mxu0 %v2155_v31  ;;  %v2695_v43 = vmul.f32 %v3751_v53, %v6929_v50  ;;  %v2694_v9 = vmul.f32 %v3751_v53, %v6930_v0 }
 0x342   : > { %v3753_v48 = vpop.eup %3752 }
 0x343   : > { %v2693_v57 = vmul.f32 %v3753_v48, %v5826_v29  ;;  %v2692_v20 = vmul.f32 %v3753_v48, %v6931_v51 }
 0x344   : > { %v2649_v41 = vpop.xlane.xlu1 %2648 }
 0x345   : > { %v2717_v7 = vpack.c.bf16 %v2695_v43, %v2693_v57  ;;  %v2716_v6 = vpack.c.bf16 %v2694_v9, %v2692_v20  ;;  %3758 = vrcp.f32 %v2649_v41 }
 0x347   : > { %2742 = vmatprep.subr.bf16.mxu1 %v2717_v7  ;;  %v2646_v32 = vpop.xlane.xlu0 %2645  ;;  %v3755_v4 = vpop.eup %3754 }
 0x348   : > { %3760 = vrcp.f32 %v2646_v32  ;;  %2743 = vmatpush1.bf16.xpose.msra.mxu1 %v2716_v6  ;;  %v2138_v14 = vmul.f32 %v3755_v4, %v6932_v58  ;;  %v2137_v10 = vmul.f32 %v3755_v4, %v6933_v36 }
 0x349   : > { %v3757_v35 = vpop.eup %3756 }
 0x34a   : > { %v2136_v3 = vmul.f32 %v3757_v35, %v5846_v54  ;;  %v2135_v29 = vmul.f32 %v3757_v35, %v6934_v33 }
 0x34c   : > { %v2158_v12 = vpack.c.bf16 %v2138_v14, %v2136_v3  ;;  %v2157_v1 = vpack.c.bf16 %v2137_v10, %v2135_v29  ;;  %v3816_v10 = vmov 0.0  }
 0x34d   : > { %v2094_v42 = vpop.xlane.xlu1 %2093 }
 0x34e   : > { %3762 = vrcp.f32 %v2094_v42  ;;  %2183 = vmatprep.subr.bf16.mxu0 %v2158_v12 }
 0x34f   : > { %v2091_v2 = vpop.xlane.xlu0 %2090  ;;  %v3759_v24 = vpop.eup %3758  ;;  %2184 = vmatpush1.bf16.xpose.msra.mxu0 %v2157_v1 }
 0x350   : > { %3764 = vrcp.f32 %v2091_v2  ;;  %v2699_v28 = vmul.f32 %v3759_v24, %v5858_v27  ;;  %v2698_v37 = vmul.f32 %v3759_v24, %v5856_v52 }
 0x352   : > { %v3761_v59 = vpop.eup %3760 }
 0x353   : > { %v2697_v30 = vmul.f32 %v3761_v59, %v5866_v38  ;;  %v2696_v54 = vmul.f32 %v3761_v59, %v5860_v63 }
 0x355   : > { %v2719_v46 = vpack.c.bf16 %v2699_v28, %v2697_v30  ;;  %v2718_v56 = vpack.c.bf16 %v2698_v37, %v2696_v54 }
 0x356   : > { %v2655_v60 = vpop.xlane.xlu1 %2654 }
 0x357   : > { %3766 = vrcp.f32 %v2655_v60  ;;  %2744 = vmatprep.subr.bf16.mxu1 %v2719_v46 }
 0x358   : > { %v2652_v21 = vpop.xlane.xlu0 %2651  ;;  %v3763_v47 = vpop.eup %3762  ;;  %2745 = vmatpush1.bf16.xpose.msra.mxu1 %v2718_v56 }
 0x359   : > { %3768 = vrcp.f32 %v2652_v21  ;;  %v2142_v18 = vmul.f32 %v3763_v47, %v5878_v34  ;;  %v2141_v27 = vmul.f32 %v3763_v47, %v5876_v40  ;;  %v3380_v40 = vld [vmem:[%s6089_s1 + $0x20] ss:$8 sps:$4 sm:$0xff]  }
 0x35a   : > { %v3765_v22 = vpop.eup %3764 }
 0x35b   : > { %v2140_v52 = vmul.f32 %v3765_v22, %v5884_v23  ;;  %v2139_v38 = vmul.f32 %v3765_v22, %v5880_v44 }
 0x35d   : > { %v2160_v16 = vpack.c.bf16 %v2142_v18, %v2140_v52  ;;  %v2159_v63 = vpack.c.bf16 %v2141_v27, %v2139_v38 }
 0x35f   : > { %2185 = vmatprep.subr.bf16.mxu0 %v2160_v16 }
 0x360   : > { %2186 = vmatpush1.bf16.xpose.msra.mxu0 %v2159_v63 }
 0x361   : > { %v3767_v62 = vpop.eup %3766  ;;  %3323 = vmatprep.subr.bf16.mxu0 %v3814_v5 }
 0x362   : > { %v2703_v11 = vmul.f32 %v3767_v62, %v5894_v45  ;;  %v2702_v13 = vmul.f32 %v3767_v62, %v5892_v39  ;;  %v3383_v39 = vld [vmem:[%s6089_s1 + $0x30] ss:$8 sps:$4 sm:$0xff]   ;;  %v2783_v62 = vld [vmem:[%s6092_s4] sm:$0xff] }
 0x363   : > { %v3769_v34 = vpop.eup %3768 }
 0x364   : > { %v2701_v23 = vmul.f32 %v3769_v34, %v5900_v15  ;;  %v2700_v44 = vmul.f32 %v3769_v34, %v5896_v26  ;;  %v2858_v34 = vld [vmem:[%s6093_s5] sm:$0xff] }
 0x366   : > { %v2721_v19 = vpack.c.bf16 %v2703_v11, %v2701_v23  ;;  %v2720_v8 = vpack.c.bf16 %v2702_v13, %v2700_v44 }
 0x367   : > { %2204 = vmatmul.mubr.bf16.vlgmr.msra.gmra.mrb[4].mxu0 %v3380_v40  ;;  %v6935_v40 = vmov 3  }
 0x368   : > { %2746 = vmatprep.subr.bf16.mxu1 %v2721_v19  ;;  %3294 = vmatprep.mubr.msk.f32.mxu0 %vm3815_vm9, %v3816_v10 }
 0x369   : > { %2747 = vmatpush1.bf16.xpose.msra.mxu1 %v2720_v8 }
 0x36a   : > { %3335 = vmatprep.subr.mxu1 %v2858_v34 }
 0x370   : > { %2765 = vmatmul.mubr.bf16.vlgmr.msra.gmra.mrb[4].mxu1 %v3383_v39 }
 0x371   : > { %3336 = vmatpush3.msra.mxu1 %v2858_v34 }
 0x3bc   : > { %v1083_v45 = vpop.f32.mrb[0].mxu0 }
 0x3bd   : > { %v1092_v55 = vmul.f32 1.442695, %v1083_v45  ;;  %v1085_v49 = vpop.f32.mrb[1].mxu0  ;;  %vm1090_vm14 = vcmp.gt.f32.partialorder %v1083_v45, 0.0 }
 0x3be   : > { %v1086_v17 = vpop.f32.mrb[2].mxu0 }
 0x3bf   : > { %3770 = vpow2.f32 %v1092_v55  ;;  %v1094_v61 = vmul.f32 1.442695, %v1086_v17  ;;  %v1088_v31 = vpop.f32.mrb[3].mxu0  ;;  %vm1091_vm6 = vcmp.gt.f32.partialorder %v1086_v17, 0.0 }
 0x3c1   : > { %3772 = vpow2.f32 %v1094_v61 }
 0x3c2   : > { %v1644_v15 = vpop.f32.mrb[0].mxu1 }
 0x3c3   : > { %v1653_v26 = vmul.f32 1.442695, %v1644_v15  ;;  %v1646_v25 = vpop.f32.mrb[1].mxu1  ;;  %vm1651_vm15 = vcmp.gt.f32.partialorder %v1644_v15, 0.0 }
 0x3c4   : > { %v1647_v53 = vpop.f32.mrb[2].mxu1 }
 0x3c5   : > { %3774 = vpow2.f32 %v1653_v26  ;;  %v1655_v50 = vmul.f32 1.442695, %v1647_v53  ;;  %v1649_v43 = vpop.f32.mrb[3].mxu1  ;;  %vm1652_vm8 = vcmp.gt.f32.partialorder %v1647_v53, 0.0 }
 0x3c7   : > { %3776 = vpow2.f32 %v1655_v50 }
 0x3c9   : > { %v3771_v0 = vpop.eup %3770 }
 0x3ca   : > { %v3218_v9 = vadd.f32 -1.0, %v3771_v0 }
 0x3cb   : > { %v3773_v48 = vpop.eup %3772 }
 0x3cc   : > { %v1098_v57 = vsel %vm1090_vm14, %v1083_v45, %v3218_v9  ;;  %v3219_v51 = vadd.f32 -1.0, %v3773_v48 }
 0x3ce   : > { %v1099_v20 = vsel %vm1091_vm6, %v1086_v17, %v3219_v51 }
 0x3cf   : > { %v3775_v41 = vpop.eup %3774  ;;  %v3324_v7 = vpack.c.bf16 %v1099_v20, %v1098_v57 }
 0x3d0   : > { %v3222_v6 = vadd.f32 -1.0, %v3775_v41 }
 0x3d1   : > { %v3777_v32 = vpop.eup %3776  ;;  %3325 = vmatpush3.bf16.msra.mxu0 %v3324_v7 }
 0x3d2   : > { %v1659_v4 = vsel %vm1651_vm15, %v1644_v15, %v3222_v6  ;;  %v3223_v58 = vadd.f32 -1.0, %v3777_v32  ;;  %3326 = vmatprep.subr.bf16.mxu0 %v3814_v5 }
 0x3d4   : > { %v1660_v14 = vsel %vm1652_vm8, %v1647_v53, %v3223_v58 }
 0x3d5   : > { %v3327_v36 = vpack.c.bf16 %v1660_v14, %v1659_v4 }
 0x3d7   : > { %3328 = vmatpush3.bf16.msra.mxu0 %v3327_v36 }
 0x3d8   : > { %3329 = vmatprep.subr.bf16.mxu0 %v3814_v5 }
 0x43a   : > { %v2205_v35 = vpop.f32.mrb[4].mxu0 }
 0x43b   : > { %v2214_v3 = vmul.f32 1.442695, %v2205_v35  ;;  %v2207_v33 = vpop.f32.mrb[5].mxu0  ;;  %vm2212_vm11 = vcmp.gt.f32.partialorder %v2205_v35, 0.0 }
 0x43c   : > { %v2208_v29 = vpop.f32.mrb[6].mxu0 }
 0x43d   : > { %3778 = vpow2.f32 %v2214_v3  ;;  %v2216_v42 = vmul.f32 1.442695, %v2208_v29  ;;  %v2210_v12 = vpop.f32.mrb[7].mxu0  ;;  %vm2213_vm0 = vcmp.gt.f32.partialorder %v2208_v29, 0.0 }
 0x43f   : > { %3780 = vpow2.f32 %v2216_v42 }
 0x443   : > { %v2766_v1 = vpop.f32.mrb[4].mxu1 }
 0x444   : > { %v2775_v2 = vmul.f32 1.442695, %v2766_v1  ;;  %v2768_v24 = vpop.f32.mrb[5].mxu1  ;;  %vm2773_vm5 = vcmp.gt.f32.partialorder %v2766_v1, 0.0 }
 0x445   : > { %v2769_v28 = vpop.f32.mrb[6].mxu1 }
 0x446   : > { %3782 = vpow2.f32 %v2775_v2  ;;  %v2777_v37 = vmul.f32 1.442695, %v2769_v28  ;;  %v2771_v59 = vpop.f32.mrb[7].mxu1  ;;  %vm2774_vm1 = vcmp.gt.f32.partialorder %v2769_v28, 0.0 }
 0x447   : > { %v3779_v30 = vpop.eup %3778 }
 0x448   : > { %3784 = vpow2.f32 %v2777_v37  ;;  %v3226_v54 = vadd.f32 -1.0, %v3779_v30 }
 0x449   : > { %v3781_v60 = vpop.eup %3780 }
 0x44a   : > { %v3227_v46 = vadd.f32 -1.0, %v3781_v60  ;;  %v2220_v56 = vsel %vm2212_vm11, %v2205_v35, %v3226_v54 }
 0x44c   : > { %v2221_v21 = vsel %vm2213_vm0, %v2208_v29, %v3227_v46 }
 0x44d   : > { %v3330_v47 = vpack.c.bf16 %v2221_v21, %v2220_v56 }
 0x44f   : > { %3331 = vmatpush3.bf16.msra.mxu0 %v3330_v47 }
 0x450   : > { %v3783_v18 = vpop.eup %3782  ;;  %3332 = vmatprep.subr.bf16.mxu0 %v3814_v5 }
 0x451   : > { %v3230_v27 = vadd.f32 -1.0, %v3783_v18 }
 0x452   : > { %v3785_v22 = vpop.eup %3784 }
 0x453   : > { %v3231_v52 = vadd.f32 -1.0, %v3785_v22  ;;  %v2781_v38 = vsel %vm2773_vm5, %v2766_v1, %v3230_v27 }
 0x455   : > { %v2782_v16 = vsel %vm2774_vm1, %v2769_v28, %v3231_v52 }
 0x456   : > { %v3333_v63 = vpack.c.bf16 %v2782_v16, %v2781_v38 }
 0x458   : > { %3334 = vmatpush3.bf16.msra.mxu0 %v3333_v63 }
 0x459   : > { %3297 = vmatprep.subr.mxu0 %v2858_v34 }
 0x45b   : > { %3295 = vmatmul.mubr.msk.f32.vlgmr.msra.gmra.mrb[8].mxu0 %vm2784_vm2, %v2783_v62 }
 0x45c   : > { %3298 = vmatpush3.msra.mxu0 %v2858_v34 }
 0x52e   : > { %v2854_v11 = vpop.f32.mrb[8].mxu0 }
 0x52f   : > { %v3102_v13 = vpack.c.bf16 %v2854_v11, %v2854_v11  ;;  %2859 = vxpose.xlu0.b32.start.end [1/1] (short) %v2854_v11, 128  ;;  %v3296_v5 = vpop.f32.mrb[9].mxu0 }
 0x531   : > { %3103 = vst [vmem:[%s311_s19] sm:$0xf] %v3102_v13 }
 0x558   : > { %3373 = vset.pattern.permute.xlu0 %v6935_v40 }
 0x5af   : > { %v2875_v23 = vpop.trf.xlu0 }
 0x5b0   : > { %3299 = vmatprep.mubr.msk.f32.mxu0 %vm2891_vm4, %v2875_v23 }
 0x5b3   : > { %v2876_v44 = vpop.trf.xlu0 }
 0x5b4   : > { %3300 = vmatmul.mubr.msk.f32.vlgmr.msra.gmra.mrb[10].mxu0 %vm2891_vm4, %v2876_v44 }
 0x5b7   : > { %v2877_v19 = vpop.trf.xlu0 }
 0x5b8   : > { %3302 = vmatprep.mubr.msk.f32.mxu0 %vm2891_vm4, %v2877_v19 }
 0x5bb   : > { %v2878_v8 = vpop.trf.xlu0 }
 0x5bc   : > { %3303 = vmatmul.mubr.msk.f32.gmra.mrb[12].mxu0 %vm2891_vm4, %v2878_v8 }
 0x5bf   : > { %v2879_v39 = vpop.trf.xlu0 }
 0x5c0   : > { %3305 = vmatprep.mubr.msk.f32.mxu1 %vm2891_vm4, %v2879_v39 }
 0x5c3   : > { %v2880_v45 = vpop.trf.xlu0 }
 0x5c4   : > { %3306 = vmatmul.mubr.msk.f32.vlgmr.msra.gmra.mrb[8].mxu1 %vm2891_vm4, %v2880_v45 }
 0x5c7   : > { %v2881_v55 = vpop.trf.xlu0 }
 0x5c8   : > { %3308 = vmatprep.mubr.msk.f32.mxu1 %vm2891_vm4, %v2881_v55 }
 0x5cb   : > { %v2882_v49 = vpop.trf.xlu0 }
 0x5cc   : > { %3309 = vmatmul.mubr.msk.f32.gmra.mrb[10].mxu1 %vm2891_vm4, %v2882_v49 }
 0x5cf   : > { %v2883_v17 = vpop.trf.xlu0 }
 0x5d0   : > { %3311 = vmatprep.mubr.msk.f32.mxu1 %vm2891_vm4, %v2883_v17 }
 0x5d3   : > { %v2884_v61 = vpop.trf.xlu0 }
 0x5d4   : > { %3312 = vmatmul.mubr.msk.f32.gmra.mrb[12].mxu1 %vm2891_vm4, %v2884_v61 }
 0x5d7   : > { %v2885_v31 = vpop.trf.xlu0 }
 0x5d8   : > { %3314 = vmatprep.mubr.msk.f32.mxu1 %vm2891_vm4, %v2885_v31 }
 0x5db   : > { %v2886_v15 = vpop.trf.xlu0 }
 0x5dc   : > { %3315 = vmatmul.mubr.msk.f32.gmra.mrb[14].mxu1 %vm2891_vm4, %v2886_v15 }
 0x5df   : > { %v2887_v26 = vpop.trf.xlu0 }
 0x5e0   : > { %3317 = vmatprep.mubr.msk.f32.mxu1 %vm2891_vm4, %v2887_v26 }
 0x5e3   : > { %v2888_v25 = vpop.trf.xlu0 }
 0x5e4   : > { %3318 = vmatmul.mubr.msk.f32.gmra.mrb[16].mxu1 %vm2891_vm4, %v2888_v25 }
 0x5e7   : > { %v2889_v53 = vpop.trf.xlu0 }
 0x5e8   : > { %3320 = vmatprep.mubr.msk.f32.mxu1 %vm2891_vm4, %v2889_v53 }
 0x5eb   : > { %v2890_v50 = vpop.trf.xlu0 }
 0x5ec   : > { %3321 = vmatmul.mubr.msk.f32.gmra.mrb[18].mxu1 %vm2891_vm4, %v2890_v50 }
 0x687   : > { %v3301_v43 = vpop.f32.mrb[10].mxu0 }
 0x688   : > { %3087 = vst.msk [vmem:[%s6051_s23 + $0x8] sm:$0xff] %vm3085_vm3, %v3301_v43  ;;  %v3006_v0 = vpop.f32.mrb[11].mxu0 }
 0x689   : > { %3086 = vst.msk [vmem:[%s6051_s23] sm:$0xff] %vm3085_vm3, %v3006_v0 }
 0x68f   : > { %v3304_v9 = vpop.f32.mrb[12].mxu0 }
 0x690   : > { %3089 = vst.msk [vmem:[%s6051_s23 + $0x18] sm:$0xff] %vm3085_vm3, %v3304_v9  ;;  %v3016_v48 = vpop.f32.mrb[13].mxu0 }
 0x691   : > { %3088 = vst.msk [vmem:[%s6051_s23 + $0x10] sm:$0xff] %vm3085_vm3, %v3016_v48 }
 0x697   : > { %v3307_v57 = vpop.f32.mrb[8].mxu1 }
 0x698   : > { %3091 = vst.msk [vmem:[%s6051_s23 + $0x28] sm:$0xff] %vm3085_vm3, %v3307_v57  ;;  %v3026_v51 = vpop.f32.mrb[9].mxu1 }
 0x699   : > { %3090 = vst.msk [vmem:[%s6051_s23 + $0x20] sm:$0xff] %vm3085_vm3, %v3026_v51 }
 0x69f   : > { %v3310_v20 = vpop.f32.mrb[10].mxu1 }
 0x6a0   : > { %3093 = vst.msk [vmem:[%s6051_s23 + $0x38] sm:$0xff] %vm3085_vm3, %v3310_v20  ;;  %v3036_v41 = vpop.f32.mrb[11].mxu1 }
 0x6a1   : > { %3092 = vst.msk [vmem:[%s6051_s23 + $0x30] sm:$0xff] %vm3085_vm3, %v3036_v41 }
 0x6a7   : > { %v3313_v7 = vpop.f32.mrb[12].mxu1 }
 0x6a8   : > { %3095 = vst.msk [vmem:[%s6051_s23 + $0x48] sm:$0xff] %vm3085_vm3, %v3313_v7  ;;  %v3046_v6 = vpop.f32.mrb[13].mxu1 }
 0x6a9   : > { %3094 = vst.msk [vmem:[%s6051_s23 + $0x40] sm:$0xff] %vm3085_vm3, %v3046_v6 }
 0x6af   : > { %v3316_v32 = vpop.f32.mrb[14].mxu1 }
 0x6b0   : > { %3097 = vst.msk [vmem:[%s6051_s23 + $0x58] sm:$0xff] %vm3085_vm3, %v3316_v32  ;;  %v3056_v4 = vpop.f32.mrb[15].mxu1 }
 0x6b1   : > { %3096 = vst.msk [vmem:[%s6051_s23 + $0x50] sm:$0xff] %vm3085_vm3, %v3056_v4 }
 0x6b7   : > { %v3319_v58 = vpop.f32.mrb[16].mxu1 }
 0x6b8   : > { %3099 = vst.msk [vmem:[%s6051_s23 + $0x68] sm:$0xff] %vm3085_vm3, %v3319_v58  ;;  %v3066_v14 = vpop.f32.mrb[17].mxu1 }
 0x6b9   : > { %3098 = vst.msk [vmem:[%s6051_s23 + $0x60] sm:$0xff] %vm3085_vm3, %v3066_v14 }
 0x6bf   : > { %v3322_v36 = vpop.f32.mrb[18].mxu1 }
 0x6c0   : > { %3101 = vst.msk [vmem:[%s6051_s23 + $0x78] sm:$0xff] %vm3085_vm3, %v3322_v36  ;;  %v3076_v10 = vpop.f32.mrb[19].mxu1 }
 0x6c1   : > { %3100 = vst.msk [vmem:[%s6051_s23 + $0x70] sm:$0xff] %vm3085_vm3, %v3076_v10 }
 0x6c2 PF: > { %s18_s24 = sadd.s32 1, %s3808_s24  }
 0x6c3   : > { %p15_p6 = scmp.ge.s32.totalorder %s18_s24, 4  }
 0x6c5   :  { %17 = sbr.rel (!%p15_p6) target bundleno = 1 (0x1), region = 89 }

</bundles_post_ra>
